<compile_context>
chip_gen: v5e
topology: v5e:2x2
jax: 0.10.0
libtpu: 0.0.40
codegen_flags: <defaults>
</compile_context>

<pallas_src>
import functools

import jax
import jax.numpy as jnp
from jax.experimental import pallas as pl
from jax.experimental.pallas import tpu as pltpu

# ----------------------------------------------------------------------------
# Config (small synthetic CLIP)
# ----------------------------------------------------------------------------
CFG = dict(
    batch=2,
    # vision tower
    image_size=16, patch_size=8, channels=3,
    v_hidden=32, v_heads=2, v_mlp=128, v_layers=1,
    # text tower
    vocab=64, seq_len=8, t_hidden=32, t_heads=2, t_mlp=128, t_layers=1,
    # shared projection
    proj_dim=16,
    # token compressor (registers-as-tokens)
    dim_cond=256, tc_layers=1, tc_heads=2,
)
NEG = -1e30  # additive attention-mask value (f32 only)

LAYER_KEYS = ('ln1_g', 'ln1_b', 'ln2_g', 'ln2_b',
              'wqkv', 'bqkv', 'wo', 'bo', 'w1', 'b1', 'w2', 'b2')
MMDIT_KEYS = ('ada_w', 'ada_b', 'qkv_w', 'qkv_b', 'qg', 'kg',
              'ow', 'ob', 'ff1_w', 'ff1_b', 'ff2_w', 'ff2_b')


# ----------------------------------------------------------------------------
# In-kernel math helpers (operate on loaded VMEM values, f32)
# ----------------------------------------------------------------------------
def _ln(x, g=1.0, b=0.0, eps=1e-5):
    mu = jnp.mean(x, axis=-1, keepdims=True)
    xc = x - mu
    var = jnp.mean(xc * xc, axis=-1, keepdims=True)
    return xc * jax.lax.rsqrt(var + eps) * g + b


def _rms(x, g, eps=1e-6):
    ms = jnp.mean(x * x, axis=-1, keepdims=True)
    return x * jax.lax.rsqrt(ms + eps) * g


def _l2(x, eps=1e-12):
    # == F.normalize(dim=-1)
    ss = jnp.sum(x * x, axis=-1, keepdims=True)
    return x * jax.lax.rsqrt(jnp.maximum(ss, eps * eps))


def _dot_nt(a_bf16, b_bf16):
    # a @ b^T on the last dims, bf16 MXU inputs, f32 accumulation.
    return jax.lax.dot_general(a_bf16, b_bf16, (((1,), (1,)), ((), ())),
                               preferred_element_type=jnp.float32)


def _mm3(x3, w, b=None):
    """(B,S,D) x (D,N) -> (B,S,N): one batch-flattened MXU matmul."""
    B, S, D = x3.shape
    y = jnp.dot(x3.reshape(B * S, D).astype(jnp.bfloat16), w,
                preferred_element_type=jnp.float32)
    if b is not None:
        y = y + b
    return y.reshape(B, S, w.shape[-1])


def _softmax_rows(s):
    s = s - jnp.max(s, axis=-1, keepdims=True)
    p = jnp.exp(s)
    return p * pl.reciprocal(jnp.sum(p, axis=-1, keepdims=True), approx=True)


def _joint_softmax_av(sa, sb, va_bf, vb_bf):
    """Block-decomposed softmax over [sa | sb] followed by @ [va ; vb]."""
    mx = jnp.maximum(jnp.max(sa, axis=-1, keepdims=True),
                     jnp.max(sb, axis=-1, keepdims=True))
    pa = jnp.exp(sa - mx)
    pb = jnp.exp(sb - mx)
    r = pl.reciprocal(jnp.sum(pa, axis=-1, keepdims=True)
                      + jnp.sum(pb, axis=-1, keepdims=True), approx=True)
    o = (jnp.dot(pa.astype(jnp.bfloat16), va_bf, preferred_element_type=jnp.float32)
         + jnp.dot(pb.astype(jnp.bfloat16), vb_bf, preferred_element_type=jnp.float32))
    return o * r


def _encoder_layer(x3, p, n_heads, shared_bias=None, kbias=None):
    """One CLIP encoder layer on a (B,S,D) value, batch-flattened matmuls."""
    B, S, D = x3.shape
    H = n_heads
    hd = D // H
    scale = hd ** -0.5

    h = _ln(x3, p['ln1_g'], p['ln1_b'])
    qkv = _mm3(h, p['wqkv'], p['bqkv'])                 # (B, S, 3D)

    attn_rows = []
    for b in range(B):
        qkv_b = qkv[b]                                  # (S, 3D)
        bias = shared_bias
        if kbias is not None:
            kb = kbias[b]                               # (1, S)
            bias = kb if bias is None else bias + kb
        heads = []
        for hh in range(H):
            q = qkv_b[:, hh * hd:(hh + 1) * hd].astype(jnp.bfloat16)
            k = qkv_b[:, D + hh * hd:D + (hh + 1) * hd].astype(jnp.bfloat16)
            v = qkv_b[:, 2 * D + hh * hd:2 * D + (hh + 1) * hd].astype(jnp.bfloat16)
            s = _dot_nt(q, k) * scale
            if bias is not None:
                s = s + bias
            pm = _softmax_rows(s)
            heads.append(jnp.dot(pm.astype(jnp.bfloat16), v,
                                 preferred_element_type=jnp.float32))
        attn_rows.append(jnp.concatenate(heads, axis=-1))   # (S, D)
    attn = jnp.stack(attn_rows, axis=0)                      # (B, S, D)

    x3 = x3 + _mm3(attn, p['wo'], p['bo'])               # one (B*S,D)@(D,D)
    h2 = _ln(x3, p['ln2_g'], p['ln2_b'])
    f = _mm3(h2, p['w1'], p['b1'])
    f = f * jax.nn.sigmoid(1.702 * f)                     # CLIP quick_gelu
    x3 = x3 + _mm3(f, p['w2'], p['b2'])
    return x3


# ----------------------------------------------------------------------------
# Generic single-block pallas_call wrapper (everything fits VMEM at toy sizes)
# ----------------------------------------------------------------------------
def fused_call(kernel, inputs, out_shapes):
    multi = isinstance(out_shapes, (list, tuple))
    outs = list(out_shapes) if multi else [out_shapes]

    def _spec(shape):
        nd = len(shape)
        return pl.BlockSpec(shape, lambda i, _nd=nd: (0,) * _nd)

    out_specs = [_spec(o.shape) for o in outs]
    return pl.pallas_call(
        kernel,
        out_shape=tuple(outs) if multi else outs[0],
        grid=(1,),
        in_specs=[_spec(x.shape) for x in inputs],
        out_specs=tuple(out_specs) if multi else out_specs[0],
        compiler_params=pltpu.CompilerParams(
            dimension_semantics=("arbitrary",)),
    )(*inputs)


# ----------------------------------------------------------------------------
# Kernel 1: full vision tower
# ----------------------------------------------------------------------------
def vision_tower_kernel(*refs, n_layers, n_heads, n_patches, seq_pad):
    idx = 0
    patches_ref = refs[idx]; idx += 1      # (B*Np, C*P*P)  f32
    pw_ref = refs[idx]; idx += 1           # (C*P*P, Dv)    bf16
    cls_ref = refs[idx]; idx += 1          # (1, Dv)
    pos_ref = refs[idx]; idx += 1          # (Np+1, Dv)
    pre_g_ref = refs[idx]; idx += 1
    pre_b_ref = refs[idx]; idx += 1
    layers = []
    for _ in range(n_layers):
        layers.append({k: refs[idx + j][...] for j, k in enumerate(LAYER_KEYS)})
        idx += len(LAYER_KEYS)
    post_g_ref = refs[idx]; idx += 1
    post_b_ref = refs[idx]; idx += 1
    vproj_ref = refs[idx]; idx += 1
    pooled_ref = refs[idx]; idx += 1       # (B, proj)
    patch_ref = refs[idx]                  # (B, Np, Dv)

    Np = n_patches
    S = seq_pad
    BNp, _ = patches_ref.shape
    B = BNp // Np
    Dv = pw_ref.shape[1]

    pos = pos_ref[...]
    # one batch-flattened patch-embed matmul
    pe = jnp.dot(patches_ref[...].astype(jnp.bfloat16), pw_ref[...],
                 preferred_element_type=jnp.float32)          # (B*Np, Dv)
    cls_row = cls_ref[...] + pos[0:1, :]                      # (1, Dv)
    rows = []
    for b in range(B):
        pieces = [cls_row, pe[b * Np:(b + 1) * Np, :] + pos[1:Np + 1, :]]
        if S > Np + 1:
            pieces.append(jnp.zeros((S - Np - 1, Dv), jnp.float32))
        rows.append(jnp.concatenate(pieces, axis=0))          # (S, Dv)
    x3 = jnp.stack(rows, axis=0)                              # (B, S, Dv)
    x3 = _ln(x3, pre_g_ref[...], pre_b_ref[...])

    # mask padded key columns (positions >= Np+1) for all queries / batches
    shared_bias = None
    if S > Np + 1:
        cols = jax.lax.broadcasted_iota(jnp.int32, (1, S), 1)
        shared_bias = jnp.where(cols >= Np + 1, NEG, 0.0).astype(jnp.float32)

    for p in layers:
        x3 = _encoder_layer(x3, p, n_heads, shared_bias=shared_bias)

    cls_tok = x3[:, 0, :]                                     # (B, Dv)
    cls_ln = _ln(cls_tok, post_g_ref[...], post_b_ref[...])
    pooled = _l2(jnp.dot(cls_ln.astype(jnp.bfloat16), vproj_ref[...],
                         preferred_element_type=jnp.float32))
    pooled_ref[...] = pooled                                  # one dense store
    patch_ref[...] = _l2(x3[:, 1:Np + 1, :])                  # one dense store


# ----------------------------------------------------------------------------
# Kernel 2: full text tower
# ----------------------------------------------------------------------------
def text_tower_kernel(*refs, n_layers, n_heads):
    idx = 0
    tx_ref = refs[idx]; idx += 1           # (B, S, Dt) f32 (embedded in glue)
    kmask_ref = refs[idx]; idx += 1        # (B, S) f32
    eot_ref = refs[idx]; idx += 1          # (B, S) f32 one-hot
    layers = []
    for _ in range(n_layers):
        layers.append({k: refs[idx + j][...] for j, k in enumerate(LAYER_KEYS)})
        idx += len(LAYER_KEYS)
    fin_g_ref = refs[idx]; idx += 1
    fin_b_ref = refs[idx]; idx += 1
    tproj_ref = refs[idx]; idx += 1
    last_ref = refs[idx]; idx += 1         # (B, S, Dt)
    pooled_ref = refs[idx]                 # (B, proj)

    x3 = tx_ref[...]
    B, S, _ = x3.shape

    rows = jax.lax.broadcasted_iota(jnp.int32, (S, S), 0)
    cols = jax.lax.broadcasted_iota(jnp.int32, (S, S), 1)
    causal = jnp.where(cols > rows, NEG, 0.0).astype(jnp.float32)
    kbias = ((1.0 - kmask_ref[...]) * NEG)[:, None, :]        # (B, 1, S)

    for p in layers:
        x3 = _encoder_layer(x3, p, n_heads, shared_bias=causal, kbias=kbias)

    ln = _ln(x3, fin_g_ref[...], fin_b_ref[...])
    last_ref[...] = ln

    # classic HF CLIP eot pooling (argmax id) via one-hot selection matmul
    # TODO(synk): argmax(input_ids) assumes EOT has the largest token id.
    eot = eot_ref[...]
    sels = [jnp.dot(eot[b:b + 1, :], ln[b], preferred_element_type=jnp.float32)
            for b in range(B)]
    sel = jnp.concatenate(sels, axis=0)                        # (B, Dt)
    pooled_ref[...] = _l2(jnp.dot(sel.astype(jnp.bfloat16), tproj_ref[...],
                                  preferred_element_type=jnp.float32))


# ----------------------------------------------------------------------------
# Kernel 3: token compressor (MMDiT blocks + out_proj + L2)
# ----------------------------------------------------------------------------
def compressor_kernel(*refs, n_blocks, n_heads, n_patches):
    idx = 0
    reg_ref = refs[idx]; idx += 1          # (Np, Dt)
    t_ref = refs[idx]; idx += 1            # (B, S1, Dt)
    meta_ref = refs[idx]; idx += 1         # (B, 2)
    tmask_ref = refs[idx]; idx += 1        # (B, S1)
    tocond_ref = refs[idx]; idx += 1       # (2, dim_cond) f32
    blocks = []
    for _ in range(n_blocks):
        blocks.append({k: refs[idx + j] for j, k in enumerate(MMDIT_KEYS)})
        idx += len(MMDIT_KEYS)
    outw_ref = refs[idx]; idx += 1         # (Dt, Dv) bf16
    outb_ref = refs[idx]; idx += 1         # (1, Dv)
    ctf_ref = refs[idx]                    # (B, Np, Dv)

    t3 = t_ref[...]
    B, S1, D = t3.shape
    S0 = n_patches
    H = n_heads
    hd = D // H
    scale = hd ** -0.5

    y3 = jnp.broadcast_to(reg_ref[...][None], (B, S0, D))

    # conditioning: K=2 contraction done on the VPU (two broadcast FMAs) + SiLU
    meta = meta_ref[...]
    tw = tocond_ref[...]
    cond = meta[:, 0:1] * tw[0:1, :] + meta[:, 1:2] * tw[1:2, :]   # (B, dim_cond)
    cond = cond * jax.nn.sigmoid(cond)
    cond_bf = cond.astype(jnp.bfloat16)

    kbias_t = ((1.0 - tmask_ref[...]) * NEG)[:, None, :]           # (B, 1, S1)

    for p in blocks:
        xs = (y3, t3)
        mods, qkvs = [], []
        for m in range(2):
            ada = jnp.dot(cond_bf, p['ada_w'][m],
                          preferred_element_type=jnp.float32) + p['ada_b'][m]
            sa, ca, ga, sf, cf, gf = [ada[:, i * D:(i + 1) * D][:, None, :]
                                      for i in range(6)]
            mods.append((sa, ca, ga, sf, cf, gf))
            h = _ln(xs[m]) * (1.0 + ca) + sa                       # adaLN
            qkvs.append(_mm3(h, p['qkv_w'][m], p['qkv_b'][m]))     # (B, Sm, 3D)
        qkv0, qkv1 = qkvs
        qg0, kg0 = p['qg'][0], p['kg'][0]
        qg1, kg1 = p['qg'][1], p['kg'][1]

        # joint attention over [registers ; text]; attention computed
        # immediately per (b, h) — no long-lived staging dicts.
        attn0_rows, attn1_rows = [], []
        for b in range(B):
            qkv0_b, qkv1_b = qkv0[b], qkv1[b]
            bias_t = kbias_t[b]                                    # (1, S1)
            h0, h1 = [], []
            for hh in range(H):
                sq = slice(hh * hd, (hh + 1) * hd)
                sk = slice(D + hh * hd, D + (hh + 1) * hd)
                sv = slice(2 * D + hh * hd, 2 * D + (hh + 1) * hd)
                # cast reused operands to bf16 exactly once
                q0 = _rms(qkv0_b[:, sq], qg0).astype(jnp.bfloat16)
                k0 = _rms(qkv0_b[:, sk], kg0).astype(jnp.bfloat16)
                v0 = qkv0_b[:, sv].astype(jnp.bfloat16)
                q1 = _rms(qkv1_b[:, sq], qg1).astype(jnp.bfloat16)
                k1 = _rms(qkv1_b[:, sk], kg1).astype(jnp.bfloat16)
                v1 = qkv1_b[:, sv].astype(jnp.bfloat16)
                s00 = _dot_nt(q0, k0) * scale
                s01 = _dot_nt(q0, k1) * scale + bias_t
                s10 = _dot_nt(q1, k0) * scale
                s11 = _dot_nt(q1, k1) * scale + bias_t
                h0.append(_joint_softmax_av(s00, s01, v0, v1))     # (S0, hd)
                h1.append(_joint_softmax_av(s10, s11, v0, v1))     # (S1, hd)
            attn0_rows.append(jnp.concatenate(h0, axis=-1))        # (S0, D)
            attn1_rows.append(jnp.concatenate(h1, axis=-1))        # (S1, D)
        attn0 = jnp.stack(attn0_rows, axis=0)                      # (B, S0, D)
        attn1 = jnp.stack(attn1_rows, axis=0)                      # (B, S1, D)

        # gated residual + adaLN-modulated feed-forward (batched matmuls)
        new_xs = []
        for m, attn in ((0, attn0), (1, attn1)):
            sa, ca, ga, sf, cf, gf = mods[m]
            x = xs[m] + ga * (_mm3(attn, p['ow'][m]) + p['ob'][m])
            hmod = _ln(x) * (1.0 + cf) + sf
            f = _mm3(hmod, p['ff1_w'][m], p['ff1_b'][m])
            f = jax.nn.gelu(f, approximate=True)
            x = x + gf * _mm3(f, p['ff2_w'][m], p['ff2_b'][m])
            new_xs.append(x)
        y3, t3 = new_xs

    ctf_ref[...] = _l2(_mm3(y3, outw_ref[...], outb_ref[...]))     # one store


# ----------------------------------------------------------------------------
# PatchWiseCLIP forward (3 pallas_calls)
# ----------------------------------------------------------------------------
def patchwise_clip_forward(params, input_ids, pixel_values, attention_mask,
                           meta_tensor):
    cfg = CFG
    B = input_ids.shape[0]
    Dv, Dt = cfg['v_hidden'], cfg['t_hidden']
    P, C = cfg['patch_size'], cfg['channels']
    G = cfg['image_size'] // P
    Np = G * G
    S_pad = ((Np + 1 + 7) // 8) * 8
    proj = cfg['proj_dim']

    # ---------------- vision tower ----------------
    vp = params['vision']
    # stride==kernel conv == im2col (pure relayout in XLA glue) + one matmul
    patches = pixel_values.reshape(B, C, G, P, G, P).transpose(0, 2, 4, 1, 3, 5)
    patches = patches.reshape(B * Np, C * P * P)
    v_inputs = [patches, vp['patch_w'], vp['class_emb'], vp['pos_emb'],
                vp['pre_ln_g'], vp['pre_ln_b']]
    for lp in vp['layers']:
        v_inputs += [lp[k] for k in LAYER_KEYS]
    v_inputs += [vp['post_ln_g'], vp['post_ln_b'], params['visual_projection_w']]
    img_pool, img_patch = fused_call(
        functools.partial(vision_tower_kernel, n_layers=cfg['v_layers'],
                          n_heads=cfg['v_heads'], n_patches=Np, seq_pad=S_pad),
        v_inputs,
        [jax.ShapeDtypeStruct((B, proj), jnp.float32),
         jax.ShapeDtypeStruct((B, Np, Dv), jnp.float32)])

    # ---------------- text tower ----------------
    tp = params['text']
    S = input_ids.shape[1]
    tx = tp['tok_emb'][input_ids] + tp['pos_emb'][None, :S]   # gather in glue
    kmask = attention_mask.astype(jnp.float32)
    eot_onehot = jax.nn.one_hot(jnp.argmax(input_ids, axis=-1), S,
                                dtype=jnp.float32)
    t_inputs = [tx, kmask, eot_onehot]
    for lp in tp['layers']:
        t_inputs += [lp[k] for k in LAYER_KEYS]
    t_inputs += [tp['final_ln_g'], tp['final_ln_b'],
                 params['text_projection_w']]
    last_t, txt_pool = fused_call(
        functools.partial(text_tower_kernel, n_layers=cfg['t_layers'],
                          n_heads=cfg['t_heads']),
        t_inputs,
        [jax.ShapeDtypeStruct((B, S, Dt), jnp.float32),
         jax.ShapeDtypeStruct((B, proj), jnp.float32)])

    # ---------------- token compressor ----------------
    tc = params['token_compressor']
    c_inputs = [tc['register'], last_t, meta_tensor, kmask, tc['to_cond_w']]
    for bp in tc['mmdit']:
        c_inputs += [bp[k] for k in MMDIT_KEYS]
    c_inputs += [tc['out_proj_w'], tc['out_proj_b']]
    ctf = fused_call(
        functools.partial(compressor_kernel, n_blocks=cfg['tc_layers'],
                          n_heads=cfg['tc_heads'], n_patches=Np),
        c_inputs,
        jax.ShapeDtypeStruct((B, Np, Dv), jnp.float32))

    return {'text_pooled': txt_pool, 'text_latents': ctf,
            'image_pooled': img_pool, 'image_patches': img_patch}


# ----------------------------------------------------------------------------
# Deterministic parameter init (matmul weights bf16 for the MXU; biases /
# norms / embeddings / VPU-only weights stay f32)
# ----------------------------------------------------------------------------
def init_params(key, cfg):
    C, P = cfg['channels'], cfg['patch_size']
    G = cfg['image_size'] // P
    Np = G * G
    Dv, Dt = cfg['v_hidden'], cfg['t_hidden']

    def nrm(k, shape, scale=0.02, dtype=jnp.float32):
        return (jax.random.normal(k, shape, jnp.float32) * scale).astype(dtype)

    def clip_layer(k, dim, mlp):
        ks = jax.random.split(k, 4)
        return {
            'ln1_g': jnp.ones((1, dim), jnp.float32),
            'ln1_b': jnp.zeros((1, dim), jnp.float32),
            'ln2_g': jnp.ones((1, dim), jnp.float32),
            'ln2_b': jnp.zeros((1, dim), jnp.float32),
            'wqkv': nrm(ks[0], (dim, 3 * dim), dtype=jnp.bfloat16),
            'bqkv': jnp.zeros((1, 3 * dim), jnp.float32),
            'wo': nrm(ks[1], (dim, dim), dtype=jnp.bfloat16),   # concat-heads proj
            'bo': jnp.zeros((1, dim), jnp.float32),
            'w1': nrm(ks[2], (dim, mlp), dtype=jnp.bfloat16),
            'b1': jnp.zeros((1, mlp), jnp.float32),
            'w2': nrm(ks[3], (mlp, dim), dtype=jnp.bfloat16),
            'b2': jnp.zeros((1, dim), jnp.float32),
        }

    def mmdit_block_params(k, dim, dim_cond, heads):
        hd = dim // heads
        n_mods = 2
        ks = jax.random.split(k, 6)
        return {
            'ada_w': nrm(ks[0], (n_mods, dim_cond, 6 * dim), dtype=jnp.bfloat16),
            'ada_b': nrm(ks[1], (n_mods, 1, 6 * dim)),
            'qkv_w': nrm(ks[2], (n_mods, dim, 3 * dim), dtype=jnp.bfloat16),
            'qkv_b': jnp.zeros((n_mods, 1, 3 * dim), jnp.float32),
            'qg': jnp.ones((n_mods, 1, hd), jnp.float32),
            'kg': jnp.ones((n_mods, 1, hd), jnp.float32),
            'ow': nrm(ks[3], (n_mods, dim, dim), dtype=jnp.bfloat16),
            'ob': jnp.zeros((n_mods, 1, dim), jnp.float32),
            'ff1_w': nrm(ks[4], (n_mods, dim, 4 * dim), dtype=jnp.bfloat16),
            'ff1_b': jnp.zeros((n_mods, 1, 4 * dim), jnp.float32),
            'ff2_w': nrm(ks[5], (n_mods, 4 * dim, dim), dtype=jnp.bfloat16),
            'ff2_b': jnp.zeros((n_mods, 1, dim), jnp.float32),
        }

    keys = jax.random.split(key, 8)
    kv = jax.random.split(keys[0], 3 + cfg['v_layers'])
    vision = {
        'patch_w': nrm(kv[0], (C * P * P, Dv), dtype=jnp.bfloat16),
        'class_emb': nrm(kv[1], (1, Dv)),
        'pos_emb': nrm(kv[2], (Np + 1, Dv)),
        'pre_ln_g': jnp.ones((1, Dv), jnp.float32),
        'pre_ln_b': jnp.zeros((1, Dv), jnp.float32),
        'post_ln_g': jnp.ones((1, Dv), jnp.float32),
        'post_ln_b': jnp.zeros((1, Dv), jnp.float32),
        'layers': [clip_layer(kv[3 + i], Dv, cfg['v_mlp'])
                   for i in range(cfg['v_layers'])],
    }

    kt = jax.random.split(keys[1], 2 + cfg['t_layers'])
    text = {
        'tok_emb': nrm(kt[0], (cfg['vocab'], Dt)),
        'pos_emb': nrm(kt[1], (cfg['seq_len'], Dt)),
        'final_ln_g': jnp.ones((1, Dt), jnp.float32),
        'final_ln_b': jnp.zeros((1, Dt), jnp.float32),
        'layers': [clip_layer(kt[2 + i], Dt, cfg['t_mlp'])
                   for i in range(cfg['t_layers'])],
    }

    kc = jax.random.split(keys[2], 3 + cfg['tc_layers'])
    tc = {
        'register': nrm(kc[0], (Np, Dt)),
        'to_cond_w': nrm(kc[1], (2, cfg['dim_cond'])),          # f32: VPU FMA
        'out_proj_w': nrm(kc[2], (Dt, Dv), dtype=jnp.bfloat16),
        'out_proj_b': jnp.zeros((1, Dv), jnp.float32),
        'mmdit': [mmdit_block_params(jax.random.fold_in(keys[5], l), Dt,
                                     cfg['dim_cond'], cfg['tc_heads'])
                  for l in range(cfg['tc_layers'])],
    }

    return {
        'vision': vision, 'text': text,
        'visual_projection_w': nrm(keys[3], (Dv, cfg['proj_dim']),
                                   dtype=jnp.bfloat16),
        'text_projection_w': nrm(keys[4], (Dt, cfg['proj_dim']),
                                 dtype=jnp.bfloat16),
        'token_compressor': tc,
    }


# ----------------------------------------------------------------------------
# Main
# ----------------------------------------------------------------------------
if __name__ == "__main__":
    key = jax.random.PRNGKey(0)
    k_param, k_pix, k_ids, k_meta = jax.random.split(key, 4)

    params = init_params(k_param, CFG)

    B = CFG['batch']
    pixel_values = jax.random.normal(
        k_pix, (B, CFG['channels'], CFG['image_size'], CFG['image_size']),
        jnp.float32)
    input_ids = jax.random.randint(k_ids, (B, CFG['seq_len']), 1, CFG['vocab'],
                                   jnp.int32)
    attention_mask = jnp.array([[1, 1, 1, 1, 1, 1, 1, 1],
                                [1, 1, 1, 1, 1, 0, 0, 0]], jnp.int32)
    meta_tensor = jax.random.normal(k_meta, (B, 2), jnp.float32)

    fwd = jax.jit(patchwise_clip_forward)
    out = fwd(params, input_ids, pixel_values, attention_mask, meta_tensor)
    out = jax.block_until_ready(out)

    # sanity: shapes + finiteness + unit-norm outputs
    assert out['text_pooled'].shape == (B, CFG['proj_dim'])
    assert out['image_pooled'].shape == (B, CFG['proj_dim'])
    assert out['image_patches'].shape == (B, 4, CFG['v_hidden'])
    assert out['text_latents'].shape == (B, 4, CFG['v_hidden'])
    for v in out.values():
        assert bool(jnp.all(jnp.isfinite(v)))
    assert bool(jnp.allclose(jnp.linalg.norm(out['text_pooled'], axis=-1),
                             1.0, atol=1e-3))
    assert bool(jnp.allclose(jnp.linalg.norm(out['image_patches'], axis=-1),
                             1.0, atol=1e-3))
    assert bool(jnp.allclose(jnp.linalg.norm(out['text_latents'], axis=-1),
                             1.0, atol=1e-3))

    print("KERNEL_OK")
</pallas_src>

<mosaic_0001>
module attributes {stable_mosaic.version = 11 : i64} {
  func.func @text_tower_kernel(%arg0: i32, %arg1: memref<2x8x32xf32, #tpu.memory_space<vmem>>, %arg2: memref<2x8xf32, #tpu.memory_space<vmem>>, %arg3: memref<2x8xf32, #tpu.memory_space<vmem>>, %arg4: memref<1x32xf32, #tpu.memory_space<vmem>>, %arg5: memref<1x32xf32, #tpu.memory_space<vmem>>, %arg6: memref<1x32xf32, #tpu.memory_space<vmem>>, %arg7: memref<1x32xf32, #tpu.memory_space<vmem>>, %arg8: memref<32x96xbf16, #tpu.memory_space<vmem>>, %arg9: memref<1x96xf32, #tpu.memory_space<vmem>>, %arg10: memref<32x32xbf16, #tpu.memory_space<vmem>>, %arg11: memref<1x32xf32, #tpu.memory_space<vmem>>, %arg12: memref<32x128xbf16, #tpu.memory_space<vmem>>, %arg13: memref<1x128xf32, #tpu.memory_space<vmem>>, %arg14: memref<128x32xbf16, #tpu.memory_space<vmem>>, %arg15: memref<1x32xf32, #tpu.memory_space<vmem>>, %arg16: memref<1x32xf32, #tpu.memory_space<vmem>>, %arg17: memref<1x32xf32, #tpu.memory_space<vmem>>, %arg18: memref<32x16xbf16, #tpu.memory_space<vmem>>, %arg19: memref<2x8x32xf32, #tpu.memory_space<vmem>>, %arg20: memref<2x16xf32, #tpu.memory_space<vmem>>) attributes {dimension_semantics = [#tpu.dimension_semantics<arbitrary>], iteration_bounds = array<i64: 1>, scalar_prefetch = 0 : i64, scratch_operands = 0 : i64, tpu.core_type = #tpu.core_type<tc>, window_params = [{pipeline_mode = #tpu.pipeline_mode<synchronous>, transform_indices = @transform_0, window_bounds = array<i64: 2, 8, 32>}, {pipeline_mode = #tpu.pipeline_mode<synchronous>, transform_indices = @transform_1, window_bounds = array<i64: 2, 8>}, {pipeline_mode = #tpu.pipeline_mode<synchronous>, transform_indices = @transform_2, window_bounds = array<i64: 2, 8>}, {pipeline_mode = #tpu.pipeline_mode<synchronous>, transform_indices = @transform_3, window_bounds = array<i64: 1, 32>}, {pipeline_mode = #tpu.pipeline_mode<synchronous>, transform_indices = @transform_4, window_bounds = array<i64: 1, 32>}, {pipeline_mode = #tpu.pipeline_mode<synchronous>, transform_indices = @transform_5, window_bounds = array<i64: 1, 32>}, {pipeline_mode = #tpu.pipeline_mode<synchronous>, transform_indices = @transform_6, window_bounds = array<i64: 1, 32>}, {pipeline_mode = #tpu.pipeline_mode<synchronous>, transform_indices = @transform_7, window_bounds = array<i64: 32, 96>}, {pipeline_mode = #tpu.pipeline_mode<synchronous>, transform_indices = @transform_8, window_bounds = array<i64: 1, 96>}, {pipeline_mode = #tpu.pipeline_mode<synchronous>, transform_indices = @transform_9, window_bounds = array<i64: 32, 32>}, {pipeline_mode = #tpu.pipeline_mode<synchronous>, transform_indices = @transform_10, window_bounds = array<i64: 1, 32>}, {pipeline_mode = #tpu.pipeline_mode<synchronous>, transform_indices = @transform_11, window_bounds = array<i64: 32, 128>}, {pipeline_mode = #tpu.pipeline_mode<synchronous>, transform_indices = @transform_12, window_bounds = array<i64: 1, 128>}, {pipeline_mode = #tpu.pipeline_mode<synchronous>, transform_indices = @transform_13, window_bounds = array<i64: 128, 32>}, {pipeline_mode = #tpu.pipeline_mode<synchronous>, transform_indices = @transform_14, window_bounds = array<i64: 1, 32>}, {pipeline_mode = #tpu.pipeline_mode<synchronous>, transform_indices = @transform_15, window_bounds = array<i64: 1, 32>}, {pipeline_mode = #tpu.pipeline_mode<synchronous>, transform_indices = @transform_16, window_bounds = array<i64: 1, 32>}, {pipeline_mode = #tpu.pipeline_mode<synchronous>, transform_indices = @transform_17, window_bounds = array<i64: 32, 16>}, {pipeline_mode = #tpu.pipeline_mode<synchronous>, transform_indices = @transform_18, window_bounds = array<i64: 2, 8, 32>}, {pipeline_mode = #tpu.pipeline_mode<synchronous>, transform_indices = @transform_19, window_bounds = array<i64: 2, 16>}]} {
    %c0 = arith.constant 0 : index
    %c0_0 = arith.constant 0 : index
    %0 = vector.load %arg4[%c0, %c0_0] : memref<1x32xf32, #tpu.memory_space<vmem>>, vector<1x32xf32>
    %c0_1 = arith.constant 0 : index
    %c0_2 = arith.constant 0 : index
    %1 = vector.load %arg5[%c0_1, %c0_2] : memref<1x32xf32, #tpu.memory_space<vmem>>, vector<1x32xf32>
    %c0_3 = arith.constant 0 : index
    %c0_4 = arith.constant 0 : index
    %2 = vector.load %arg6[%c0_3, %c0_4] : memref<1x32xf32, #tpu.memory_space<vmem>>, vector<1x32xf32>
    %c0_5 = arith.constant 0 : index
    %c0_6 = arith.constant 0 : index
    %3 = vector.load %arg7[%c0_5, %c0_6] : memref<1x32xf32, #tpu.memory_space<vmem>>, vector<1x32xf32>
    %c0_7 = arith.constant 0 : index
    %c0_8 = arith.constant 0 : index
    %4 = vector.load %arg8[%c0_7, %c0_8] : memref<32x96xbf16, #tpu.memory_space<vmem>>, vector<32x96xbf16>
    %c0_9 = arith.constant 0 : index
    %c0_10 = arith.constant 0 : index
    %5 = vector.load %arg9[%c0_9, %c0_10] : memref<1x96xf32, #tpu.memory_space<vmem>>, vector<1x96xf32>
    %c0_11 = arith.constant 0 : index
    %c0_12 = arith.constant 0 : index
    %6 = vector.load %arg10[%c0_11, %c0_12] : memref<32x32xbf16, #tpu.memory_space<vmem>>, vector<32x32xbf16>
    %c0_13 = arith.constant 0 : index
    %c0_14 = arith.constant 0 : index
    %7 = vector.load %arg11[%c0_13, %c0_14] : memref<1x32xf32, #tpu.memory_space<vmem>>, vector<1x32xf32>
    %c0_15 = arith.constant 0 : index
    %c0_16 = arith.constant 0 : index
    %8 = vector.load %arg12[%c0_15, %c0_16] : memref<32x128xbf16, #tpu.memory_space<vmem>>, vector<32x128xbf16>
    %c0_17 = arith.constant 0 : index
    %c0_18 = arith.constant 0 : index
    %9 = vector.load %arg13[%c0_17, %c0_18] : memref<1x128xf32, #tpu.memory_space<vmem>>, vector<1x128xf32>
    %c0_19 = arith.constant 0 : index
    %c0_20 = arith.constant 0 : index
    %10 = vector.load %arg14[%c0_19, %c0_20] : memref<128x32xbf16, #tpu.memory_space<vmem>>, vector<128x32xbf16>
    %c0_21 = arith.constant 0 : index
    %c0_22 = arith.constant 0 : index
    %11 = vector.load %arg15[%c0_21, %c0_22] : memref<1x32xf32, #tpu.memory_space<vmem>>, vector<1x32xf32>
    %c0_23 = arith.constant 0 : index
    %c0_24 = arith.constant 0 : index
    %c0_25 = arith.constant 0 : index
    %12 = vector.load %arg1[%c0_23, %c0_24, %c0_25] : memref<2x8x32xf32, #tpu.memory_space<vmem>>, vector<2x8x32xf32>
    %13 = tpu.iota {dimensions = array<i32: 0>} : vector<8x8xi32>
    %14 = tpu.iota {dimensions = array<i32: 1>} : vector<8x8xi32>
    %15 = arith.cmpi sgt, %14, %13 : vector<8x8xi32>
    %cst = arith.constant -1.000000e+30 : f32
    %cst_26 = arith.constant 0.000000e+00 : f32
    %16 = vector.broadcast %cst : f32 to vector<8x8xf32>
    %17 = vector.broadcast %cst_26 : f32 to vector<8x8xf32>
    %18 = arith.select %15, %16, %17 : vector<8x8xi1>, vector<8x8xf32>
    %c0_27 = arith.constant 0 : index
    %c0_28 = arith.constant 0 : index
    %19 = vector.load %arg2[%c0_27, %c0_28] : memref<2x8xf32, #tpu.memory_space<vmem>>, vector<2x8xf32>
    %cst_29 = arith.constant 1.000000e+00 : f32
    %20 = vector.broadcast %cst_29 : f32 to vector<2x8xf32>
    %21 = arith.subf %20, %19 : vector<2x8xf32>
    %cst_30 = arith.constant -1.000000e+30 : f32
    %22 = vector.broadcast %cst_30 : f32 to vector<2x8xf32>
    %23 = arith.mulf %21, %22 : vector<2x8xf32>
    %24 = vector.shape_cast %23 : vector<2x8xf32> to vector<2x1x8xf32>
    %cst_31 = arith.constant dense<0.000000e+00> : vector<2x8xf32>
    %25 = vector.multi_reduction <add>, %12, %cst_31 [2] : vector<2x8x32xf32> to vector<2x8xf32>
    %26 = vector.shape_cast %25 : vector<2x8xf32> to vector<2x8x1xf32>
    %cst_32 = arith.constant 3.200000e+01 : f32
    %27 = vector.broadcast %cst_32 : f32 to vector<2x8x1xf32>
    %28 = arith.divf %26, %27 : vector<2x8x1xf32>
    %29 = vector.broadcast %28 : vector<2x8x1xf32> to vector<2x8x32xf32>
    %30 = arith.subf %12, %29 : vector<2x8x32xf32>
    %31 = arith.mulf %30, %30 : vector<2x8x32xf32>
    %cst_33 = arith.constant dense<0.000000e+00> : vector<2x8xf32>
    %32 = vector.multi_reduction <add>, %31, %cst_33 [2] : vector<2x8x32xf32> to vector<2x8xf32>
    %33 = vector.shape_cast %32 : vector<2x8xf32> to vector<2x8x1xf32>
    %cst_34 = arith.constant 3.200000e+01 : f32
    %34 = vector.broadcast %cst_34 : f32 to vector<2x8x1xf32>
    %35 = arith.divf %33, %34 : vector<2x8x1xf32>
    %cst_35 = arith.constant 9.99999974E-6 : f32
    %36 = vector.broadcast %cst_35 : f32 to vector<2x8x1xf32>
    %37 = arith.addf %35, %36 : vector<2x8x1xf32>
    %38 = math.rsqrt %37 : vector<2x8x1xf32>
    %39 = vector.broadcast %38 : vector<2x8x1xf32> to vector<2x8x32xf32>
    %40 = arith.mulf %30, %39 : vector<2x8x32xf32>
    %41 = vector.shape_cast %0 : vector<1x32xf32> to vector<1x1x32xf32>
    %42 = vector.broadcast %41 : vector<1x1x32xf32> to vector<2x8x32xf32>
    %43 = arith.mulf %40, %42 : vector<2x8x32xf32>
    %44 = vector.shape_cast %1 : vector<1x32xf32> to vector<1x1x32xf32>
    %45 = vector.broadcast %44 : vector<1x1x32xf32> to vector<2x8x32xf32>
    %46 = arith.addf %43, %45 : vector<2x8x32xf32>
    %47 = vector.shape_cast %46 : vector<2x8x32xf32> to vector<16x32xf32>
    %48 = arith.truncf %47 : vector<16x32xf32> to vector<16x32xbf16>
    %cst_36 = arith.constant dense<0.000000e+00> : vector<16x96xf32>
    %49 = tpu.matmul %48, %4, %cst_36 {dimension_numbers = #tpu.dot_dimension_numbers<[1], [0], [0], [1], [0, 0, 1, 1], [], []>} : vector<16x32xbf16>, vector<32x96xbf16>, vector<16x96xf32> -> vector<16x96xf32>
    %50 = vector.broadcast %5 : vector<1x96xf32> to vector<16x96xf32>
    %51 = arith.addf %49, %50 : vector<16x96xf32>
    %52 = vector.shape_cast %51 : vector<16x96xf32> to vector<2x8x96xf32>
    %53 = vector.extract_strided_slice %52 {offsets = [0, 0, 0], sizes = [1, 8, 96], strides = [1, 1, 1]} : vector<2x8x96xf32> to vector<1x8x96xf32>
    %54 = vector.shape_cast %53 : vector<1x8x96xf32> to vector<8x96xf32>
    %55 = vector.extract_strided_slice %24 {offsets = [0, 0, 0], sizes = [1, 1, 8], strides = [1, 1, 1]} : vector<2x1x8xf32> to vector<1x1x8xf32>
    %56 = vector.shape_cast %55 : vector<1x1x8xf32> to vector<1x8xf32>
    %57 = vector.broadcast %56 : vector<1x8xf32> to vector<8x8xf32>
    %58 = arith.addf %18, %57 : vector<8x8xf32>
    %59 = vector.extract_strided_slice %54 {offsets = [0, 0], sizes = [8, 16], strides = [1, 1]} : vector<8x96xf32> to vector<8x16xf32>
    %60 = arith.truncf %59 : vector<8x16xf32> to vector<8x16xbf16>
    %61 = vector.extract_strided_slice %54 {offsets = [0, 32], sizes = [8, 16], strides = [1, 1]} : vector<8x96xf32> to vector<8x16xf32>
    %62 = arith.truncf %61 : vector<8x16xf32> to vector<8x16xbf16>
    %63 = vector.extract_strided_slice %54 {offsets = [0, 64], sizes = [8, 16], strides = [1, 1]} : vector<8x96xf32> to vector<8x16xf32>
    %64 = arith.truncf %63 : vector<8x16xf32> to vector<8x16xbf16>
    %cst_37 = arith.constant dense<0.000000e+00> : vector<8x8xf32>
    %65 = tpu.matmul %60, %62, %cst_37 {dimension_numbers = #tpu.dot_dimension_numbers<[1], [1], [0], [0], [0, 0, 1, 0], [], []>} : vector<8x16xbf16>, vector<8x16xbf16>, vector<8x8xf32> -> vector<8x8xf32>
    %cst_38 = arith.constant 2.500000e-01 : f32
    %66 = vector.broadcast %cst_38 : f32 to vector<8x8xf32>
    %67 = arith.mulf %65, %66 : vector<8x8xf32>
    %68 = arith.addf %67, %58 : vector<8x8xf32>
    %cst_39 = arith.constant dense<0xFF800000> : vector<8xf32>
    %69 = vector.multi_reduction <maximumf>, %68, %cst_39 [1] : vector<8x8xf32> to vector<8xf32>
    %70 = vector.shape_cast %69 : vector<8xf32> to vector<8x1xf32>
    %71 = vector.broadcast %70 : vector<8x1xf32> to vector<8x8xf32>
    %72 = arith.subf %68, %71 : vector<8x8xf32>
    %73 = math.exp %72 : vector<8x8xf32>
    %cst_40 = arith.constant dense<0.000000e+00> : vector<8xf32>
    %74 = vector.multi_reduction <add>, %73, %cst_40 [1] : vector<8x8xf32> to vector<8xf32>
    %75 = vector.shape_cast %74 : vector<8xf32> to vector<8x1xf32>
    %76 = tpu.reciprocal %75 {approx = true} : vector<8x1xf32> -> vector<8x1xf32>
    %77 = vector.broadcast %76 : vector<8x1xf32> to vector<8x8xf32>
    %78 = arith.mulf %73, %77 : vector<8x8xf32>
    %79 = arith.truncf %78 : vector<8x8xf32> to vector<8x8xbf16>
    %cst_41 = arith.constant dense<0.000000e+00> : vector<8x16xf32>
    %80 = tpu.matmul %79, %64, %cst_41 {dimension_numbers = #tpu.dot_dimension_numbers<[1], [0], [0], [1], [0, 0, 1, 1], [], []>} : vector<8x8xbf16>, vector<8x16xbf16>, vector<8x16xf32> -> vector<8x16xf32>
    %81 = vector.extract_strided_slice %54 {offsets = [0, 16], sizes = [8, 16], strides = [1, 1]} : vector<8x96xf32> to vector<8x16xf32>
    %82 = arith.truncf %81 : vector<8x16xf32> to vector<8x16xbf16>
    %83 = vector.extract_strided_slice %54 {offsets = [0, 48], sizes = [8, 16], strides = [1, 1]} : vector<8x96xf32> to vector<8x16xf32>
    %84 = arith.truncf %83 : vector<8x16xf32> to vector<8x16xbf16>
    %85 = vector.extract_strided_slice %54 {offsets = [0, 80], sizes = [8, 16], strides = [1, 1]} : vector<8x96xf32> to vector<8x16xf32>
    %86 = arith.truncf %85 : vector<8x16xf32> to vector<8x16xbf16>
    %cst_42 = arith.constant dense<0.000000e+00> : vector<8x8xf32>
    %87 = tpu.matmul %82, %84, %cst_42 {dimension_numbers = #tpu.dot_dimension_numbers<[1], [1], [0], [0], [0, 0, 1, 0], [], []>} : vector<8x16xbf16>, vector<8x16xbf16>, vector<8x8xf32> -> vector<8x8xf32>
    %cst_43 = arith.constant 2.500000e-01 : f32
    %88 = vector.broadcast %cst_43 : f32 to vector<8x8xf32>
    %89 = arith.mulf %87, %88 : vector<8x8xf32>
    %90 = arith.addf %89, %58 : vector<8x8xf32>
    %cst_44 = arith.constant dense<0xFF800000> : vector<8xf32>
    %91 = vector.multi_reduction <maximumf>, %90, %cst_44 [1] : vector<8x8xf32> to vector<8xf32>
    %92 = vector.shape_cast %91 : vector<8xf32> to vector<8x1xf32>
    %93 = vector.broadcast %92 : vector<8x1xf32> to vector<8x8xf32>
    %94 = arith.subf %90, %93 : vector<8x8xf32>
    %95 = math.exp %94 : vector<8x8xf32>
    %cst_45 = arith.constant dense<0.000000e+00> : vector<8xf32>
    %96 = vector.multi_reduction <add>, %95, %cst_45 [1] : vector<8x8xf32> to vector<8xf32>
    %97 = vector.shape_cast %96 : vector<8xf32> to vector<8x1xf32>
    %98 = tpu.reciprocal %97 {approx = true} : vector<8x1xf32> -> vector<8x1xf32>
    %99 = vector.broadcast %98 : vector<8x1xf32> to vector<8x8xf32>
    %100 = arith.mulf %95, %99 : vector<8x8xf32>
    %101 = arith.truncf %100 : vector<8x8xf32> to vector<8x8xbf16>
    %cst_46 = arith.constant dense<0.000000e+00> : vector<8x16xf32>
    %102 = tpu.matmul %101, %86, %cst_46 {dimension_numbers = #tpu.dot_dimension_numbers<[1], [0], [0], [1], [0, 0, 1, 1], [], []>} : vector<8x8xbf16>, vector<8x16xbf16>, vector<8x16xf32> -> vector<8x16xf32>
    %103 = tpu.concatenate %80, %102 in 1 : vector<8x16xf32>, vector<8x16xf32> -> vector<8x32xf32>
    %104 = vector.extract_strided_slice %52 {offsets = [1, 0, 0], sizes = [1, 8, 96], strides = [1, 1, 1]} : vector<2x8x96xf32> to vector<1x8x96xf32>
    %105 = vector.shape_cast %104 : vector<1x8x96xf32> to vector<8x96xf32>
    %106 = vector.extract_strided_slice %24 {offsets = [1, 0, 0], sizes = [1, 1, 8], strides = [1, 1, 1]} : vector<2x1x8xf32> to vector<1x1x8xf32>
    %107 = vector.shape_cast %106 : vector<1x1x8xf32> to vector<1x8xf32>
    %108 = vector.broadcast %107 : vector<1x8xf32> to vector<8x8xf32>
    %109 = arith.addf %18, %108 : vector<8x8xf32>
    %110 = vector.extract_strided_slice %105 {offsets = [0, 0], sizes = [8, 16], strides = [1, 1]} : vector<8x96xf32> to vector<8x16xf32>
    %111 = arith.truncf %110 : vector<8x16xf32> to vector<8x16xbf16>
    %112 = vector.extract_strided_slice %105 {offsets = [0, 32], sizes = [8, 16], strides = [1, 1]} : vector<8x96xf32> to vector<8x16xf32>
    %113 = arith.truncf %112 : vector<8x16xf32> to vector<8x16xbf16>
    %114 = vector.extract_strided_slice %105 {offsets = [0, 64], sizes = [8, 16], strides = [1, 1]} : vector<8x96xf32> to vector<8x16xf32>
    %115 = arith.truncf %114 : vector<8x16xf32> to vector<8x16xbf16>
    %cst_47 = arith.constant dense<0.000000e+00> : vector<8x8xf32>
    %116 = tpu.matmul %111, %113, %cst_47 {dimension_numbers = #tpu.dot_dimension_numbers<[1], [1], [0], [0], [0, 0, 1, 0], [], []>} : vector<8x16xbf16>, vector<8x16xbf16>, vector<8x8xf32> -> vector<8x8xf32>
    %cst_48 = arith.constant 2.500000e-01 : f32
    %117 = vector.broadcast %cst_48 : f32 to vector<8x8xf32>
    %118 = arith.mulf %116, %117 : vector<8x8xf32>
    %119 = arith.addf %118, %109 : vector<8x8xf32>
    %cst_49 = arith.constant dense<0xFF800000> : vector<8xf32>
    %120 = vector.multi_reduction <maximumf>, %119, %cst_49 [1] : vector<8x8xf32> to vector<8xf32>
    %121 = vector.shape_cast %120 : vector<8xf32> to vector<8x1xf32>
    %122 = vector.broadcast %121 : vector<8x1xf32> to vector<8x8xf32>
    %123 = arith.subf %119, %122 : vector<8x8xf32>
    %124 = math.exp %123 : vector<8x8xf32>
    %cst_50 = arith.constant dense<0.000000e+00> : vector<8xf32>
    %125 = vector.multi_reduction <add>, %124, %cst_50 [1] : vector<8x8xf32> to vector<8xf32>
    %126 = vector.shape_cast %125 : vector<8xf32> to vector<8x1xf32>
    %127 = tpu.reciprocal %126 {approx = true} : vector<8x1xf32> -> vector<8x1xf32>
    %128 = vector.broadcast %127 : vector<8x1xf32> to vector<8x8xf32>
    %129 = arith.mulf %124, %128 : vector<8x8xf32>
    %130 = arith.truncf %129 : vector<8x8xf32> to vector<8x8xbf16>
    %cst_51 = arith.constant dense<0.000000e+00> : vector<8x16xf32>
    %131 = tpu.matmul %130, %115, %cst_51 {dimension_numbers = #tpu.dot_dimension_numbers<[1], [0], [0], [1], [0, 0, 1, 1], [], []>} : vector<8x8xbf16>, vector<8x16xbf16>, vector<8x16xf32> -> vector<8x16xf32>
    %132 = vector.extract_strided_slice %105 {offsets = [0, 16], sizes = [8, 16], strides = [1, 1]} : vector<8x96xf32> to vector<8x16xf32>
    %133 = arith.truncf %132 : vector<8x16xf32> to vector<8x16xbf16>
    %134 = vector.extract_strided_slice %105 {offsets = [0, 48], sizes = [8, 16], strides = [1, 1]} : vector<8x96xf32> to vector<8x16xf32>
    %135 = arith.truncf %134 : vector<8x16xf32> to vector<8x16xbf16>
    %136 = vector.extract_strided_slice %105 {offsets = [0, 80], sizes = [8, 16], strides = [1, 1]} : vector<8x96xf32> to vector<8x16xf32>
    %137 = arith.truncf %136 : vector<8x16xf32> to vector<8x16xbf16>
    %cst_52 = arith.constant dense<0.000000e+00> : vector<8x8xf32>
    %138 = tpu.matmul %133, %135, %cst_52 {dimension_numbers = #tpu.dot_dimension_numbers<[1], [1], [0], [0], [0, 0, 1, 0], [], []>} : vector<8x16xbf16>, vector<8x16xbf16>, vector<8x8xf32> -> vector<8x8xf32>
    %cst_53 = arith.constant 2.500000e-01 : f32
    %139 = vector.broadcast %cst_53 : f32 to vector<8x8xf32>
    %140 = arith.mulf %138, %139 : vector<8x8xf32>
    %141 = arith.addf %140, %109 : vector<8x8xf32>
    %cst_54 = arith.constant dense<0xFF800000> : vector<8xf32>
    %142 = vector.multi_reduction <maximumf>, %141, %cst_54 [1] : vector<8x8xf32> to vector<8xf32>
    %143 = vector.shape_cast %142 : vector<8xf32> to vector<8x1xf32>
    %144 = vector.broadcast %143 : vector<8x1xf32> to vector<8x8xf32>
    %145 = arith.subf %141, %144 : vector<8x8xf32>
    %146 = math.exp %145 : vector<8x8xf32>
    %cst_55 = arith.constant dense<0.000000e+00> : vector<8xf32>
    %147 = vector.multi_reduction <add>, %146, %cst_55 [1] : vector<8x8xf32> to vector<8xf32>
    %148 = vector.shape_cast %147 : vector<8xf32> to vector<8x1xf32>
    %149 = tpu.reciprocal %148 {approx = true} : vector<8x1xf32> -> vector<8x1xf32>
    %150 = vector.broadcast %149 : vector<8x1xf32> to vector<8x8xf32>
    %151 = arith.mulf %146, %150 : vector<8x8xf32>
    %152 = arith.truncf %151 : vector<8x8xf32> to vector<8x8xbf16>
    %cst_56 = arith.constant dense<0.000000e+00> : vector<8x16xf32>
    %153 = tpu.matmul %152, %137, %cst_56 {dimension_numbers = #tpu.dot_dimension_numbers<[1], [0], [0], [1], [0, 0, 1, 1], [], []>} : vector<8x8xbf16>, vector<8x16xbf16>, vector<8x16xf32> -> vector<8x16xf32>
    %154 = tpu.concatenate %131, %153 in 1 : vector<8x16xf32>, vector<8x16xf32> -> vector<8x32xf32>
    %155 = vector.shape_cast %103 : vector<8x32xf32> to vector<1x8x32xf32>
    %156 = vector.shape_cast %154 : vector<8x32xf32> to vector<1x8x32xf32>
    %157 = tpu.concatenate %155, %156 in 0 : vector<1x8x32xf32>, vector<1x8x32xf32> -> vector<2x8x32xf32>
    %158 = vector.shape_cast %157 : vector<2x8x32xf32> to vector<16x32xf32>
    %159 = arith.truncf %158 : vector<16x32xf32> to vector<16x32xbf16>
    %cst_57 = arith.constant dense<0.000000e+00> : vector<16x32xf32>
    %160 = tpu.matmul %159, %6, %cst_57 {dimension_numbers = #tpu.dot_dimension_numbers<[1], [0], [0], [1], [0, 0, 1, 1], [], []>} : vector<16x32xbf16>, vector<32x32xbf16>, vector<16x32xf32> -> vector<16x32xf32>
    %161 = vector.broadcast %7 : vector<1x32xf32> to vector<16x32xf32>
    %162 = arith.addf %160, %161 : vector<16x32xf32>
    %163 = vector.shape_cast %162 : vector<16x32xf32> to vector<2x8x32xf32>
    %164 = arith.addf %12, %163 : vector<2x8x32xf32>
    %cst_58 = arith.constant dense<0.000000e+00> : vector<2x8xf32>
    %165 = vector.multi_reduction <add>, %164, %cst_58 [2] : vector<2x8x32xf32> to vector<2x8xf32>
    %166 = vector.shape_cast %165 : vector<2x8xf32> to vector<2x8x1xf32>
    %cst_59 = arith.constant 3.200000e+01 : f32
    %167 = vector.broadcast %cst_59 : f32 to vector<2x8x1xf32>
    %168 = arith.divf %166, %167 : vector<2x8x1xf32>
    %169 = vector.broadcast %168 : vector<2x8x1xf32> to vector<2x8x32xf32>
    %170 = arith.subf %164, %169 : vector<2x8x32xf32>
    %171 = arith.mulf %170, %170 : vector<2x8x32xf32>
    %cst_60 = arith.constant dense<0.000000e+00> : vector<2x8xf32>
    %172 = vector.multi_reduction <add>, %171, %cst_60 [2] : vector<2x8x32xf32> to vector<2x8xf32>
    %173 = vector.shape_cast %172 : vector<2x8xf32> to vector<2x8x1xf32>
    %cst_61 = arith.constant 3.200000e+01 : f32
    %174 = vector.broadcast %cst_61 : f32 to vector<2x8x1xf32>
    %175 = arith.divf %173, %174 : vector<2x8x1xf32>
    %cst_62 = arith.constant 9.99999974E-6 : f32
    %176 = vector.broadcast %cst_62 : f32 to vector<2x8x1xf32>
    %177 = arith.addf %175, %176 : vector<2x8x1xf32>
    %178 = math.rsqrt %177 : vector<2x8x1xf32>
    %179 = vector.broadcast %178 : vector<2x8x1xf32> to vector<2x8x32xf32>
    %180 = arith.mulf %170, %179 : vector<2x8x32xf32>
    %181 = vector.shape_cast %2 : vector<1x32xf32> to vector<1x1x32xf32>
    %182 = vector.broadcast %181 : vector<1x1x32xf32> to vector<2x8x32xf32>
    %183 = arith.mulf %180, %182 : vector<2x8x32xf32>
    %184 = vector.shape_cast %3 : vector<1x32xf32> to vector<1x1x32xf32>
    %185 = vector.broadcast %184 : vector<1x1x32xf32> to vector<2x8x32xf32>
    %186 = arith.addf %183, %185 : vector<2x8x32xf32>
    %187 = vector.shape_cast %186 : vector<2x8x32xf32> to vector<16x32xf32>
    %188 = arith.truncf %187 : vector<16x32xf32> to vector<16x32xbf16>
    %cst_63 = arith.constant dense<0.000000e+00> : vector<16x128xf32>
    %189 = tpu.matmul %188, %8, %cst_63 {dimension_numbers = #tpu.dot_dimension_numbers<[1], [0], [0], [1], [0, 0, 1, 1], [], []>} : vector<16x32xbf16>, vector<32x128xbf16>, vector<16x128xf32> -> vector<16x128xf32>
    %190 = vector.broadcast %9 : vector<1x128xf32> to vector<16x128xf32>
    %191 = arith.addf %189, %190 : vector<16x128xf32>
    %192 = vector.shape_cast %191 : vector<16x128xf32> to vector<2x8x128xf32>
    %cst_64 = arith.constant 1.702000e+00 : f32
    %193 = vector.broadcast %cst_64 : f32 to vector<2x8x128xf32>
    %194 = arith.mulf %193, %192 : vector<2x8x128xf32>
    %195 = arith.negf %194 : vector<2x8x128xf32>
    %196 = math.exp %195 : vector<2x8x128xf32>
    %cst_65 = arith.constant 1.000000e+00 : f32
    %197 = vector.broadcast %cst_65 : f32 to vector<2x8x128xf32>
    %198 = arith.addf %197, %196 : vector<2x8x128xf32>
    %199 = arith.divf %197, %198 : vector<2x8x128xf32>
    %200 = arith.mulf %192, %199 : vector<2x8x128xf32>
    %201 = vector.shape_cast %200 : vector<2x8x128xf32> to vector<16x128xf32>
    %202 = arith.truncf %201 : vector<16x128xf32> to vector<16x128xbf16>
    %cst_66 = arith.constant dense<0.000000e+00> : vector<16x32xf32>
    %203 = tpu.matmul %202, %10, %cst_66 {dimension_numbers = #tpu.dot_dimension_numbers<[1], [0], [0], [1], [0, 0, 1, 1], [], []>} : vector<16x128xbf16>, vector<128x32xbf16>, vector<16x32xf32> -> vector<16x32xf32>
    %204 = vector.broadcast %11 : vector<1x32xf32> to vector<16x32xf32>
    %205 = arith.addf %203, %204 : vector<16x32xf32>
    %206 = vector.shape_cast %205 : vector<16x32xf32> to vector<2x8x32xf32>
    %207 = arith.addf %164, %206 : vector<2x8x32xf32>
    %c0_67 = arith.constant 0 : index
    %c0_68 = arith.constant 0 : index
    %208 = vector.load %arg16[%c0_67, %c0_68] : memref<1x32xf32, #tpu.memory_space<vmem>>, vector<1x32xf32>
    %c0_69 = arith.constant 0 : index
    %c0_70 = arith.constant 0 : index
    %209 = vector.load %arg17[%c0_69, %c0_70] : memref<1x32xf32, #tpu.memory_space<vmem>>, vector<1x32xf32>
    %cst_71 = arith.constant dense<0.000000e+00> : vector<2x8xf32>
    %210 = vector.multi_reduction <add>, %207, %cst_71 [2] : vector<2x8x32xf32> to vector<2x8xf32>
    %211 = vector.shape_cast %210 : vector<2x8xf32> to vector<2x8x1xf32>
    %cst_72 = arith.constant 3.200000e+01 : f32
    %212 = vector.broadcast %cst_72 : f32 to vector<2x8x1xf32>
    %213 = arith.divf %211, %212 : vector<2x8x1xf32>
    %214 = vector.broadcast %213 : vector<2x8x1xf32> to vector<2x8x32xf32>
    %215 = arith.subf %207, %214 : vector<2x8x32xf32>
    %216 = arith.mulf %215, %215 : vector<2x8x32xf32>
    %cst_73 = arith.constant dense<0.000000e+00> : vector<2x8xf32>
    %217 = vector.multi_reduction <add>, %216, %cst_73 [2] : vector<2x8x32xf32> to vector<2x8xf32>
    %218 = vector.shape_cast %217 : vector<2x8xf32> to vector<2x8x1xf32>
    %cst_74 = arith.constant 3.200000e+01 : f32
    %219 = vector.broadcast %cst_74 : f32 to vector<2x8x1xf32>
    %220 = arith.divf %218, %219 : vector<2x8x1xf32>
    %cst_75 = arith.constant 9.99999974E-6 : f32
    %221 = vector.broadcast %cst_75 : f32 to vector<2x8x1xf32>
    %222 = arith.addf %220, %221 : vector<2x8x1xf32>
    %223 = math.rsqrt %222 : vector<2x8x1xf32>
    %224 = vector.broadcast %223 : vector<2x8x1xf32> to vector<2x8x32xf32>
    %225 = arith.mulf %215, %224 : vector<2x8x32xf32>
    %226 = vector.shape_cast %208 : vector<1x32xf32> to vector<1x1x32xf32>
    %227 = vector.broadcast %226 : vector<1x1x32xf32> to vector<2x8x32xf32>
    %228 = arith.mulf %225, %227 : vector<2x8x32xf32>
    %229 = vector.shape_cast %209 : vector<1x32xf32> to vector<1x1x32xf32>
    %230 = vector.broadcast %229 : vector<1x1x32xf32> to vector<2x8x32xf32>
    %231 = arith.addf %228, %230 : vector<2x8x32xf32>
    %c0_76 = arith.constant 0 : index
    %c0_77 = arith.constant 0 : index
    %c0_78 = arith.constant 0 : index
    %232 = vector.load %arg19[%c0_76, %c0_77, %c0_78] : memref<2x8x32xf32, #tpu.memory_space<vmem>>, vector<2x8x32xf32>
    tpu.vector_store %arg19[%c0_76, %c0_77, %c0_78], %231 {strides = array<i32>} : memref<2x8x32xf32, #tpu.memory_space<vmem>>, vector<2x8x32xf32>,
    %c0_79 = arith.constant 0 : index
    %c0_80 = arith.constant 0 : index
    %233 = vector.load %arg3[%c0_79, %c0_80] : memref<2x8xf32, #tpu.memory_space<vmem>>, vector<2x8xf32>
    %234 = vector.extract_strided_slice %233 {offsets = [0, 0], sizes = [1, 8], strides = [1, 1]} : vector<2x8xf32> to vector<1x8xf32>
    %235 = vector.extract_strided_slice %231 {offsets = [0, 0, 0], sizes = [1, 8, 32], strides = [1, 1, 1]} : vector<2x8x32xf32> to vector<1x8x32xf32>
    %236 = vector.shape_cast %235 : vector<1x8x32xf32> to vector<8x32xf32>
    %cst_81 = arith.constant dense<0.000000e+00> : vector<1x32xf32>
    %237 = tpu.matmul %234, %236, %cst_81 {dimension_numbers = #tpu.dot_dimension_numbers<[1], [0], [0], [1], [0, 0, 1, 1], [], []>} : vector<1x8xf32>, vector<8x32xf32>, vector<1x32xf32> -> vector<1x32xf32>
    %238 = vector.extract_strided_slice %233 {offsets = [1, 0], sizes = [1, 8], strides = [1, 1]} : vector<2x8xf32> to vector<1x8xf32>
    %239 = vector.extract_strided_slice %231 {offsets = [1, 0, 0], sizes = [1, 8, 32], strides = [1, 1, 1]} : vector<2x8x32xf32> to vector<1x8x32xf32>
    %240 = vector.shape_cast %239 : vector<1x8x32xf32> to vector<8x32xf32>
    %cst_82 = arith.constant dense<0.000000e+00> : vector<1x32xf32>
    %241 = tpu.matmul %238, %240, %cst_82 {dimension_numbers = #tpu.dot_dimension_numbers<[1], [0], [0], [1], [0, 0, 1, 1], [], []>} : vector<1x8xf32>, vector<8x32xf32>, vector<1x32xf32> -> vector<1x32xf32>
    %242 = tpu.concatenate %237, %241 in 0 : vector<1x32xf32>, vector<1x32xf32> -> vector<2x32xf32>
    %243 = arith.truncf %242 : vector<2x32xf32> to vector<2x32xbf16>
    %c0_83 = arith.constant 0 : index
    %c0_84 = arith.constant 0 : index
    %244 = vector.load %arg18[%c0_83, %c0_84] : memref<32x16xbf16, #tpu.memory_space<vmem>>, vector<32x16xbf16>
    %cst_85 = arith.constant dense<0.000000e+00> : vector<2x16xf32>
    %245 = tpu.matmul %243, %244, %cst_85 {dimension_numbers = #tpu.dot_dimension_numbers<[1], [0], [0], [1], [0, 0, 1, 1], [], []>} : vector<2x32xbf16>, vector<32x16xbf16>, vector<2x16xf32> -> vector<2x16xf32>
    %246 = arith.mulf %245, %245 : vector<2x16xf32>
    %cst_86 = arith.constant dense<0.000000e+00> : vector<2xf32>
    %247 = vector.multi_reduction <add>, %246, %cst_86 [1] : vector<2x16xf32> to vector<2xf32>
    %248 = vector.shape_cast %247 : vector<2xf32> to vector<2x1xf32>
    %cst_87 = arith.constant 1.000000e-24 : f32
    %249 = vector.broadcast %cst_87 : f32 to vector<2x1xf32>
    %250 = arith.maximumf %248, %249 : vector<2x1xf32>
    %251 = math.rsqrt %250 : vector<2x1xf32>
    %252 = vector.broadcast %251 : vector<2x1xf32> to vector<2x16xf32>
    %253 = arith.mulf %245, %252 : vector<2x16xf32>
    %c0_88 = arith.constant 0 : index
    %c0_89 = arith.constant 0 : index
    %254 = vector.load %arg20[%c0_88, %c0_89] : memref<2x16xf32, #tpu.memory_space<vmem>>, vector<2x16xf32>
    tpu.vector_store %arg20[%c0_88, %c0_89], %253 {strides = array<i32>} : memref<2x16xf32, #tpu.memory_space<vmem>>, vector<2x16xf32>,
    return
  }
  func.func @transform_0(%arg0: i32) -> (i32, i32, i32) {
    %c0_i32 = arith.constant 0 : i32
    %c0_i32_0 = arith.constant 0 : i32
    %c0_i32_1 = arith.constant 0 : i32
    %c0_i32_2 = arith.constant 0 : i32
    return %c0_i32, %c0_i32_0, %c0_i32_1 : i32, i32, i32
  }
  func.func @transform_1(%arg0: i32) -> (i32, i32) {
    %c0_i32 = arith.constant 0 : i32
    %c0_i32_0 = arith.constant 0 : i32
    %c0_i32_1 = arith.constant 0 : i32
    return %c0_i32, %c0_i32_0 : i32, i32
  }
  func.func @transform_2(%arg0: i32) -> (i32, i32) {
    %c0_i32 = arith.constant 0 : i32
    %c0_i32_0 = arith.constant 0 : i32
    %c0_i32_1 = arith.constant 0 : i32
    return %c0_i32, %c0_i32_0 : i32, i32
  }
  func.func @transform_3(%arg0: i32) -> (i32, i32) {
    %c0_i32 = arith.constant 0 : i32
    %c0_i32_0 = arith.constant 0 : i32
    %c0_i32_1 = arith.constant 0 : i32
    return %c0_i32, %c0_i32_0 : i32, i32
  }
  func.func @transform_4(%arg0: i32) -> (i32, i32) {
    %c0_i32 = arith.constant 0 : i32
    %c0_i32_0 = arith.constant 0 : i32
    %c0_i32_1 = arith.constant 0 : i32
    return %c0_i32, %c0_i32_0 : i32, i32
  }
  func.func @transform_5(%arg0: i32) -> (i32, i32) {
    %c0_i32 = arith.constant 0 : i32
    %c0_i32_0 = arith.constant 0 : i32
    %c0_i32_1 = arith.constant 0 : i32
    return %c0_i32, %c0_i32_0 : i32, i32
  }
  func.func @transform_6(%arg0: i32) -> (i32, i32) {
    %c0_i32 = arith.constant 0 : i32
    %c0_i32_0 = arith.constant 0 : i32
    %c0_i32_1 = arith.constant 0 : i32
    return %c0_i32, %c0_i32_0 : i32, i32
  }
  func.func @transform_7(%arg0: i32) -> (i32, i32) {
    %c0_i32 = arith.constant 0 : i32
    %c0_i32_0 = arith.constant 0 : i32
    %c0_i32_1 = arith.constant 0 : i32
    return %c0_i32, %c0_i32_0 : i32, i32
  }
  func.func @transform_8(%arg0: i32) -> (i32, i32) {
    %c0_i32 = arith.constant 0 : i32
    %c0_i32_0 = arith.constant 0 : i32
    %c0_i32_1 = arith.constant 0 : i32
    return %c0_i32, %c0_i32_0 : i32, i32
  }
  func.func @transform_9(%arg0: i32) -> (i32, i32) {
    %c0_i32 = arith.constant 0 : i32
    %c0_i32_0 = arith.constant 0 : i32
    %c0_i32_1 = arith.constant 0 : i32
    return %c0_i32, %c0_i32_0 : i32, i32
  }
  func.func @transform_10(%arg0: i32) -> (i32, i32) {
    %c0_i32 = arith.constant 0 : i32
    %c0_i32_0 = arith.constant 0 : i32
    %c0_i32_1 = arith.constant 0 : i32
    return %c0_i32, %c0_i32_0 : i32, i32
  }
  func.func @transform_11(%arg0: i32) -> (i32, i32) {
    %c0_i32 = arith.constant 0 : i32
    %c0_i32_0 = arith.constant 0 : i32
    %c0_i32_1 = arith.constant 0 : i32
    return %c0_i32, %c0_i32_0 : i32, i32
  }
  func.func @transform_12(%arg0: i32) -> (i32, i32) {
    %c0_i32 = arith.constant 0 : i32
    %c0_i32_0 = arith.constant 0 : i32
    %c0_i32_1 = arith.constant 0 : i32
    return %c0_i32, %c0_i32_0 : i32, i32
  }
  func.func @transform_13(%arg0: i32) -> (i32, i32) {
    %c0_i32 = arith.constant 0 : i32
    %c0_i32_0 = arith.constant 0 : i32
    %c0_i32_1 = arith.constant 0 : i32
    return %c0_i32, %c0_i32_0 : i32, i32
  }
  func.func @transform_14(%arg0: i32) -> (i32, i32) {
    %c0_i32 = arith.constant 0 : i32
    %c0_i32_0 = arith.constant 0 : i32
    %c0_i32_1 = arith.constant 0 : i32
    return %c0_i32, %c0_i32_0 : i32, i32
  }
  func.func @transform_15(%arg0: i32) -> (i32, i32) {
    %c0_i32 = arith.constant 0 : i32
    %c0_i32_0 = arith.constant 0 : i32
    %c0_i32_1 = arith.constant 0 : i32
    return %c0_i32, %c0_i32_0 : i32, i32
  }
  func.func @transform_16(%arg0: i32) -> (i32, i32) {
    %c0_i32 = arith.constant 0 : i32
    %c0_i32_0 = arith.constant 0 : i32
    %c0_i32_1 = arith.constant 0 : i32
    return %c0_i32, %c0_i32_0 : i32, i32
  }
  func.func @transform_17(%arg0: i32) -> (i32, i32) {
    %c0_i32 = arith.constant 0 : i32
    %c0_i32_0 = arith.constant 0 : i32
    %c0_i32_1 = arith.constant 0 : i32
    return %c0_i32, %c0_i32_0 : i32, i32
  }
  func.func @transform_18(%arg0: i32) -> (i32, i32, i32) {
    %c0_i32 = arith.constant 0 : i32
    %c0_i32_0 = arith.constant 0 : i32
    %c0_i32_1 = arith.constant 0 : i32
    %c0_i32_2 = arith.constant 0 : i32
    return %c0_i32, %c0_i32_0, %c0_i32_1 : i32, i32, i32
  }
  func.func @transform_19(%arg0: i32) -> (i32, i32) {
    %c0_i32 = arith.constant 0 : i32
    %c0_i32_0 = arith.constant 0 : i32
    %c0_i32_1 = arith.constant 0 : i32
    return %c0_i32, %c0_i32_0 : i32, i32
  }
}

module attributes {stable_mosaic.version = 11 : i64} {
  func.func @vision_tower_kernel(%arg0: i32, %arg1: memref<8x192xf32, #tpu.memory_space<vmem>>, %arg2: memref<192x32xbf16, #tpu.memory_space<vmem>>, %arg3: memref<1x32xf32, #tpu.memory_space<vmem>>, %arg4: memref<5x32xf32, #tpu.memory_space<vmem>>, %arg5: memref<1x32xf32, #tpu.memory_space<vmem>>, %arg6: memref<1x32xf32, #tpu.memory_space<vmem>>, %arg7: memref<1x32xf32, #tpu.memory_space<vmem>>, %arg8: memref<1x32xf32, #tpu.memory_space<vmem>>, %arg9: memref<1x32xf32, #tpu.memory_space<vmem>>, %arg10: memref<1x32xf32, #tpu.memory_space<vmem>>, %arg11: memref<32x96xbf16, #tpu.memory_space<vmem>>, %arg12: memref<1x96xf32, #tpu.memory_space<vmem>>, %arg13: memref<32x32xbf16, #tpu.memory_space<vmem>>, %arg14: memref<1x32xf32, #tpu.memory_space<vmem>>, %arg15: memref<32x128xbf16, #tpu.memory_space<vmem>>, %arg16: memref<1x128xf32, #tpu.memory_space<vmem>>, %arg17: memref<128x32xbf16, #tpu.memory_space<vmem>>, %arg18: memref<1x32xf32, #tpu.memory_space<vmem>>, %arg19: memref<1x32xf32, #tpu.memory_space<vmem>>, %arg20: memref<1x32xf32, #tpu.memory_space<vmem>>, %arg21: memref<32x16xbf16, #tpu.memory_space<vmem>>, %arg22: memref<2x16xf32, #tpu.memory_space<vmem>>, %arg23: memref<2x4x32xf32, #tpu.memory_space<vmem>>) attributes {dimension_semantics = [#tpu.dimension_semantics<arbitrary>], iteration_bounds = array<i64: 1>, scalar_prefetch = 0 : i64, scratch_operands = 0 : i64, tpu.core_type = #tpu.core_type<tc>, window_params = [{pipeline_mode = #tpu.pipeline_mode<synchronous>, transform_indices = @transform_0, window_bounds = array<i64: 8, 192>}, {pipeline_mode = #tpu.pipeline_mode<synchronous>, transform_indices = @transform_1, window_bounds = array<i64: 192, 32>}, {pipeline_mode = #tpu.pipeline_mode<synchronous>, transform_indices = @transform_2, window_bounds = array<i64: 1, 32>}, {pipeline_mode = #tpu.pipeline_mode<synchronous>, transform_indices = @transform_3, window_bounds = array<i64: 5, 32>}, {pipeline_mode = #tpu.pipeline_mode<synchronous>, transform_indices = @transform_4, window_bounds = array<i64: 1, 32>}, {pipeline_mode = #tpu.pipeline_mode<synchronous>, transform_indices = @transform_5, window_bounds = array<i64: 1, 32>}, {pipeline_mode = #tpu.pipeline_mode<synchronous>, transform_indices = @transform_6, window_bounds = array<i64: 1, 32>}, {pipeline_mode = #tpu.pipeline_mode<synchronous>, transform_indices = @transform_7, window_bounds = array<i64: 1, 32>}, {pipeline_mode = #tpu.pipeline_mode<synchronous>, transform_indices = @transform_8, window_bounds = array<i64: 1, 32>}, {pipeline_mode = #tpu.pipeline_mode<synchronous>, transform_indices = @transform_9, window_bounds = array<i64: 1, 32>}, {pipeline_mode = #tpu.pipeline_mode<synchronous>, transform_indices = @transform_10, window_bounds = array<i64: 32, 96>}, {pipeline_mode = #tpu.pipeline_mode<synchronous>, transform_indices = @transform_11, window_bounds = array<i64: 1, 96>}, {pipeline_mode = #tpu.pipeline_mode<synchronous>, transform_indices = @transform_12, window_bounds = array<i64: 32, 32>}, {pipeline_mode = #tpu.pipeline_mode<synchronous>, transform_indices = @transform_13, window_bounds = array<i64: 1, 32>}, {pipeline_mode = #tpu.pipeline_mode<synchronous>, transform_indices = @transform_14, window_bounds = array<i64: 32, 128>}, {pipeline_mode = #tpu.pipeline_mode<synchronous>, transform_indices = @transform_15, window_bounds = array<i64: 1, 128>}, {pipeline_mode = #tpu.pipeline_mode<synchronous>, transform_indices = @transform_16, window_bounds = array<i64: 128, 32>}, {pipeline_mode = #tpu.pipeline_mode<synchronous>, transform_indices = @transform_17, window_bounds = array<i64: 1, 32>}, {pipeline_mode = #tpu.pipeline_mode<synchronous>, transform_indices = @transform_18, window_bounds = array<i64: 1, 32>}, {pipeline_mode = #tpu.pipeline_mode<synchronous>, transform_indices = @transform_19, window_bounds = array<i64: 1, 32>}, {pipeline_mode = #tpu.pipeline_mode<synchronous>, transform_indices = @transform_20, window_bounds = array<i64: 32, 16>}, {pipeline_mode = #tpu.pipeline_mode<synchronous>, transform_indices = @transform_21, window_bounds = array<i64: 2, 16>}, {pipeline_mode = #tpu.pipeline_mode<synchronous>, transform_indices = @transform_22, window_bounds = array<i64: 2, 4, 32>}]} {
    %c0 = arith.constant 0 : index
    %c0_0 = arith.constant 0 : index
    %0 = vector.load %arg7[%c0, %c0_0] : memref<1x32xf32, #tpu.memory_space<vmem>>, vector<1x32xf32>
    %c0_1 = arith.constant 0 : index
    %c0_2 = arith.constant 0 : index
    %1 = vector.load %arg8[%c0_1, %c0_2] : memref<1x32xf32, #tpu.memory_space<vmem>>, vector<1x32xf32>
    %c0_3 = arith.constant 0 : index
    %c0_4 = arith.constant 0 : index
    %2 = vector.load %arg9[%c0_3, %c0_4] : memref<1x32xf32, #tpu.memory_space<vmem>>, vector<1x32xf32>
    %c0_5 = arith.constant 0 : index
    %c0_6 = arith.constant 0 : index
    %3 = vector.load %arg10[%c0_5, %c0_6] : memref<1x32xf32, #tpu.memory_space<vmem>>, vector<1x32xf32>
    %c0_7 = arith.constant 0 : index
    %c0_8 = arith.constant 0 : index
    %4 = vector.load %arg11[%c0_7, %c0_8] : memref<32x96xbf16, #tpu.memory_space<vmem>>, vector<32x96xbf16>
    %c0_9 = arith.constant 0 : index
    %c0_10 = arith.constant 0 : index
    %5 = vector.load %arg12[%c0_9, %c0_10] : memref<1x96xf32, #tpu.memory_space<vmem>>, vector<1x96xf32>
    %c0_11 = arith.constant 0 : index
    %c0_12 = arith.constant 0 : index
    %6 = vector.load %arg13[%c0_11, %c0_12] : memref<32x32xbf16, #tpu.memory_space<vmem>>, vector<32x32xbf16>
    %c0_13 = arith.constant 0 : index
    %c0_14 = arith.constant 0 : index
    %7 = vector.load %arg14[%c0_13, %c0_14] : memref<1x32xf32, #tpu.memory_space<vmem>>, vector<1x32xf32>
    %c0_15 = arith.constant 0 : index
    %c0_16 = arith.constant 0 : index
    %8 = vector.load %arg15[%c0_15, %c0_16] : memref<32x128xbf16, #tpu.memory_space<vmem>>, vector<32x128xbf16>
    %c0_17 = arith.constant 0 : index
    %c0_18 = arith.constant 0 : index
    %9 = vector.load %arg16[%c0_17, %c0_18] : memref<1x128xf32, #tpu.memory_space<vmem>>, vector<1x128xf32>
    %c0_19 = arith.constant 0 : index
    %c0_20 = arith.constant 0 : index
    %10 = vector.load %arg17[%c0_19, %c0_20] : memref<128x32xbf16, #tpu.memory_space<vmem>>, vector<128x32xbf16>
    %c0_21 = arith.constant 0 : index
    %c0_22 = arith.constant 0 : index
    %11 = vector.load %arg18[%c0_21, %c0_22] : memref<1x32xf32, #tpu.memory_space<vmem>>, vector<1x32xf32>
    %c0_23 = arith.constant 0 : index
    %c0_24 = arith.constant 0 : index
    %12 = vector.load %arg4[%c0_23, %c0_24] : memref<5x32xf32, #tpu.memory_space<vmem>>, vector<5x32xf32>
    %c0_25 = arith.constant 0 : index
    %c0_26 = arith.constant 0 : index
    %13 = vector.load %arg1[%c0_25, %c0_26] : memref<8x192xf32, #tpu.memory_space<vmem>>, vector<8x192xf32>
    %14 = arith.truncf %13 : vector<8x192xf32> to vector<8x192xbf16>
    %c0_27 = arith.constant 0 : index
    %c0_28 = arith.constant 0 : index
    %15 = vector.load %arg2[%c0_27, %c0_28] : memref<192x32xbf16, #tpu.memory_space<vmem>>, vector<192x32xbf16>
    %cst = arith.constant dense<0.000000e+00> : vector<8x32xf32>
    %16 = tpu.matmul %14, %15, %cst {dimension_numbers = #tpu.dot_dimension_numbers<[1], [0], [0], [1], [0, 0, 1, 1], [], []>} : vector<8x192xbf16>, vector<192x32xbf16>, vector<8x32xf32> -> vector<8x32xf32>
    %c0_29 = arith.constant 0 : index
    %c0_30 = arith.constant 0 : index
    %17 = vector.load %arg3[%c0_29, %c0_30] : memref<1x32xf32, #tpu.memory_space<vmem>>, vector<1x32xf32>
    %18 = vector.extract_strided_slice %12 {offsets = [0, 0], sizes = [1, 32], strides = [1, 1]} : vector<5x32xf32> to vector<1x32xf32>
    %19 = arith.addf %17, %18 : vector<1x32xf32>
    %20 = vector.extract_strided_slice %16 {offsets = [0, 0], sizes = [4, 32], strides = [1, 1]} : vector<8x32xf32> to vector<4x32xf32>
    %21 = vector.extract_strided_slice %12 {offsets = [1, 0], sizes = [4, 32], strides = [1, 1]} : vector<5x32xf32> to vector<4x32xf32>
    %22 = arith.addf %20, %21 : vector<4x32xf32>
    %cst_31 = arith.constant 0.000000e+00 : f32
    %23 = vector.broadcast %cst_31 : f32 to vector<3x32xf32>
    %24 = tpu.concatenate %19, %22, %23 in 0 : vector<1x32xf32>, vector<4x32xf32>, vector<3x32xf32> -> vector<8x32xf32>
    %25 = vector.extract_strided_slice %16 {offsets = [4, 0], sizes = [4, 32], strides = [1, 1]} : vector<8x32xf32> to vector<4x32xf32>
    %26 = vector.extract_strided_slice %12 {offsets = [1, 0], sizes = [4, 32], strides = [1, 1]} : vector<5x32xf32> to vector<4x32xf32>
    %27 = arith.addf %25, %26 : vector<4x32xf32>
    %cst_32 = arith.constant 0.000000e+00 : f32
    %28 = vector.broadcast %cst_32 : f32 to vector<3x32xf32>
    %29 = tpu.concatenate %19, %27, %28 in 0 : vector<1x32xf32>, vector<4x32xf32>, vector<3x32xf32> -> vector<8x32xf32>
    %30 = vector.shape_cast %24 : vector<8x32xf32> to vector<1x8x32xf32>
    %31 = vector.shape_cast %29 : vector<8x32xf32> to vector<1x8x32xf32>
    %32 = tpu.concatenate %30, %31 in 0 : vector<1x8x32xf32>, vector<1x8x32xf32> -> vector<2x8x32xf32>
    %c0_33 = arith.constant 0 : index
    %c0_34 = arith.constant 0 : index
    %33 = vector.load %arg5[%c0_33, %c0_34] : memref<1x32xf32, #tpu.memory_space<vmem>>, vector<1x32xf32>
    %c0_35 = arith.constant 0 : index
    %c0_36 = arith.constant 0 : index
    %34 = vector.load %arg6[%c0_35, %c0_36] : memref<1x32xf32, #tpu.memory_space<vmem>>, vector<1x32xf32>
    %cst_37 = arith.constant dense<0.000000e+00> : vector<2x8xf32>
    %35 = vector.multi_reduction <add>, %32, %cst_37 [2] : vector<2x8x32xf32> to vector<2x8xf32>
    %36 = vector.shape_cast %35 : vector<2x8xf32> to vector<2x8x1xf32>
    %cst_38 = arith.constant 3.200000e+01 : f32
    %37 = vector.broadcast %cst_38 : f32 to vector<2x8x1xf32>
    %38 = arith.divf %36, %37 : vector<2x8x1xf32>
    %39 = vector.broadcast %38 : vector<2x8x1xf32> to vector<2x8x32xf32>
    %40 = arith.subf %32, %39 : vector<2x8x32xf32>
    %41 = arith.mulf %40, %40 : vector<2x8x32xf32>
    %cst_39 = arith.constant dense<0.000000e+00> : vector<2x8xf32>
    %42 = vector.multi_reduction <add>, %41, %cst_39 [2] : vector<2x8x32xf32> to vector<2x8xf32>
    %43 = vector.shape_cast %42 : vector<2x8xf32> to vector<2x8x1xf32>
    %cst_40 = arith.constant 3.200000e+01 : f32
    %44 = vector.broadcast %cst_40 : f32 to vector<2x8x1xf32>
    %45 = arith.divf %43, %44 : vector<2x8x1xf32>
    %cst_41 = arith.constant 9.99999974E-6 : f32
    %46 = vector.broadcast %cst_41 : f32 to vector<2x8x1xf32>
    %47 = arith.addf %45, %46 : vector<2x8x1xf32>
    %48 = math.rsqrt %47 : vector<2x8x1xf32>
    %49 = vector.broadcast %48 : vector<2x8x1xf32> to vector<2x8x32xf32>
    %50 = arith.mulf %40, %49 : vector<2x8x32xf32>
    %51 = vector.shape_cast %33 : vector<1x32xf32> to vector<1x1x32xf32>
    %52 = vector.broadcast %51 : vector<1x1x32xf32> to vector<2x8x32xf32>
    %53 = arith.mulf %50, %52 : vector<2x8x32xf32>
    %54 = vector.shape_cast %34 : vector<1x32xf32> to vector<1x1x32xf32>
    %55 = vector.broadcast %54 : vector<1x1x32xf32> to vector<2x8x32xf32>
    %56 = arith.addf %53, %55 : vector<2x8x32xf32>
    %57 = tpu.iota {dimensions = array<i32: 1>} : vector<1x8xi32>
    %c5_i32 = arith.constant 5 : i32
    %58 = vector.broadcast %c5_i32 : i32 to vector<1x8xi32>
    %59 = arith.cmpi sge, %57, %58 : vector<1x8xi32>
    %cst_42 = arith.constant -1.000000e+30 : f32
    %cst_43 = arith.constant 0.000000e+00 : f32
    %60 = vector.broadcast %cst_42 : f32 to vector<1x8xf32>
    %61 = vector.broadcast %cst_43 : f32 to vector<1x8xf32>
    %62 = arith.select %59, %60, %61 : vector<1x8xi1>, vector<1x8xf32>
    %cst_44 = arith.constant dense<0.000000e+00> : vector<2x8xf32>
    %63 = vector.multi_reduction <add>, %56, %cst_44 [2] : vector<2x8x32xf32> to vector<2x8xf32>
    %64 = vector.shape_cast %63 : vector<2x8xf32> to vector<2x8x1xf32>
    %cst_45 = arith.constant 3.200000e+01 : f32
    %65 = vector.broadcast %cst_45 : f32 to vector<2x8x1xf32>
    %66 = arith.divf %64, %65 : vector<2x8x1xf32>
    %67 = vector.broadcast %66 : vector<2x8x1xf32> to vector<2x8x32xf32>
    %68 = arith.subf %56, %67 : vector<2x8x32xf32>
    %69 = arith.mulf %68, %68 : vector<2x8x32xf32>
    %cst_46 = arith.constant dense<0.000000e+00> : vector<2x8xf32>
    %70 = vector.multi_reduction <add>, %69, %cst_46 [2] : vector<2x8x32xf32> to vector<2x8xf32>
    %71 = vector.shape_cast %70 : vector<2x8xf32> to vector<2x8x1xf32>
    %cst_47 = arith.constant 3.200000e+01 : f32
    %72 = vector.broadcast %cst_47 : f32 to vector<2x8x1xf32>
    %73 = arith.divf %71, %72 : vector<2x8x1xf32>
    %cst_48 = arith.constant 9.99999974E-6 : f32
    %74 = vector.broadcast %cst_48 : f32 to vector<2x8x1xf32>
    %75 = arith.addf %73, %74 : vector<2x8x1xf32>
    %76 = math.rsqrt %75 : vector<2x8x1xf32>
    %77 = vector.broadcast %76 : vector<2x8x1xf32> to vector<2x8x32xf32>
    %78 = arith.mulf %68, %77 : vector<2x8x32xf32>
    %79 = vector.shape_cast %0 : vector<1x32xf32> to vector<1x1x32xf32>
    %80 = vector.broadcast %79 : vector<1x1x32xf32> to vector<2x8x32xf32>
    %81 = arith.mulf %78, %80 : vector<2x8x32xf32>
    %82 = vector.shape_cast %1 : vector<1x32xf32> to vector<1x1x32xf32>
    %83 = vector.broadcast %82 : vector<1x1x32xf32> to vector<2x8x32xf32>
    %84 = arith.addf %81, %83 : vector<2x8x32xf32>
    %85 = vector.shape_cast %84 : vector<2x8x32xf32> to vector<16x32xf32>
    %86 = arith.truncf %85 : vector<16x32xf32> to vector<16x32xbf16>
    %cst_49 = arith.constant dense<0.000000e+00> : vector<16x96xf32>
    %87 = tpu.matmul %86, %4, %cst_49 {dimension_numbers = #tpu.dot_dimension_numbers<[1], [0], [0], [1], [0, 0, 1, 1], [], []>} : vector<16x32xbf16>, vector<32x96xbf16>, vector<16x96xf32> -> vector<16x96xf32>
    %88 = vector.broadcast %5 : vector<1x96xf32> to vector<16x96xf32>
    %89 = arith.addf %87, %88 : vector<16x96xf32>
    %90 = vector.shape_cast %89 : vector<16x96xf32> to vector<2x8x96xf32>
    %91 = vector.extract_strided_slice %90 {offsets = [0, 0, 0], sizes = [1, 8, 96], strides = [1, 1, 1]} : vector<2x8x96xf32> to vector<1x8x96xf32>
    %92 = vector.shape_cast %91 : vector<1x8x96xf32> to vector<8x96xf32>
    %93 = vector.extract_strided_slice %92 {offsets = [0, 0], sizes = [8, 16], strides = [1, 1]} : vector<8x96xf32> to vector<8x16xf32>
    %94 = arith.truncf %93 : vector<8x16xf32> to vector<8x16xbf16>
    %95 = vector.extract_strided_slice %92 {offsets = [0, 32], sizes = [8, 16], strides = [1, 1]} : vector<8x96xf32> to vector<8x16xf32>
    %96 = arith.truncf %95 : vector<8x16xf32> to vector<8x16xbf16>
    %97 = vector.extract_strided_slice %92 {offsets = [0, 64], sizes = [8, 16], strides = [1, 1]} : vector<8x96xf32> to vector<8x16xf32>
    %98 = arith.truncf %97 : vector<8x16xf32> to vector<8x16xbf16>
    %cst_50 = arith.constant dense<0.000000e+00> : vector<8x8xf32>
    %99 = tpu.matmul %94, %96, %cst_50 {dimension_numbers = #tpu.dot_dimension_numbers<[1], [1], [0], [0], [0, 0, 1, 0], [], []>} : vector<8x16xbf16>, vector<8x16xbf16>, vector<8x8xf32> -> vector<8x8xf32>
    %cst_51 = arith.constant 2.500000e-01 : f32
    %100 = vector.broadcast %cst_51 : f32 to vector<8x8xf32>
    %101 = arith.mulf %99, %100 : vector<8x8xf32>
    %102 = vector.broadcast %62 : vector<1x8xf32> to vector<8x8xf32>
    %103 = arith.addf %101, %102 : vector<8x8xf32>
    %cst_52 = arith.constant dense<0xFF800000> : vector<8xf32>
    %104 = vector.multi_reduction <maximumf>, %103, %cst_52 [1] : vector<8x8xf32> to vector<8xf32>
    %105 = vector.shape_cast %104 : vector<8xf32> to vector<8x1xf32>
    %106 = vector.broadcast %105 : vector<8x1xf32> to vector<8x8xf32>
    %107 = arith.subf %103, %106 : vector<8x8xf32>
    %108 = math.exp %107 : vector<8x8xf32>
    %cst_53 = arith.constant dense<0.000000e+00> : vector<8xf32>
    %109 = vector.multi_reduction <add>, %108, %cst_53 [1] : vector<8x8xf32> to vector<8xf32>
    %110 = vector.shape_cast %109 : vector<8xf32> to vector<8x1xf32>
    %111 = tpu.reciprocal %110 {approx = true} : vector<8x1xf32> -> vector<8x1xf32>
    %112 = vector.broadcast %111 : vector<8x1xf32> to vector<8x8xf32>
    %113 = arith.mulf %108, %112 : vector<8x8xf32>
    %114 = arith.truncf %113 : vector<8x8xf32> to vector<8x8xbf16>
    %cst_54 = arith.constant dense<0.000000e+00> : vector<8x16xf32>
    %115 = tpu.matmul %114, %98, %cst_54 {dimension_numbers = #tpu.dot_dimension_numbers<[1], [0], [0], [1], [0, 0, 1, 1], [], []>} : vector<8x8xbf16>, vector<8x16xbf16>, vector<8x16xf32> -> vector<8x16xf32>
    %116 = vector.extract_strided_slice %92 {offsets = [0, 16], sizes = [8, 16], strides = [1, 1]} : vector<8x96xf32> to vector<8x16xf32>
    %117 = arith.truncf %116 : vector<8x16xf32> to vector<8x16xbf16>
    %118 = vector.extract_strided_slice %92 {offsets = [0, 48], sizes = [8, 16], strides = [1, 1]} : vector<8x96xf32> to vector<8x16xf32>
    %119 = arith.truncf %118 : vector<8x16xf32> to vector<8x16xbf16>
    %120 = vector.extract_strided_slice %92 {offsets = [0, 80], sizes = [8, 16], strides = [1, 1]} : vector<8x96xf32> to vector<8x16xf32>
    %121 = arith.truncf %120 : vector<8x16xf32> to vector<8x16xbf16>
    %cst_55 = arith.constant dense<0.000000e+00> : vector<8x8xf32>
    %122 = tpu.matmul %117, %119, %cst_55 {dimension_numbers = #tpu.dot_dimension_numbers<[1], [1], [0], [0], [0, 0, 1, 0], [], []>} : vector<8x16xbf16>, vector<8x16xbf16>, vector<8x8xf32> -> vector<8x8xf32>
    %cst_56 = arith.constant 2.500000e-01 : f32
    %123 = vector.broadcast %cst_56 : f32 to vector<8x8xf32>
    %124 = arith.mulf %122, %123 : vector<8x8xf32>
    %125 = vector.broadcast %62 : vector<1x8xf32> to vector<8x8xf32>
    %126 = arith.addf %124, %125 : vector<8x8xf32>
    %cst_57 = arith.constant dense<0xFF800000> : vector<8xf32>
    %127 = vector.multi_reduction <maximumf>, %126, %cst_57 [1] : vector<8x8xf32> to vector<8xf32>
    %128 = vector.shape_cast %127 : vector<8xf32> to vector<8x1xf32>
    %129 = vector.broadcast %128 : vector<8x1xf32> to vector<8x8xf32>
    %130 = arith.subf %126, %129 : vector<8x8xf32>
    %131 = math.exp %130 : vector<8x8xf32>
    %cst_58 = arith.constant dense<0.000000e+00> : vector<8xf32>
    %132 = vector.multi_reduction <add>, %131, %cst_58 [1] : vector<8x8xf32> to vector<8xf32>
    %133 = vector.shape_cast %132 : vector<8xf32> to vector<8x1xf32>
    %134 = tpu.reciprocal %133 {approx = true} : vector<8x1xf32> -> vector<8x1xf32>
    %135 = vector.broadcast %134 : vector<8x1xf32> to vector<8x8xf32>
    %136 = arith.mulf %131, %135 : vector<8x8xf32>
    %137 = arith.truncf %136 : vector<8x8xf32> to vector<8x8xbf16>
    %cst_59 = arith.constant dense<0.000000e+00> : vector<8x16xf32>
    %138 = tpu.matmul %137, %121, %cst_59 {dimension_numbers = #tpu.dot_dimension_numbers<[1], [0], [0], [1], [0, 0, 1, 1], [], []>} : vector<8x8xbf16>, vector<8x16xbf16>, vector<8x16xf32> -> vector<8x16xf32>
    %139 = tpu.concatenate %115, %138 in 1 : vector<8x16xf32>, vector<8x16xf32> -> vector<8x32xf32>
    %140 = vector.extract_strided_slice %90 {offsets = [1, 0, 0], sizes = [1, 8, 96], strides = [1, 1, 1]} : vector<2x8x96xf32> to vector<1x8x96xf32>
    %141 = vector.shape_cast %140 : vector<1x8x96xf32> to vector<8x96xf32>
    %142 = vector.extract_strided_slice %141 {offsets = [0, 0], sizes = [8, 16], strides = [1, 1]} : vector<8x96xf32> to vector<8x16xf32>
    %143 = arith.truncf %142 : vector<8x16xf32> to vector<8x16xbf16>
    %144 = vector.extract_strided_slice %141 {offsets = [0, 32], sizes = [8, 16], strides = [1, 1]} : vector<8x96xf32> to vector<8x16xf32>
    %145 = arith.truncf %144 : vector<8x16xf32> to vector<8x16xbf16>
    %146 = vector.extract_strided_slice %141 {offsets = [0, 64], sizes = [8, 16], strides = [1, 1]} : vector<8x96xf32> to vector<8x16xf32>
    %147 = arith.truncf %146 : vector<8x16xf32> to vector<8x16xbf16>
    %cst_60 = arith.constant dense<0.000000e+00> : vector<8x8xf32>
    %148 = tpu.matmul %143, %145, %cst_60 {dimension_numbers = #tpu.dot_dimension_numbers<[1], [1], [0], [0], [0, 0, 1, 0], [], []>} : vector<8x16xbf16>, vector<8x16xbf16>, vector<8x8xf32> -> vector<8x8xf32>
    %cst_61 = arith.constant 2.500000e-01 : f32
    %149 = vector.broadcast %cst_61 : f32 to vector<8x8xf32>
    %150 = arith.mulf %148, %149 : vector<8x8xf32>
    %151 = vector.broadcast %62 : vector<1x8xf32> to vector<8x8xf32>
    %152 = arith.addf %150, %151 : vector<8x8xf32>
    %cst_62 = arith.constant dense<0xFF800000> : vector<8xf32>
    %153 = vector.multi_reduction <maximumf>, %152, %cst_62 [1] : vector<8x8xf32> to vector<8xf32>
    %154 = vector.shape_cast %153 : vector<8xf32> to vector<8x1xf32>
    %155 = vector.broadcast %154 : vector<8x1xf32> to vector<8x8xf32>
    %156 = arith.subf %152, %155 : vector<8x8xf32>
    %157 = math.exp %156 : vector<8x8xf32>
    %cst_63 = arith.constant dense<0.000000e+00> : vector<8xf32>
    %158 = vector.multi_reduction <add>, %157, %cst_63 [1] : vector<8x8xf32> to vector<8xf32>
    %159 = vector.shape_cast %158 : vector<8xf32> to vector<8x1xf32>
    %160 = tpu.reciprocal %159 {approx = true} : vector<8x1xf32> -> vector<8x1xf32>
    %161 = vector.broadcast %160 : vector<8x1xf32> to vector<8x8xf32>
    %162 = arith.mulf %157, %161 : vector<8x8xf32>
    %163 = arith.truncf %162 : vector<8x8xf32> to vector<8x8xbf16>
    %cst_64 = arith.constant dense<0.000000e+00> : vector<8x16xf32>
    %164 = tpu.matmul %163, %147, %cst_64 {dimension_numbers = #tpu.dot_dimension_numbers<[1], [0], [0], [1], [0, 0, 1, 1], [], []>} : vector<8x8xbf16>, vector<8x16xbf16>, vector<8x16xf32> -> vector<8x16xf32>
    %165 = vector.extract_strided_slice %141 {offsets = [0, 16], sizes = [8, 16], strides = [1, 1]} : vector<8x96xf32> to vector<8x16xf32>
    %166 = arith.truncf %165 : vector<8x16xf32> to vector<8x16xbf16>
    %167 = vector.extract_strided_slice %141 {offsets = [0, 48], sizes = [8, 16], strides = [1, 1]} : vector<8x96xf32> to vector<8x16xf32>
    %168 = arith.truncf %167 : vector<8x16xf32> to vector<8x16xbf16>
    %169 = vector.extract_strided_slice %141 {offsets = [0, 80], sizes = [8, 16], strides = [1, 1]} : vector<8x96xf32> to vector<8x16xf32>
    %170 = arith.truncf %169 : vector<8x16xf32> to vector<8x16xbf16>
    %cst_65 = arith.constant dense<0.000000e+00> : vector<8x8xf32>
    %171 = tpu.matmul %166, %168, %cst_65 {dimension_numbers = #tpu.dot_dimension_numbers<[1], [1], [0], [0], [0, 0, 1, 0], [], []>} : vector<8x16xbf16>, vector<8x16xbf16>, vector<8x8xf32> -> vector<8x8xf32>
    %cst_66 = arith.constant 2.500000e-01 : f32
    %172 = vector.broadcast %cst_66 : f32 to vector<8x8xf32>
    %173 = arith.mulf %171, %172 : vector<8x8xf32>
    %174 = vector.broadcast %62 : vector<1x8xf32> to vector<8x8xf32>
    %175 = arith.addf %173, %174 : vector<8x8xf32>
    %cst_67 = arith.constant dense<0xFF800000> : vector<8xf32>
    %176 = vector.multi_reduction <maximumf>, %175, %cst_67 [1] : vector<8x8xf32> to vector<8xf32>
    %177 = vector.shape_cast %176 : vector<8xf32> to vector<8x1xf32>
    %178 = vector.broadcast %177 : vector<8x1xf32> to vector<8x8xf32>
    %179 = arith.subf %175, %178 : vector<8x8xf32>
    %180 = math.exp %179 : vector<8x8xf32>
    %cst_68 = arith.constant dense<0.000000e+00> : vector<8xf32>
    %181 = vector.multi_reduction <add>, %180, %cst_68 [1] : vector<8x8xf32> to vector<8xf32>
    %182 = vector.shape_cast %181 : vector<8xf32> to vector<8x1xf32>
    %183 = tpu.reciprocal %182 {approx = true} : vector<8x1xf32> -> vector<8x1xf32>
    %184 = vector.broadcast %183 : vector<8x1xf32> to vector<8x8xf32>
    %185 = arith.mulf %180, %184 : vector<8x8xf32>
    %186 = arith.truncf %185 : vector<8x8xf32> to vector<8x8xbf16>
    %cst_69 = arith.constant dense<0.000000e+00> : vector<8x16xf32>
    %187 = tpu.matmul %186, %170, %cst_69 {dimension_numbers = #tpu.dot_dimension_numbers<[1], [0], [0], [1], [0, 0, 1, 1], [], []>} : vector<8x8xbf16>, vector<8x16xbf16>, vector<8x16xf32> -> vector<8x16xf32>
    %188 = tpu.concatenate %164, %187 in 1 : vector<8x16xf32>, vector<8x16xf32> -> vector<8x32xf32>
    %189 = vector.shape_cast %139 : vector<8x32xf32> to vector<1x8x32xf32>
    %190 = vector.shape_cast %188 : vector<8x32xf32> to vector<1x8x32xf32>
    %191 = tpu.concatenate %189, %190 in 0 : vector<1x8x32xf32>, vector<1x8x32xf32> -> vector<2x8x32xf32>
    %192 = vector.shape_cast %191 : vector<2x8x32xf32> to vector<16x32xf32>
    %193 = arith.truncf %192 : vector<16x32xf32> to vector<16x32xbf16>
    %cst_70 = arith.constant dense<0.000000e+00> : vector<16x32xf32>
    %194 = tpu.matmul %193, %6, %cst_70 {dimension_numbers = #tpu.dot_dimension_numbers<[1], [0], [0], [1], [0, 0, 1, 1], [], []>} : vector<16x32xbf16>, vector<32x32xbf16>, vector<16x32xf32> -> vector<16x32xf32>
    %195 = vector.broadcast %7 : vector<1x32xf32> to vector<16x32xf32>
    %196 = arith.addf %194, %195 : vector<16x32xf32>
    %197 = vector.shape_cast %196 : vector<16x32xf32> to vector<2x8x32xf32>
    %198 = arith.addf %56, %197 : vector<2x8x32xf32>
    %cst_71 = arith.constant dense<0.000000e+00> : vector<2x8xf32>
    %199 = vector.multi_reduction <add>, %198, %cst_71 [2] : vector<2x8x32xf32> to vector<2x8xf32>
    %200 = vector.shape_cast %199 : vector<2x8xf32> to vector<2x8x1xf32>
    %cst_72 = arith.constant 3.200000e+01 : f32
    %201 = vector.broadcast %cst_72 : f32 to vector<2x8x1xf32>
    %202 = arith.divf %200, %201 : vector<2x8x1xf32>
    %203 = vector.broadcast %202 : vector<2x8x1xf32> to vector<2x8x32xf32>
    %204 = arith.subf %198, %203 : vector<2x8x32xf32>
    %205 = arith.mulf %204, %204 : vector<2x8x32xf32>
    %cst_73 = arith.constant dense<0.000000e+00> : vector<2x8xf32>
    %206 = vector.multi_reduction <add>, %205, %cst_73 [2] : vector<2x8x32xf32> to vector<2x8xf32>
    %207 = vector.shape_cast %206 : vector<2x8xf32> to vector<2x8x1xf32>
    %cst_74 = arith.constant 3.200000e+01 : f32
    %208 = vector.broadcast %cst_74 : f32 to vector<2x8x1xf32>
    %209 = arith.divf %207, %208 : vector<2x8x1xf32>
    %cst_75 = arith.constant 9.99999974E-6 : f32
    %210 = vector.broadcast %cst_75 : f32 to vector<2x8x1xf32>
    %211 = arith.addf %209, %210 : vector<2x8x1xf32>
    %212 = math.rsqrt %211 : vector<2x8x1xf32>
    %213 = vector.broadcast %212 : vector<2x8x1xf32> to vector<2x8x32xf32>
    %214 = arith.mulf %204, %213 : vector<2x8x32xf32>
    %215 = vector.shape_cast %2 : vector<1x32xf32> to vector<1x1x32xf32>
    %216 = vector.broadcast %215 : vector<1x1x32xf32> to vector<2x8x32xf32>
    %217 = arith.mulf %214, %216 : vector<2x8x32xf32>
    %218 = vector.shape_cast %3 : vector<1x32xf32> to vector<1x1x32xf32>
    %219 = vector.broadcast %218 : vector<1x1x32xf32> to vector<2x8x32xf32>
    %220 = arith.addf %217, %219 : vector<2x8x32xf32>
    %221 = vector.shape_cast %220 : vector<2x8x32xf32> to vector<16x32xf32>
    %222 = arith.truncf %221 : vector<16x32xf32> to vector<16x32xbf16>
    %cst_76 = arith.constant dense<0.000000e+00> : vector<16x128xf32>
    %223 = tpu.matmul %222, %8, %cst_76 {dimension_numbers = #tpu.dot_dimension_numbers<[1], [0], [0], [1], [0, 0, 1, 1], [], []>} : vector<16x32xbf16>, vector<32x128xbf16>, vector<16x128xf32> -> vector<16x128xf32>
    %224 = vector.broadcast %9 : vector<1x128xf32> to vector<16x128xf32>
    %225 = arith.addf %223, %224 : vector<16x128xf32>
    %226 = vector.shape_cast %225 : vector<16x128xf32> to vector<2x8x128xf32>
    %cst_77 = arith.constant 1.702000e+00 : f32
    %227 = vector.broadcast %cst_77 : f32 to vector<2x8x128xf32>
    %228 = arith.mulf %227, %226 : vector<2x8x128xf32>
    %229 = arith.negf %228 : vector<2x8x128xf32>
    %230 = math.exp %229 : vector<2x8x128xf32>
    %cst_78 = arith.constant 1.000000e+00 : f32
    %231 = vector.broadcast %cst_78 : f32 to vector<2x8x128xf32>
    %232 = arith.addf %231, %230 : vector<2x8x128xf32>
    %233 = arith.divf %231, %232 : vector<2x8x128xf32>
    %234 = arith.mulf %226, %233 : vector<2x8x128xf32>
    %235 = vector.shape_cast %234 : vector<2x8x128xf32> to vector<16x128xf32>
    %236 = arith.truncf %235 : vector<16x128xf32> to vector<16x128xbf16>
    %cst_79 = arith.constant dense<0.000000e+00> : vector<16x32xf32>
    %237 = tpu.matmul %236, %10, %cst_79 {dimension_numbers = #tpu.dot_dimension_numbers<[1], [0], [0], [1], [0, 0, 1, 1], [], []>} : vector<16x128xbf16>, vector<128x32xbf16>, vector<16x32xf32> -> vector<16x32xf32>
    %238 = vector.broadcast %11 : vector<1x32xf32> to vector<16x32xf32>
    %239 = arith.addf %237, %238 : vector<16x32xf32>
    %240 = vector.shape_cast %239 : vector<16x32xf32> to vector<2x8x32xf32>
    %241 = arith.addf %198, %240 : vector<2x8x32xf32>
    %242 = vector.extract_strided_slice %241 {offsets = [0, 0, 0], sizes = [2, 1, 32], strides = [1, 1, 1]} : vector<2x8x32xf32> to vector<2x1x32xf32>
    %243 = vector.shape_cast %242 : vector<2x1x32xf32> to vector<2x32xf32>
    %c0_80 = arith.constant 0 : index
    %c0_81 = arith.constant 0 : index
    %244 = vector.load %arg19[%c0_80, %c0_81] : memref<1x32xf32, #tpu.memory_space<vmem>>, vector<1x32xf32>
    %c0_82 = arith.constant 0 : index
    %c0_83 = arith.constant 0 : index
    %245 = vector.load %arg20[%c0_82, %c0_83] : memref<1x32xf32, #tpu.memory_space<vmem>>, vector<1x32xf32>
    %cst_84 = arith.constant dense<0.000000e+00> : vector<2xf32>
    %246 = vector.multi_reduction <add>, %243, %cst_84 [1] : vector<2x32xf32> to vector<2xf32>
    %247 = vector.shape_cast %246 : vector<2xf32> to vector<2x1xf32>
    %cst_85 = arith.constant 3.200000e+01 : f32
    %248 = vector.broadcast %cst_85 : f32 to vector<2x1xf32>
    %249 = arith.divf %247, %248 : vector<2x1xf32>
    %250 = vector.broadcast %249 : vector<2x1xf32> to vector<2x32xf32>
    %251 = arith.subf %243, %250 : vector<2x32xf32>
    %252 = arith.mulf %251, %251 : vector<2x32xf32>
    %cst_86 = arith.constant dense<0.000000e+00> : vector<2xf32>
    %253 = vector.multi_reduction <add>, %252, %cst_86 [1] : vector<2x32xf32> to vector<2xf32>
    %254 = vector.shape_cast %253 : vector<2xf32> to vector<2x1xf32>
    %cst_87 = arith.constant 3.200000e+01 : f32
    %255 = vector.broadcast %cst_87 : f32 to vector<2x1xf32>
    %256 = arith.divf %254, %255 : vector<2x1xf32>
    %cst_88 = arith.constant 9.99999974E-6 : f32
    %257 = vector.broadcast %cst_88 : f32 to vector<2x1xf32>
    %258 = arith.addf %256, %257 : vector<2x1xf32>
    %259 = math.rsqrt %258 : vector<2x1xf32>
    %260 = vector.broadcast %259 : vector<2x1xf32> to vector<2x32xf32>
    %261 = arith.mulf %251, %260 : vector<2x32xf32>
    %262 = vector.broadcast %244 : vector<1x32xf32> to vector<2x32xf32>
    %263 = arith.mulf %261, %262 : vector<2x32xf32>
    %264 = vector.broadcast %245 : vector<1x32xf32> to vector<2x32xf32>
    %265 = arith.addf %263, %264 : vector<2x32xf32>
    %266 = arith.truncf %265 : vector<2x32xf32> to vector<2x32xbf16>
    %c0_89 = arith.constant 0 : index
    %c0_90 = arith.constant 0 : index
    %267 = vector.load %arg21[%c0_89, %c0_90] : memref<32x16xbf16, #tpu.memory_space<vmem>>, vector<32x16xbf16>
    %cst_91 = arith.constant dense<0.000000e+00> : vector<2x16xf32>
    %268 = tpu.matmul %266, %267, %cst_91 {dimension_numbers = #tpu.dot_dimension_numbers<[1], [0], [0], [1], [0, 0, 1, 1], [], []>} : vector<2x32xbf16>, vector<32x16xbf16>, vector<2x16xf32> -> vector<2x16xf32>
    %269 = arith.mulf %268, %268 : vector<2x16xf32>
    %cst_92 = arith.constant dense<0.000000e+00> : vector<2xf32>
    %270 = vector.multi_reduction <add>, %269, %cst_92 [1] : vector<2x16xf32> to vector<2xf32>
    %271 = vector.shape_cast %270 : vector<2xf32> to vector<2x1xf32>
    %cst_93 = arith.constant 1.000000e-24 : f32
    %272 = vector.broadcast %cst_93 : f32 to vector<2x1xf32>
    %273 = arith.maximumf %271, %272 : vector<2x1xf32>
    %274 = math.rsqrt %273 : vector<2x1xf32>
    %275 = vector.broadcast %274 : vector<2x1xf32> to vector<2x16xf32>
    %276 = arith.mulf %268, %275 : vector<2x16xf32>
    %c0_94 = arith.constant 0 : index
    %c0_95 = arith.constant 0 : index
    %277 = vector.load %arg22[%c0_94, %c0_95] : memref<2x16xf32, #tpu.memory_space<vmem>>, vector<2x16xf32>
    tpu.vector_store %arg22[%c0_94, %c0_95], %276 {strides = array<i32>} : memref<2x16xf32, #tpu.memory_space<vmem>>, vector<2x16xf32>,
    %278 = vector.extract_strided_slice %241 {offsets = [0, 1, 0], sizes = [2, 4, 32], strides = [1, 1, 1]} : vector<2x8x32xf32> to vector<2x4x32xf32>
    %279 = arith.mulf %278, %278 : vector<2x4x32xf32>
    %cst_96 = arith.constant dense<0.000000e+00> : vector<2x4xf32>
    %280 = vector.multi_reduction <add>, %279, %cst_96 [2] : vector<2x4x32xf32> to vector<2x4xf32>
    %281 = vector.shape_cast %280 : vector<2x4xf32> to vector<2x4x1xf32>
    %cst_97 = arith.constant 1.000000e-24 : f32
    %282 = vector.broadcast %cst_97 : f32 to vector<2x4x1xf32>
    %283 = arith.maximumf %281, %282 : vector<2x4x1xf32>
    %284 = math.rsqrt %283 : vector<2x4x1xf32>
    %285 = vector.broadcast %284 : vector<2x4x1xf32> to vector<2x4x32xf32>
    %286 = arith.mulf %278, %285 : vector<2x4x32xf32>
    %c0_98 = arith.constant 0 : index
    %c0_99 = arith.constant 0 : index
    %c0_100 = arith.constant 0 : index
    %287 = vector.load %arg23[%c0_98, %c0_99, %c0_100] : memref<2x4x32xf32, #tpu.memory_space<vmem>>, vector<2x4x32xf32>
    tpu.vector_store %arg23[%c0_98, %c0_99, %c0_100], %286 {strides = array<i32>} : memref<2x4x32xf32, #tpu.memory_space<vmem>>, vector<2x4x32xf32>,
    return
  }
  func.func @transform_0(%arg0: i32) -> (i32, i32) {
    %c0_i32 = arith.constant 0 : i32
    %c0_i32_0 = arith.constant 0 : i32
    %c0_i32_1 = arith.constant 0 : i32
    return %c0_i32, %c0_i32_0 : i32, i32
  }
  func.func @transform_1(%arg0: i32) -> (i32, i32) {
    %c0_i32 = arith.constant 0 : i32
    %c0_i32_0 = arith.constant 0 : i32
    %c0_i32_1 = arith.constant 0 : i32
    return %c0_i32, %c0_i32_0 : i32, i32
  }
  func.func @transform_2(%arg0: i32) -> (i32, i32) {
    %c0_i32 = arith.constant 0 : i32
    %c0_i32_0 = arith.constant 0 : i32
    %c0_i32_1 = arith.constant 0 : i32
    return %c0_i32, %c0_i32_0 : i32, i32
  }
  func.func @transform_3(%arg0: i32) -> (i32, i32) {
    %c0_i32 = arith.constant 0 : i32
    %c0_i32_0 = arith.constant 0 : i32
    %c0_i32_1 = arith.constant 0 : i32
    return %c0_i32, %c0_i32_0 : i32, i32
  }
  func.func @transform_4(%arg0: i32) -> (i32, i32) {
    %c0_i32 = arith.constant 0 : i32
    %c0_i32_0 = arith.constant 0 : i32
    %c0_i32_1 = arith.constant 0 : i32
    return %c0_i32, %c0_i32_0 : i32, i32
  }
  func.func @transform_5(%arg0: i32) -> (i32, i32) {
    %c0_i32 = arith.constant 0 : i32
    %c0_i32_0 = arith.constant 0 : i32
    %c0_i32_1 = arith.constant 0 : i32
    return %c0_i32, %c0_i32_0 : i32, i32
  }
  func.func @transform_6(%arg0: i32) -> (i32, i32) {
    %c0_i32 = arith.constant 0 : i32
    %c0_i32_0 = arith.constant 0 : i32
    %c0_i32_1 = arith.constant 0 : i32
    return %c0_i32, %c0_i32_0 : i32, i32
  }
  func.func @transform_7(%arg0: i32) -> (i32, i32) {
    %c0_i32 = arith.constant 0 : i32
    %c0_i32_0 = arith.constant 0 : i32
    %c0_i32_1 = arith.constant 0 : i32
    return %c0_i32, %c0_i32_0 : i32, i32
  }
  func.func @transform_8(%arg0: i32) -> (i32, i32) {
    %c0_i32 = arith.constant 0 : i32
    %c0_i32_0 = arith.constant 0 : i32
    %c0_i32_1 = arith.constant 0 : i32
    return %c0_i32, %c0_i32_0 : i32, i32
  }
  func.func @transform_9(%arg0: i32) -> (i32, i32) {
    %c0_i32 = arith.constant 0 : i32
    %c0_i32_0 = arith.constant 0 : i32
    %c0_i32_1 = arith.constant 0 : i32
    return %c0_i32, %c0_i32_0 : i32, i32
  }
  func.func @transform_10(%arg0: i32) -> (i32, i32) {
    %c0_i32 = arith.constant 0 : i32
    %c0_i32_0 = arith.constant 0 : i32
    %c0_i32_1 = arith.constant 0 : i32
    return %c0_i32, %c0_i32_0 : i32, i32
  }
  func.func @transform_11(%arg0: i32) -> (i32, i32) {
    %c0_i32 = arith.constant 0 : i32
    %c0_i32_0 = arith.constant 0 : i32
    %c0_i32_1 = arith.constant 0 : i32
    return %c0_i32, %c0_i32_0 : i32, i32
  }
  func.func @transform_12(%arg0: i32) -> (i32, i32) {
    %c0_i32 = arith.constant 0 : i32
    %c0_i32_0 = arith.constant 0 : i32
    %c0_i32_1 = arith.constant 0 : i32
    return %c0_i32, %c0_i32_0 : i32, i32
  }
  func.func @transform_13(%arg0: i32) -> (i32, i32) {
    %c0_i32 = arith.constant 0 : i32
    %c0_i32_0 = arith.constant 0 : i32
    %c0_i32_1 = arith.constant 0 : i32
    return %c0_i32, %c0_i32_0 : i32, i32
  }
  func.func @transform_14(%arg0: i32) -> (i32, i32) {
    %c0_i32 = arith.constant 0 : i32
    %c0_i32_0 = arith.constant 0 : i32
    %c0_i32_1 = arith.constant 0 : i32
    return %c0_i32, %c0_i32_0 : i32, i32
  }
  func.func @transform_15(%arg0: i32) -> (i32, i32) {
    %c0_i32 = arith.constant 0 : i32
    %c0_i32_0 = arith.constant 0 : i32
    %c0_i32_1 = arith.constant 0 : i32
    return %c0_i32, %c0_i32_0 : i32, i32
  }
  func.func @transform_16(%arg0: i32) -> (i32, i32) {
    %c0_i32 = arith.constant 0 : i32
    %c0_i32_0 = arith.constant 0 : i32
    %c0_i32_1 = arith.constant 0 : i32
    return %c0_i32, %c0_i32_0 : i32, i32
  }
  func.func @transform_17(%arg0: i32) -> (i32, i32) {
    %c0_i32 = arith.constant 0 : i32
    %c0_i32_0 = arith.constant 0 : i32
    %c0_i32_1 = arith.constant 0 : i32
    return %c0_i32, %c0_i32_0 : i32, i32
  }
  func.func @transform_18(%arg0: i32) -> (i32, i32) {
    %c0_i32 = arith.constant 0 : i32
    %c0_i32_0 = arith.constant 0 : i32
    %c0_i32_1 = arith.constant 0 : i32
    return %c0_i32, %c0_i32_0 : i32, i32
  }
  func.func @transform_19(%arg0: i32) -> (i32, i32) {
    %c0_i32 = arith.constant 0 : i32
    %c0_i32_0 = arith.constant 0 : i32
    %c0_i32_1 = arith.constant 0 : i32
    return %c0_i32, %c0_i32_0 : i32, i32
  }
  func.func @transform_20(%arg0: i32) -> (i32, i32) {
    %c0_i32 = arith.constant 0 : i32
    %c0_i32_0 = arith.constant 0 : i32
    %c0_i32_1 = arith.constant 0 : i32
    return %c0_i32, %c0_i32_0 : i32, i32
  }
  func.func @transform_21(%arg0: i32) -> (i32, i32) {
    %c0_i32 = arith.constant 0 : i32
    %c0_i32_0 = arith.constant 0 : i32
    %c0_i32_1 = arith.constant 0 : i32
    return %c0_i32, %c0_i32_0 : i32, i32
  }
  func.func @transform_22(%arg0: i32) -> (i32, i32, i32) {
    %c0_i32 = arith.constant 0 : i32
    %c0_i32_0 = arith.constant 0 : i32
    %c0_i32_1 = arith.constant 0 : i32
    %c0_i32_2 = arith.constant 0 : i32
    return %c0_i32, %c0_i32_0, %c0_i32_1 : i32, i32, i32
  }
}

module attributes {stable_mosaic.version = 11 : i64} {
  func.func @compressor_kernel(%arg0: i32, %arg1: memref<4x32xf32, #tpu.memory_space<vmem>>, %arg2: memref<2x8x32xf32, #tpu.memory_space<vmem>>, %arg3: memref<2x2xf32, #tpu.memory_space<vmem>>, %arg4: memref<2x8xf32, #tpu.memory_space<vmem>>, %arg5: memref<2x256xf32, #tpu.memory_space<vmem>>, %arg6: memref<2x256x192xbf16, #tpu.memory_space<vmem>>, %arg7: memref<2x1x192xf32, #tpu.memory_space<vmem>>, %arg8: memref<2x32x96xbf16, #tpu.memory_space<vmem>>, %arg9: memref<2x1x96xf32, #tpu.memory_space<vmem>>, %arg10: memref<2x1x16xf32, #tpu.memory_space<vmem>>, %arg11: memref<2x1x16xf32, #tpu.memory_space<vmem>>, %arg12: memref<2x32x32xbf16, #tpu.memory_space<vmem>>, %arg13: memref<2x1x32xf32, #tpu.memory_space<vmem>>, %arg14: memref<2x32x128xbf16, #tpu.memory_space<vmem>>, %arg15: memref<2x1x128xf32, #tpu.memory_space<vmem>>, %arg16: memref<2x128x32xbf16, #tpu.memory_space<vmem>>, %arg17: memref<2x1x32xf32, #tpu.memory_space<vmem>>, %arg18: memref<32x32xbf16, #tpu.memory_space<vmem>>, %arg19: memref<1x32xf32, #tpu.memory_space<vmem>>, %arg20: memref<2x4x32xf32, #tpu.memory_space<vmem>>) attributes {dimension_semantics = [#tpu.dimension_semantics<arbitrary>], iteration_bounds = array<i64: 1>, scalar_prefetch = 0 : i64, scratch_operands = 0 : i64, tpu.core_type = #tpu.core_type<tc>, window_params = [{pipeline_mode = #tpu.pipeline_mode<synchronous>, transform_indices = @transform_0, window_bounds = array<i64: 4, 32>}, {pipeline_mode = #tpu.pipeline_mode<synchronous>, transform_indices = @transform_1, window_bounds = array<i64: 2, 8, 32>}, {pipeline_mode = #tpu.pipeline_mode<synchronous>, transform_indices = @transform_2, window_bounds = array<i64: 2, 2>}, {pipeline_mode = #tpu.pipeline_mode<synchronous>, transform_indices = @transform_3, window_bounds = array<i64: 2, 8>}, {pipeline_mode = #tpu.pipeline_mode<synchronous>, transform_indices = @transform_4, window_bounds = array<i64: 2, 256>}, {pipeline_mode = #tpu.pipeline_mode<synchronous>, transform_indices = @transform_5, window_bounds = array<i64: 2, 256, 192>}, {pipeline_mode = #tpu.pipeline_mode<synchronous>, transform_indices = @transform_6, window_bounds = array<i64: 2, 1, 192>}, {pipeline_mode = #tpu.pipeline_mode<synchronous>, transform_indices = @transform_7, window_bounds = array<i64: 2, 32, 96>}, {pipeline_mode = #tpu.pipeline_mode<synchronous>, transform_indices = @transform_8, window_bounds = array<i64: 2, 1, 96>}, {pipeline_mode = #tpu.pipeline_mode<synchronous>, transform_indices = @transform_9, window_bounds = array<i64: 2, 1, 16>}, {pipeline_mode = #tpu.pipeline_mode<synchronous>, transform_indices = @transform_10, window_bounds = array<i64: 2, 1, 16>}, {pipeline_mode = #tpu.pipeline_mode<synchronous>, transform_indices = @transform_11, window_bounds = array<i64: 2, 32, 32>}, {pipeline_mode = #tpu.pipeline_mode<synchronous>, transform_indices = @transform_12, window_bounds = array<i64: 2, 1, 32>}, {pipeline_mode = #tpu.pipeline_mode<synchronous>, transform_indices = @transform_13, window_bounds = array<i64: 2, 32, 128>}, {pipeline_mode = #tpu.pipeline_mode<synchronous>, transform_indices = @transform_14, window_bounds = array<i64: 2, 1, 128>}, {pipeline_mode = #tpu.pipeline_mode<synchronous>, transform_indices = @transform_15, window_bounds = array<i64: 2, 128, 32>}, {pipeline_mode = #tpu.pipeline_mode<synchronous>, transform_indices = @transform_16, window_bounds = array<i64: 2, 1, 32>}, {pipeline_mode = #tpu.pipeline_mode<synchronous>, transform_indices = @transform_17, window_bounds = array<i64: 32, 32>}, {pipeline_mode = #tpu.pipeline_mode<synchronous>, transform_indices = @transform_18, window_bounds = array<i64: 1, 32>}, {pipeline_mode = #tpu.pipeline_mode<synchronous>, transform_indices = @transform_19, window_bounds = array<i64: 2, 4, 32>}]} {
    %c0 = arith.constant 0 : index
    %c0_0 = arith.constant 0 : index
    %c0_1 = arith.constant 0 : index
    %0 = vector.load %arg2[%c0, %c0_0, %c0_1] : memref<2x8x32xf32, #tpu.memory_space<vmem>>, vector<2x8x32xf32>
    %c0_2 = arith.constant 0 : index
    %c0_3 = arith.constant 0 : index
    %1 = vector.load %arg1[%c0_2, %c0_3] : memref<4x32xf32, #tpu.memory_space<vmem>>, vector<4x32xf32>
    %2 = vector.shape_cast %1 : vector<4x32xf32> to vector<1x4x32xf32>
    %3 = vector.shape_cast %2 : vector<1x4x32xf32> to vector<1x4x32xf32>
    %4 = vector.broadcast %3 : vector<1x4x32xf32> to vector<2x4x32xf32>
    %c0_4 = arith.constant 0 : index
    %c0_5 = arith.constant 0 : index
    %5 = vector.load %arg3[%c0_4, %c0_5] : memref<2x2xf32, #tpu.memory_space<vmem>>, vector<2x2xf32>
    %c0_6 = arith.constant 0 : index
    %c0_7 = arith.constant 0 : index
    %6 = vector.load %arg5[%c0_6, %c0_7] : memref<2x256xf32, #tpu.memory_space<vmem>>, vector<2x256xf32>
    %7 = vector.extract_strided_slice %5 {offsets = [0, 0], sizes = [2, 1], strides = [1, 1]} : vector<2x2xf32> to vector<2x1xf32>
    %8 = vector.extract_strided_slice %6 {offsets = [0, 0], sizes = [1, 256], strides = [1, 1]} : vector<2x256xf32> to vector<1x256xf32>
    %9 = vector.broadcast %7 : vector<2x1xf32> to vector<2x256xf32>
    %10 = vector.broadcast %8 : vector<1x256xf32> to vector<2x256xf32>
    %11 = arith.mulf %9, %10 : vector<2x256xf32>
    %12 = vector.extract_strided_slice %5 {offsets = [0, 1], sizes = [2, 1], strides = [1, 1]} : vector<2x2xf32> to vector<2x1xf32>
    %13 = vector.extract_strided_slice %6 {offsets = [1, 0], sizes = [1, 256], strides = [1, 1]} : vector<2x256xf32> to vector<1x256xf32>
    %14 = vector.broadcast %12 : vector<2x1xf32> to vector<2x256xf32>
    %15 = vector.broadcast %13 : vector<1x256xf32> to vector<2x256xf32>
    %16 = arith.mulf %14, %15 : vector<2x256xf32>
    %17 = arith.addf %11, %16 : vector<2x256xf32>
    %18 = arith.negf %17 : vector<2x256xf32>
    %19 = math.exp %18 : vector<2x256xf32>
    %cst = arith.constant 1.000000e+00 : f32
    %20 = vector.broadcast %cst : f32 to vector<2x256xf32>
    %21 = arith.addf %20, %19 : vector<2x256xf32>
    %22 = arith.divf %20, %21 : vector<2x256xf32>
    %23 = arith.mulf %17, %22 : vector<2x256xf32>
    %24 = arith.truncf %23 : vector<2x256xf32> to vector<2x256xbf16>
    %c0_8 = arith.constant 0 : index
    %c0_9 = arith.constant 0 : index
    %25 = vector.load %arg4[%c0_8, %c0_9] : memref<2x8xf32, #tpu.memory_space<vmem>>, vector<2x8xf32>
    %cst_10 = arith.constant 1.000000e+00 : f32
    %26 = vector.broadcast %cst_10 : f32 to vector<2x8xf32>
    %27 = arith.subf %26, %25 : vector<2x8xf32>
    %cst_11 = arith.constant -1.000000e+30 : f32
    %28 = vector.broadcast %cst_11 : f32 to vector<2x8xf32>
    %29 = arith.mulf %27, %28 : vector<2x8xf32>
    %30 = vector.shape_cast %29 : vector<2x8xf32> to vector<2x1x8xf32>
    %c0_12 = arith.constant 0 : index
    %c0_13 = arith.constant 0 : index
    %c0_14 = arith.constant 0 : index
    %31 = vector.load %arg6[%c0_12, %c0_13, %c0_14] : memref<2x256x192xbf16, #tpu.memory_space<vmem>>, vector<1x256x192xbf16>
    %32 = vector.shape_cast %31 : vector<1x256x192xbf16> to vector<256x192xbf16>
    %cst_15 = arith.constant dense<0.000000e+00> : vector<2x192xf32>
    %33 = tpu.matmul %24, %32, %cst_15 {dimension_numbers = #tpu.dot_dimension_numbers<[1], [0], [0], [1], [0, 0, 1, 1], [], []>} : vector<2x256xbf16>, vector<256x192xbf16>, vector<2x192xf32> -> vector<2x192xf32>
    %c0_16 = arith.constant 0 : index
    %c0_17 = arith.constant 0 : index
    %c0_18 = arith.constant 0 : index
    %34 = vector.load %arg7[%c0_16, %c0_17, %c0_18] : memref<2x1x192xf32, #tpu.memory_space<vmem>>, vector<1x1x192xf32>
    %35 = vector.shape_cast %34 : vector<1x1x192xf32> to vector<1x192xf32>
    %36 = vector.broadcast %35 : vector<1x192xf32> to vector<2x192xf32>
    %37 = arith.addf %33, %36 : vector<2x192xf32>
    %38 = vector.extract_strided_slice %37 {offsets = [0, 0], sizes = [2, 32], strides = [1, 1]} : vector<2x192xf32> to vector<2x32xf32>
    %39 = vector.shape_cast %38 : vector<2x32xf32> to vector<2x1x32xf32>
    %40 = vector.extract_strided_slice %37 {offsets = [0, 32], sizes = [2, 32], strides = [1, 1]} : vector<2x192xf32> to vector<2x32xf32>
    %41 = vector.shape_cast %40 : vector<2x32xf32> to vector<2x1x32xf32>
    %42 = vector.extract_strided_slice %37 {offsets = [0, 64], sizes = [2, 32], strides = [1, 1]} : vector<2x192xf32> to vector<2x32xf32>
    %43 = vector.shape_cast %42 : vector<2x32xf32> to vector<2x1x32xf32>
    %44 = vector.extract_strided_slice %37 {offsets = [0, 96], sizes = [2, 32], strides = [1, 1]} : vector<2x192xf32> to vector<2x32xf32>
    %45 = vector.shape_cast %44 : vector<2x32xf32> to vector<2x1x32xf32>
    %46 = vector.extract_strided_slice %37 {offsets = [0, 128], sizes = [2, 32], strides = [1, 1]} : vector<2x192xf32> to vector<2x32xf32>
    %47 = vector.shape_cast %46 : vector<2x32xf32> to vector<2x1x32xf32>
    %48 = vector.extract_strided_slice %37 {offsets = [0, 160], sizes = [2, 32], strides = [1, 1]} : vector<2x192xf32> to vector<2x32xf32>
    %49 = vector.shape_cast %48 : vector<2x32xf32> to vector<2x1x32xf32>
    %cst_19 = arith.constant dense<0.000000e+00> : vector<2x4xf32>
    %50 = vector.multi_reduction <add>, %4, %cst_19 [2] : vector<2x4x32xf32> to vector<2x4xf32>
    %51 = vector.shape_cast %50 : vector<2x4xf32> to vector<2x4x1xf32>
    %cst_20 = arith.constant 3.200000e+01 : f32
    %52 = vector.broadcast %cst_20 : f32 to vector<2x4x1xf32>
    %53 = arith.divf %51, %52 : vector<2x4x1xf32>
    %54 = vector.broadcast %53 : vector<2x4x1xf32> to vector<2x4x32xf32>
    %55 = arith.subf %4, %54 : vector<2x4x32xf32>
    %56 = arith.mulf %55, %55 : vector<2x4x32xf32>
    %cst_21 = arith.constant dense<0.000000e+00> : vector<2x4xf32>
    %57 = vector.multi_reduction <add>, %56, %cst_21 [2] : vector<2x4x32xf32> to vector<2x4xf32>
    %58 = vector.shape_cast %57 : vector<2x4xf32> to vector<2x4x1xf32>
    %cst_22 = arith.constant 3.200000e+01 : f32
    %59 = vector.broadcast %cst_22 : f32 to vector<2x4x1xf32>
    %60 = arith.divf %58, %59 : vector<2x4x1xf32>
    %cst_23 = arith.constant 9.99999974E-6 : f32
    %61 = vector.broadcast %cst_23 : f32 to vector<2x4x1xf32>
    %62 = arith.addf %60, %61 : vector<2x4x1xf32>
    %63 = math.rsqrt %62 : vector<2x4x1xf32>
    %64 = vector.broadcast %63 : vector<2x4x1xf32> to vector<2x4x32xf32>
    %65 = arith.mulf %55, %64 : vector<2x4x32xf32>
    %cst_24 = arith.constant 1.000000e+00 : f32
    %66 = vector.broadcast %cst_24 : f32 to vector<2x4x32xf32>
    %67 = arith.mulf %65, %66 : vector<2x4x32xf32>
    %cst_25 = arith.constant 0.000000e+00 : f32
    %68 = vector.broadcast %cst_25 : f32 to vector<2x4x32xf32>
    %69 = arith.addf %67, %68 : vector<2x4x32xf32>
    %cst_26 = arith.constant 1.000000e+00 : f32
    %70 = vector.broadcast %cst_26 : f32 to vector<2x1x32xf32>
    %71 = arith.addf %70, %41 : vector<2x1x32xf32>
    %72 = vector.broadcast %71 : vector<2x1x32xf32> to vector<2x4x32xf32>
    %73 = arith.mulf %69, %72 : vector<2x4x32xf32>
    %74 = vector.broadcast %39 : vector<2x1x32xf32> to vector<2x4x32xf32>
    %75 = arith.addf %73, %74 : vector<2x4x32xf32>
    %c0_27 = arith.constant 0 : index
    %c0_28 = arith.constant 0 : index
    %c0_29 = arith.constant 0 : index
    %76 = vector.load %arg8[%c0_27, %c0_28, %c0_29] : memref<2x32x96xbf16, #tpu.memory_space<vmem>>, vector<1x32x96xbf16>
    %77 = vector.shape_cast %76 : vector<1x32x96xbf16> to vector<32x96xbf16>
    %c0_30 = arith.constant 0 : index
    %c0_31 = arith.constant 0 : index
    %c0_32 = arith.constant 0 : index
    %78 = vector.load %arg9[%c0_30, %c0_31, %c0_32] : memref<2x1x96xf32, #tpu.memory_space<vmem>>, vector<1x1x96xf32>
    %79 = vector.shape_cast %78 : vector<1x1x96xf32> to vector<1x96xf32>
    %80 = vector.shape_cast %75 : vector<2x4x32xf32> to vector<8x32xf32>
    %81 = arith.truncf %80 : vector<8x32xf32> to vector<8x32xbf16>
    %cst_33 = arith.constant dense<0.000000e+00> : vector<8x96xf32>
    %82 = tpu.matmul %81, %77, %cst_33 {dimension_numbers = #tpu.dot_dimension_numbers<[1], [0], [0], [1], [0, 0, 1, 1], [], []>} : vector<8x32xbf16>, vector<32x96xbf16>, vector<8x96xf32> -> vector<8x96xf32>
    %83 = vector.broadcast %79 : vector<1x96xf32> to vector<8x96xf32>
    %84 = arith.addf %82, %83 : vector<8x96xf32>
    %85 = vector.shape_cast %84 : vector<8x96xf32> to vector<2x4x96xf32>
    %c1 = arith.constant 1 : index
    %c0_34 = arith.constant 0 : index
    %c0_35 = arith.constant 0 : index
    %86 = vector.load %arg6[%c1, %c0_34, %c0_35] : memref<2x256x192xbf16, #tpu.memory_space<vmem>>, vector<1x256x192xbf16>
    %87 = vector.shape_cast %86 : vector<1x256x192xbf16> to vector<256x192xbf16>
    %cst_36 = arith.constant dense<0.000000e+00> : vector<2x192xf32>
    %88 = tpu.matmul %24, %87, %cst_36 {dimension_numbers = #tpu.dot_dimension_numbers<[1], [0], [0], [1], [0, 0, 1, 1], [], []>} : vector<2x256xbf16>, vector<256x192xbf16>, vector<2x192xf32> -> vector<2x192xf32>
    %c1_37 = arith.constant 1 : index
    %c0_38 = arith.constant 0 : index
    %c0_39 = arith.constant 0 : index
    %89 = vector.load %arg7[%c1_37, %c0_38, %c0_39] : memref<2x1x192xf32, #tpu.memory_space<vmem>>, vector<1x1x192xf32>
    %90 = vector.shape_cast %89 : vector<1x1x192xf32> to vector<1x192xf32>
    %91 = vector.broadcast %90 : vector<1x192xf32> to vector<2x192xf32>
    %92 = arith.addf %88, %91 : vector<2x192xf32>
    %93 = vector.extract_strided_slice %92 {offsets = [0, 0], sizes = [2, 32], strides = [1, 1]} : vector<2x192xf32> to vector<2x32xf32>
    %94 = vector.shape_cast %93 : vector<2x32xf32> to vector<2x1x32xf32>
    %95 = vector.extract_strided_slice %92 {offsets = [0, 32], sizes = [2, 32], strides = [1, 1]} : vector<2x192xf32> to vector<2x32xf32>
    %96 = vector.shape_cast %95 : vector<2x32xf32> to vector<2x1x32xf32>
    %cst_40 = arith.constant dense<0.000000e+00> : vector<2x8xf32>
    %97 = vector.multi_reduction <add>, %0, %cst_40 [2] : vector<2x8x32xf32> to vector<2x8xf32>
    %98 = vector.shape_cast %97 : vector<2x8xf32> to vector<2x8x1xf32>
    %cst_41 = arith.constant 3.200000e+01 : f32
    %99 = vector.broadcast %cst_41 : f32 to vector<2x8x1xf32>
    %100 = arith.divf %98, %99 : vector<2x8x1xf32>
    %101 = vector.broadcast %100 : vector<2x8x1xf32> to vector<2x8x32xf32>
    %102 = arith.subf %0, %101 : vector<2x8x32xf32>
    %103 = arith.mulf %102, %102 : vector<2x8x32xf32>
    %cst_42 = arith.constant dense<0.000000e+00> : vector<2x8xf32>
    %104 = vector.multi_reduction <add>, %103, %cst_42 [2] : vector<2x8x32xf32> to vector<2x8xf32>
    %105 = vector.shape_cast %104 : vector<2x8xf32> to vector<2x8x1xf32>
    %cst_43 = arith.constant 3.200000e+01 : f32
    %106 = vector.broadcast %cst_43 : f32 to vector<2x8x1xf32>
    %107 = arith.divf %105, %106 : vector<2x8x1xf32>
    %cst_44 = arith.constant 9.99999974E-6 : f32
    %108 = vector.broadcast %cst_44 : f32 to vector<2x8x1xf32>
    %109 = arith.addf %107, %108 : vector<2x8x1xf32>
    %110 = math.rsqrt %109 : vector<2x8x1xf32>
    %111 = vector.broadcast %110 : vector<2x8x1xf32> to vector<2x8x32xf32>
    %112 = arith.mulf %102, %111 : vector<2x8x32xf32>
    %cst_45 = arith.constant 1.000000e+00 : f32
    %113 = vector.broadcast %cst_45 : f32 to vector<2x8x32xf32>
    %114 = arith.mulf %112, %113 : vector<2x8x32xf32>
    %cst_46 = arith.constant 0.000000e+00 : f32
    %115 = vector.broadcast %cst_46 : f32 to vector<2x8x32xf32>
    %116 = arith.addf %114, %115 : vector<2x8x32xf32>
    %cst_47 = arith.constant 1.000000e+00 : f32
    %117 = vector.broadcast %cst_47 : f32 to vector<2x1x32xf32>
    %118 = arith.addf %117, %96 : vector<2x1x32xf32>
    %119 = vector.broadcast %118 : vector<2x1x32xf32> to vector<2x8x32xf32>
    %120 = arith.mulf %116, %119 : vector<2x8x32xf32>
    %121 = vector.broadcast %94 : vector<2x1x32xf32> to vector<2x8x32xf32>
    %122 = arith.addf %120, %121 : vector<2x8x32xf32>
    %c1_48 = arith.constant 1 : index
    %c0_49 = arith.constant 0 : index
    %c0_50 = arith.constant 0 : index
    %123 = vector.load %arg8[%c1_48, %c0_49, %c0_50] : memref<2x32x96xbf16, #tpu.memory_space<vmem>>, vector<1x32x96xbf16>
    %124 = vector.shape_cast %123 : vector<1x32x96xbf16> to vector<32x96xbf16>
    %c1_51 = arith.constant 1 : index
    %c0_52 = arith.constant 0 : index
    %c0_53 = arith.constant 0 : index
    %125 = vector.load %arg9[%c1_51, %c0_52, %c0_53] : memref<2x1x96xf32, #tpu.memory_space<vmem>>, vector<1x1x96xf32>
    %126 = vector.shape_cast %125 : vector<1x1x96xf32> to vector<1x96xf32>
    %127 = vector.shape_cast %122 : vector<2x8x32xf32> to vector<16x32xf32>
    %128 = arith.truncf %127 : vector<16x32xf32> to vector<16x32xbf16>
    %cst_54 = arith.constant dense<0.000000e+00> : vector<16x96xf32>
    %129 = tpu.matmul %128, %124, %cst_54 {dimension_numbers = #tpu.dot_dimension_numbers<[1], [0], [0], [1], [0, 0, 1, 1], [], []>} : vector<16x32xbf16>, vector<32x96xbf16>, vector<16x96xf32> -> vector<16x96xf32>
    %130 = vector.broadcast %126 : vector<1x96xf32> to vector<16x96xf32>
    %131 = arith.addf %129, %130 : vector<16x96xf32>
    %132 = vector.shape_cast %131 : vector<16x96xf32> to vector<2x8x96xf32>
    %c0_55 = arith.constant 0 : index
    %c0_56 = arith.constant 0 : index
    %c0_57 = arith.constant 0 : index
    %133 = vector.load %arg10[%c0_55, %c0_56, %c0_57] : memref<2x1x16xf32, #tpu.memory_space<vmem>>, vector<1x1x16xf32>
    %134 = vector.shape_cast %133 : vector<1x1x16xf32> to vector<1x16xf32>
    %c0_58 = arith.constant 0 : index
    %c0_59 = arith.constant 0 : index
    %c0_60 = arith.constant 0 : index
    %135 = vector.load %arg11[%c0_58, %c0_59, %c0_60] : memref<2x1x16xf32, #tpu.memory_space<vmem>>, vector<1x1x16xf32>
    %136 = vector.shape_cast %135 : vector<1x1x16xf32> to vector<1x16xf32>
    %c1_61 = arith.constant 1 : index
    %c0_62 = arith.constant 0 : index
    %c0_63 = arith.constant 0 : index
    %137 = vector.load %arg11[%c1_61, %c0_62, %c0_63] : memref<2x1x16xf32, #tpu.memory_space<vmem>>, vector<1x1x16xf32>
    %138 = vector.shape_cast %137 : vector<1x1x16xf32> to vector<1x16xf32>
    %139 = vector.extract_strided_slice %85 {offsets = [0, 0, 0], sizes = [1, 4, 96], strides = [1, 1, 1]} : vector<2x4x96xf32> to vector<1x4x96xf32>
    %140 = vector.shape_cast %139 : vector<1x4x96xf32> to vector<4x96xf32>
    %141 = vector.extract_strided_slice %132 {offsets = [0, 0, 0], sizes = [1, 8, 96], strides = [1, 1, 1]} : vector<2x8x96xf32> to vector<1x8x96xf32>
    %142 = vector.shape_cast %141 : vector<1x8x96xf32> to vector<8x96xf32>
    %143 = vector.extract_strided_slice %30 {offsets = [0, 0, 0], sizes = [1, 1, 8], strides = [1, 1, 1]} : vector<2x1x8xf32> to vector<1x1x8xf32>
    %144 = vector.shape_cast %143 : vector<1x1x8xf32> to vector<1x8xf32>
    %145 = vector.extract_strided_slice %140 {offsets = [0, 0], sizes = [4, 16], strides = [1, 1]} : vector<4x96xf32> to vector<4x16xf32>
    %146 = arith.mulf %145, %145 : vector<4x16xf32>
    %cst_64 = arith.constant dense<0.000000e+00> : vector<4xf32>
    %147 = vector.multi_reduction <add>, %146, %cst_64 [1] : vector<4x16xf32> to vector<4xf32>
    %148 = vector.shape_cast %147 : vector<4xf32> to vector<4x1xf32>
    %cst_65 = arith.constant 1.600000e+01 : f32
    %149 = vector.broadcast %cst_65 : f32 to vector<4x1xf32>
    %150 = arith.divf %148, %149 : vector<4x1xf32>
    %cst_66 = arith.constant 9.99999997E-7 : f32
    %151 = vector.broadcast %cst_66 : f32 to vector<4x1xf32>
    %152 = arith.addf %150, %151 : vector<4x1xf32>
    %153 = math.rsqrt %152 : vector<4x1xf32>
    %154 = vector.broadcast %153 : vector<4x1xf32> to vector<4x16xf32>
    %155 = arith.mulf %145, %154 : vector<4x16xf32>
    %156 = vector.broadcast %134 : vector<1x16xf32> to vector<4x16xf32>
    %157 = arith.mulf %155, %156 : vector<4x16xf32>
    %158 = arith.truncf %157 : vector<4x16xf32> to vector<4x16xbf16>
    %159 = vector.extract_strided_slice %140 {offsets = [0, 32], sizes = [4, 16], strides = [1, 1]} : vector<4x96xf32> to vector<4x16xf32>
    %160 = arith.mulf %159, %159 : vector<4x16xf32>
    %cst_67 = arith.constant dense<0.000000e+00> : vector<4xf32>
    %161 = vector.multi_reduction <add>, %160, %cst_67 [1] : vector<4x16xf32> to vector<4xf32>
    %162 = vector.shape_cast %161 : vector<4xf32> to vector<4x1xf32>
    %cst_68 = arith.constant 1.600000e+01 : f32
    %163 = vector.broadcast %cst_68 : f32 to vector<4x1xf32>
    %164 = arith.divf %162, %163 : vector<4x1xf32>
    %cst_69 = arith.constant 9.99999997E-7 : f32
    %165 = vector.broadcast %cst_69 : f32 to vector<4x1xf32>
    %166 = arith.addf %164, %165 : vector<4x1xf32>
    %167 = math.rsqrt %166 : vector<4x1xf32>
    %168 = vector.broadcast %167 : vector<4x1xf32> to vector<4x16xf32>
    %169 = arith.mulf %159, %168 : vector<4x16xf32>
    %170 = vector.broadcast %136 : vector<1x16xf32> to vector<4x16xf32>
    %171 = arith.mulf %169, %170 : vector<4x16xf32>
    %172 = arith.truncf %171 : vector<4x16xf32> to vector<4x16xbf16>
    %173 = vector.extract_strided_slice %140 {offsets = [0, 64], sizes = [4, 16], strides = [1, 1]} : vector<4x96xf32> to vector<4x16xf32>
    %174 = arith.truncf %173 : vector<4x16xf32> to vector<4x16xbf16>
    %175 = vector.extract_strided_slice %142 {offsets = [0, 32], sizes = [8, 16], strides = [1, 1]} : vector<8x96xf32> to vector<8x16xf32>
    %176 = arith.mulf %175, %175 : vector<8x16xf32>
    %cst_70 = arith.constant dense<0.000000e+00> : vector<8xf32>
    %177 = vector.multi_reduction <add>, %176, %cst_70 [1] : vector<8x16xf32> to vector<8xf32>
    %178 = vector.shape_cast %177 : vector<8xf32> to vector<8x1xf32>
    %cst_71 = arith.constant 1.600000e+01 : f32
    %179 = vector.broadcast %cst_71 : f32 to vector<8x1xf32>
    %180 = arith.divf %178, %179 : vector<8x1xf32>
    %cst_72 = arith.constant 9.99999997E-7 : f32
    %181 = vector.broadcast %cst_72 : f32 to vector<8x1xf32>
    %182 = arith.addf %180, %181 : vector<8x1xf32>
    %183 = math.rsqrt %182 : vector<8x1xf32>
    %184 = vector.broadcast %183 : vector<8x1xf32> to vector<8x16xf32>
    %185 = arith.mulf %175, %184 : vector<8x16xf32>
    %186 = vector.broadcast %138 : vector<1x16xf32> to vector<8x16xf32>
    %187 = arith.mulf %185, %186 : vector<8x16xf32>
    %188 = arith.truncf %187 : vector<8x16xf32> to vector<8x16xbf16>
    %189 = vector.extract_strided_slice %142 {offsets = [0, 64], sizes = [8, 16], strides = [1, 1]} : vector<8x96xf32> to vector<8x16xf32>
    %190 = arith.truncf %189 : vector<8x16xf32> to vector<8x16xbf16>
    %cst_73 = arith.constant dense<0.000000e+00> : vector<4x4xf32>
    %191 = tpu.matmul %158, %172, %cst_73 {dimension_numbers = #tpu.dot_dimension_numbers<[1], [1], [0], [0], [0, 0, 1, 0], [], []>} : vector<4x16xbf16>, vector<4x16xbf16>, vector<4x4xf32> -> vector<4x4xf32>
    %cst_74 = arith.constant 2.500000e-01 : f32
    %192 = vector.broadcast %cst_74 : f32 to vector<4x4xf32>
    %193 = arith.mulf %191, %192 : vector<4x4xf32>
    %cst_75 = arith.constant dense<0.000000e+00> : vector<4x8xf32>
    %194 = tpu.matmul %158, %188, %cst_75 {dimension_numbers = #tpu.dot_dimension_numbers<[1], [1], [0], [0], [0, 0, 1, 0], [], []>} : vector<4x16xbf16>, vector<8x16xbf16>, vector<4x8xf32> -> vector<4x8xf32>
    %cst_76 = arith.constant 2.500000e-01 : f32
    %195 = vector.broadcast %cst_76 : f32 to vector<4x8xf32>
    %196 = arith.mulf %194, %195 : vector<4x8xf32>
    %197 = vector.broadcast %144 : vector<1x8xf32> to vector<4x8xf32>
    %198 = arith.addf %196, %197 : vector<4x8xf32>
    %cst_77 = arith.constant dense<0xFF800000> : vector<4xf32>
    %199 = vector.multi_reduction <maximumf>, %193, %cst_77 [1] : vector<4x4xf32> to vector<4xf32>
    %200 = vector.shape_cast %199 : vector<4xf32> to vector<4x1xf32>
    %cst_78 = arith.constant dense<0xFF800000> : vector<4xf32>
    %201 = vector.multi_reduction <maximumf>, %198, %cst_78 [1] : vector<4x8xf32> to vector<4xf32>
    %202 = vector.shape_cast %201 : vector<4xf32> to vector<4x1xf32>
    %203 = arith.maximumf %200, %202 : vector<4x1xf32>
    %204 = vector.broadcast %203 : vector<4x1xf32> to vector<4x4xf32>
    %205 = arith.subf %193, %204 : vector<4x4xf32>
    %206 = math.exp %205 : vector<4x4xf32>
    %207 = vector.broadcast %203 : vector<4x1xf32> to vector<4x8xf32>
    %208 = arith.subf %198, %207 : vector<4x8xf32>
    %209 = math.exp %208 : vector<4x8xf32>
    %cst_79 = arith.constant dense<0.000000e+00> : vector<4xf32>
    %210 = vector.multi_reduction <add>, %206, %cst_79 [1] : vector<4x4xf32> to vector<4xf32>
    %211 = vector.shape_cast %210 : vector<4xf32> to vector<4x1xf32>
    %cst_80 = arith.constant dense<0.000000e+00> : vector<4xf32>
    %212 = vector.multi_reduction <add>, %209, %cst_80 [1] : vector<4x8xf32> to vector<4xf32>
    %213 = vector.shape_cast %212 : vector<4xf32> to vector<4x1xf32>
    %214 = arith.addf %211, %213 : vector<4x1xf32>
    %215 = tpu.reciprocal %214 {approx = true} : vector<4x1xf32> -> vector<4x1xf32>
    %216 = arith.truncf %206 : vector<4x4xf32> to vector<4x4xbf16>
    %cst_81 = arith.constant dense<0.000000e+00> : vector<4x16xf32>
    %217 = tpu.matmul %216, %174, %cst_81 {dimension_numbers = #tpu.dot_dimension_numbers<[1], [0], [0], [1], [0, 0, 1, 1], [], []>} : vector<4x4xbf16>, vector<4x16xbf16>, vector<4x16xf32> -> vector<4x16xf32>
    %218 = arith.truncf %209 : vector<4x8xf32> to vector<4x8xbf16>
    %cst_82 = arith.constant dense<0.000000e+00> : vector<4x16xf32>
    %219 = tpu.matmul %218, %190, %cst_82 {dimension_numbers = #tpu.dot_dimension_numbers<[1], [0], [0], [1], [0, 0, 1, 1], [], []>} : vector<4x8xbf16>, vector<8x16xbf16>, vector<4x16xf32> -> vector<4x16xf32>
    %220 = arith.addf %217, %219 : vector<4x16xf32>
    %221 = vector.broadcast %215 : vector<4x1xf32> to vector<4x16xf32>
    %222 = arith.mulf %220, %221 : vector<4x16xf32>
    %223 = vector.extract_strided_slice %140 {offsets = [0, 16], sizes = [4, 16], strides = [1, 1]} : vector<4x96xf32> to vector<4x16xf32>
    %224 = arith.mulf %223, %223 : vector<4x16xf32>
    %cst_83 = arith.constant dense<0.000000e+00> : vector<4xf32>
    %225 = vector.multi_reduction <add>, %224, %cst_83 [1] : vector<4x16xf32> to vector<4xf32>
    %226 = vector.shape_cast %225 : vector<4xf32> to vector<4x1xf32>
    %cst_84 = arith.constant 1.600000e+01 : f32
    %227 = vector.broadcast %cst_84 : f32 to vector<4x1xf32>
    %228 = arith.divf %226, %227 : vector<4x1xf32>
    %cst_85 = arith.constant 9.99999997E-7 : f32
    %229 = vector.broadcast %cst_85 : f32 to vector<4x1xf32>
    %230 = arith.addf %228, %229 : vector<4x1xf32>
    %231 = math.rsqrt %230 : vector<4x1xf32>
    %232 = vector.broadcast %231 : vector<4x1xf32> to vector<4x16xf32>
    %233 = arith.mulf %223, %232 : vector<4x16xf32>
    %234 = vector.broadcast %134 : vector<1x16xf32> to vector<4x16xf32>
    %235 = arith.mulf %233, %234 : vector<4x16xf32>
    %236 = arith.truncf %235 : vector<4x16xf32> to vector<4x16xbf16>
    %237 = vector.extract_strided_slice %140 {offsets = [0, 48], sizes = [4, 16], strides = [1, 1]} : vector<4x96xf32> to vector<4x16xf32>
    %238 = arith.mulf %237, %237 : vector<4x16xf32>
    %cst_86 = arith.constant dense<0.000000e+00> : vector<4xf32>
    %239 = vector.multi_reduction <add>, %238, %cst_86 [1] : vector<4x16xf32> to vector<4xf32>
    %240 = vector.shape_cast %239 : vector<4xf32> to vector<4x1xf32>
    %cst_87 = arith.constant 1.600000e+01 : f32
    %241 = vector.broadcast %cst_87 : f32 to vector<4x1xf32>
    %242 = arith.divf %240, %241 : vector<4x1xf32>
    %cst_88 = arith.constant 9.99999997E-7 : f32
    %243 = vector.broadcast %cst_88 : f32 to vector<4x1xf32>
    %244 = arith.addf %242, %243 : vector<4x1xf32>
    %245 = math.rsqrt %244 : vector<4x1xf32>
    %246 = vector.broadcast %245 : vector<4x1xf32> to vector<4x16xf32>
    %247 = arith.mulf %237, %246 : vector<4x16xf32>
    %248 = vector.broadcast %136 : vector<1x16xf32> to vector<4x16xf32>
    %249 = arith.mulf %247, %248 : vector<4x16xf32>
    %250 = arith.truncf %249 : vector<4x16xf32> to vector<4x16xbf16>
    %251 = vector.extract_strided_slice %140 {offsets = [0, 80], sizes = [4, 16], strides = [1, 1]} : vector<4x96xf32> to vector<4x16xf32>
    %252 = arith.truncf %251 : vector<4x16xf32> to vector<4x16xbf16>
    %253 = vector.extract_strided_slice %142 {offsets = [0, 48], sizes = [8, 16], strides = [1, 1]} : vector<8x96xf32> to vector<8x16xf32>
    %254 = arith.mulf %253, %253 : vector<8x16xf32>
    %cst_89 = arith.constant dense<0.000000e+00> : vector<8xf32>
    %255 = vector.multi_reduction <add>, %254, %cst_89 [1] : vector<8x16xf32> to vector<8xf32>
    %256 = vector.shape_cast %255 : vector<8xf32> to vector<8x1xf32>
    %cst_90 = arith.constant 1.600000e+01 : f32
    %257 = vector.broadcast %cst_90 : f32 to vector<8x1xf32>
    %258 = arith.divf %256, %257 : vector<8x1xf32>
    %cst_91 = arith.constant 9.99999997E-7 : f32
    %259 = vector.broadcast %cst_91 : f32 to vector<8x1xf32>
    %260 = arith.addf %258, %259 : vector<8x1xf32>
    %261 = math.rsqrt %260 : vector<8x1xf32>
    %262 = vector.broadcast %261 : vector<8x1xf32> to vector<8x16xf32>
    %263 = arith.mulf %253, %262 : vector<8x16xf32>
    %264 = vector.broadcast %138 : vector<1x16xf32> to vector<8x16xf32>
    %265 = arith.mulf %263, %264 : vector<8x16xf32>
    %266 = arith.truncf %265 : vector<8x16xf32> to vector<8x16xbf16>
    %267 = vector.extract_strided_slice %142 {offsets = [0, 80], sizes = [8, 16], strides = [1, 1]} : vector<8x96xf32> to vector<8x16xf32>
    %268 = arith.truncf %267 : vector<8x16xf32> to vector<8x16xbf16>
    %cst_92 = arith.constant dense<0.000000e+00> : vector<4x4xf32>
    %269 = tpu.matmul %236, %250, %cst_92 {dimension_numbers = #tpu.dot_dimension_numbers<[1], [1], [0], [0], [0, 0, 1, 0], [], []>} : vector<4x16xbf16>, vector<4x16xbf16>, vector<4x4xf32> -> vector<4x4xf32>
    %cst_93 = arith.constant 2.500000e-01 : f32
    %270 = vector.broadcast %cst_93 : f32 to vector<4x4xf32>
    %271 = arith.mulf %269, %270 : vector<4x4xf32>
    %cst_94 = arith.constant dense<0.000000e+00> : vector<4x8xf32>
    %272 = tpu.matmul %236, %266, %cst_94 {dimension_numbers = #tpu.dot_dimension_numbers<[1], [1], [0], [0], [0, 0, 1, 0], [], []>} : vector<4x16xbf16>, vector<8x16xbf16>, vector<4x8xf32> -> vector<4x8xf32>
    %cst_95 = arith.constant 2.500000e-01 : f32
    %273 = vector.broadcast %cst_95 : f32 to vector<4x8xf32>
    %274 = arith.mulf %272, %273 : vector<4x8xf32>
    %275 = vector.broadcast %144 : vector<1x8xf32> to vector<4x8xf32>
    %276 = arith.addf %274, %275 : vector<4x8xf32>
    %cst_96 = arith.constant dense<0xFF800000> : vector<4xf32>
    %277 = vector.multi_reduction <maximumf>, %271, %cst_96 [1] : vector<4x4xf32> to vector<4xf32>
    %278 = vector.shape_cast %277 : vector<4xf32> to vector<4x1xf32>
    %cst_97 = arith.constant dense<0xFF800000> : vector<4xf32>
    %279 = vector.multi_reduction <maximumf>, %276, %cst_97 [1] : vector<4x8xf32> to vector<4xf32>
    %280 = vector.shape_cast %279 : vector<4xf32> to vector<4x1xf32>
    %281 = arith.maximumf %278, %280 : vector<4x1xf32>
    %282 = vector.broadcast %281 : vector<4x1xf32> to vector<4x4xf32>
    %283 = arith.subf %271, %282 : vector<4x4xf32>
    %284 = math.exp %283 : vector<4x4xf32>
    %285 = vector.broadcast %281 : vector<4x1xf32> to vector<4x8xf32>
    %286 = arith.subf %276, %285 : vector<4x8xf32>
    %287 = math.exp %286 : vector<4x8xf32>
    %cst_98 = arith.constant dense<0.000000e+00> : vector<4xf32>
    %288 = vector.multi_reduction <add>, %284, %cst_98 [1] : vector<4x4xf32> to vector<4xf32>
    %289 = vector.shape_cast %288 : vector<4xf32> to vector<4x1xf32>
    %cst_99 = arith.constant dense<0.000000e+00> : vector<4xf32>
    %290 = vector.multi_reduction <add>, %287, %cst_99 [1] : vector<4x8xf32> to vector<4xf32>
    %291 = vector.shape_cast %290 : vector<4xf32> to vector<4x1xf32>
    %292 = arith.addf %289, %291 : vector<4x1xf32>
    %293 = tpu.reciprocal %292 {approx = true} : vector<4x1xf32> -> vector<4x1xf32>
    %294 = arith.truncf %284 : vector<4x4xf32> to vector<4x4xbf16>
    %cst_100 = arith.constant dense<0.000000e+00> : vector<4x16xf32>
    %295 = tpu.matmul %294, %252, %cst_100 {dimension_numbers = #tpu.dot_dimension_numbers<[1], [0], [0], [1], [0, 0, 1, 1], [], []>} : vector<4x4xbf16>, vector<4x16xbf16>, vector<4x16xf32> -> vector<4x16xf32>
    %296 = arith.truncf %287 : vector<4x8xf32> to vector<4x8xbf16>
    %cst_101 = arith.constant dense<0.000000e+00> : vector<4x16xf32>
    %297 = tpu.matmul %296, %268, %cst_101 {dimension_numbers = #tpu.dot_dimension_numbers<[1], [0], [0], [1], [0, 0, 1, 1], [], []>} : vector<4x8xbf16>, vector<8x16xbf16>, vector<4x16xf32> -> vector<4x16xf32>
    %298 = arith.addf %295, %297 : vector<4x16xf32>
    %299 = vector.broadcast %293 : vector<4x1xf32> to vector<4x16xf32>
    %300 = arith.mulf %298, %299 : vector<4x16xf32>
    %301 = tpu.concatenate %222, %300 in 1 : vector<4x16xf32>, vector<4x16xf32> -> vector<4x32xf32>
    %302 = vector.extract_strided_slice %85 {offsets = [1, 0, 0], sizes = [1, 4, 96], strides = [1, 1, 1]} : vector<2x4x96xf32> to vector<1x4x96xf32>
    %303 = vector.shape_cast %302 : vector<1x4x96xf32> to vector<4x96xf32>
    %304 = vector.extract_strided_slice %132 {offsets = [1, 0, 0], sizes = [1, 8, 96], strides = [1, 1, 1]} : vector<2x8x96xf32> to vector<1x8x96xf32>
    %305 = vector.shape_cast %304 : vector<1x8x96xf32> to vector<8x96xf32>
    %306 = vector.extract_strided_slice %30 {offsets = [1, 0, 0], sizes = [1, 1, 8], strides = [1, 1, 1]} : vector<2x1x8xf32> to vector<1x1x8xf32>
    %307 = vector.shape_cast %306 : vector<1x1x8xf32> to vector<1x8xf32>
    %308 = vector.extract_strided_slice %303 {offsets = [0, 0], sizes = [4, 16], strides = [1, 1]} : vector<4x96xf32> to vector<4x16xf32>
    %309 = arith.mulf %308, %308 : vector<4x16xf32>
    %cst_102 = arith.constant dense<0.000000e+00> : vector<4xf32>
    %310 = vector.multi_reduction <add>, %309, %cst_102 [1] : vector<4x16xf32> to vector<4xf32>
    %311 = vector.shape_cast %310 : vector<4xf32> to vector<4x1xf32>
    %cst_103 = arith.constant 1.600000e+01 : f32
    %312 = vector.broadcast %cst_103 : f32 to vector<4x1xf32>
    %313 = arith.divf %311, %312 : vector<4x1xf32>
    %cst_104 = arith.constant 9.99999997E-7 : f32
    %314 = vector.broadcast %cst_104 : f32 to vector<4x1xf32>
    %315 = arith.addf %313, %314 : vector<4x1xf32>
    %316 = math.rsqrt %315 : vector<4x1xf32>
    %317 = vector.broadcast %316 : vector<4x1xf32> to vector<4x16xf32>
    %318 = arith.mulf %308, %317 : vector<4x16xf32>
    %319 = vector.broadcast %134 : vector<1x16xf32> to vector<4x16xf32>
    %320 = arith.mulf %318, %319 : vector<4x16xf32>
    %321 = arith.truncf %320 : vector<4x16xf32> to vector<4x16xbf16>
    %322 = vector.extract_strided_slice %303 {offsets = [0, 32], sizes = [4, 16], strides = [1, 1]} : vector<4x96xf32> to vector<4x16xf32>
    %323 = arith.mulf %322, %322 : vector<4x16xf32>
    %cst_105 = arith.constant dense<0.000000e+00> : vector<4xf32>
    %324 = vector.multi_reduction <add>, %323, %cst_105 [1] : vector<4x16xf32> to vector<4xf32>
    %325 = vector.shape_cast %324 : vector<4xf32> to vector<4x1xf32>
    %cst_106 = arith.constant 1.600000e+01 : f32
    %326 = vector.broadcast %cst_106 : f32 to vector<4x1xf32>
    %327 = arith.divf %325, %326 : vector<4x1xf32>
    %cst_107 = arith.constant 9.99999997E-7 : f32
    %328 = vector.broadcast %cst_107 : f32 to vector<4x1xf32>
    %329 = arith.addf %327, %328 : vector<4x1xf32>
    %330 = math.rsqrt %329 : vector<4x1xf32>
    %331 = vector.broadcast %330 : vector<4x1xf32> to vector<4x16xf32>
    %332 = arith.mulf %322, %331 : vector<4x16xf32>
    %333 = vector.broadcast %136 : vector<1x16xf32> to vector<4x16xf32>
    %334 = arith.mulf %332, %333 : vector<4x16xf32>
    %335 = arith.truncf %334 : vector<4x16xf32> to vector<4x16xbf16>
    %336 = vector.extract_strided_slice %303 {offsets = [0, 64], sizes = [4, 16], strides = [1, 1]} : vector<4x96xf32> to vector<4x16xf32>
    %337 = arith.truncf %336 : vector<4x16xf32> to vector<4x16xbf16>
    %338 = vector.extract_strided_slice %305 {offsets = [0, 32], sizes = [8, 16], strides = [1, 1]} : vector<8x96xf32> to vector<8x16xf32>
    %339 = arith.mulf %338, %338 : vector<8x16xf32>
    %cst_108 = arith.constant dense<0.000000e+00> : vector<8xf32>
    %340 = vector.multi_reduction <add>, %339, %cst_108 [1] : vector<8x16xf32> to vector<8xf32>
    %341 = vector.shape_cast %340 : vector<8xf32> to vector<8x1xf32>
    %cst_109 = arith.constant 1.600000e+01 : f32
    %342 = vector.broadcast %cst_109 : f32 to vector<8x1xf32>
    %343 = arith.divf %341, %342 : vector<8x1xf32>
    %cst_110 = arith.constant 9.99999997E-7 : f32
    %344 = vector.broadcast %cst_110 : f32 to vector<8x1xf32>
    %345 = arith.addf %343, %344 : vector<8x1xf32>
    %346 = math.rsqrt %345 : vector<8x1xf32>
    %347 = vector.broadcast %346 : vector<8x1xf32> to vector<8x16xf32>
    %348 = arith.mulf %338, %347 : vector<8x16xf32>
    %349 = vector.broadcast %138 : vector<1x16xf32> to vector<8x16xf32>
    %350 = arith.mulf %348, %349 : vector<8x16xf32>
    %351 = arith.truncf %350 : vector<8x16xf32> to vector<8x16xbf16>
    %352 = vector.extract_strided_slice %305 {offsets = [0, 64], sizes = [8, 16], strides = [1, 1]} : vector<8x96xf32> to vector<8x16xf32>
    %353 = arith.truncf %352 : vector<8x16xf32> to vector<8x16xbf16>
    %cst_111 = arith.constant dense<0.000000e+00> : vector<4x4xf32>
    %354 = tpu.matmul %321, %335, %cst_111 {dimension_numbers = #tpu.dot_dimension_numbers<[1], [1], [0], [0], [0, 0, 1, 0], [], []>} : vector<4x16xbf16>, vector<4x16xbf16>, vector<4x4xf32> -> vector<4x4xf32>
    %cst_112 = arith.constant 2.500000e-01 : f32
    %355 = vector.broadcast %cst_112 : f32 to vector<4x4xf32>
    %356 = arith.mulf %354, %355 : vector<4x4xf32>
    %cst_113 = arith.constant dense<0.000000e+00> : vector<4x8xf32>
    %357 = tpu.matmul %321, %351, %cst_113 {dimension_numbers = #tpu.dot_dimension_numbers<[1], [1], [0], [0], [0, 0, 1, 0], [], []>} : vector<4x16xbf16>, vector<8x16xbf16>, vector<4x8xf32> -> vector<4x8xf32>
    %cst_114 = arith.constant 2.500000e-01 : f32
    %358 = vector.broadcast %cst_114 : f32 to vector<4x8xf32>
    %359 = arith.mulf %357, %358 : vector<4x8xf32>
    %360 = vector.broadcast %307 : vector<1x8xf32> to vector<4x8xf32>
    %361 = arith.addf %359, %360 : vector<4x8xf32>
    %cst_115 = arith.constant dense<0xFF800000> : vector<4xf32>
    %362 = vector.multi_reduction <maximumf>, %356, %cst_115 [1] : vector<4x4xf32> to vector<4xf32>
    %363 = vector.shape_cast %362 : vector<4xf32> to vector<4x1xf32>
    %cst_116 = arith.constant dense<0xFF800000> : vector<4xf32>
    %364 = vector.multi_reduction <maximumf>, %361, %cst_116 [1] : vector<4x8xf32> to vector<4xf32>
    %365 = vector.shape_cast %364 : vector<4xf32> to vector<4x1xf32>
    %366 = arith.maximumf %363, %365 : vector<4x1xf32>
    %367 = vector.broadcast %366 : vector<4x1xf32> to vector<4x4xf32>
    %368 = arith.subf %356, %367 : vector<4x4xf32>
    %369 = math.exp %368 : vector<4x4xf32>
    %370 = vector.broadcast %366 : vector<4x1xf32> to vector<4x8xf32>
    %371 = arith.subf %361, %370 : vector<4x8xf32>
    %372 = math.exp %371 : vector<4x8xf32>
    %cst_117 = arith.constant dense<0.000000e+00> : vector<4xf32>
    %373 = vector.multi_reduction <add>, %369, %cst_117 [1] : vector<4x4xf32> to vector<4xf32>
    %374 = vector.shape_cast %373 : vector<4xf32> to vector<4x1xf32>
    %cst_118 = arith.constant dense<0.000000e+00> : vector<4xf32>
    %375 = vector.multi_reduction <add>, %372, %cst_118 [1] : vector<4x8xf32> to vector<4xf32>
    %376 = vector.shape_cast %375 : vector<4xf32> to vector<4x1xf32>
    %377 = arith.addf %374, %376 : vector<4x1xf32>
    %378 = tpu.reciprocal %377 {approx = true} : vector<4x1xf32> -> vector<4x1xf32>
    %379 = arith.truncf %369 : vector<4x4xf32> to vector<4x4xbf16>
    %cst_119 = arith.constant dense<0.000000e+00> : vector<4x16xf32>
    %380 = tpu.matmul %379, %337, %cst_119 {dimension_numbers = #tpu.dot_dimension_numbers<[1], [0], [0], [1], [0, 0, 1, 1], [], []>} : vector<4x4xbf16>, vector<4x16xbf16>, vector<4x16xf32> -> vector<4x16xf32>
    %381 = arith.truncf %372 : vector<4x8xf32> to vector<4x8xbf16>
    %cst_120 = arith.constant dense<0.000000e+00> : vector<4x16xf32>
    %382 = tpu.matmul %381, %353, %cst_120 {dimension_numbers = #tpu.dot_dimension_numbers<[1], [0], [0], [1], [0, 0, 1, 1], [], []>} : vector<4x8xbf16>, vector<8x16xbf16>, vector<4x16xf32> -> vector<4x16xf32>
    %383 = arith.addf %380, %382 : vector<4x16xf32>
    %384 = vector.broadcast %378 : vector<4x1xf32> to vector<4x16xf32>
    %385 = arith.mulf %383, %384 : vector<4x16xf32>
    %386 = vector.extract_strided_slice %303 {offsets = [0, 16], sizes = [4, 16], strides = [1, 1]} : vector<4x96xf32> to vector<4x16xf32>
    %387 = arith.mulf %386, %386 : vector<4x16xf32>
    %cst_121 = arith.constant dense<0.000000e+00> : vector<4xf32>
    %388 = vector.multi_reduction <add>, %387, %cst_121 [1] : vector<4x16xf32> to vector<4xf32>
    %389 = vector.shape_cast %388 : vector<4xf32> to vector<4x1xf32>
    %cst_122 = arith.constant 1.600000e+01 : f32
    %390 = vector.broadcast %cst_122 : f32 to vector<4x1xf32>
    %391 = arith.divf %389, %390 : vector<4x1xf32>
    %cst_123 = arith.constant 9.99999997E-7 : f32
    %392 = vector.broadcast %cst_123 : f32 to vector<4x1xf32>
    %393 = arith.addf %391, %392 : vector<4x1xf32>
    %394 = math.rsqrt %393 : vector<4x1xf32>
    %395 = vector.broadcast %394 : vector<4x1xf32> to vector<4x16xf32>
    %396 = arith.mulf %386, %395 : vector<4x16xf32>
    %397 = vector.broadcast %134 : vector<1x16xf32> to vector<4x16xf32>
    %398 = arith.mulf %396, %397 : vector<4x16xf32>
    %399 = arith.truncf %398 : vector<4x16xf32> to vector<4x16xbf16>
    %400 = vector.extract_strided_slice %303 {offsets = [0, 48], sizes = [4, 16], strides = [1, 1]} : vector<4x96xf32> to vector<4x16xf32>
    %401 = arith.mulf %400, %400 : vector<4x16xf32>
    %cst_124 = arith.constant dense<0.000000e+00> : vector<4xf32>
    %402 = vector.multi_reduction <add>, %401, %cst_124 [1] : vector<4x16xf32> to vector<4xf32>
    %403 = vector.shape_cast %402 : vector<4xf32> to vector<4x1xf32>
    %cst_125 = arith.constant 1.600000e+01 : f32
    %404 = vector.broadcast %cst_125 : f32 to vector<4x1xf32>
    %405 = arith.divf %403, %404 : vector<4x1xf32>
    %cst_126 = arith.constant 9.99999997E-7 : f32
    %406 = vector.broadcast %cst_126 : f32 to vector<4x1xf32>
    %407 = arith.addf %405, %406 : vector<4x1xf32>
    %408 = math.rsqrt %407 : vector<4x1xf32>
    %409 = vector.broadcast %408 : vector<4x1xf32> to vector<4x16xf32>
    %410 = arith.mulf %400, %409 : vector<4x16xf32>
    %411 = vector.broadcast %136 : vector<1x16xf32> to vector<4x16xf32>
    %412 = arith.mulf %410, %411 : vector<4x16xf32>
    %413 = arith.truncf %412 : vector<4x16xf32> to vector<4x16xbf16>
    %414 = vector.extract_strided_slice %303 {offsets = [0, 80], sizes = [4, 16], strides = [1, 1]} : vector<4x96xf32> to vector<4x16xf32>
    %415 = arith.truncf %414 : vector<4x16xf32> to vector<4x16xbf16>
    %416 = vector.extract_strided_slice %305 {offsets = [0, 48], sizes = [8, 16], strides = [1, 1]} : vector<8x96xf32> to vector<8x16xf32>
    %417 = arith.mulf %416, %416 : vector<8x16xf32>
    %cst_127 = arith.constant dense<0.000000e+00> : vector<8xf32>
    %418 = vector.multi_reduction <add>, %417, %cst_127 [1] : vector<8x16xf32> to vector<8xf32>
    %419 = vector.shape_cast %418 : vector<8xf32> to vector<8x1xf32>
    %cst_128 = arith.constant 1.600000e+01 : f32
    %420 = vector.broadcast %cst_128 : f32 to vector<8x1xf32>
    %421 = arith.divf %419, %420 : vector<8x1xf32>
    %cst_129 = arith.constant 9.99999997E-7 : f32
    %422 = vector.broadcast %cst_129 : f32 to vector<8x1xf32>
    %423 = arith.addf %421, %422 : vector<8x1xf32>
    %424 = math.rsqrt %423 : vector<8x1xf32>
    %425 = vector.broadcast %424 : vector<8x1xf32> to vector<8x16xf32>
    %426 = arith.mulf %416, %425 : vector<8x16xf32>
    %427 = vector.broadcast %138 : vector<1x16xf32> to vector<8x16xf32>
    %428 = arith.mulf %426, %427 : vector<8x16xf32>
    %429 = arith.truncf %428 : vector<8x16xf32> to vector<8x16xbf16>
    %430 = vector.extract_strided_slice %305 {offsets = [0, 80], sizes = [8, 16], strides = [1, 1]} : vector<8x96xf32> to vector<8x16xf32>
    %431 = arith.truncf %430 : vector<8x16xf32> to vector<8x16xbf16>
    %cst_130 = arith.constant dense<0.000000e+00> : vector<4x4xf32>
    %432 = tpu.matmul %399, %413, %cst_130 {dimension_numbers = #tpu.dot_dimension_numbers<[1], [1], [0], [0], [0, 0, 1, 0], [], []>} : vector<4x16xbf16>, vector<4x16xbf16>, vector<4x4xf32> -> vector<4x4xf32>
    %cst_131 = arith.constant 2.500000e-01 : f32
    %433 = vector.broadcast %cst_131 : f32 to vector<4x4xf32>
    %434 = arith.mulf %432, %433 : vector<4x4xf32>
    %cst_132 = arith.constant dense<0.000000e+00> : vector<4x8xf32>
    %435 = tpu.matmul %399, %429, %cst_132 {dimension_numbers = #tpu.dot_dimension_numbers<[1], [1], [0], [0], [0, 0, 1, 0], [], []>} : vector<4x16xbf16>, vector<8x16xbf16>, vector<4x8xf32> -> vector<4x8xf32>
    %cst_133 = arith.constant 2.500000e-01 : f32
    %436 = vector.broadcast %cst_133 : f32 to vector<4x8xf32>
    %437 = arith.mulf %435, %436 : vector<4x8xf32>
    %438 = vector.broadcast %307 : vector<1x8xf32> to vector<4x8xf32>
    %439 = arith.addf %437, %438 : vector<4x8xf32>
    %cst_134 = arith.constant dense<0xFF800000> : vector<4xf32>
    %440 = vector.multi_reduction <maximumf>, %434, %cst_134 [1] : vector<4x4xf32> to vector<4xf32>
    %441 = vector.shape_cast %440 : vector<4xf32> to vector<4x1xf32>
    %cst_135 = arith.constant dense<0xFF800000> : vector<4xf32>
    %442 = vector.multi_reduction <maximumf>, %439, %cst_135 [1] : vector<4x8xf32> to vector<4xf32>
    %443 = vector.shape_cast %442 : vector<4xf32> to vector<4x1xf32>
    %444 = arith.maximumf %441, %443 : vector<4x1xf32>
    %445 = vector.broadcast %444 : vector<4x1xf32> to vector<4x4xf32>
    %446 = arith.subf %434, %445 : vector<4x4xf32>
    %447 = math.exp %446 : vector<4x4xf32>
    %448 = vector.broadcast %444 : vector<4x1xf32> to vector<4x8xf32>
    %449 = arith.subf %439, %448 : vector<4x8xf32>
    %450 = math.exp %449 : vector<4x8xf32>
    %cst_136 = arith.constant dense<0.000000e+00> : vector<4xf32>
    %451 = vector.multi_reduction <add>, %447, %cst_136 [1] : vector<4x4xf32> to vector<4xf32>
    %452 = vector.shape_cast %451 : vector<4xf32> to vector<4x1xf32>
    %cst_137 = arith.constant dense<0.000000e+00> : vector<4xf32>
    %453 = vector.multi_reduction <add>, %450, %cst_137 [1] : vector<4x8xf32> to vector<4xf32>
    %454 = vector.shape_cast %453 : vector<4xf32> to vector<4x1xf32>
    %455 = arith.addf %452, %454 : vector<4x1xf32>
    %456 = tpu.reciprocal %455 {approx = true} : vector<4x1xf32> -> vector<4x1xf32>
    %457 = arith.truncf %447 : vector<4x4xf32> to vector<4x4xbf16>
    %cst_138 = arith.constant dense<0.000000e+00> : vector<4x16xf32>
    %458 = tpu.matmul %457, %415, %cst_138 {dimension_numbers = #tpu.dot_dimension_numbers<[1], [0], [0], [1], [0, 0, 1, 1], [], []>} : vector<4x4xbf16>, vector<4x16xbf16>, vector<4x16xf32> -> vector<4x16xf32>
    %459 = arith.truncf %450 : vector<4x8xf32> to vector<4x8xbf16>
    %cst_139 = arith.constant dense<0.000000e+00> : vector<4x16xf32>
    %460 = tpu.matmul %459, %431, %cst_139 {dimension_numbers = #tpu.dot_dimension_numbers<[1], [0], [0], [1], [0, 0, 1, 1], [], []>} : vector<4x8xbf16>, vector<8x16xbf16>, vector<4x16xf32> -> vector<4x16xf32>
    %461 = arith.addf %458, %460 : vector<4x16xf32>
    %462 = vector.broadcast %456 : vector<4x1xf32> to vector<4x16xf32>
    %463 = arith.mulf %461, %462 : vector<4x16xf32>
    %464 = tpu.concatenate %385, %463 in 1 : vector<4x16xf32>, vector<4x16xf32> -> vector<4x32xf32>
    %465 = vector.shape_cast %301 : vector<4x32xf32> to vector<1x4x32xf32>
    %466 = vector.shape_cast %464 : vector<4x32xf32> to vector<1x4x32xf32>
    %467 = tpu.concatenate %465, %466 in 0 : vector<1x4x32xf32>, vector<1x4x32xf32> -> vector<2x4x32xf32>
    %c0_140 = arith.constant 0 : index
    %c0_141 = arith.constant 0 : index
    %c0_142 = arith.constant 0 : index
    %468 = vector.load %arg12[%c0_140, %c0_141, %c0_142] : memref<2x32x32xbf16, #tpu.memory_space<vmem>>, vector<1x32x32xbf16>
    %469 = vector.shape_cast %468 : vector<1x32x32xbf16> to vector<32x32xbf16>
    %470 = vector.shape_cast %467 : vector<2x4x32xf32> to vector<8x32xf32>
    %471 = arith.truncf %470 : vector<8x32xf32> to vector<8x32xbf16>
    %cst_143 = arith.constant dense<0.000000e+00> : vector<8x32xf32>
    %472 = tpu.matmul %471, %469, %cst_143 {dimension_numbers = #tpu.dot_dimension_numbers<[1], [0], [0], [1], [0, 0, 1, 1], [], []>} : vector<8x32xbf16>, vector<32x32xbf16>, vector<8x32xf32> -> vector<8x32xf32>
    %473 = vector.shape_cast %472 : vector<8x32xf32> to vector<2x4x32xf32>
    %c0_144 = arith.constant 0 : index
    %c0_145 = arith.constant 0 : index
    %c0_146 = arith.constant 0 : index
    %474 = vector.load %arg13[%c0_144, %c0_145, %c0_146] : memref<2x1x32xf32, #tpu.memory_space<vmem>>, vector<1x1x32xf32>
    %475 = vector.shape_cast %474 : vector<1x1x32xf32> to vector<1x32xf32>
    %476 = vector.shape_cast %475 : vector<1x32xf32> to vector<1x1x32xf32>
    %477 = vector.broadcast %476 : vector<1x1x32xf32> to vector<2x4x32xf32>
    %478 = arith.addf %473, %477 : vector<2x4x32xf32>
    %479 = vector.broadcast %43 : vector<2x1x32xf32> to vector<2x4x32xf32>
    %480 = arith.mulf %479, %478 : vector<2x4x32xf32>
    %481 = arith.addf %4, %480 : vector<2x4x32xf32>
    %cst_147 = arith.constant dense<0.000000e+00> : vector<2x4xf32>
    %482 = vector.multi_reduction <add>, %481, %cst_147 [2] : vector<2x4x32xf32> to vector<2x4xf32>
    %483 = vector.shape_cast %482 : vector<2x4xf32> to vector<2x4x1xf32>
    %cst_148 = arith.constant 3.200000e+01 : f32
    %484 = vector.broadcast %cst_148 : f32 to vector<2x4x1xf32>
    %485 = arith.divf %483, %484 : vector<2x4x1xf32>
    %486 = vector.broadcast %485 : vector<2x4x1xf32> to vector<2x4x32xf32>
    %487 = arith.subf %481, %486 : vector<2x4x32xf32>
    %488 = arith.mulf %487, %487 : vector<2x4x32xf32>
    %cst_149 = arith.constant dense<0.000000e+00> : vector<2x4xf32>
    %489 = vector.multi_reduction <add>, %488, %cst_149 [2] : vector<2x4x32xf32> to vector<2x4xf32>
    %490 = vector.shape_cast %489 : vector<2x4xf32> to vector<2x4x1xf32>
    %cst_150 = arith.constant 3.200000e+01 : f32
    %491 = vector.broadcast %cst_150 : f32 to vector<2x4x1xf32>
    %492 = arith.divf %490, %491 : vector<2x4x1xf32>
    %cst_151 = arith.constant 9.99999974E-6 : f32
    %493 = vector.broadcast %cst_151 : f32 to vector<2x4x1xf32>
    %494 = arith.addf %492, %493 : vector<2x4x1xf32>
    %495 = math.rsqrt %494 : vector<2x4x1xf32>
    %496 = vector.broadcast %495 : vector<2x4x1xf32> to vector<2x4x32xf32>
    %497 = arith.mulf %487, %496 : vector<2x4x32xf32>
    %cst_152 = arith.constant 1.000000e+00 : f32
    %498 = vector.broadcast %cst_152 : f32 to vector<2x4x32xf32>
    %499 = arith.mulf %497, %498 : vector<2x4x32xf32>
    %cst_153 = arith.constant 0.000000e+00 : f32
    %500 = vector.broadcast %cst_153 : f32 to vector<2x4x32xf32>
    %501 = arith.addf %499, %500 : vector<2x4x32xf32>
    %cst_154 = arith.constant 1.000000e+00 : f32
    %502 = vector.broadcast %cst_154 : f32 to vector<2x1x32xf32>
    %503 = arith.addf %502, %47 : vector<2x1x32xf32>
    %504 = vector.broadcast %503 : vector<2x1x32xf32> to vector<2x4x32xf32>
    %505 = arith.mulf %501, %504 : vector<2x4x32xf32>
    %506 = vector.broadcast %45 : vector<2x1x32xf32> to vector<2x4x32xf32>
    %507 = arith.addf %505, %506 : vector<2x4x32xf32>
    %c0_155 = arith.constant 0 : index
    %c0_156 = arith.constant 0 : index
    %c0_157 = arith.constant 0 : index
    %508 = vector.load %arg14[%c0_155, %c0_156, %c0_157] : memref<2x32x128xbf16, #tpu.memory_space<vmem>>, vector<1x32x128xbf16>
    %509 = vector.shape_cast %508 : vector<1x32x128xbf16> to vector<32x128xbf16>
    %c0_158 = arith.constant 0 : index
    %c0_159 = arith.constant 0 : index
    %c0_160 = arith.constant 0 : index
    %510 = vector.load %arg15[%c0_158, %c0_159, %c0_160] : memref<2x1x128xf32, #tpu.memory_space<vmem>>, vector<1x1x128xf32>
    %511 = vector.shape_cast %510 : vector<1x1x128xf32> to vector<1x128xf32>
    %512 = vector.shape_cast %507 : vector<2x4x32xf32> to vector<8x32xf32>
    %513 = arith.truncf %512 : vector<8x32xf32> to vector<8x32xbf16>
    %cst_161 = arith.constant dense<0.000000e+00> : vector<8x128xf32>
    %514 = tpu.matmul %513, %509, %cst_161 {dimension_numbers = #tpu.dot_dimension_numbers<[1], [0], [0], [1], [0, 0, 1, 1], [], []>} : vector<8x32xbf16>, vector<32x128xbf16>, vector<8x128xf32> -> vector<8x128xf32>
    %515 = vector.broadcast %511 : vector<1x128xf32> to vector<8x128xf32>
    %516 = arith.addf %514, %515 : vector<8x128xf32>
    %517 = vector.shape_cast %516 : vector<8x128xf32> to vector<2x4x128xf32>
    %518 = arith.mulf %517, %517 : vector<2x4x128xf32>
    %519 = arith.mulf %517, %518 : vector<2x4x128xf32>
    %cst_162 = arith.constant 4.471500e-02 : f32
    %520 = vector.broadcast %cst_162 : f32 to vector<2x4x128xf32>
    %521 = arith.mulf %520, %519 : vector<2x4x128xf32>
    %522 = arith.addf %517, %521 : vector<2x4x128xf32>
    %cst_163 = arith.constant 0.797884583 : f32
    %523 = vector.broadcast %cst_163 : f32 to vector<2x4x128xf32>
    %524 = arith.mulf %523, %522 : vector<2x4x128xf32>
    %525 = math.tanh %524 : vector<2x4x128xf32>
    %cst_164 = arith.constant 1.000000e+00 : f32
    %526 = vector.broadcast %cst_164 : f32 to vector<2x4x128xf32>
    %527 = arith.addf %526, %525 : vector<2x4x128xf32>
    %cst_165 = arith.constant 5.000000e-01 : f32
    %528 = vector.broadcast %cst_165 : f32 to vector<2x4x128xf32>
    %529 = arith.mulf %528, %527 : vector<2x4x128xf32>
    %530 = arith.mulf %517, %529 : vector<2x4x128xf32>
    %c0_166 = arith.constant 0 : index
    %c0_167 = arith.constant 0 : index
    %c0_168 = arith.constant 0 : index
    %531 = vector.load %arg16[%c0_166, %c0_167, %c0_168] : memref<2x128x32xbf16, #tpu.memory_space<vmem>>, vector<1x128x32xbf16>
    %532 = vector.shape_cast %531 : vector<1x128x32xbf16> to vector<128x32xbf16>
    %c0_169 = arith.constant 0 : index
    %c0_170 = arith.constant 0 : index
    %c0_171 = arith.constant 0 : index
    %533 = vector.load %arg17[%c0_169, %c0_170, %c0_171] : memref<2x1x32xf32, #tpu.memory_space<vmem>>, vector<1x1x32xf32>
    %534 = vector.shape_cast %533 : vector<1x1x32xf32> to vector<1x32xf32>
    %535 = vector.shape_cast %530 : vector<2x4x128xf32> to vector<8x128xf32>
    %536 = arith.truncf %535 : vector<8x128xf32> to vector<8x128xbf16>
    %cst_172 = arith.constant dense<0.000000e+00> : vector<8x32xf32>
    %537 = tpu.matmul %536, %532, %cst_172 {dimension_numbers = #tpu.dot_dimension_numbers<[1], [0], [0], [1], [0, 0, 1, 1], [], []>} : vector<8x128xbf16>, vector<128x32xbf16>, vector<8x32xf32> -> vector<8x32xf32>
    %538 = vector.broadcast %534 : vector<1x32xf32> to vector<8x32xf32>
    %539 = arith.addf %537, %538 : vector<8x32xf32>
    %540 = vector.shape_cast %539 : vector<8x32xf32> to vector<2x4x32xf32>
    %541 = vector.broadcast %49 : vector<2x1x32xf32> to vector<2x4x32xf32>
    %542 = arith.mulf %541, %540 : vector<2x4x32xf32>
    %543 = arith.addf %481, %542 : vector<2x4x32xf32>
    %c0_173 = arith.constant 0 : index
    %c0_174 = arith.constant 0 : index
    %544 = vector.load %arg18[%c0_173, %c0_174] : memref<32x32xbf16, #tpu.memory_space<vmem>>, vector<32x32xbf16>
    %c0_175 = arith.constant 0 : index
    %c0_176 = arith.constant 0 : index
    %545 = vector.load %arg19[%c0_175, %c0_176] : memref<1x32xf32, #tpu.memory_space<vmem>>, vector<1x32xf32>
    %546 = vector.shape_cast %543 : vector<2x4x32xf32> to vector<8x32xf32>
    %547 = arith.truncf %546 : vector<8x32xf32> to vector<8x32xbf16>
    %cst_177 = arith.constant dense<0.000000e+00> : vector<8x32xf32>
    %548 = tpu.matmul %547, %544, %cst_177 {dimension_numbers = #tpu.dot_dimension_numbers<[1], [0], [0], [1], [0, 0, 1, 1], [], []>} : vector<8x32xbf16>, vector<32x32xbf16>, vector<8x32xf32> -> vector<8x32xf32>
    %549 = vector.broadcast %545 : vector<1x32xf32> to vector<8x32xf32>
    %550 = arith.addf %548, %549 : vector<8x32xf32>
    %551 = vector.shape_cast %550 : vector<8x32xf32> to vector<2x4x32xf32>
    %552 = arith.mulf %551, %551 : vector<2x4x32xf32>
    %cst_178 = arith.constant dense<0.000000e+00> : vector<2x4xf32>
    %553 = vector.multi_reduction <add>, %552, %cst_178 [2] : vector<2x4x32xf32> to vector<2x4xf32>
    %554 = vector.shape_cast %553 : vector<2x4xf32> to vector<2x4x1xf32>
    %cst_179 = arith.constant 1.000000e-24 : f32
    %555 = vector.broadcast %cst_179 : f32 to vector<2x4x1xf32>
    %556 = arith.maximumf %554, %555 : vector<2x4x1xf32>
    %557 = math.rsqrt %556 : vector<2x4x1xf32>
    %558 = vector.broadcast %557 : vector<2x4x1xf32> to vector<2x4x32xf32>
    %559 = arith.mulf %551, %558 : vector<2x4x32xf32>
    %c0_180 = arith.constant 0 : index
    %c0_181 = arith.constant 0 : index
    %c0_182 = arith.constant 0 : index
    %560 = vector.load %arg20[%c0_180, %c0_181, %c0_182] : memref<2x4x32xf32, #tpu.memory_space<vmem>>, vector<2x4x32xf32>
    tpu.vector_store %arg20[%c0_180, %c0_181, %c0_182], %559 {strides = array<i32>} : memref<2x4x32xf32, #tpu.memory_space<vmem>>, vector<2x4x32xf32>,
    return
  }
  func.func @transform_0(%arg0: i32) -> (i32, i32) {
    %c0_i32 = arith.constant 0 : i32
    %c0_i32_0 = arith.constant 0 : i32
    %c0_i32_1 = arith.constant 0 : i32
    return %c0_i32, %c0_i32_0 : i32, i32
  }
  func.func @transform_1(%arg0: i32) -> (i32, i32, i32) {
    %c0_i32 = arith.constant 0 : i32
    %c0_i32_0 = arith.constant 0 : i32
    %c0_i32_1 = arith.constant 0 : i32
    %c0_i32_2 = arith.constant 0 : i32
    return %c0_i32, %c0_i32_0, %c0_i32_1 : i32, i32, i32
  }
  func.func @transform_2(%arg0: i32) -> (i32, i32) {
    %c0_i32 = arith.constant 0 : i32
    %c0_i32_0 = arith.constant 0 : i32
    %c0_i32_1 = arith.constant 0 : i32
    return %c0_i32, %c0_i32_0 : i32, i32
  }
  func.func @transform_3(%arg0: i32) -> (i32, i32) {
    %c0_i32 = arith.constant 0 : i32
    %c0_i32_0 = arith.constant 0 : i32
    %c0_i32_1 = arith.constant 0 : i32
    return %c0_i32, %c0_i32_0 : i32, i32
  }
  func.func @transform_4(%arg0: i32) -> (i32, i32) {
    %c0_i32 = arith.constant 0 : i32
    %c0_i32_0 = arith.constant 0 : i32
    %c0_i32_1 = arith.constant 0 : i32
    return %c0_i32, %c0_i32_0 : i32, i32
  }
  func.func @transform_5(%arg0: i32) -> (i32, i32, i32) {
    %c0_i32 = arith.constant 0 : i32
    %c0_i32_0 = arith.constant 0 : i32
    %c0_i32_1 = arith.constant 0 : i32
    %c0_i32_2 = arith.constant 0 : i32
    return %c0_i32, %c0_i32_0, %c0_i32_1 : i32, i32, i32
  }
  func.func @transform_6(%arg0: i32) -> (i32, i32, i32) {
    %c0_i32 = arith.constant 0 : i32
    %c0_i32_0 = arith.constant 0 : i32
    %c0_i32_1 = arith.constant 0 : i32
    %c0_i32_2 = arith.constant 0 : i32
    return %c0_i32, %c0_i32_0, %c0_i32_1 : i32, i32, i32
  }
  func.func @transform_7(%arg0: i32) -> (i32, i32, i32) {
    %c0_i32 = arith.constant 0 : i32
    %c0_i32_0 = arith.constant 0 : i32
    %c0_i32_1 = arith.constant 0 : i32
    %c0_i32_2 = arith.constant 0 : i32
    return %c0_i32, %c0_i32_0, %c0_i32_1 : i32, i32, i32
  }
  func.func @transform_8(%arg0: i32) -> (i32, i32, i32) {
    %c0_i32 = arith.constant 0 : i32
    %c0_i32_0 = arith.constant 0 : i32
    %c0_i32_1 = arith.constant 0 : i32
    %c0_i32_2 = arith.constant 0 : i32
    return %c0_i32, %c0_i32_0, %c0_i32_1 : i32, i32, i32
  }
  func.func @transform_9(%arg0: i32) -> (i32, i32, i32) {
    %c0_i32 = arith.constant 0 : i32
    %c0_i32_0 = arith.constant 0 : i32
    %c0_i32_1 = arith.constant 0 : i32
    %c0_i32_2 = arith.constant 0 : i32
    return %c0_i32, %c0_i32_0, %c0_i32_1 : i32, i32, i32
  }
  func.func @transform_10(%arg0: i32) -> (i32, i32, i32) {
    %c0_i32 = arith.constant 0 : i32
    %c0_i32_0 = arith.constant 0 : i32
    %c0_i32_1 = arith.constant 0 : i32
    %c0_i32_2 = arith.constant 0 : i32
    return %c0_i32, %c0_i32_0, %c0_i32_1 : i32, i32, i32
  }
  func.func @transform_11(%arg0: i32) -> (i32, i32, i32) {
    %c0_i32 = arith.constant 0 : i32
    %c0_i32_0 = arith.constant 0 : i32
    %c0_i32_1 = arith.constant 0 : i32
    %c0_i32_2 = arith.constant 0 : i32
    return %c0_i32, %c0_i32_0, %c0_i32_1 : i32, i32, i32
  }
  func.func @transform_12(%arg0: i32) -> (i32, i32, i32) {
    %c0_i32 = arith.constant 0 : i32
    %c0_i32_0 = arith.constant 0 : i32
    %c0_i32_1 = arith.constant 0 : i32
    %c0_i32_2 = arith.constant 0 : i32
    return %c0_i32, %c0_i32_0, %c0_i32_1 : i32, i32, i32
  }
  func.func @transform_13(%arg0: i32) -> (i32, i32, i32) {
    %c0_i32 = arith.constant 0 : i32
    %c0_i32_0 = arith.constant 0 : i32
    %c0_i32_1 = arith.constant 0 : i32
    %c0_i32_2 = arith.constant 0 : i32
    return %c0_i32, %c0_i32_0, %c0_i32_1 : i32, i32, i32
  }
  func.func @transform_14(%arg0: i32) -> (i32, i32, i32) {
    %c0_i32 = arith.constant 0 : i32
    %c0_i32_0 = arith.constant 0 : i32
    %c0_i32_1 = arith.constant 0 : i32
    %c0_i32_2 = arith.constant 0 : i32
    return %c0_i32, %c0_i32_0, %c0_i32_1 : i32, i32, i32
  }
  func.func @transform_15(%arg0: i32) -> (i32, i32, i32) {
    %c0_i32 = arith.constant 0 : i32
    %c0_i32_0 = arith.constant 0 : i32
    %c0_i32_1 = arith.constant 0 : i32
    %c0_i32_2 = arith.constant 0 : i32
    return %c0_i32, %c0_i32_0, %c0_i32_1 : i32, i32, i32
  }
  func.func @transform_16(%arg0: i32) -> (i32, i32, i32) {
    %c0_i32 = arith.constant 0 : i32
    %c0_i32_0 = arith.constant 0 : i32
    %c0_i32_1 = arith.constant 0 : i32
    %c0_i32_2 = arith.constant 0 : i32
    return %c0_i32, %c0_i32_0, %c0_i32_1 : i32, i32, i32
  }
  func.func @transform_17(%arg0: i32) -> (i32, i32) {
    %c0_i32 = arith.constant 0 : i32
    %c0_i32_0 = arith.constant 0 : i32
    %c0_i32_1 = arith.constant 0 : i32
    return %c0_i32, %c0_i32_0 : i32, i32
  }
  func.func @transform_18(%arg0: i32) -> (i32, i32) {
    %c0_i32 = arith.constant 0 : i32
    %c0_i32_0 = arith.constant 0 : i32
    %c0_i32_1 = arith.constant 0 : i32
    return %c0_i32, %c0_i32_0 : i32, i32
  }
  func.func @transform_19(%arg0: i32) -> (i32, i32, i32) {
    %c0_i32 = arith.constant 0 : i32
    %c0_i32_0 = arith.constant 0 : i32
    %c0_i32_1 = arith.constant 0 : i32
    %c0_i32_2 = arith.constant 0 : i32
    return %c0_i32, %c0_i32_0, %c0_i32_1 : i32, i32, i32
  }
}

</mosaic_0001>

<bundles_post_ra>
// kernel: patchwise_clip_forward.4
= control target key start
LH: loop header
LB: loop body
LE: loop exit
PB: predicated region body
PF: predicated region fallthrough
CT: control target
= control target key end

     0   :  { %s1495_s0 = inlined_call_operand.vmem [shape: f32[2,8,32], index: 0, kind: input, shape index: {}]   ;;  %s1496_s1 = inlined_call_operand.vmem [shape: f32[2,8], index: 1, kind: input, shape index: {}]   ;;  %s1497_s2 = inlined_call_operand.vmem [shape: f32[2,8], index: 2, kind: input, shape index: {}]   ;;  %s1498_s3 = inlined_call_operand.vmem [shape: f32[1,32], index: 3, kind: input, shape index: {}]   ;;  %s1499_s4 = inlined_call_operand.vmem [shape: f32[1,32], index: 4, kind: input, shape index: {}]   ;;  %s1500_s5 = inlined_call_operand.vmem [shape: f32[1,32], index: 5, kind: input, shape index: {}]   ;;  %s1501_s6 = inlined_call_operand.vmem [shape: f32[1,32], index: 6, kind: input, shape index: {}]   ;;  %s1502_s7 = inlined_call_operand.hbm [shape: bf16[32,96], index: 7, kind: input, shape index: {}]   ;;  %s1503_s8 = inlined_call_operand.vmem [shape: f32[1,96], index: 8, kind: input, shape index: {}]   ;;  %s1504_s9 = inlined_call_operand.hbm [shape: bf16[32,32], index: 9, kind: input, shape index: {}]   ;;  %s1505_s10 = inlined_call_operand.vmem [shape: f32[1,32], index: 10, kind: input, shape index: {}]   ;;  %s1506_s11 = inlined_call_operand.hbm [shape: bf16[32,128], index: 11, kind: input, shape index: {}]   ;;  %s1507_s12 = inlined_call_operand.vmem [shape: f32[1,128], index: 12, kind: input, shape index: {}]   ;;  %s1508_s13 = inlined_call_operand.vmem [shape: bf16[128,32], index: 13, kind: input, shape index: {}]   ;;  %s1509_s14 = inlined_call_operand.vmem [shape: f32[1,32], index: 14, kind: input, shape index: {}]   ;;  %s1510_s15 = inlined_call_operand.vmem [shape: f32[1,32], index: 15, kind: input, shape index: {}]   ;;  %s1511_s16 = inlined_call_operand.vmem [shape: f32[1,32], index: 16, kind: input, shape index: {}]   ;;  %s1512_s17 = inlined_call_operand.vmem [shape: bf16[32,16], index: 17, kind: input, shape index: {}]   ;;  %s1513_s18 = inlined_call_operand.vmem [shape: f32[2,8,32], index: 18, kind: output, shape index: {0}]   ;;  %s1514_s19 = inlined_call_operand.hbm [shape: f32[2,16], index: 19, kind: output, shape index: {1}]  }
   0x1   :  { %1516 = sst [smem:[#allocation12_spill]] %s1495_s0 }
   0x2   :  { %1517 = sst [smem:[#allocation13_spill]] %s1496_s1 }
   0x3   :  { %1518 = sst [smem:[#allocation14_spill]] %s1497_s2 }
   0x4   :  { %1519 = sst [smem:[#allocation15_spill]] %s1498_s3 }
   0x5   :  { %25 = vsyncpa [#allocation3], 0 }
   0x6   :  { %26 = vsyncpa [#allocation6], 0 }
   0x7   :  { %27 = vsyncpa [#allocation4], 0  ;;  %s61_s20 = sshll.u32 %s1504_s9, 4  ;;  %s1182_s21 = smov [#allocation5]   ;;  %s62_s20 = int_to_ptr.hbm [resolvable:$true] %s61_s20 }
   0x8   :  { %s63_s1 = sshll.u32 %s1182_s21, 4  ;;  %s46_s23 = sshll.u32 %s1502_s7, 4  ;;  %s64_s1 = int_to_ptr.vmem [resolvable:$true] %s63_s1  ;;  %s47_s23 = int_to_ptr.hbm [resolvable:$true] %s46_s23 }
   0x9   :  { %s1183_s24 = smov 64   ;;  %s1184_s25 = smov 4  }
   0xa   :  { %69 = dma.hbm_to_vmem [thread:$0]  %s62_s20, 256, %s64_s1, [#allocation6], %s1183_s24, %s1183_s24, %s1184_s25  }
   0xb   :  { %s1185_s3 = smov [#allocation2]   ;;  %s76_s9 = sshll.u32 %s1506_s11, 4  ;;  %s77_s9 = int_to_ptr.hbm [resolvable:$true] %s76_s9 }
   0xc   :  { %s48_s26 = sshll.u32 %s1185_s3, 4  ;;  %s1186_s29 = smov [#allocation7]   ;;  %s49_s26 = int_to_ptr.vmem [resolvable:$true] %s48_s26 }
   0xd   :  { %54 = dma.hbm_to_vmem [thread:$0]  %s47_s23, 256, %s49_s26, [#allocation3], %s1183_s24, %s1183_s24, %s1184_s25  }
   0xe   :  { %s78_s0 = sshll.u32 %s1186_s29, 4  ;;  %s79_s0 = int_to_ptr.vmem [resolvable:$true] %s78_s0 }
   0xf   :  { %84 = dma.hbm_to_vmem [thread:$0]  %s77_s9, 256, %s79_s0, [#allocation6], %s1183_s24, %s1183_s24, %s1184_s25  }
  0x10   :  { %1176 = dma.done.wait [#allocation3], 256  }
  0x11   :  { %1177 = vsyncadd [#allocation3], 4294967040 }
  0x12   :  { %1178 = dma.done.wait [#allocation6], 512  }
  0x13   :  { %1179 = vsyncadd [#allocation6], 4294966784  ;;  %vm157_vm0 = vcmask 261120   ;;  %s1520_s20 = sld [smem:[#allocation12_spill]]  ;;  %v1187_v4 = vmov 32.0   ;;  %v997_v21 = vld [vmem:[#allocation2 + $0x8] sm:$0xff] }
  0x14   :  { %1040 = vrcp.f32 %v1187_v4  ;;  %244 = vmatpush.bf16.msra.mxu0 %v997_v21  ;;  %v996_v23 = vld [vmem:[#allocation2] sm:$0xff]  ;;  %s1521_s2 = sld [smem:[#allocation15_spill]]  ;;  %s1188_s27 = smov 112   ;;  %vm258_vm8 = vcmask 130048   ;;  %vm280_vm10 = vcmask 64512   ;;  %vm298_vm11 = vcmask 1043456  }
  0x15   :  { %v1031_v47 = vld [vmem:[%s1499_s4] ss:$0 sm:$0xff]  ;;  %s1189_s28 = smov 96   ;;  %s1190_s4 = smov 80  }
  0x16   :  { %v1032_v52 = vld [vmem:[%s1503_s8] ss:$0 sm:$0xff]  ;;  %s1522_s29 = sld [smem:[#allocation13_spill]]  ;;  %s1192_s0 = smov 48  }
  0x18   :  { %245 = vmatpush.bf16.msra.mxu0 %v996_v23 }
  0x19   :  { %v1313_v0 = vld [vmem:[%s1520_s20] sm:$0xff]  ;;  %v1320_v2 = vld [vmem:[%s1520_s20 + $0x8] sm:$0xff] }
  0x1a   :  { %v158_v1 = vsel %vm157_vm0, %v1313_v0, 0.0  ;;  %v161_v3 = vsel %vm157_vm0, %v1320_v2, 0.0  ;;  %v1041_v5 = vpop.eup %1040  ;;  %v1030_v42 = vld [vmem:[%s1521_s2] ss:$0 sm:$0xff] }
  0x1b   :  { %159 = vadd.xlane.f32.xlu0 %v158_v1  ;;  %v165_v6 = vmul.f32 32.0, %v1041_v5  ;;  %vm169_vm1 = vweird.f32 %v1041_v5 }
  0x1d   :  { %v166_v7 = vsub.f32 1.0, %v165_v6 }
  0x1f   :  { %v167_v8 = vmul.f32 %v1041_v5, %v166_v7  ;;  %v154_v7 = vld [vmem:[%s1522_s29] sm:$0x3] }
  0x21   :  { %v168_v9 = vadd.f32 %v1041_v5, %v167_v8  ;;  %v148_v8 = vlaneseq }
  0x23   :  { %162 = vadd.xlane.f32.xlu0 %v161_v3  ;;  %v1324_v10 = vsel %vm169_vm1, %v1041_v5, %v168_v9  ;;  %v155_v9 = vsub.f32 1.0, %v154_v7 }
  0x8e   :  { %v160_v11 = vpop.xlane.xlu0 %159 }
  0x8f   :  { %v171_v12 = vmul.f32 %v1324_v10, %v160_v11  ;;  %v149_v11 = vshrl.u32 %v148_v8, 7 }
  0x91   :  { %v173_v13 = vsub.f32 %v1313_v0, %v171_v12  ;;  %v151_v12 = vand.u32 127, %v148_v8 }
  0x93   :  { %v175_v14 = vmul.f32 %v173_v13, %v173_v13  ;;  %vm152_vm9 = vcmp.gt.s32.totalorder %v151_v12, %v149_v11 }
  0x95   :  { %v177_v15 = vsel %vm157_vm0, %v175_v14, 0.0 }
  0x96   :  { %178 = vadd.xlane.f32.xlu1 %v177_v15  ;;  %v163_v16 = vpop.xlane.xlu0 %162  ;;  %v1191_v15 = vmov 0.0  }
  0x97   :  { %v172_v17 = vmul.f32 %v1324_v10, %v163_v16  ;;  %v153_v16 = vsel %vm152_vm9, -1e+30, %v1191_v15 }
  0x99   :  { %v174_v18 = vsub.f32 %v1320_v2, %v172_v17 }
  0x9b   :  { %v176_v19 = vmul.f32 %v174_v18, %v174_v18 }
  0x9d   :  { %v180_v20 = vsel %vm157_vm0, %v176_v19, 0.0 }
  0x9e   :  { %181 = vadd.xlane.f32.xlu1 %v180_v20 }
 0x109   :  { %v179_v22 = vpop.xlane.xlu1 %178 }
 0x10a   :  { %v183_v24 = vmul.f32 %v179_v22, %v1324_v10 }
 0x10c   :  { %v185_v25 = vadd.f32 1e-05, %v183_v24 }
 0x10e   :  { %1042 = vrsqrt.f32 %v185_v25  ;;  %vm193_vm3 = vweird.f32 %v185_v25 }
 0x111   :  { %v182_v26 = vpop.xlane.xlu1 %181 }
 0x112   :  { %v184_v27 = vmul.f32 %v182_v26, %v1324_v10 }
 0x114   :  { %v1043_v28 = vpop.eup %1042  ;;  %v186_v29 = vadd.f32 1e-05, %v184_v27 }
 0x115   :  { %v188_v30 = vmul.f32 %v1043_v28, %v185_v25  ;;  %vm194_vm2 = vweird.f32 %v1043_v28 }
 0x116   :  { %1044 = vrsqrt.f32 %v186_v29  ;;  %vm195_vm4 = vmor %vm193_vm3, %vm194_vm2  ;;  %vm203_vm6 = vweird.f32 %v186_v29 }
 0x117   :  { %v189_v31 = vmul.f32 %v1043_v28, %v188_v30 }
 0x119   :  { %v190_v32 = vmul.f32 0.5, %v189_v31 }
 0x11b   :  { %v191_v33 = vsub.f32 1.5, %v190_v32 }
 0x11c   :  { %v1045_v34 = vpop.eup %1044 }
 0x11d   :  { %v192_v35 = vmul.f32 %v1043_v28, %v191_v33  ;;  %v198_v36 = vmul.f32 %v1045_v34, %v186_v29  ;;  %vm204_vm5 = vweird.f32 %v1045_v34 }
 0x11e   :  { %vm205_vm7 = vmor %vm203_vm6, %vm204_vm5 }
 0x11f   :  { %v199_v37 = vmul.f32 %v1045_v34, %v198_v36  ;;  %v196_v38 = vsel %vm195_vm4, %v1043_v28, %v192_v35 }
 0x120   :  { %v207_v41 = vmul.f32 %v196_v38, %v173_v13  ;;  %v156_v13 = vmul.f32 -1e+30, %v155_v9 }
 0x121   :  { %v200_v39 = vmul.f32 0.5, %v199_v37 }
 0x122   :  { %v212_v46 = vmul.f32 %v1030_v42, %v207_v41  ;;  %v252_v14 = vperm.slane %v156_v13, 0  ;;  %v378_v23 = vperm.slane %v156_v13, 1 }
 0x123   :  { %v201_v40 = vsub.f32 1.5, %v200_v39 }
 0x124   :  { %v217_v49 = vadd.f32 %v1031_v47, %v212_v46  ;;  %v253_v17 = vadd.f32 %v252_v14, %v153_v16  ;;  %v379_v26 = vadd.f32 %v378_v23, %v153_v16 }
 0x125   :  { %v202_v43 = vmul.f32 %v1045_v34, %v201_v40 }
 0x127   :  { %v206_v44 = vsel %vm205_vm7, %v1045_v34, %v202_v43 }
 0x128   :  { %v208_v45 = vmul.f32 %v206_v44, %v174_v18 }
 0x12a   :  { %v213_v48 = vmul.f32 %v1030_v42, %v208_v45 }
 0x12c   :  { %v218_v50 = vadd.f32 %v1031_v47, %v213_v48 }
 0x12e   :  { %v219_v51 = vpack.c.bf16 %v218_v50, %v217_v49 }
 0x130   :  { %924 = vmatmul.msk.bf16.vlgmr.msra.gmra.mxu0 %vm157_vm0, %v219_v51 }
 0x1ad   :  { %v247_v53 = vpop.f32.mrf.mxu0 }
 0x1ae   :  { %v248_v54 = vadd.f32 %v1032_v52, %v247_v53 }
 0x1b0   :  { %v1344_v55 = vpack.c.bf16 %v248_v54, %v248_v54 }
 0x1b2   :  { %315 = vrot.lane.b32.xlu0 %v1344_v55, %s1188_s27  ;;  %256 = vrot.lane.b32.xlu2 %v1344_v55, %s1189_s28 }
 0x1b5   :  { %v249_v56 = vpop.f32.mrf.mxu0 }
 0x1b6   :  { %v250_v57 = vadd.f32 %v1032_v52, %v249_v56 }
 0x1b8   :  { %v1348_v58 = vpack.c.bf16 %v250_v57, %v250_v57 }
 0x1ba   :  { %440 = vrot.lane.b32.xlu1 %v1348_v58, %s1190_s4  ;;  %317 = vrot.lane.b32.xlu2 %v1344_v55, %s1190_s4 }
 0x1c2   :  { %438 = vrot.lane.b32.xlu2 %v1348_v58, %s1188_s27  ;;  %s903_s27 = sshll.u32 %s1514_s19, 4  ;;  %s904_s27 = int_to_ptr.hbm [resolvable:$true] %s903_s27 }
 0x1ca   :  { %382 = vrot.lane.b32.xlu2 %v1348_v58, %s1189_s28 }
 0x20c   :  { %v257_v59 = vpop.permute.xlu2 %256 }
 0x20d   :  { %v263_v60 = vsel %vm258_vm8, %v257_v59, 0 }
 0x20e   :  { %272 = vmatpush.bf16.xpose.msra.mxu1 %v263_v60 }
 0x214   :  { %v318_v61 = vpop.permute.xlu2 %317 }
 0x215   :  { %925 = vmatmul.msk.bf16.vlgmr.msra.gmra.mxu1 %vm258_vm8, %v1344_v55  ;;  %v323_v62 = vsel %vm258_vm8, %v318_v61, 0 }
 0x216   :  { %332 = vmatpush.bf16.xpose.msra.mxu3 %v323_v62 }
 0x21c   :  { %v439_v63 = vpop.permute.xlu2 %438 }
 0x224   :  { %v316_v1 = vpop.permute.xlu0 %315  ;;  %v383_v3 = vpop.permute.xlu2 %382 }
 0x225   :  { %927 = vmatmul.msk.bf16.vlgmr.msra.gmra.mxu3 %vm258_vm8, %v316_v1  ;;  %v388_v4 = vsel %vm258_vm8, %v383_v3, 0 }
 0x226   :  { %397 = vmatpush.bf16.xpose.msrb.mxu0 %v388_v4 }
 0x22c   :  { %v441_v5 = vpop.permute.xlu1 %440 }
 0x22d   :  { %929 = vmatmul.msk.bf16.vlgmr.msrb.gmra.mxu0 %vm258_vm8, %v1348_v58  ;;  %v446_v6 = vsel %vm258_vm8, %v441_v5, 0 }
 0x22e   :  { %455 = vmatpush.bf16.xpose.msrb.mxu3 %v446_v6 }
 0x235   :  { %931 = vmatmul.msk.bf16.vlgmr.msrb.gmra.mxu3 %vm258_vm8, %v439_v63 }
 0x292   :  { %v274_v18 = vpop.f32.mrf.mxu1 }
 0x293   :  { %v278_v19 = vmul.f32 0.25, %v274_v18 }
 0x295   :  { %v279_v20 = vadd.f32 %v278_v19, %v253_v17 }
 0x297   :  { %v281_v21 = vsel %vm280_vm10, %v279_v20, -inf }
 0x298   :  { %282 = vmax.xlane.f32.xlu2 %v281_v21 }
 0x29a   :  { %v276_v22 = vpop.f32.mrf.mxu1 }
 0x2a8   :  { %v334_v24 = vpop.f32.mrf.mxu3 }
 0x2a9   :  { %v338_v25 = vmul.f32 0.25, %v334_v24 }
 0x2aa   :  { %v399_v27 = vpop.f32.mrf.mxu0 }
 0x2ab   :  { %v403_v28 = vmul.f32 0.25, %v399_v27  ;;  %v339_v29 = vadd.f32 %v338_v25, %v253_v17 }
 0x2ad   :  { %v340_v30 = vsel %vm280_vm10, %v339_v29, -inf  ;;  %v1369_v31 = vadd.f32 %v403_v28, %v379_v26 }
 0x2ae   :  { %341 = vmax.xlane.f32.xlu0 %v340_v30  ;;  %v999_v30 = vld [vmem:[#allocation5 + $0x8] sm:$0xff] }
 0x2af   :  { %v405_v54 = vsel %vm280_vm10, %v1369_v31, -inf  ;;  %526 = vmatpush.bf16.msra.mxu0 %v999_v30  ;;  %v1006_v30 = vld [vmem:[%s1508_s13 + $0x20] sm:$0xff] }
 0x2b0   :  { %v336_v32 = vpop.f32.mrf.mxu3 }
 0x2b2   :  { %v401_v33 = vpop.f32.mrf.mxu0 }
 0x2b8   :  { %v457_v34 = vpop.f32.mrf.mxu3 }
 0x2b9   :  { %v461_v35 = vmul.f32 0.25, %v457_v34 }
 0x2bb   :  { %v462_v36 = vadd.f32 %v461_v35, %v379_v26 }
 0x2bd   :  { %v463_v37 = vsel %vm280_vm10, %v462_v36, -inf }
 0x2be   :  { %464 = vmax.xlane.f32.xlu1 %v463_v37 }
 0x2c0   :  { %v459_v38 = vpop.f32.mrf.mxu3 }
 0x2c2   :  { %293 = vrot.lane.b32.xlu0 %v1344_v55, %s1183_s24 }
 0x2ca   :  { %475 = vrot.lane.b32.xlu0 %v1348_v58, %s1192_s0 }
 0x2d2   :  { %417 = vrot.lane.b32.xlu0 %v1348_v58, %s1183_s24  ;;  %s1193_s24 = smov 16  }
 0x2d7   :  { %352 = vrot.lane.b32.xlu1 %v1344_v55, %s1192_s0 }
 0x30b   :  { %v283_v39 = vpop.xlane.xlu2 %282 }
 0x30c   :  { %v284_v40 = vsub.f32 %v279_v20, %v283_v39 }
 0x30e   :  { %v285_v41 = vmul.f32 1.442695, %v284_v40  ;;  %v1033_v40 = vld [vmem:[%s1505_s10] ss:$0 sm:$0xff] }
 0x310   :  { %1046 = vpow2.f32 %v285_v41 }
 0x316   :  { %v1047_v42 = vpop.eup %1046 }
 0x317   :  { %v287_v43 = vsel %vm280_vm10, %v1047_v42, 0.0 }
 0x318   :  { %288 = vadd.xlane.f32.xlu2 %v287_v43 }
 0x321   :  { %v342_v44 = vpop.xlane.xlu0 %341 }
 0x322   :  { %v343_v45 = vsub.f32 %v339_v29, %v342_v44 }
 0x324   :  { %v344_v46 = vmul.f32 1.442695, %v343_v45 }
 0x326   :  { %1048 = vpow2.f32 %v344_v46 }
 0x32c   :  { %v1049_v47 = vpop.eup %1048 }
 0x32d   :  { %v346_v48 = vsel %vm280_vm10, %v1049_v47, 0.0 }
 0x32e   :  { %347 = vadd.xlane.f32.xlu2 %v346_v48 }
 0x331   :  { %v465_v49 = vpop.xlane.xlu1 %464 }
 0x332   :  { %v466_v50 = vsub.f32 %v462_v36, %v465_v49 }
 0x334   :  { %v467_v51 = vmul.f32 1.442695, %v466_v50  ;;  %v294_v52 = vpop.permute.xlu0 %293 }
 0x335   :  { %v300_v53 = vsel %vm298_vm11, %v294_v52, 0 }
 0x336   :  { %1050 = vpow2.f32 %v467_v51  ;;  %309 = vmatpush.bf16.msra.mxu2 %v300_v53  ;;  %406 = vmax.xlane.f32.xlu2 %v405_v54 }
 0x33c   :  { %v1051_v55 = vpop.eup %1050  ;;  %v476_v56 = vpop.permute.xlu0 %475 }
 0x33d   :  { %v481_v57 = vsel %vm298_vm11, %v476_v56, 0  ;;  %v469_v58 = vsel %vm280_vm10, %v1051_v55, 0.0 }
 0x33e   :  { %470 = vadd.xlane.f32.xlu2 %v469_v58 }
 0x344   :  { %v418_v59 = vpop.permute.xlu0 %417 }
 0x345   :  { %v423_v60 = vsel %vm298_vm11, %v418_v59, 0 }
 0x346   :  { %432 = vmatpush.bf16.msrb.mxu1 %v423_v60 }
 0x349   :  { %v353_v61 = vpop.permute.xlu1 %352 }
 0x34a   :  { %v358_v62 = vsel %vm298_vm11, %v353_v61, 0  ;;  %v1000_v61 = vld [vmem:[#allocation7] sm:$0xff] }
 0x34b   :  { %367 = vmatpush.bf16.msrb.mxu2 %v358_v62 }
 0x38b   :  { %v289_v63 = vpop.xlane.xlu2 %288 }
 0x38c   :  { %1052 = vrcp.f32 %v289_v63 }
 0x392   :  { %v1053_v1 = vpop.eup %1052 }
 0x393   :  { %v291_v3 = vmul.f32 %v1053_v1, %v1047_v42 }
 0x395   :  { %v292_v4 = vpack.c.bf16 %v291_v3, %v291_v3 }
 0x397   :  { %926 = vmatmul.msk.bf16.vlgmr.msra.gmra.mxu2 %vm280_vm10, %v292_v4 }
 0x398   :  { %490 = vmatpush.bf16.msra.mxu2 %v481_v57  ;;  %v1001_v57 = vld [vmem:[#allocation7 + $0x8] sm:$0xff] }
 0x399   :  { %615 = vmatpush.bf16.msra.mxu1 %v1001_v57 }
 0x39d   :  { %616 = vmatpush.bf16.msra.mxu1 %v1000_v61 }
 0x3a1   :  { %v348_v5 = vpop.xlane.xlu2 %347 }
 0x3a2   :  { %1054 = vrcp.f32 %v348_v5 }
 0x3a8   :  { %v1055_v6 = vpop.eup %1054 }
 0x3a9   :  { %v350_v7 = vmul.f32 %v1055_v6, %v1049_v47  ;;  %v407_v8 = vpop.xlane.xlu2 %406 }
 0x3aa   :  { %v408_v9 = vsub.f32 %v1369_v31, %v407_v8  ;;  %v998_v31 = vld [vmem:[#allocation5] sm:$0xff] }
 0x3ab   :  { %v351_v11 = vpack.c.bf16 %v350_v7, %v350_v7  ;;  %527 = vmatpush.bf16.msra.mxu0 %v998_v31  ;;  %v1036_v31 = vld [vmem:[%s1507_s12] ss:$0 sm:$0xff] }
 0x3ac   :  { %v409_v12 = vmul.f32 1.442695, %v408_v9 }
 0x3ad   :  { %928 = vmatmul.msk.bf16.vlgmr.msrb.gmra.mxu2 %vm280_vm10, %v351_v11 }
 0x3ae   :  { %1056 = vpow2.f32 %v409_v12 }
 0x3b1   :  { %v471_v13 = vpop.xlane.xlu2 %470 }
 0x3b2   :  { %1058 = vrcp.f32 %v471_v13 }
 0x3b4   :  { %v1057_v14 = vpop.eup %1056 }
 0x3b5   :  { %v411_v15 = vsel %vm280_vm10, %v1057_v14, 0.0 }
 0x3b6   :  { %412 = vadd.xlane.f32.xlu2 %v411_v15 }
 0x3b8   :  { %v1059_v16 = vpop.eup %1058 }
 0x3b9   :  { %v473_v17 = vmul.f32 %v1059_v16, %v1051_v55  ;;  %v1034_v16 = vld [vmem:[%s1500_s5] ss:$0 sm:$0xff]  ;;  %s1523_s5 = sld [smem:[#allocation14_spill]] }
 0x3bb   :  { %v474_v18 = vpack.c.bf16 %v473_v17, %v473_v17 }
 0x3bd   :  { %932 = vmatmul.msk.bf16.vlgmr.msra.gmra.mxu2 %vm280_vm10, %v474_v18 }
 0x41a   :  { %v311_v19 = vpop.f32.mrf.mxu2 }
 0x422   :  { %v313_v20 = vpop.f32.mrf.mxu2 }
 0x423   :  { %v1035_v20 = vld [vmem:[%s1501_s6] ss:$0 sm:$0xff] }
 0x429   :  { %v413_v21 = vpop.xlane.xlu2 %412 }
 0x42a   :  { %1060 = vrcp.f32 %v413_v21 }
 0x430   :  { %v1061_v22 = vpop.eup %1060  ;;  %v369_v23 = vpop.f32.mrf.mxu2 }
 0x431   :  { %v415_v24 = vmul.f32 %v1061_v22, %v1057_v14 }
 0x433   :  { %v416_v25 = vpack.c.bf16 %v415_v24, %v415_v24 }
 0x435   :  { %930 = vmatmul.msk.bf16.vlgmr.msrb.gmra.mxu1 %vm280_vm10, %v416_v25 }
 0x438   :  { %v371_v26 = vpop.f32.mrf.mxu2 }
 0x440   :  { %v492_v27 = vpop.f32.mrf.mxu2 }
 0x441   :  { %v1025_v28 = vpack.i.bf16 %v492_v27, %v369_v23  ;;  %v1009_v27 = vld [vmem:[%s1508_s13 + $0x38] sm:$0xff] }
 0x442   :  { %717 = vmatpush.bf16.msra.mxu3 %v1009_v27 }
 0x443   :  { %1026 = vrot.lane.b32.xlu1 %v1025_v28, %s1193_s24  ;;  %v1008_v28 = vld [vmem:[%s1508_s13 + $0x30] sm:$0xff] }
 0x446   :  { %718 = vmatpush.bf16.msra.mxu3 %v1008_v28 }
 0x448   :  { %v494_v29 = vpop.f32.mrf.mxu2 }
 0x449   :  { %v1007_v29 = vld [vmem:[%s1508_s13 + $0x28] sm:$0xff] }
 0x44a   :  { %719 = vmatpush.bf16.msra.mxu3 %v1007_v29 }
 0x44e   :  { %720 = vmatpush.bf16.msra.mxu3 %v1006_v30  ;;  %v1011_v30 = vld [vmem:[%s1512_s17 + $0x8] sm:$0xff] }
 0x44f   :  { %869 = vmatpush.bf16.msrb.mxu1 %v1011_v30 }
 0x4b2   :  { %v434_v32 = vpop.f32.mrf.mxu1 }
 0x4b5   :  { %v1027_v33 = vpop.permute.xlu1 %1026 }
 0x4b6   :  { %v1029_v34 = vunpack.i.h.bf16 %v1027_v33  ;;  %v1028_v35 = vunpack.i.l.bf16 %v1027_v33 }
 0x4b8   :  { %v377_v36 = vsel %vm258_vm8, %v311_v19, %v1028_v35  ;;  %v500_v37 = vsel %vm258_vm8, %v434_v32, %v1029_v34  ;;  %v1005_v32 = vld [vmem:[%s1508_s13 + $0x18] sm:$0xff]  ;;  %v1004_v35 = vld [vmem:[%s1508_s13 + $0x10] sm:$0xff] }
 0x4b9   :  { %v501_v38 = vpack.c.bf16 %v500_v37, %v377_v36  ;;  %721 = vmatpush.bf16.msra.mxu3 %v1005_v32 }
 0x4ba   :  { %v436_v39 = vpop.f32.mrf.mxu1 }
 0x4bb   :  { %941 = vmatmul.msk.bf16.vlgmr.msra.gmra.mxu0 %vm157_vm0, %v501_v38  ;;  %v1003_v38 = vld [vmem:[%s1508_s13 + $0x8] sm:$0xff] }
 0x4bd   :  { %722 = vmatpush.bf16.msra.mxu3 %v1004_v35 }
 0x4c1   :  { %723 = vmatpush.bf16.msra.mxu3 %v1003_v38 }
 0x538   :  { %v529_v41 = vpop.f32.mrf.mxu0 }
 0x539   :  { %v530_v42 = vadd.f32 %v1033_v40, %v529_v41  ;;  %v1002_v41 = vld [vmem:[%s1508_s13] sm:$0xff] }
 0x53a   :  { %724 = vmatpush.bf16.msra.mxu3 %v1002_v41 }
 0x53b   :  { %v1400_v43 = vadd.f32 %v530_v42, %v1313_v0 }
 0x53d   :  { %v536_v44 = vsel %vm157_vm0, %v1400_v43, 0.0 }
 0x53e   :  { %537 = vadd.xlane.f32.xlu2 %v536_v44 }
 0x540   :  { %v531_v45 = vpop.f32.mrf.mxu0 }
 0x541   :  { %v532_v46 = vadd.f32 %v1033_v40, %v531_v45 }
 0x543   :  { %v1405_v47 = vadd.f32 %v532_v46, %v1320_v2 }
 0x545   :  { %v539_v48 = vsel %vm157_vm0, %v1405_v47, 0.0 }
 0x546   :  { %540 = vadd.xlane.f32.xlu0 %v539_v48 }
 0x5b1   :  { %v538_v49 = vpop.xlane.xlu2 %537 }
 0x5b2   :  { %v542_v50 = vmul.f32 %v538_v49, %v1324_v10 }
 0x5b4   :  { %v544_v51 = vsub.f32 %v1400_v43, %v542_v50 }
 0x5b6   :  { %v546_v0 = vmul.f32 %v544_v51, %v544_v51 }
 0x5b8   :  { %v548_v52 = vsel %vm157_vm0, %v546_v0, 0.0 }
 0x5b9   :  { %v541_v53 = vpop.xlane.xlu0 %540  ;;  %549 = vadd.xlane.f32.xlu1 %v548_v52 }
 0x5ba   :  { %v543_v54 = vmul.f32 %v541_v53, %v1324_v10 }
 0x5bc   :  { %v545_v55 = vsub.f32 %v1405_v47, %v543_v54 }
 0x5be   :  { %v547_v2 = vmul.f32 %v545_v55, %v545_v55 }
 0x5c0   :  { %v551_v56 = vsel %vm157_vm0, %v547_v2, 0.0 }
 0x5c1   :  { %552 = vadd.xlane.f32.xlu2 %v551_v56 }
 0x62c   :  { %v550_v58 = vpop.xlane.xlu1 %549 }
 0x62d   :  { %v554_v59 = vmul.f32 %v550_v58, %v1324_v10 }
 0x62f   :  { %v556_v60 = vadd.f32 1e-05, %v554_v59 }
 0x631   :  { %1062 = vrsqrt.f32 %v556_v60  ;;  %vm564_vm13 = vweird.f32 %v556_v60 }
 0x634   :  { %v553_v62 = vpop.xlane.xlu2 %552 }
 0x635   :  { %v555_v63 = vmul.f32 %v553_v62, %v1324_v10 }
 0x637   :  { %v1063_v1 = vpop.eup %1062  ;;  %v557_v3 = vadd.f32 1e-05, %v555_v63 }
 0x638   :  { %v559_v4 = vmul.f32 %v1063_v1, %v556_v60  ;;  %vm565_vm12 = vweird.f32 %v1063_v1 }
 0x639   :  { %1064 = vrsqrt.f32 %v557_v3  ;;  %vm566_vm14 = vmor %vm564_vm13, %vm565_vm12  ;;  %vm574_vm1 = vweird.f32 %v557_v3 }
 0x63a   :  { %v560_v5 = vmul.f32 %v1063_v1, %v559_v4 }
 0x63c   :  { %v561_v6 = vmul.f32 0.5, %v560_v5 }
 0x63e   :  { %v562_v7 = vsub.f32 1.5, %v561_v6 }
 0x63f   :  { %v1065_v8 = vpop.eup %1064 }
 0x640   :  { %v563_v9 = vmul.f32 %v1063_v1, %v562_v7  ;;  %v569_v11 = vmul.f32 %v1065_v8, %v557_v3  ;;  %vm575_vm15 = vweird.f32 %v1065_v8 }
 0x641   :  { %vm576_vm2 = vmor %vm574_vm1, %vm575_vm15 }
 0x642   :  { %v570_v12 = vmul.f32 %v1065_v8, %v569_v11  ;;  %v567_v13 = vsel %vm566_vm14, %v1063_v1, %v563_v9  ;;  %v1037_v9 = vld [vmem:[%s1509_s14] ss:$0 sm:$0xff] }
 0x643   :  { %v578_v17 = vmul.f32 %v567_v13, %v544_v51 }
 0x644   :  { %v571_v14 = vmul.f32 0.5, %v570_v12 }
 0x645   :  { %v583_v21 = vmul.f32 %v1034_v16, %v578_v17 }
 0x646   :  { %v572_v15 = vsub.f32 1.5, %v571_v14 }
 0x647   :  { %v588_v24 = vadd.f32 %v1035_v20, %v583_v21 }
 0x648   :  { %v573_v18 = vmul.f32 %v1065_v8, %v572_v15 }
 0x64a   :  { %v577_v19 = vsel %vm576_vm2, %v1065_v8, %v573_v18 }
 0x64b   :  { %v579_v22 = vmul.f32 %v577_v19, %v545_v55 }
 0x64d   :  { %v584_v23 = vmul.f32 %v1034_v16, %v579_v22 }
 0x64f   :  { %v589_v25 = vadd.f32 %v1035_v20, %v584_v23 }
 0x651   :  { %v590_v26 = vpack.c.bf16 %v589_v25, %v588_v24 }
 0x653   :  { %950 = vmatmul.msk.bf16.vlgmr.msra.gmra.mxu1 %vm157_vm0, %v590_v26 }
 0x6d0   :  { %v618_v33 = vpop.f32.mrf.mxu1 }
 0x6d1   :  { %v619_v34 = vadd.f32 %v1036_v31, %v618_v33 }
 0x6d3   :  { %v951_v36 = vmul.f32 -1.702, %v619_v34 }
 0x6d5   :  { %v627_v37 = vmul.f32 1.442695, %v951_v36 }
 0x6d7   :  { %1066 = vpow2.f32 %v627_v37 }
 0x6d8   :  { %v620_v39 = vpop.f32.mrf.mxu1 }
 0x6d9   :  { %v621_v40 = vadd.f32 %v1036_v31, %v620_v39 }
 0x6db   :  { %v952_v42 = vmul.f32 -1.702, %v621_v40 }
 0x6dd   :  { %v1067_v44 = vpop.eup %1066  ;;  %v629_v45 = vmul.f32 1.442695, %v952_v42  ;;  %v1038_v42 = vld [vmem:[%s1510_s15] ss:$0 sm:$0xff] }
 0x6de   :  { %v631_v46 = vadd.f32 1.0, %v1067_v44 }
 0x6df   :  { %1068 = vpow2.f32 %v629_v45 }
 0x6e0   :  { %1070 = vrcp.f32 %v631_v46  ;;  %v644_v2 = vand.u32 2147483648, %v631_v46  ;;  %vm638_vm4 = vweird.f32 %v631_v46  ;;  %v642_v56 = vand.u32 2147483647, %v631_v46 }
 0x6e2   :  { %v645_v62 = vor.u32 1.1754944e-38, %v644_v2  ;;  %vm643_vm7 = vcmp.eq.f32.partialorder %v642_v56, 8.507059e+37 }
 0x6e5   :  { %v1069_v48 = vpop.eup %1068 }
 0x6e6   :  { %v1071_v49 = vpop.eup %1070  ;;  %v632_v50 = vadd.f32 1.0, %v1069_v48 }
 0x6e7   :  { %v634_v51 = vmul.f32 %v1071_v49, %v631_v46  ;;  %vm639_vm3 = vweird.f32 %v1071_v49  ;;  %v1039_v46 = vld [vmem:[%s1511_s16] ss:$0 sm:$0xff] }
 0x6e8   :  { %1072 = vrcp.f32 %v632_v50  ;;  %vm640_vm5 = vmor %vm638_vm4, %vm639_vm3  ;;  %v659_v58 = vand.u32 2147483648, %v632_v50  ;;  %v657_v61 = vand.u32 2147483647, %v632_v50  ;;  %vm653_vm8 = vweird.f32 %v632_v50 }
 0x6e9   :  { %v635_v0 = vsub.f32 1.0, %v634_v51  ;;  %vm841_vm3 = vcmask 1040384   ;;  %vm877_vm4 = vcmask 123904  }
 0x6ea   :  { %v660_v3 = vor.u32 1.1754944e-38, %v659_v58  ;;  %vm658_vm11 = vcmp.eq.f32.partialorder %v657_v61, 8.507059e+37 }
 0x6eb   :  { %v636_v52 = vmul.f32 %v1071_v49, %v635_v0  ;;  %v791_v0 = vld [vmem:[%s1523_s5] sm:$0x3] }
 0x6ec   :  { %v815_v2 = vrot.slane %v791_v0, 1 }
 0x6ed   :  { %v637_v54 = vadd.f32 %v1071_v49, %v636_v52 }
 0x6ee   :  { %v1073_v53 = vpop.eup %1072 }
 0x6ef   :  { %v649_v55 = vmul.f32 %v1073_v53, %v632_v50  ;;  %v641_v59 = vsel %vm640_vm5, %v1071_v49, %v637_v54  ;;  %vm654_vm6 = vweird.f32 %v1073_v53 }
 0x6f0   :  { %v646_v1 = vsel %vm643_vm7, %v645_v62, %v641_v59  ;;  %vm655_vm9 = vmor %vm653_vm8, %vm654_vm6 }
 0x6f1   :  { %v650_v57 = vsub.f32 1.0, %v649_v55  ;;  %v663_v6 = vmul.f32 %v646_v1, %v619_v34 }
 0x6f3   :  { %v651_v60 = vmul.f32 %v1073_v53, %v650_v57  ;;  %v1010_v57 = vld [vmem:[%s1512_s17] sm:$0xff]  ;;  %s1194_s17 = smov [#allocation8]  }
 0x6f4   :  { %870 = vmatpush.bf16.msrb.mxu1 %v1010_v57 }
 0x6f5   :  { %v652_v63 = vadd.f32 %v1073_v53, %v651_v60 }
 0x6f7   :  { %v656_v4 = vsel %vm655_vm9, %v1073_v53, %v652_v63 }
 0x6f8   :  { %v661_v5 = vsel %vm658_vm11, %v660_v3, %v656_v4 }
 0x6f9   :  { %v664_v7 = vmul.f32 %v661_v5, %v621_v40 }
 0x6fb   :  { %v665_v8 = vpack.c.bf16 %v664_v7, %v663_v6 }
 0x6fd   :  { %725 = vmatmul.bf16.vlgmr.msra.gmra.mxu3 %v665_v8 }
 0x780   :  { %v726_v11 = vpop.f32.mrf.mxu3 }
 0x781   :  { %v727_v12 = vadd.f32 %v1037_v9, %v726_v11 }
 0x783   :  { %v731_v13 = vadd.f32 %v727_v12, %v1400_v43 }
 0x785   :  { %v735_v14 = vsel %vm157_vm0, %v731_v13, 0.0 }
 0x786   :  { %736 = vadd.xlane.f32.xlu2 %v735_v14 }
 0x788   :  { %v728_v15 = vpop.f32.mrf.mxu3 }
 0x789   :  { %v729_v16 = vadd.f32 %v1037_v9, %v728_v15 }
 0x78b   :  { %v732_v17 = vadd.f32 %v729_v16, %v1405_v47 }
 0x78d   :  { %v738_v18 = vsel %vm157_vm0, %v732_v17, 0.0 }
 0x78e   :  { %739 = vadd.xlane.f32.xlu2 %v738_v18 }
 0x7f9   :  { %v737_v19 = vpop.xlane.xlu2 %736 }
 0x7fa   :  { %v741_v20 = vmul.f32 %v737_v19, %v1324_v10 }
 0x7fc   :  { %v743_v21 = vsub.f32 %v731_v13, %v741_v20 }
 0x7fe   :  { %v745_v22 = vmul.f32 %v743_v21, %v743_v21 }
 0x800   :  { %v747_v23 = vsel %vm157_vm0, %v745_v22, 0.0 }
 0x801   :  { %748 = vadd.xlane.f32.xlu2 %v747_v23  ;;  %v740_v24 = vpop.xlane.xlu2 %739 }
 0x802   :  { %v742_v43 = vmul.f32 %v740_v24, %v1324_v10 }
 0x804   :  { %v744_v25 = vsub.f32 %v732_v17, %v742_v43 }
 0x806   :  { %v746_v26 = vmul.f32 %v744_v25, %v744_v25 }
 0x808   :  { %v750_v27 = vsel %vm157_vm0, %v746_v26, 0.0 }
 0x809   :  { %751 = vadd.xlane.f32.xlu2 %v750_v27 }
 0x874   :  { %v749_v47 = vpop.xlane.xlu2 %748 }
 0x875   :  { %v753_v28 = vmul.f32 %v749_v47, %v1324_v10 }
 0x877   :  { %v755_v29 = vadd.f32 1e-05, %v753_v28 }
 0x879   :  { %1074 = vrsqrt.f32 %v755_v29  ;;  %vm763_vm13 = vweird.f32 %v755_v29 }
 0x87c   :  { %v752_v31 = vpop.xlane.xlu2 %751 }
 0x87d   :  { %v754_v32 = vmul.f32 %v752_v31, %v1324_v10 }
 0x87f   :  { %v1075_v33 = vpop.eup %1074  ;;  %v756_v34 = vadd.f32 1e-05, %v754_v32 }
 0x880   :  { %v758_v35 = vmul.f32 %v1075_v33, %v755_v29  ;;  %vm764_vm12 = vweird.f32 %v1075_v33 }
 0x881   :  { %1076 = vrsqrt.f32 %v756_v34  ;;  %vm765_vm14 = vmor %vm763_vm13, %vm764_vm12  ;;  %vm773_vm1 = vweird.f32 %v756_v34 }
 0x882   :  { %v759_v36 = vmul.f32 %v1075_v33, %v758_v35 }
 0x884   :  { %v760_v37 = vmul.f32 0.5, %v759_v36 }
 0x886   :  { %v761_v38 = vsub.f32 1.5, %v760_v37 }
 0x887   :  { %v1077_v39 = vpop.eup %1076 }
 0x888   :  { %v762_v40 = vmul.f32 %v1075_v33, %v761_v38  ;;  %v768_v41 = vmul.f32 %v1077_v39, %v756_v34  ;;  %vm774_vm15 = vweird.f32 %v1077_v39 }
 0x889   :  { %vm775_vm2 = vmor %vm773_vm1, %vm774_vm15 }
 0x88a   :  { %v766_v44 = vsel %vm765_vm14, %v1075_v33, %v762_v40  ;;  %v769_v45 = vmul.f32 %v1077_v39, %v768_v41 }
 0x88b   :  { %v777_v10 = vmul.f32 %v766_v44, %v743_v21 }
 0x88c   :  { %v770_v48 = vmul.f32 0.5, %v769_v45 }
 0x88d   :  { %v782_v49 = vmul.f32 %v1038_v42, %v777_v10 }
 0x88e   :  { %v771_v50 = vsub.f32 1.5, %v770_v48 }
 0x88f   :  { %v787_v51 = vadd.f32 %v1039_v46, %v782_v49 }
 0x890   :  { %v772_v52 = vmul.f32 %v1077_v39, %v771_v50 }
 0x891   :  { %789 = vst.msk [vmem:[%s1513_s18] sm:$0xff] %vm157_vm0, %v787_v51  ;;  %810 = vmatpush.msrb.mxu2 %v787_v51 }
 0x892   :  { %v776_v53 = vsel %vm775_vm2, %v1077_v39, %v772_v52  ;;  %985 = vmatmul.msk.f32.vlgmr.msrb.gmra.mxu2 %vm280_vm10, %v791_v0 }
 0x893   :  { %v778_v54 = vmul.f32 %v776_v53, %v744_v25 }
 0x895   :  { %v783_v55 = vmul.f32 %v1038_v42, %v778_v54 }
 0x897   :  { %v788_v56 = vadd.f32 %v1039_v46, %v783_v55 }
 0x899   :  { %790 = vst.msk [vmem:[%s1513_s18 + $0x8] sm:$0xff] %vm157_vm0, %v788_v56  ;;  %833 = vmatpush.msrb.mxu0 %v788_v56  ;;  %s901_s18 = sshll.u32 %s1194_s17, 4  ;;  %s902_s18 = int_to_ptr.vmem [resolvable:$true] %s901_s18 }
 0x89a   :  { %986 = vmatmul.msk.f32.vlgmr.msrb.gmra.mxu0 %vm280_vm10, %v815_v2 }
 0x915   :  { %v812_v59 = vpop.f32.mrf.mxu2 }
 0x917   :  { %v835_v58 = vpop.f32.mrf.mxu0 }
 0x918   :  { %v839_v60 = vrot.slane %v835_v58, 7 }
 0x91a   :  { %v842_v61 = vsel %vm841_vm3, %v812_v59, %v839_v60 }
 0x91b   :  { %v843_v62 = vpack.c.bf16 %v842_v61, %v842_v61 }
 0x91d   :  { %995 = vmatmul.msk.bf16.vlgmr.msrb.gmra.mxu1 %vm157_vm0, %v843_v62 }
 0x99a   :  { %v872_v63 = vpop.f32.mrf.mxu1 }
 0x99b   :  { %v876_v1 = vmul.f32 %v872_v63, %v872_v63 }
 0x99d   :  { %v878_v3 = vsel %vm877_vm4, %v876_v1, 0.0 }
 0x99e   :  { %879 = vadd.xlane.f32.xlu0 %v878_v3 }
 0x9a2   :  { %v874_v4 = vpop.f32.mrf.mxu1 }
 0xa11   :  { %v880_v5 = vpop.xlane.xlu0 %879 }
 0xa12   :  { %v881_v6 = vmax.f32 %v880_v5, 1e-24 }
 0xa14   :  { %1078 = vrsqrt.f32 %v881_v6  ;;  %vm888_vm5 = vweird.f32 %v881_v6 }
 0xa1a   :  { %v1079_v7 = vpop.eup %1078 }
 0xa1b   :  { %v883_v8 = vmul.f32 %v1079_v7, %v881_v6  ;;  %vm889_vm10 = vweird.f32 %v1079_v7 }
 0xa1c   :  { %vm890_vm0 = vmor %vm888_vm5, %vm889_vm10 }
 0xa1d   :  { %v884_v9 = vmul.f32 %v1079_v7, %v883_v8 }
 0xa1f   :  { %v885_v11 = vmul.f32 0.5, %v884_v9 }
 0xa21   :  { %v886_v12 = vsub.f32 1.5, %v885_v11 }
 0xa23   :  { %v887_v13 = vmul.f32 %v1079_v7, %v886_v12 }
 0xa25   :  { %v891_v14 = vsel %vm890_vm0, %v1079_v7, %v887_v13 }
 0xa26   :  { %v892_v15 = vmul.f32 %v891_v14, %v872_v63 }
 0xa28   :  { %893 = vst.msk [vmem:[#allocation8] sm:$0x3] %vm877_vm4, %v892_v15 }
 0xa29   :  { %906 = dma.vmem_to_hbm [thread:$0]  %s902_s18, 32, %s904_s27, [#allocation4]  }
 0xa2a   :  { %1180 = dma.done.wait [#allocation4], 32  }
 0xa2b   :  { %1181 = vsyncadd [#allocation4], 4294967264 }
 0xa2c   :  { %913 = vsyncpa [#allocation3], 1 }
 0xa2d   :  { %914 = vsyncpa [#allocation6], 1 }
 0xa2e   :  { %915 = vsyncpa [#allocation4], 1 }

// kernel: patchwise_clip_forward.3
= control target key start
LH: loop header
LB: loop body
LE: loop exit
PB: predicated region body
PF: predicated region fallthrough
CT: control target
= control target key end

     0   :  { %s1742_s0 = inlined_call_operand.vmem [shape: f32[8,192], index: 0, kind: input, shape index: {}]   ;;  %s1743_s1 = inlined_call_operand.vmem [shape: bf16[192,32], index: 1, kind: input, shape index: {}]   ;;  %s1744_s2 = inlined_call_operand.vmem [shape: f32[1,32], index: 2, kind: input, shape index: {}]   ;;  %s1745_s3 = inlined_call_operand.vmem [shape: f32[5,32], index: 3, kind: input, shape index: {}]   ;;  %s1746_s4 = inlined_call_operand.vmem [shape: f32[1,32], index: 4, kind: input, shape index: {}]   ;;  %s1747_s5 = inlined_call_operand.vmem [shape: f32[1,32], index: 5, kind: input, shape index: {}]   ;;  %s1748_s6 = inlined_call_operand.vmem [shape: f32[1,32], index: 6, kind: input, shape index: {}]   ;;  %s1749_s7 = inlined_call_operand.vmem [shape: f32[1,32], index: 7, kind: input, shape index: {}]   ;;  %s1750_s8 = inlined_call_operand.vmem [shape: f32[1,32], index: 8, kind: input, shape index: {}]   ;;  %s1751_s9 = inlined_call_operand.vmem [shape: f32[1,32], index: 9, kind: input, shape index: {}]   ;;  %s1752_s10 = inlined_call_operand.vmem [shape: bf16[32,96], index: 10, kind: input, shape index: {}]   ;;  %s1753_s11 = inlined_call_operand.vmem [shape: f32[1,96], index: 11, kind: input, shape index: {}]   ;;  %s1754_s12 = inlined_call_operand.vmem [shape: bf16[32,32], index: 12, kind: input, shape index: {}]   ;;  %s1755_s13 = inlined_call_operand.vmem [shape: f32[1,32], index: 13, kind: input, shape index: {}]   ;;  %s1756_s14 = inlined_call_operand.vmem [shape: bf16[32,128], index: 14, kind: input, shape index: {}]   ;;  %s1757_s15 = inlined_call_operand.vmem [shape: f32[1,128], index: 15, kind: input, shape index: {}]   ;;  %s1758_s16 = inlined_call_operand.vmem [shape: bf16[128,32], index: 16, kind: input, shape index: {}]   ;;  %s1759_s17 = inlined_call_operand.vmem [shape: f32[1,32], index: 17, kind: input, shape index: {}]   ;;  %s1760_s18 = inlined_call_operand.vmem [shape: f32[1,32], index: 18, kind: input, shape index: {}]   ;;  %s1761_s19 = inlined_call_operand.vmem [shape: f32[1,32], index: 19, kind: input, shape index: {}]   ;;  %s1762_s20 = inlined_call_operand.vmem [shape: bf16[32,16], index: 20, kind: input, shape index: {}]   ;;  %s1763_s21 = inlined_call_operand.hbm [shape: f32[2,16], index: 21, kind: output, shape index: {0}]   ;;  %s1764_s22 = inlined_call_operand.hbm [shape: f32[2,4,32], index: 22, kind: output, shape index: {1}]  }
   0x1   :  { %1767 = sst [smem:[#allocation8_spill]] %s1742_s0 }
   0x2   :  { %1768 = sst [smem:[#allocation9_spill]] %s1743_s1 }
   0x3   :  { %1769 = sst [smem:[#allocation10_spill]] %s1744_s2 }
   0x4   :  { %1770 = sst [smem:[#allocation11_spill]] %s1745_s3 }
   0x5   :  { %1771 = sst [smem:[#allocation12_spill]] %s1746_s4 }
   0x6   :  { %1772 = sst [smem:[#allocation13_spill]] %s1747_s5 }
   0x7   :  { %1773 = sst [smem:[#allocation14_spill]] %s1748_s6 }
   0x8   :  { %28 = vsyncpa [#allocation3], 0  ;;  %s1774_s29 = sld [smem:[#allocation9_spill]] }
   0xe   :  { %v1226_v0 = vld [vmem:[%s1774_s29 + $0x38] sm:$0xff]  ;;  %v1225_v2 = vld [vmem:[%s1774_s29 + $0x30] sm:$0xff]  ;;  %v1224_v4 = vld [vmem:[%s1774_s29 + $0x28] sm:$0xff] }
   0xf   :  { %v1230_v1 = vld [vmem:[%s1774_s29 + $0x58] sm:$0xff]  ;;  %214 = vmatpush.bf16.msra.mxu0 %v1226_v0  ;;  %v1229_v3 = vld [vmem:[%s1774_s29 + $0x50] sm:$0xff]  ;;  %v1228_v5 = vld [vmem:[%s1774_s29 + $0x48] sm:$0xff] }
  0x10   :  { %231 = vmatpush.bf16.msra.mxu1 %v1230_v1 }
  0x13   :  { %215 = vmatpush.bf16.msra.mxu0 %v1225_v2 }
  0x14   :  { %232 = vmatpush.bf16.msra.mxu1 %v1229_v3 }
  0x15   :  { %29 = vsyncpa [#allocation5], 0  ;;  %v1223_v6 = vld [vmem:[%s1774_s29 + $0x20] sm:$0xff]  ;;  %s1775_s0 = sld [smem:[#allocation8_spill]]  ;;  %v1222_v9 = vld [vmem:[%s1774_s29 + $0x18] sm:$0xff]  ;;  %vm210_vm0 = vcmask 523264  }
  0x16   :  { %v1227_v7 = vld [vmem:[%s1774_s29 + $0x40] sm:$0xff]  ;;  %v1221_v11 = vld [vmem:[%s1774_s29 + $0x10] sm:$0xff]  ;;  %v1220_v12 = vld [vmem:[%s1774_s29 + $0x8] sm:$0xff]  ;;  %s1776_s4 = sld [smem:[#allocation11_spill]]  ;;  %vm249_vm1 = vcmask 1040384   ;;  %vm251_vm2 = vcmask 1044480  }
  0x17   :  { %216 = vmatpush.bf16.msra.mxu0 %v1224_v4  ;;  %v1219_v13 = vld [vmem:[%s1774_s29] sm:$0xff]  ;;  %s1777_s5 = sld [smem:[#allocation10_spill]]  ;;  %vm263_vm3 = vcmask 261120   ;;  %v1359_v36 = vmov 32.0   ;;  %s1365_s6 = smov 48  }
  0x18   :  { %233 = vmatpush.bf16.msra.mxu1 %v1228_v5  ;;  %1261 = vrcp.f32 %v1359_v36  ;;  %s1778_s24 = sld [smem:[#allocation12_spill]]  ;;  %s1366_s2 = smov 16  }
  0x19   :  { %s1779_s26 = sld [smem:[#allocation13_spill]] }
  0x1b   :  { %v111_v8 = vld [vmem:[%s1775_s0 + $0x8] sm:$0xff]  ;;  %217 = vmatpush.bf16.msra.mxu0 %v1223_v6  ;;  %v110_v14 = vld [vmem:[%s1775_s0] sm:$0xff]  ;;  %s1360_s0 = smov 96  }
  0x1c   :  { %v113_v10 = vpack.c.bf16 %v111_v8, %v111_v8  ;;  %234 = vmatpush.bf16.msra.mxu1 %v1227_v7  ;;  %v112_v15 = vpack.c.bf16 %v110_v14, %v110_v14  ;;  %v109_v18 = vld [vmem:[%s1776_s4] sm:$0x1f]  ;;  %s1780_s4 = sld [smem:[#allocation14_spill]] }
  0x1d   :  { %v243_v19 = vrot.slane %v109_v18, 1  ;;  %v253_v20 = vrot.slane %v109_v18, 5  ;;  %v240_v22 = vld [vmem:[%s1777_s5] sm:$0x1] }
  0x1e   :  { %v241_v26 = vadd.f32 %v240_v22, %v109_v18  ;;  %v1262_v37 = vpop.eup %1261  ;;  %v1249_v3 = vld [vmem:[%s1778_s24] ss:$0 sm:$0xff]  ;;  %s1364_s24 = smov 80  }
  0x1f   :  { %218 = vmatpush.bf16.msra.mxu0 %v1222_v9  ;;  %1126 = vmatmul.msk.bf16.vlgmr.msra.gmra.mxu1 %vm210_vm0, %v113_v10  ;;  %v271_v38 = vmul.f32 32.0, %v1262_v37  ;;  %vm275_vm4 = vweird.f32 %v1262_v37  ;;  %v1250_v7 = vld [vmem:[%s1779_s26] ss:$0 sm:$0xff] }
  0x21   :  { %v272_v39 = vsub.f32 1.0, %v271_v38 }
  0x23   :  { %219 = vmatpush.bf16.msra.mxu0 %v1221_v11  ;;  %v273_v40 = vmul.f32 %v1262_v37, %v272_v39 }
  0x25   :  { %v274_v41 = vadd.f32 %v1262_v37, %v273_v40 }
  0x27   :  { %220 = vmatpush.bf16.msra.mxu0 %v1220_v12  ;;  %v1535_v42 = vsel %vm275_vm4, %v1262_v37, %v274_v41  ;;  %vm442_vm4 = vcmask 64512  }
  0x2b   :  { %221 = vmatpush.bf16.msra.mxu0 %v1219_v13 }
  0x2e   :  { %222 = vmatmul.bf16.vlgmr.msra.gmra.mxu0 %v112_v15 }
  0x9c   :  { %v236_v16 = vpop.f32.mrf.mxu1 }
  0xa4   :  { %v238_v17 = vpop.f32.mrf.mxu1 }
  0xab   :  { %v223_v21 = vpop.f32.mrf.mxu0 }
  0xac   :  { %v237_v23 = vadd.f32 %v236_v16, %v223_v21 }
  0xae   :  { %v245_v24 = vadd.f32 %v243_v19, %v237_v23  ;;  %v255_v25 = vadd.f32 %v253_v20, %v237_v23 }
  0xb0   :  { %v247_v27 = vrot.slane %v245_v24, 7  ;;  %v257_v28 = vrot.slane %v255_v25, 3 }
  0xb2   :  { %v250_v29 = vsel %vm249_vm1, %v241_v26, %v247_v27  ;;  %v259_v33 = vsel %vm249_vm1, %v241_v26, %v257_v28  ;;  %vm420_vm1 = vcmask 130048  }
  0xb3   :  { %v225_v30 = vpop.f32.mrf.mxu0  ;;  %v252_v31 = vsel %vm251_vm2, %v250_v29, 0.0  ;;  %v260_v34 = vsel %vm251_vm2, %v259_v33, 0.0  ;;  %v1206_v29 = vld [vmem:[%s1752_s10 + $0x8] sm:$0xff] }
  0xb4   :  { %v264_v32 = vsel %vm263_vm3, %v252_v31, 0.0  ;;  %v267_v35 = vsel %vm263_vm3, %v260_v34, 0.0  ;;  %408 = vmatpush.bf16.msra.mxu2 %v1206_v29 }
  0xb5   :  { %265 = vadd.xlane.f32.xlu0 %v264_v32 }
  0xbd   :  { %268 = vadd.xlane.f32.xlu0 %v267_v35 }
 0x128   :  { %v266_v43 = vpop.xlane.xlu0 %265 }
 0x129   :  { %v277_v44 = vmul.f32 %v1535_v42, %v266_v43 }
 0x12b   :  { %v279_v45 = vsub.f32 %v252_v31, %v277_v44  ;;  %v1205_v31 = vld [vmem:[%s1752_s10] sm:$0xff] }
 0x12c   :  { %409 = vmatpush.bf16.msra.mxu2 %v1205_v31 }
 0x12d   :  { %v281_v46 = vmul.f32 %v279_v45, %v279_v45 }
 0x12f   :  { %v283_v47 = vsel %vm263_vm3, %v281_v46, 0.0 }
 0x130   :  { %284 = vadd.xlane.f32.xlu1 %v283_v47  ;;  %v269_v48 = vpop.xlane.xlu0 %268 }
 0x131   :  { %v278_v49 = vmul.f32 %v1535_v42, %v269_v48 }
 0x133   :  { %v280_v50 = vsub.f32 %v260_v34, %v278_v49 }
 0x135   :  { %v282_v51 = vmul.f32 %v280_v50, %v280_v50 }
 0x137   :  { %v286_v52 = vsel %vm263_vm3, %v282_v51, 0.0  ;;  %v1251_v51 = vld [vmem:[%s1780_s4] ss:$0 sm:$0xff] }
 0x138   :  { %287 = vadd.xlane.f32.xlu1 %v286_v52 }
 0x1a3   :  { %v285_v53 = vpop.xlane.xlu1 %284 }
 0x1a4   :  { %v289_v54 = vmul.f32 %v285_v53, %v1535_v42 }
 0x1a6   :  { %v291_v55 = vadd.f32 1e-05, %v289_v54 }
 0x1a8   :  { %1263 = vrsqrt.f32 %v291_v55  ;;  %vm299_vm6 = vweird.f32 %v291_v55 }
 0x1ab   :  { %v288_v56 = vpop.xlane.xlu1 %287 }
 0x1ac   :  { %v290_v57 = vmul.f32 %v288_v56, %v1535_v42  ;;  %v1252_v56 = vld [vmem:[%s1749_s7] ss:$0 sm:$0xff]  ;;  %s1361_s7 = smov 112  }
 0x1ae   :  { %v1264_v58 = vpop.eup %1263  ;;  %v292_v59 = vadd.f32 1e-05, %v290_v57 }
 0x1af   :  { %v294_v60 = vmul.f32 %v1264_v58, %v291_v55  ;;  %vm300_vm5 = vweird.f32 %v1264_v58 }
 0x1b0   :  { %1265 = vrsqrt.f32 %v292_v59  ;;  %vm301_vm7 = vmor %vm299_vm6, %vm300_vm5  ;;  %vm309_vm9 = vweird.f32 %v292_v59  ;;  %vm460_vm5 = vcmask 1043456  }
 0x1b1   :  { %v295_v61 = vmul.f32 %v1264_v58, %v294_v60 }
 0x1b3   :  { %v296_v62 = vmul.f32 0.5, %v295_v61  ;;  %v1253_v61 = vld [vmem:[%s1753_s11] ss:$0 sm:$0xff]  ;;  %s1363_s11 = smov 64  }
 0x1b5   :  { %v297_v63 = vsub.f32 1.5, %v296_v62 }
 0x1b6   :  { %v1266_v0 = vpop.eup %1265 }
 0x1b7   :  { %v298_v1 = vmul.f32 %v1264_v58, %v297_v63  ;;  %v304_v2 = vmul.f32 %v1266_v0, %v292_v59  ;;  %vm310_vm8 = vweird.f32 %v1266_v0 }
 0x1b8   :  { %vm311_vm10 = vmor %vm309_vm9, %vm310_vm8 }
 0x1b9   :  { %v302_v4 = vsel %vm301_vm7, %v1264_v58, %v298_v1  ;;  %v305_v5 = vmul.f32 %v1266_v0, %v304_v2 }
 0x1ba   :  { %v313_v6 = vmul.f32 %v302_v4, %v279_v45 }
 0x1bb   :  { %v306_v8 = vmul.f32 0.5, %v305_v5 }
 0x1bc   :  { %v318_v9 = vmul.f32 %v1249_v3, %v313_v6  ;;  %v325_v6 = vlaneseq }
 0x1bd   :  { %v307_v10 = vsub.f32 1.5, %v306_v8 }
 0x1be   :  { %v1549_v11 = vadd.f32 %v1250_v7, %v318_v9  ;;  %v1362_v9 = vmov 0.0  }
 0x1bf   :  { %v308_v12 = vmul.f32 %v1266_v0, %v307_v10 }
 0x1c0   :  { %v329_v13 = vsel %vm263_vm3, %v1549_v11, 0.0 }
 0x1c1   :  { %v312_v14 = vsel %vm311_vm10, %v1266_v0, %v308_v12  ;;  %330 = vadd.xlane.f32.xlu2 %v329_v13 }
 0x1c2   :  { %v314_v15 = vmul.f32 %v312_v14, %v280_v50 }
 0x1c4   :  { %v319_v16 = vmul.f32 %v1249_v3, %v314_v15 }
 0x1c6   :  { %v1553_v17 = vadd.f32 %v1250_v7, %v319_v16  ;;  %v326_v7 = vand.u32 127, %v325_v6 }
 0x1c8   :  { %v332_v18 = vsel %vm263_vm3, %v1553_v17, 0.0  ;;  %vm327_vm2 = vcmp.ge.s32.totalorder %v326_v7, 5 }
 0x1c9   :  { %333 = vadd.xlane.f32.xlu2 %v332_v18  ;;  %v328_v10 = vsel %vm327_vm2, -1e+30, %v1362_v9 }
 0x234   :  { %v331_v19 = vpop.xlane.xlu2 %330 }
 0x235   :  { %v335_v20 = vmul.f32 %v331_v19, %v1535_v42 }
 0x237   :  { %v337_v21 = vsub.f32 %v1549_v11, %v335_v20 }
 0x239   :  { %v339_v22 = vmul.f32 %v337_v21, %v337_v21 }
 0x23b   :  { %v341_v23 = vsel %vm263_vm3, %v339_v22, 0.0 }
 0x23c   :  { %342 = vadd.xlane.f32.xlu0 %v341_v23  ;;  %v334_v24 = vpop.xlane.xlu2 %333 }
 0x23d   :  { %v336_v25 = vmul.f32 %v334_v24, %v1535_v42 }
 0x23f   :  { %v338_v26 = vsub.f32 %v1553_v17, %v336_v25 }
 0x241   :  { %v340_v27 = vmul.f32 %v338_v26, %v338_v26 }
 0x243   :  { %v344_v28 = vsel %vm263_vm3, %v340_v27, 0.0 }
 0x244   :  { %345 = vadd.xlane.f32.xlu1 %v344_v28 }
 0x2af   :  { %v343_v30 = vpop.xlane.xlu0 %342 }
 0x2b0   :  { %v347_v32 = vmul.f32 %v343_v30, %v1535_v42 }
 0x2b2   :  { %v349_v33 = vadd.f32 1e-05, %v347_v32 }
 0x2b4   :  { %1267 = vrsqrt.f32 %v349_v33  ;;  %vm357_vm12 = vweird.f32 %v349_v33 }
 0x2b7   :  { %v346_v34 = vpop.xlane.xlu1 %345 }
 0x2b8   :  { %v348_v35 = vmul.f32 %v346_v34, %v1535_v42 }
 0x2ba   :  { %v1268_v36 = vpop.eup %1267  ;;  %v350_v37 = vadd.f32 1e-05, %v348_v35 }
 0x2bb   :  { %v352_v38 = vmul.f32 %v1268_v36, %v349_v33  ;;  %vm358_vm11 = vweird.f32 %v1268_v36 }
 0x2bc   :  { %1269 = vrsqrt.f32 %v350_v37  ;;  %vm359_vm13 = vmor %vm357_vm12, %vm358_vm11  ;;  %vm367_vm15 = vweird.f32 %v350_v37 }
 0x2bd   :  { %v353_v39 = vmul.f32 %v1268_v36, %v352_v38 }
 0x2bf   :  { %v354_v40 = vmul.f32 0.5, %v353_v39 }
 0x2c1   :  { %v355_v41 = vsub.f32 1.5, %v354_v40 }
 0x2c2   :  { %v1270_v43 = vpop.eup %1269 }
 0x2c3   :  { %v356_v44 = vmul.f32 %v1268_v36, %v355_v41  ;;  %v362_v45 = vmul.f32 %v1270_v43, %v350_v37  ;;  %vm368_vm14 = vweird.f32 %v1270_v43 }
 0x2c4   :  { %vm369_vm0 = vmor %vm367_vm15, %vm368_vm14 }
 0x2c5   :  { %v363_v46 = vmul.f32 %v1270_v43, %v362_v45  ;;  %v360_v47 = vsel %vm359_vm13, %v1268_v36, %v356_v44 }
 0x2c6   :  { %v371_v50 = vmul.f32 %v360_v47, %v337_v21 }
 0x2c7   :  { %v364_v48 = vmul.f32 0.5, %v363_v46 }
 0x2c8   :  { %v376_v55 = vmul.f32 %v1251_v51, %v371_v50 }
 0x2c9   :  { %v365_v49 = vsub.f32 1.5, %v364_v48 }
 0x2ca   :  { %v381_v58 = vadd.f32 %v1252_v56, %v376_v55 }
 0x2cb   :  { %v366_v52 = vmul.f32 %v1270_v43, %v365_v49 }
 0x2cd   :  { %v370_v53 = vsel %vm369_vm0, %v1270_v43, %v366_v52 }
 0x2ce   :  { %v372_v54 = vmul.f32 %v370_v53, %v338_v26 }
 0x2d0   :  { %v377_v57 = vmul.f32 %v1251_v51, %v372_v54 }
 0x2d2   :  { %v382_v59 = vadd.f32 %v1252_v56, %v377_v57 }
 0x2d4   :  { %v383_v60 = vpack.c.bf16 %v382_v59, %v381_v58 }
 0x2d6   :  { %1135 = vmatmul.msk.bf16.vlgmr.msra.gmra.mxu2 %vm263_vm3, %v383_v60 }
 0x359   :  { %v411_v62 = vpop.f32.mrf.mxu2 }
 0x35a   :  { %v412_v63 = vadd.f32 %v1253_v61, %v411_v62 }
 0x35c   :  { %v1581_v0 = vpack.c.bf16 %v412_v63, %v412_v63 }
 0x35e   :  { %418 = vrot.lane.b32.xlu2 %v1581_v0, %s1360_s0 }
 0x361   :  { %v413_v1 = vpop.f32.mrf.mxu2 }
 0x362   :  { %v414_v2 = vadd.f32 %v1253_v61, %v413_v1 }
 0x364   :  { %v1584_v3 = vpack.c.bf16 %v414_v2, %v414_v2 }
 0x366   :  { %542 = vrot.lane.b32.xlu2 %v1584_v3, %s1360_s0 }
 0x36e   :  { %477 = vrot.lane.b32.xlu2 %v1581_v0, %s1361_s7 }
 0x376   :  { %598 = vrot.lane.b32.xlu2 %v1584_v3, %s1361_s7 }
 0x3b8   :  { %v419_v4 = vpop.permute.xlu2 %418 }
 0x3b9   :  { %v425_v5 = vsel %vm420_vm1, %v419_v4, 0 }
 0x3ba   :  { %434 = vmatpush.bf16.xpose.msra.mxu3 %v425_v5 }
 0x3c0   :  { %v543_v22 = vpop.permute.xlu2 %542 }
 0x3c1   :  { %1136 = vmatmul.msk.bf16.vlgmr.msra.gmra.mxu3 %vm420_vm1, %v1581_v0  ;;  %v548_v25 = vsel %vm420_vm1, %v543_v22, 0 }
 0x3c8   :  { %v478_v34 = vpop.permute.xlu2 %477 }
 0x3d0   :  { %v599_v35 = vpop.permute.xlu2 %598 }
 0x444   :  { %v436_v8 = vpop.f32.mrf.mxu3 }
 0x445   :  { %v440_v12 = vmul.f32 0.25, %v436_v8 }
 0x447   :  { %v441_v13 = vadd.f32 %v440_v12, %v328_v10 }
 0x449   :  { %v443_v14 = vsel %vm442_vm4, %v441_v13, -inf }
 0x44a   :  { %444 = vmax.xlane.f32.xlu0 %v443_v14 }
 0x44c   :  { %v438_v15 = vpop.f32.mrf.mxu3 }
 0x45e   :  { %455 = vrot.lane.b32.xlu0 %v1581_v0, %s1363_s11 }
 0x466   :  { %600 = vrot.lane.b32.xlu0 %v1584_v3, %s1364_s24 }
 0x4bd   :  { %v445_v16 = vpop.xlane.xlu0 %444 }
 0x4be   :  { %v446_v18 = vsub.f32 %v441_v13, %v445_v16 }
 0x4c0   :  { %v447_v19 = vmul.f32 1.442695, %v446_v18 }
 0x4c2   :  { %1271 = vpow2.f32 %v447_v19 }
 0x4c8   :  { %v1272_v20 = vpop.eup %1271 }
 0x4c9   :  { %v449_v21 = vsel %vm442_vm4, %v1272_v20, 0.0 }
 0x4ca   :  { %450 = vadd.xlane.f32.xlu1 %v449_v21 }
 0x4d0   :  { %v456_v23 = vpop.permute.xlu0 %455 }
 0x4d1   :  { %v462_v24 = vsel %vm460_vm5, %v456_v23, 0 }
 0x4d2   :  { %471 = vmatpush.bf16.msrb.mxu2 %v462_v24 }
 0x4d6   :  { %557 = vmatpush.bf16.xpose.msra.mxu2 %v548_v25  ;;  %v1208_v25 = vld [vmem:[%s1754_s12 + $0x8] sm:$0xff] }
 0x4d8   :  { %v601_v29 = vpop.permute.xlu0 %600 }
 0x4d9   :  { %v606_v31 = vsel %vm420_vm1, %v601_v29, 0 }
 0x4e3   :  { %479 = vrot.lane.b32.xlu1 %v1581_v0, %s1364_s24  ;;  %s1061_s24 = sshll.u32 %s1764_s22, 4  ;;  %s1062_s24 = int_to_ptr.hbm [resolvable:$true] %s1061_s24 }
 0x53d   :  { %v451_v26 = vpop.xlane.xlu1 %450 }
 0x53e   :  { %1273 = vrcp.f32 %v451_v26 }
 0x544   :  { %v1274_v27 = vpop.eup %1273 }
 0x545   :  { %v453_v28 = vmul.f32 %v1274_v27, %v1272_v20 }
 0x547   :  { %v454_v30 = vpack.c.bf16 %v453_v28, %v453_v28 }
 0x549   :  { %1137 = vmatmul.msk.bf16.vlgmr.msrb.gmra.mxu2 %vm442_vm4, %v454_v30 }
 0x54a   :  { %615 = vmatpush.bf16.xpose.msrb.mxu2 %v606_v31 }
 0x555   :  { %v480_v32 = vpop.permute.xlu1 %479 }
 0x556   :  { %v485_v33 = vsel %vm420_vm1, %v480_v32, 0 }
 0x557   :  { %494 = vmatpush.bf16.xpose.msrb.mxu3 %v485_v33  ;;  %v1207_v33 = vld [vmem:[%s1754_s12] sm:$0xff] }
 0x559   :  { %1140 = vmatmul.msk.bf16.vlgmr.msra.gmra.mxu2 %vm420_vm1, %v1584_v3 }
 0x55a   :  { %686 = vmatpush.bf16.msra.mxu2 %v1208_v25 }
 0x55e   :  { %1138 = vmatmul.msk.bf16.vlgmr.msrb.gmra.mxu3 %vm420_vm1, %v478_v34  ;;  %687 = vmatpush.bf16.msra.mxu2 %v1207_v33 }
 0x569   :  { %1142 = vmatmul.msk.bf16.vlgmr.msrb.gmra.mxu2 %vm420_vm1, %v599_v35 }
 0x5cc   :  { %v1607_v36 = vpop.f32.mrf.mxu2 }
 0x5d4   :  { %v475_v37 = vpop.f32.mrf.mxu2 }
 0x5dc   :  { %v559_v38 = vpop.f32.mrf.mxu2 }
 0x5dd   :  { %v563_v39 = vmul.f32 0.25, %v559_v38 }
 0x5df   :  { %v564_v40 = vadd.f32 %v563_v39, %v328_v10 }
 0x5e1   :  { %v496_v41 = vpop.f32.mrf.mxu3  ;;  %v565_v43 = vsel %vm442_vm4, %v564_v40, -inf }
 0x5e2   :  { %v500_v44 = vmul.f32 0.25, %v496_v41  ;;  %566 = vmax.xlane.f32.xlu2 %v565_v43  ;;  %v1254_v41 = vld [vmem:[%s1755_s13] ss:$0 sm:$0xff] }
 0x5e4   :  { %v561_v45 = vpop.f32.mrf.mxu2  ;;  %v501_v46 = vadd.f32 %v500_v44, %v328_v10 }
 0x5e6   :  { %v502_v47 = vsel %vm442_vm4, %v501_v46, -inf }
 0x5e7   :  { %503 = vmax.xlane.f32.xlu1 %v502_v47 }
 0x5e9   :  { %v498_v48 = vpop.f32.mrf.mxu3 }
 0x5ec   :  { %v617_v49 = vpop.f32.mrf.mxu2 }
 0x5ed   :  { %v621_v50 = vmul.f32 0.25, %v617_v49 }
 0x5ef   :  { %v622_v51 = vadd.f32 %v621_v50, %v328_v10 }
 0x5f1   :  { %v623_v52 = vsel %vm442_vm4, %v622_v51, -inf }
 0x5f2   :  { %624 = vmax.xlane.f32.xlu0 %v623_v52 }
 0x5f4   :  { %v619_v53 = vpop.f32.mrf.mxu2 }
 0x606   :  { %514 = vrot.lane.b32.xlu0 %v1581_v0, %s1365_s6 }
 0x655   :  { %v567_v54 = vpop.xlane.xlu2 %566 }
 0x656   :  { %v568_v55 = vsub.f32 %v564_v40, %v567_v54 }
 0x658   :  { %v569_v56 = vmul.f32 1.442695, %v568_v55 }
 0x65a   :  { %1275 = vpow2.f32 %v569_v56  ;;  %v504_v57 = vpop.xlane.xlu1 %503 }
 0x65b   :  { %v505_v58 = vsub.f32 %v501_v46, %v504_v57 }
 0x65d   :  { %v506_v59 = vmul.f32 1.442695, %v505_v58  ;;  %v1210_v58 = vld [vmem:[%s1756_s14 + $0x8] sm:$0xff] }
 0x65f   :  { %1277 = vpow2.f32 %v506_v59 }
 0x660   :  { %v1276_v60 = vpop.eup %1275 }
 0x661   :  { %v571_v61 = vsel %vm442_vm4, %v1276_v60, 0.0 }
 0x662   :  { %572 = vadd.xlane.f32.xlu2 %v571_v61 }
 0x665   :  { %v1278_v62 = vpop.eup %1277  ;;  %v625_v63 = vpop.xlane.xlu0 %624 }
 0x666   :  { %v626_v1 = vsub.f32 %v622_v51, %v625_v63  ;;  %v508_v2 = vsel %vm442_vm4, %v1278_v62, 0.0 }
 0x667   :  { %509 = vadd.xlane.f32.xlu1 %v508_v2 }
 0x668   :  { %v627_v4 = vmul.f32 1.442695, %v626_v1 }
 0x66a   :  { %1279 = vpow2.f32 %v627_v4 }
 0x670   :  { %v1280_v0 = vpop.eup %1279 }
 0x671   :  { %v629_v5 = vsel %vm442_vm4, %v1280_v0, 0.0 }
 0x672   :  { %630 = vadd.xlane.f32.xlu2 %v629_v5 }
 0x678   :  { %v515_v6 = vpop.permute.xlu0 %514 }
 0x679   :  { %v520_v7 = vsel %vm460_vm5, %v515_v6, 0 }
 0x67a   :  { %529 = vmatpush.bf16.msrb.mxu1 %v520_v7 }
 0x680   :  { %635 = vrot.lane.b32.xlu1 %v1584_v3, %s1365_s6  ;;  %s1369_s6 = smov [#allocation2]  }
 0x681   :  { %s1049_s25 = sshll.u32 %s1369_s6, 4  ;;  %s1050_s25 = int_to_ptr.vmem [resolvable:$true] %s1049_s25 }
 0x68a   :  { %577 = vrot.lane.b32.xlu2 %v1584_v3, %s1363_s11 }
 0x6d5   :  { %v573_v9 = vpop.xlane.xlu2 %572 }
 0x6da   :  { %v510_v8 = vpop.xlane.xlu1 %509 }
 0x6db   :  { %1281 = vrcp.f32 %v510_v8 }
 0x6dc   :  { %1283 = vrcp.f32 %v573_v9 }
 0x6e1   :  { %v1282_v10 = vpop.eup %1281 }
 0x6e2   :  { %v512_v12 = vmul.f32 %v1282_v10, %v1278_v62  ;;  %v1284_v15 = vpop.eup %1283  ;;  %v1209_v62 = vld [vmem:[%s1756_s14] sm:$0xff] }
 0x6e3   :  { %v575_v16 = vmul.f32 %v1284_v15, %v1276_v60 }
 0x6e4   :  { %v513_v13 = vpack.c.bf16 %v512_v12, %v512_v12 }
 0x6e5   :  { %v631_v14 = vpop.xlane.xlu2 %630  ;;  %v576_v21 = vpack.c.bf16 %v575_v16, %v575_v16  ;;  %v1255_v16 = vld [vmem:[%s1750_s8] ss:$0 sm:$0xff] }
 0x6e6   :  { %1139 = vmatmul.msk.bf16.vlgmr.msrb.gmra.mxu1 %vm442_vm4, %v513_v13  ;;  %1285 = vrcp.f32 %v631_v14 }
 0x6ec   :  { %v1286_v19 = vpop.eup %1285 }
 0x6ed   :  { %v578_v18 = vpop.permute.xlu2 %577  ;;  %v633_v3 = vmul.f32 %v1286_v19, %v1280_v0 }
 0x6ee   :  { %v583_v20 = vsel %vm460_vm5, %v578_v18, 0 }
 0x6ef   :  { %592 = vmatpush.bf16.msra.mxu3 %v583_v20  ;;  %v634_v24 = vpack.c.bf16 %v633_v3, %v633_v3 }
 0x6f2   :  { %v636_v22 = vpop.permute.xlu1 %635  ;;  %1141 = vmatmul.msk.bf16.vlgmr.msra.gmra.mxu3 %vm442_vm4, %v576_v21  ;;  %v1256_v21 = vld [vmem:[%s1751_s9] ss:$0 sm:$0xff]  ;;  %s1368_s9 = smov 4  }
 0x6f3   :  { %v641_v23 = vsel %vm460_vm5, %v636_v22, 0  ;;  %775 = vmatpush.bf16.msrb.mxu3 %v1210_v58  ;;  %vm1011_vm5 = vcmask 258049  }
 0x6f4   :  { %650 = vmatpush.bf16.msra.mxu1 %v641_v23 }
 0x6f7   :  { %1143 = vmatmul.msk.bf16.vlgmr.msra.gmra.mxu1 %vm442_vm4, %v634_v24  ;;  %776 = vmatpush.bf16.msrb.mxu3 %v1209_v62 }
 0x763   :  { %v531_v26 = vpop.f32.mrf.mxu1 }
 0x76b   :  { %v533_v27 = vpop.f32.mrf.mxu1 }
 0x76c   :  { %v1218_v27 = vld [vmem:[%s1758_s16 + $0x38] sm:$0xff] }
 0x76d   :  { %877 = vmatpush.bf16.msrb.mxu0 %v1218_v27 }
 0x774   :  { %v652_v28 = vpop.f32.mrf.mxu1 }
 0x775   :  { %v1244_v29 = vpack.i.bf16 %v652_v28, %v531_v26  ;;  %v594_v30 = vpop.f32.mrf.mxu3  ;;  %v1217_v28 = vld [vmem:[%s1758_s16 + $0x30] sm:$0xff] }
 0x776   :  { %878 = vmatpush.bf16.msrb.mxu0 %v1217_v28 }
 0x777   :  { %1245 = vrot.lane.b32.xlu0 %v1244_v29, %s1366_s2  ;;  %v1216_v29 = vld [vmem:[%s1758_s16 + $0x28] sm:$0xff]  ;;  %s1051_s2 = sshll.u32 %s1763_s21, 4  ;;  %s1052_s2 = int_to_ptr.hbm [resolvable:$true] %s1051_s2 }
 0x77a   :  { %879 = vmatpush.bf16.msrb.mxu0 %v1216_v29 }
 0x77c   :  { %v654_v31 = vpop.f32.mrf.mxu1 }
 0x77d   :  { %v596_v32 = vpop.f32.mrf.mxu3  ;;  %v1257_v31 = vld [vmem:[%s1757_s15] ss:$0 sm:$0xff] }
 0x77e   :  { %v1214_v32 = vld [vmem:[%s1758_s16 + $0x18] sm:$0xff] }
 0x7e9   :  { %v1246_v34 = vpop.permute.xlu0 %1245 }
 0x7ea   :  { %v1248_v35 = vunpack.i.h.bf16 %v1246_v34  ;;  %v1247_v37 = vunpack.i.l.bf16 %v1246_v34 }
 0x7ec   :  { %v539_v38 = vsel %vm420_vm1, %v1607_v36, %v1247_v37  ;;  %v660_v39 = vsel %vm420_vm1, %v594_v30, %v1248_v35  ;;  %v1215_v30 = vld [vmem:[%s1758_s16 + $0x20] sm:$0xff]  ;;  %v1213_v35 = vld [vmem:[%s1758_s16 + $0x10] sm:$0xff] }
 0x7ed   :  { %v661_v40 = vpack.c.bf16 %v660_v39, %v539_v38  ;;  %880 = vmatpush.bf16.msrb.mxu0 %v1215_v30  ;;  %v1212_v39 = vld [vmem:[%s1758_s16 + $0x8] sm:$0xff] }
 0x7ef   :  { %1152 = vmatmul.msk.bf16.vlgmr.msra.gmra.mxu2 %vm263_vm3, %v661_v40 }
 0x7f1   :  { %881 = vmatpush.bf16.msrb.mxu0 %v1214_v32 }
 0x7f5   :  { %882 = vmatpush.bf16.msrb.mxu0 %v1213_v35 }
 0x7f9   :  { %883 = vmatpush.bf16.msrb.mxu0 %v1212_v39 }
 0x872   :  { %v689_v43 = vpop.f32.mrf.mxu2 }
 0x873   :  { %v690_v44 = vadd.f32 %v1254_v41, %v689_v43  ;;  %v1211_v43 = vld [vmem:[%s1758_s16] sm:$0xff] }
 0x874   :  { %884 = vmatpush.bf16.msrb.mxu0 %v1211_v43 }
 0x875   :  { %v1639_v45 = vadd.f32 %v690_v44, %v1549_v11 }
 0x877   :  { %v696_v46 = vsel %vm263_vm3, %v1639_v45, 0.0 }
 0x878   :  { %697 = vadd.xlane.f32.xlu0 %v696_v46 }
 0x87a   :  { %v691_v47 = vpop.f32.mrf.mxu2 }
 0x87b   :  { %v692_v36 = vadd.f32 %v1254_v41, %v691_v47 }
 0x87d   :  { %v1644_v48 = vadd.f32 %v692_v36, %v1553_v17 }
 0x87f   :  { %v699_v49 = vsel %vm263_vm3, %v1644_v48, 0.0 }
 0x880   :  { %700 = vadd.xlane.f32.xlu1 %v699_v49 }
 0x8eb   :  { %v698_v50 = vpop.xlane.xlu0 %697 }
 0x8ec   :  { %v702_v51 = vmul.f32 %v698_v50, %v1535_v42 }
 0x8ee   :  { %v704_v52 = vsub.f32 %v1639_v45, %v702_v51 }
 0x8f0   :  { %v706_v11 = vmul.f32 %v704_v52, %v704_v52 }
 0x8f2   :  { %v708_v53 = vsel %vm263_vm3, %v706_v11, 0.0 }
 0x8f3   :  { %v701_v54 = vpop.xlane.xlu1 %700  ;;  %709 = vadd.xlane.f32.xlu2 %v708_v53 }
 0x8f4   :  { %v703_v55 = vmul.f32 %v701_v54, %v1535_v42 }
 0x8f6   :  { %v705_v56 = vsub.f32 %v1644_v48, %v703_v55 }
 0x8f8   :  { %v707_v17 = vmul.f32 %v705_v56, %v705_v56 }
 0x8fa   :  { %v711_v57 = vsel %vm263_vm3, %v707_v17, 0.0 }
 0x8fb   :  { %712 = vadd.xlane.f32.xlu0 %v711_v57 }
 0x966   :  { %v710_v59 = vpop.xlane.xlu2 %709 }
 0x967   :  { %v714_v60 = vmul.f32 %v710_v59, %v1535_v42 }
 0x969   :  { %v716_v61 = vadd.f32 1e-05, %v714_v60 }
 0x96b   :  { %1287 = vrsqrt.f32 %v716_v61  ;;  %vm724_vm7 = vweird.f32 %v716_v61 }
 0x96e   :  { %v713_v63 = vpop.xlane.xlu0 %712 }
 0x96f   :  { %v715_v1 = vmul.f32 %v713_v63, %v1535_v42 }
 0x971   :  { %v1288_v2 = vpop.eup %1287  ;;  %v717_v4 = vadd.f32 1e-05, %v715_v1 }
 0x972   :  { %v719_v0 = vmul.f32 %v1288_v2, %v716_v61  ;;  %vm725_vm6 = vweird.f32 %v1288_v2 }
 0x973   :  { %1289 = vrsqrt.f32 %v717_v4  ;;  %vm726_vm8 = vmor %vm724_vm7, %vm725_vm6  ;;  %vm734_vm10 = vweird.f32 %v717_v4  ;;  %vm898_vm6 = vcmask 1041409   ;;  %vm901_vm7 = vcmask 254976  }
 0x974   :  { %v720_v5 = vmul.f32 %v1288_v2, %v719_v0 }
 0x976   :  { %v721_v6 = vmul.f32 0.5, %v720_v5 }
 0x978   :  { %v722_v7 = vsub.f32 1.5, %v721_v6 }
 0x979   :  { %v1290_v8 = vpop.eup %1289 }
 0x97a   :  { %v723_v9 = vmul.f32 %v1288_v2, %v722_v7  ;;  %v729_v10 = vmul.f32 %v1290_v8, %v717_v4  ;;  %vm735_vm9 = vweird.f32 %v1290_v8 }
 0x97b   :  { %vm736_vm11 = vmor %vm734_vm10, %vm735_vm9 }
 0x97c   :  { %v730_v12 = vmul.f32 %v1290_v8, %v729_v10  ;;  %v727_v13 = vsel %vm726_vm8, %v1288_v2, %v723_v9  ;;  %v1258_v9 = vld [vmem:[%s1759_s17] ss:$0 sm:$0xff] }
 0x97d   :  { %v738_v18 = vmul.f32 %v727_v13, %v704_v52 }
 0x97e   :  { %v731_v14 = vmul.f32 0.5, %v730_v12 }
 0x97f   :  { %v743_v3 = vmul.f32 %v1255_v16, %v738_v18 }
 0x980   :  { %v732_v15 = vsub.f32 1.5, %v731_v14 }
 0x981   :  { %v748_v24 = vadd.f32 %v1256_v21, %v743_v3 }
 0x982   :  { %v733_v19 = vmul.f32 %v1290_v8, %v732_v15 }
 0x984   :  { %v737_v20 = vsel %vm736_vm11, %v1290_v8, %v733_v19 }
 0x985   :  { %v739_v22 = vmul.f32 %v737_v20, %v705_v56 }
 0x987   :  { %v744_v23 = vmul.f32 %v1255_v16, %v739_v22 }
 0x989   :  { %v749_v25 = vadd.f32 %v1256_v21, %v744_v23 }
 0x98b   :  { %v750_v26 = vpack.c.bf16 %v749_v25, %v748_v24 }
 0x98d   :  { %1161 = vmatmul.msk.bf16.vlgmr.msrb.gmra.mxu3 %vm263_vm3, %v750_v26 }
 0xa10   :  { %v778_v33 = vpop.f32.mrf.mxu3 }
 0xa11   :  { %v779_v34 = vadd.f32 %v1257_v31, %v778_v33 }
 0xa13   :  { %v1162_v37 = vmul.f32 -1.702, %v779_v34 }
 0xa15   :  { %v787_v38 = vmul.f32 1.442695, %v1162_v37 }
 0xa17   :  { %1291 = vpow2.f32 %v787_v38 }
 0xa18   :  { %v780_v40 = vpop.f32.mrf.mxu3 }
 0xa19   :  { %v781_v41 = vadd.f32 %v1257_v31, %v780_v40 }
 0xa1b   :  { %v1163_v44 = vmul.f32 -1.702, %v781_v41 }
 0xa1d   :  { %v1292_v46 = vpop.eup %1291  ;;  %v789_v47 = vmul.f32 1.442695, %v1163_v44 }
 0xa1e   :  { %v791_v36 = vadd.f32 1.0, %v1292_v46  ;;  %v1232_v46 = vld [vmem:[%s1762_s20 + $0x8] sm:$0xff] }
 0xa1f   :  { %1293 = vpow2.f32 %v789_v47  ;;  %984 = vmatpush.bf16.msrb.mxu1 %v1232_v46 }
 0xa20   :  { %1295 = vrcp.f32 %v791_v36  ;;  %v804_v17 = vand.u32 2147483648, %v791_v36  ;;  %vm798_vm13 = vweird.f32 %v791_v36  ;;  %v802_v57 = vand.u32 2147483647, %v791_v36 }
 0xa22   :  { %v805_v63 = vor.u32 1.1754944e-38, %v804_v17  ;;  %vm803_vm0 = vcmp.eq.f32.partialorder %v802_v57, 8.507059e+37 }
 0xa25   :  { %v1294_v49 = vpop.eup %1293 }
 0xa26   :  { %v1296_v50 = vpop.eup %1295  ;;  %v792_v51 = vadd.f32 1.0, %v1294_v49 }
 0xa27   :  { %v794_v52 = vmul.f32 %v1296_v50, %v791_v36  ;;  %vm799_vm12 = vweird.f32 %v1296_v50  ;;  %v1231_v36 = vld [vmem:[%s1762_s20] sm:$0xff] }
 0xa28   :  { %1297 = vrcp.f32 %v792_v51  ;;  %vm800_vm14 = vmor %vm798_vm13, %vm799_vm12  ;;  %v819_v59 = vand.u32 2147483648, %v792_v51  ;;  %v817_v62 = vand.u32 2147483647, %v792_v51  ;;  %vm813_vm1 = vweird.f32 %v792_v51  ;;  %985 = vmatpush.bf16.msrb.mxu1 %v1231_v36 }
 0xa29   :  { %v795_v11 = vsub.f32 1.0, %v794_v52 }
 0xa2a   :  { %v820_v4 = vor.u32 1.1754944e-38, %v819_v59  ;;  %vm818_vm4 = vcmp.eq.f32.partialorder %v817_v62, 8.507059e+37 }
 0xa2b   :  { %v796_v53 = vmul.f32 %v1296_v50, %v795_v11 }
 0xa2d   :  { %v797_v55 = vadd.f32 %v1296_v50, %v796_v53 }
 0xa2e   :  { %v1298_v54 = vpop.eup %1297 }
 0xa2f   :  { %v809_v56 = vmul.f32 %v1298_v54, %v792_v51  ;;  %v801_v60 = vsel %vm800_vm14, %v1296_v50, %v797_v55  ;;  %vm814_vm15 = vweird.f32 %v1298_v54 }
 0xa30   :  { %v806_v2 = vsel %vm803_vm0, %v805_v63, %v801_v60  ;;  %vm815_vm2 = vmor %vm813_vm1, %vm814_vm15  ;;  %vm992_vm1 = vcmask 123904  }
 0xa31   :  { %v810_v58 = vsub.f32 1.0, %v809_v56  ;;  %v823_v6 = vmul.f32 %v806_v2, %v779_v34 }
 0xa33   :  { %v811_v61 = vmul.f32 %v1298_v54, %v810_v58  ;;  %v1259_v58 = vld [vmem:[%s1760_s18] ss:$0 sm:$0xff]  ;;  %s1367_s18 = smov [#allocation4]  }
 0xa35   :  { %v812_v1 = vadd.f32 %v1298_v54, %v811_v61  ;;  %v1260_v61 = vld [vmem:[%s1761_s19] ss:$0 sm:$0xff]  ;;  %s1059_s19 = sshll.u32 %s1367_s18, 4  ;;  %s1060_s19 = int_to_ptr.vmem [resolvable:$true] %s1059_s19 }
 0xa37   :  { %v816_v0 = vsel %vm815_vm2, %v1298_v54, %v812_v1 }
 0xa38   :  { %v821_v5 = vsel %vm818_vm4, %v820_v4, %v816_v0 }
 0xa39   :  { %v824_v7 = vmul.f32 %v821_v5, %v781_v41 }
 0xa3b   :  { %v825_v8 = vpack.c.bf16 %v824_v7, %v823_v6 }
 0xa3d   :  { %885 = vmatmul.bf16.vlgmr.msrb.gmra.mxu0 %v825_v8 }
 0xaba   :  { %v886_v10 = vpop.f32.mrf.mxu0 }
 0xabb   :  { %v887_v12 = vadd.f32 %v1258_v9, %v886_v10 }
 0xabd   :  { %v891_v13 = vadd.f32 %v887_v12, %v1639_v45 }
 0xabf   :  { %v1009_v14 = vmul.f32 %v891_v13, %v891_v13 }
 0xac1   :  { %v1012_v15 = vsel %vm1011_vm5, %v1009_v14, 0.0 }
 0xac2   :  { %v888_v16 = vpop.f32.mrf.mxu0  ;;  %1013 = vadd.xlane.f32.xlu2 %v1012_v15 }
 0xac3   :  { %v889_v18 = vadd.f32 %v1258_v9, %v888_v16 }
 0xac5   :  { %v1702_v19 = vadd.f32 %v889_v18, %v1644_v48 }
 0xac7   :  { %v897_v20 = vrot.slane %v1702_v19, 7  ;;  %v1010_v41 = vmul.f32 %v1702_v19, %v1702_v19 }
 0xac9   :  { %v899_v21 = vsel %vm898_vm6, %v897_v20, %v891_v13  ;;  %v1015_v43 = vsel %vm1011_vm5, %v1010_v41, 0.0 }
 0xaca   :  { %v902_v3 = vsel %vm901_vm7, %v899_v21, 0.0 }
 0xacb   :  { %903 = vadd.xlane.f32.xlu1 %v902_v3 }
 0xb35   :  { %v1014_v45 = vpop.xlane.xlu2 %1013 }
 0xb36   :  { %v1018_v22 = vmax.f32 %v1014_v45, 1e-24 }
 0xb38   :  { %1299 = vrsqrt.f32 %v1018_v22  ;;  %vm1026_vm9 = vweird.f32 %v1018_v22 }
 0xb3e   :  { %v1300_v23 = vpop.eup %1299  ;;  %v904_v24 = vpop.xlane.xlu1 %903 }
 0xb3f   :  { %v1021_v25 = vmul.f32 %v1300_v23, %v1018_v22  ;;  %v905_v26 = vmul.f32 %v904_v24, %v1535_v42  ;;  %vm1027_vm8 = vweird.f32 %v1300_v23 }
 0xb40   :  { %vm1028_vm10 = vmor %vm1026_vm9, %vm1027_vm8 }
 0xb41   :  { %v1022_v27 = vmul.f32 %v1300_v23, %v1021_v25  ;;  %v907_v48 = vrot.slane %v905_v26, 1  ;;  %v910_v29 = vsub.f32 %v891_v13, %v905_v26 }
 0xb43   :  { %v1023_v28 = vmul.f32 0.5, %v1022_v27  ;;  %v911_v30 = vsub.f32 %v1702_v19, %v907_v48  ;;  %v912_v34 = vmul.f32 %v910_v29, %v910_v29 }
 0xb45   :  { %v1024_v31 = vsub.f32 1.5, %v1023_v28  ;;  %v913_v32 = vmul.f32 %v911_v30, %v911_v30 }
 0xb47   :  { %v1025_v33 = vmul.f32 %v1300_v23, %v1024_v31  ;;  %v916_v35 = vrot.slane %v913_v32, 7 }
 0xb49   :  { %v1029_v37 = vsel %vm1028_vm10, %v1300_v23, %v1025_v33  ;;  %v917_v38 = vsel %vm898_vm6, %v916_v35, %v912_v34 }
 0xb4a   :  { %v1040_v39 = vmul.f32 %v1029_v37, %v891_v13  ;;  %v919_v40 = vsel %vm901_vm7, %v917_v38, 0.0 }
 0xb4b   :  { %920 = vadd.xlane.f32.xlu0 %v919_v40 }
 0xb4c   :  { %1042 = vst.msk [vmem:[#allocation4 - $0x1] sm:$0x1e] %vm1011_vm5, %v1040_v39 }
 0xb53   :  { %1016 = vadd.xlane.f32.xlu0 %v1015_v43 }
 0xbbe   :  { %v921_v44 = vpop.xlane.xlu0 %920 }
 0xbbf   :  { %v922_v47 = vmul.f32 %v921_v44, %v1535_v42 }
 0xbc1   :  { %v923_v49 = vadd.f32 1e-05, %v922_v47 }
 0xbc3   :  { %1301 = vrsqrt.f32 %v923_v49  ;;  %vm930_vm12 = vweird.f32 %v923_v49 }
 0xbc6   :  { %v1017_v50 = vpop.xlane.xlu0 %1016 }
 0xbc7   :  { %v1019_v51 = vmax.f32 %v1017_v50, 1e-24 }
 0xbc9   :  { %v1302_v52 = vpop.eup %1301  ;;  %1303 = vrsqrt.f32 %v1019_v51  ;;  %vm1036_vm15 = vweird.f32 %v1019_v51 }
 0xbca   :  { %v925_v11 = vmul.f32 %v1302_v52, %v923_v49  ;;  %vm931_vm11 = vweird.f32 %v1302_v52 }
 0xbcb   :  { %vm932_vm13 = vmor %vm930_vm12, %vm931_vm11 }
 0xbcc   :  { %v926_v53 = vmul.f32 %v1302_v52, %v925_v11 }
 0xbce   :  { %v927_v54 = vmul.f32 0.5, %v926_v53 }
 0xbcf   :  { %v1304_v55 = vpop.eup %1303 }
 0xbd0   :  { %v928_v56 = vsub.f32 1.5, %v927_v54  ;;  %v1031_v17 = vmul.f32 %v1304_v55, %v1019_v51  ;;  %vm1037_vm14 = vweird.f32 %v1304_v55 }
 0xbd1   :  { %vm1038_vm0 = vmor %vm1036_vm15, %vm1037_vm14 }
 0xbd2   :  { %v929_v42 = vmul.f32 %v1302_v52, %v928_v56  ;;  %v1032_v57 = vmul.f32 %v1304_v55, %v1031_v17 }
 0xbd4   :  { %v933_v59 = vsel %vm932_vm13, %v1302_v52, %v929_v42  ;;  %v1033_v60 = vmul.f32 0.5, %v1032_v57 }
 0xbd5   :  { %v935_v62 = vrot.slane %v933_v59, 1  ;;  %v938_v63 = vmul.f32 %v933_v59, %v910_v29 }
 0xbd6   :  { %v1034_v1 = vsub.f32 1.5, %v1033_v60 }
 0xbd7   :  { %v939_v2 = vmul.f32 %v935_v62, %v911_v30  ;;  %v943_v4 = vmul.f32 %v1259_v58, %v938_v63 }
 0xbd8   :  { %v1035_v0 = vmul.f32 %v1304_v55, %v1034_v1 }
 0xbd9   :  { %v944_v5 = vmul.f32 %v1259_v58, %v939_v2  ;;  %v948_v6 = vadd.f32 %v1260_v61, %v943_v4 }
 0xbda   :  { %v1039_v7 = vsel %vm1038_vm0, %v1304_v55, %v1035_v0 }
 0xbdb   :  { %v949_v8 = vadd.f32 %v1260_v61, %v944_v5  ;;  %v1041_v9 = vmul.f32 %v1039_v7, %v1702_v19  ;;  %v950_v10 = vpack.c.bf16 %v948_v6, %v948_v6 }
 0xbdd   :  { %v951_v12 = vpack.c.bf16 %v949_v8, %v949_v8  ;;  %1043 = vst.msk [vmem:[#allocation4 + $0x3] sm:$0x1e] %vm1011_vm5, %v1041_v9  ;;  %v958_v14 = vunpack.c.l.b16 %v950_v10 }
 0xbde   :  { %1067 = dma.vmem_to_hbm [thread:$0]  %s1060_s19, 128, %s1062_s24, [#allocation5], %s1363_s11, %s1363_s11, %s1368_s9  }
 0xbdf   :  { %v959_v13 = vunpack.c.l.b16 %v951_v12 }
 0xbe1   :  { %v960_v15 = vrot.slane %v959_v13, 7 }
 0xbe3   :  { %v961_v16 = vsel %vm898_vm6, %v960_v15, %v958_v14 }
 0xbe4   :  { %v962_v18 = vpack.c.b16 %v961_v16, %v961_v16 }
 0xbe6   :  { %1204 = vmatmul.msk.bf16.vlgmr.msrb.gmra.mxu1 %vm263_vm3, %v962_v18 }
 0xc63   :  { %v987_v20 = vpop.f32.mrf.mxu1 }
 0xc64   :  { %v991_v21 = vmul.f32 %v987_v20, %v987_v20 }
 0xc66   :  { %v993_v3 = vsel %vm992_vm1, %v991_v21, 0.0 }
 0xc67   :  { %994 = vadd.xlane.f32.xlu1 %v993_v3 }
 0xc6b   :  { %v989_v45 = vpop.f32.mrf.mxu1 }
 0xcda   :  { %v995_v19 = vpop.xlane.xlu1 %994 }
 0xcdb   :  { %v996_v22 = vmax.f32 %v995_v19, 1e-24 }
 0xcdd   :  { %1305 = vrsqrt.f32 %v996_v22  ;;  %vm1003_vm2 = vweird.f32 %v996_v22 }
 0xce3   :  { %v1306_v23 = vpop.eup %1305 }
 0xce4   :  { %v998_v24 = vmul.f32 %v1306_v23, %v996_v22  ;;  %vm1004_vm3 = vweird.f32 %v1306_v23 }
 0xce5   :  { %vm1005_vm4 = vmor %vm1003_vm2, %vm1004_vm3 }
 0xce6   :  { %v999_v25 = vmul.f32 %v1306_v23, %v998_v24 }
 0xce8   :  { %v1000_v26 = vmul.f32 0.5, %v999_v25 }
 0xcea   :  { %v1001_v27 = vsub.f32 1.5, %v1000_v26 }
 0xcec   :  { %v1002_v48 = vmul.f32 %v1306_v23, %v1001_v27 }
 0xcee   :  { %v1006_v28 = vsel %vm1005_vm4, %v1306_v23, %v1002_v48 }
 0xcef   :  { %v1007_v29 = vmul.f32 %v1006_v28, %v987_v20 }
 0xcf1   :  { %1008 = vst.msk [vmem:[#allocation2] sm:$0x3] %vm992_vm1, %v1007_v29 }
 0xcf2   :  { %1054 = dma.vmem_to_hbm [thread:$0]  %s1050_s25, 32, %s1052_s2, [#allocation3]  }
 0xcf3   :  { %1355 = dma.done.wait [#allocation3], 32  }
 0xcf4   :  { %1356 = vsyncadd [#allocation3], 4294967264 }
 0xcf5   :  { %1357 = dma.done.wait [#allocation5], 128  }
 0xcf6   :  { %1358 = vsyncadd [#allocation5], 4294967168 }
 0xcf7   :  { %1076 = vsyncpa [#allocation3], 1 }
 0xcf8   :  { %1077 = vsyncpa [#allocation5], 1 }

// kernel: patchwise_clip_forward.5
= control target key start
LH: loop header
LB: loop body
LE: loop exit
PB: predicated region body
PF: predicated region fallthrough
CT: control target
= control target key end

     0   :  { %s3364_s0 = inlined_call_operand.vmem [shape: f32[4,32], index: 0, kind: input, shape index: {}]   ;;  %s3365_s1 = inlined_call_operand.vmem [shape: f32[2,8,32], index: 1, kind: input, shape index: {}]   ;;  %s3366_s2 = inlined_call_operand.vmem [shape: f32[2,2], index: 2, kind: input, shape index: {}]   ;;  %s3367_s3 = inlined_call_operand.vmem [shape: f32[2,8], index: 3, kind: input, shape index: {}]   ;;  %s3368_s4 = inlined_call_operand.vmem [shape: f32[2,256], index: 4, kind: input, shape index: {}]   ;;  %s3369_s5 = inlined_call_operand.vmem [shape: bf16[2,256,192], index: 5, kind: input, shape index: {}]   ;;  %s3370_s6 = inlined_call_operand.vmem [shape: f32[2,1,192], index: 6, kind: input, shape index: {}]   ;;  %s3371_s7 = inlined_call_operand.vmem [shape: bf16[2,32,96], index: 7, kind: input, shape index: {}]   ;;  %s3372_s8 = inlined_call_operand.vmem [shape: f32[2,1,96], index: 8, kind: input, shape index: {}]   ;;  %s3373_s9 = inlined_call_operand.vmem [shape: f32[2,1,16], index: 9, kind: input, shape index: {}]   ;;  %s3374_s10 = inlined_call_operand.vmem [shape: f32[2,1,16], index: 10, kind: input, shape index: {}]   ;;  %s3375_s11 = inlined_call_operand.vmem [shape: bf16[2,32,32], index: 11, kind: input, shape index: {}]   ;;  %s3376_s12 = inlined_call_operand.vmem [shape: f32[2,1,32], index: 12, kind: input, shape index: {}]   ;;  %s3377_s13 = inlined_call_operand.vmem [shape: bf16[2,32,128], index: 13, kind: input, shape index: {}]   ;;  %s3378_s14 = inlined_call_operand.vmem [shape: f32[2,1,128], index: 14, kind: input, shape index: {}]   ;;  %s3379_s15 = inlined_call_operand.vmem [shape: bf16[2,128,32], index: 15, kind: input, shape index: {}]   ;;  %s3380_s16 = inlined_call_operand.vmem [shape: f32[2,1,32], index: 16, kind: input, shape index: {}]   ;;  %s3381_s17 = inlined_call_operand.vmem [shape: bf16[32,32], index: 17, kind: input, shape index: {}]   ;;  %s3382_s18 = inlined_call_operand.vmem [shape: f32[1,32], index: 18, kind: input, shape index: {}]   ;;  %s3383_s19 = inlined_call_operand.hbm [shape: f32[2,4,32], index: 19, kind: output, shape index: {}]  }
   0x1   :  { %3386 = sst [smem:[#allocation5_spill]] %s3364_s0 }
   0x2   :  { %3387 = sst [smem:[#allocation6_spill]] %s3365_s1 }
   0x3   :  { %3388 = sst [smem:[#allocation7_spill]] %s3366_s2 }
   0x4   :  { %3389 = sst [smem:[#allocation8_spill]] %s3367_s3 }
   0x5   :  { %3390 = sst [smem:[#allocation9_spill]] %s3378_s14 }
   0x6   :  { %s3391_s20 = sld [smem:[#allocation7_spill]]  ;;  %vm398_vm0 = vcmask 257024   ;;  %v2480_v2 = vmov 0  }
   0x7   :  { %s3392_s14 = sld [smem:[#allocation5_spill]]  ;;  %2364 = vset.pattern.permute.xlu0 %v2480_v2 }
   0xc   :  { %v67_v0 = vld [vmem:[%s3391_s20] sm:$0x3] }
   0xd   :  { %v2599_v1 = vld [vmem:[%s3392_s14] sm:$0xf]  ;;  %71 = vperm.xlu0 %2364, %v67_v0  }
   0xe   :  { %v399_v3 = vsel %vm398_vm0, %v2599_v1, 0.0 }
   0xf   :  { %400 = vadd.xlane.f32.xlu1 %v399_v3 }
  0x10   :  { %24 = vsyncpa [#allocation3], 0  ;;  %v2481_v4 = vmov 1   ;;  %v2083_v5 = vld [vmem:[%s3369_s5 + $0xf0] sm:$0xf]  ;;  %v2482_v11 = vmov 32.0  }
  0x11   :  { %v2316_v6 = vld [vmem:[%s3369_s5 + $0xf4] sm:$0xf0]  ;;  %v2075_v8 = vld [vmem:[%s3369_s5 + $0xe0] sm:$0xf]  ;;  %v2314_v9 = vld [vmem:[%s3369_s5 + $0xe4] sm:$0xf0]  ;;  %2375 = vrcp.f32 %v2482_v11 }
  0x12   :  { %v2084_v7 = vor.u32 %v2316_v6, %v2083_v5  ;;  %v2076_v10 = vor.u32 %v2314_v9, %v2075_v8  ;;  %v2067_v12 = vld [vmem:[%s3369_s5 + $0xd0] sm:$0xf]  ;;  %v2312_v13 = vld [vmem:[%s3369_s5 + $0xd4] sm:$0xf0]  ;;  %v2059_v16 = vld [vmem:[%s3369_s5 + $0xc0] sm:$0xf] }
  0x13   :  { %v2068_v14 = vor.u32 %v2312_v13, %v2067_v12  ;;  %v2310_v17 = vld [vmem:[%s3369_s5 + $0xc4] sm:$0xf0]  ;;  %v2019_v19 = vld [vmem:[%s3369_s5 + $0x70] sm:$0xf]  ;;  %v2300_v20 = vld [vmem:[%s3369_s5 + $0x74] sm:$0xf0] }
  0x14   :  { %353 = vmatpush.bf16.msra.mxu1 %v2084_v7  ;;  %v2060_v18 = vor.u32 %v2310_v17, %v2059_v16  ;;  %v2299_v21 = vld [vmem:[%s3369_s5 + $0x74] sm:$0xf]  ;;  %v2020_v22 = vor.u32 %v2300_v20, %v2019_v19  ;;  %v2021_v23 = vld [vmem:[%s3369_s5 + $0x78] sm:$0xf0]  ;;  %v2651_v29 = vld [vmem:[%s3368_s4] sm:$0xf] }
  0x15   :  { %2365 = vset.pattern.permute.xlu0 %v2481_v4  ;;  %v2315_v24 = vld [vmem:[%s3369_s5 + $0xf4] sm:$0xf]  ;;  %v2085_v25 = vld [vmem:[%s3369_s5 + $0xf8] sm:$0xf0]  ;;  %v2024_v27 = vor.u32 %v2299_v21, %v2021_v23  ;;  %v2051_v30 = vld [vmem:[%s3369_s5 + $0xb0] sm:$0xf] }
  0x16   :  { %84 = vperm.xlu0 %2365, %v67_v0   ;;  %v2088_v28 = vor.u32 %v2315_v24, %v2085_v25  ;;  %340 = vmatpush.bf16.msra.mxu0 %v2020_v22  ;;  %v2308_v31 = vld [vmem:[%s3369_s5 + $0xb4] sm:$0xf0]  ;;  %v2011_v33 = vld [vmem:[%s3369_s5 + $0x60] sm:$0xf]  ;;  %v2298_v34 = vld [vmem:[%s3369_s5 + $0x64] sm:$0xf0] }
  0x17   :  { %v2621_v15 = vpop.eup %2375  ;;  %366 = vmatpush.bf16.msra.mxu2 %v2024_v27  ;;  %v2052_v32 = vor.u32 %v2308_v31, %v2051_v30  ;;  %v2297_v35 = vld [vmem:[%s3369_s5 + $0x64] sm:$0xf]  ;;  %v2012_v36 = vor.u32 %v2298_v34, %v2011_v33  ;;  %v2013_v37 = vld [vmem:[%s3369_s5 + $0x68] sm:$0xf0]  ;;  %v75_v43 = vperm.slane %v2651_v29, 0  ;;  %v76_v54 = vperm.slane %v2651_v29, 2 }
  0x18   :  { %354 = vmatpush.bf16.msra.mxu1 %v2076_v10  ;;  %v403_v26 = vmul.f32 32.0, %v2621_v15  ;;  %379 = vmatpush.bf16.msra.mxu3 %v2088_v28  ;;  %v2313_v38 = vld [vmem:[%s3369_s5 + $0xe4] sm:$0xf]  ;;  %v2077_v39 = vld [vmem:[%s3369_s5 + $0xe8] sm:$0xf0]  ;;  %v2016_v41 = vor.u32 %v2297_v35, %v2013_v37  ;;  %v87_v58 = vperm.slane %v2651_v29, 1  ;;  %vm407_vm1 = vweird.f32 %v2621_v15 }
  0x19   :  { %v2080_v42 = vor.u32 %v2313_v38, %v2077_v39  ;;  %v2043_v44 = vld [vmem:[%s3369_s5 + $0xa0] sm:$0xf]  ;;  %v2306_v45 = vld [vmem:[%s3369_s5 + $0xa4] sm:$0xf0]  ;;  %v2003_v47 = vld [vmem:[%s3369_s5 + $0x50] sm:$0xf] }
  0x1a   :  { %v404_v40 = vsub.f32 1.0, %v403_v26  ;;  %341 = vmatpush.bf16.msra.mxu0 %v2012_v36  ;;  %v2044_v46 = vor.u32 %v2306_v45, %v2043_v44  ;;  %v2296_v48 = vld [vmem:[%s3369_s5 + $0x54] sm:$0xf0]  ;;  %v2295_v49 = vld [vmem:[%s3369_s5 + $0x54] sm:$0xf]  ;;  %v88_v59 = vperm.slane %v2651_v29, 3 }
  0x1b   :  { %367 = vmatpush.bf16.msra.mxu2 %v2016_v41  ;;  %v2004_v50 = vor.u32 %v2296_v48, %v2003_v47  ;;  %v2005_v51 = vld [vmem:[%s3369_s5 + $0x58] sm:$0xf0]  ;;  %v2311_v52 = vld [vmem:[%s3369_s5 + $0xd4] sm:$0xf]  ;;  %v2035_v60 = vld [vmem:[%s3369_s5 + $0x90] sm:$0xf] }
  0x1c   :  { %355 = vmatpush.bf16.msra.mxu1 %v2068_v14  ;;  %380 = vmatpush.bf16.msra.mxu3 %v2080_v42  ;;  %v2069_v53 = vld [vmem:[%s3369_s5 + $0xd8] sm:$0xf0]  ;;  %v405_v55 = vmul.f32 %v2621_v15, %v404_v40  ;;  %v2008_v56 = vor.u32 %v2295_v49, %v2005_v51  ;;  %v2304_v61 = vld [vmem:[%s3369_s5 + $0x94] sm:$0xf0]  ;;  %v1995_v63 = vld [vmem:[%s3369_s5 + $0x40] sm:$0xf] }
  0x1d   :  { %v2072_v57 = vor.u32 %v2311_v52, %v2069_v53  ;;  %v2036_v62 = vor.u32 %v2304_v61, %v2035_v60  ;;  %v2294_v0 = vld [vmem:[%s3369_s5 + $0x44] sm:$0xf0]  ;;  %v2293_v2 = vld [vmem:[%s3369_s5 + $0x44] sm:$0xf]  ;;  %v1997_v4 = vld [vmem:[%s3369_s5 + $0x48] sm:$0xf0] }
  0x1e   :  { %342 = vmatpush.bf16.msra.mxu0 %v2004_v50  ;;  %v1996_v3 = vor.u32 %v2294_v0, %v1995_v63  ;;  %v2309_v5 = vld [vmem:[%s3369_s5 + $0xc4] sm:$0xf]  ;;  %v2061_v6 = vld [vmem:[%s3369_s5 + $0xc8] sm:$0xf0]  ;;  %v406_v7 = vadd.f32 %v2621_v15, %v405_v55  ;;  %v2000_v8 = vor.u32 %v2293_v2, %v1997_v4  ;;  %v2027_v10 = vld [vmem:[%s3369_s5 + $0x80] sm:$0xf] }
  0x1f   :  { %368 = vmatpush.bf16.msra.mxu2 %v2008_v56  ;;  %v2064_v9 = vor.u32 %v2309_v5, %v2061_v6  ;;  %v2302_v11 = vld [vmem:[%s3369_s5 + $0x84] sm:$0xf0]  ;;  %v1987_v12 = vld [vmem:[%s3369_s5 + $0x30] sm:$0xf]  ;;  %v2292_v14 = vld [vmem:[%s3369_s5 + $0x34] sm:$0xf0] }
  0x20   :  { %356 = vmatpush.bf16.msra.mxu1 %v2060_v18  ;;  %381 = vmatpush.bf16.msra.mxu3 %v2072_v57  ;;  %v2028_v13 = vor.u32 %v2302_v11, %v2027_v10  ;;  %v2291_v16 = vld [vmem:[%s3369_s5 + $0x34] sm:$0xf]  ;;  %v1989_v17 = vld [vmem:[%s3369_s5 + $0x38] sm:$0xf0]  ;;  %v1988_v18 = vor.u32 %v2292_v14, %v1987_v12  ;;  %v2161_v22 = vld [vmem:[%s3369_s5 + $0x170] sm:$0xf]  ;;  %v2771_v27 = vsel %vm407_vm1, %v2621_v15, %v406_v7 }
  0x21   :  { %v1992_v19 = vor.u32 %v2291_v16, %v1989_v17  ;;  %v2307_v20 = vld [vmem:[%s3369_s5 + $0xb4] sm:$0xf]  ;;  %v2053_v21 = vld [vmem:[%s3369_s5 + $0xb8] sm:$0xf0]  ;;  %v2326_v24 = vld [vmem:[%s3369_s5 + $0x174] sm:$0xf0] }
  0x22   :  { %343 = vmatpush.bf16.msra.mxu0 %v1996_v3  ;;  %v2056_v23 = vor.u32 %v2307_v20, %v2053_v21  ;;  %v1979_v25 = vld [vmem:[%s3369_s5 + $0x20] sm:$0xf]  ;;  %v2290_v26 = vld [vmem:[%s3369_s5 + $0x24] sm:$0xf0]  ;;  %v2162_v28 = vor.u32 %v2326_v24, %v2161_v22  ;;  %v2289_v30 = vld [vmem:[%s3369_s5 + $0x24] sm:$0xf] }
  0x23   :  { %369 = vmatpush.bf16.msra.mxu2 %v2000_v8  ;;  %v1981_v31 = vld [vmem:[%s3369_s5 + $0x28] sm:$0xf0]  ;;  %v1980_v34 = vor.u32 %v2290_v26, %v1979_v25  ;;  %v2157_v35 = vld [vmem:[%s3369_s5 + $0x160] sm:$0xf]  ;;  %v2325_v36 = vld [vmem:[%s3369_s5 + $0x164] sm:$0xf0] }
  0x24   :  { %357 = vmatpush.bf16.msra.mxu1 %v2052_v32  ;;  %382 = vmatpush.bf16.msra.mxu3 %v2064_v9  ;;  %v2305_v32 = vld [vmem:[%s3369_s5 + $0xa4] sm:$0xf]  ;;  %v2045_v15 = vld [vmem:[%s3369_s5 + $0xa8] sm:$0xf0]  ;;  %v79_v37 = vperm.slane %v75_v43, 0  ;;  %v80_v38 = vperm.slane %v76_v54, 0  ;;  %v1984_v40 = vor.u32 %v2289_v30, %v1981_v31 }
  0x25   :  { %v2048_v41 = vor.u32 %v2305_v32, %v2045_v15  ;;  %v1971_v42 = vld [vmem:[%s3369_s5 + $0x10] sm:$0xf]  ;;  %v2288_v44 = vld [vmem:[%s3369_s5 + $0x14] sm:$0xf0]  ;;  %v2287_v43 = vld [vmem:[%s3369_s5 + $0x14] sm:$0xf] }
  0x26   :  { %344 = vmatpush.bf16.msra.mxu0 %v1988_v18  ;;  %v1973_v47 = vld [vmem:[%s3369_s5 + $0x18] sm:$0xf0]  ;;  %v2303_v48 = vld [vmem:[%s3369_s5 + $0x94] sm:$0xf]  ;;  %v2153_v50 = vld [vmem:[%s3369_s5 + $0x150] sm:$0xf]  ;;  %v1972_v55 = vor.u32 %v2288_v44, %v1971_v42 }
  0x27   :  { %370 = vmatpush.bf16.msra.mxu2 %v1992_v19  ;;  %v2037_v49 = vld [vmem:[%s3369_s5 + $0x98] sm:$0xf0]  ;;  %v2324_v51 = vld [vmem:[%s3369_s5 + $0x154] sm:$0xf0]  ;;  %v91_v53 = vperm.slane %v87_v58, 1  ;;  %v92_v54 = vperm.slane %v88_v59, 1  ;;  %v1976_v56 = vor.u32 %v2287_v43, %v1973_v47 }
  0x28   :  { %358 = vmatpush.bf16.msra.mxu1 %v2044_v46  ;;  %383 = vmatpush.bf16.msra.mxu3 %v2056_v23  ;;  %v2158_v46 = vor.u32 %v2325_v36, %v2157_v35  ;;  %v1963_v57 = vld [vmem:[%s3369_s5] sm:$0xf]  ;;  %v2285_v58 = vld [vmem:[%s3369_s5 + $0x4] sm:$0xf]  ;;  %v2040_v59 = vor.u32 %v2303_v48, %v2037_v49  ;;  %v2154_v60 = vor.u32 %v2324_v51, %v2153_v50  ;;  %v1965_v61 = vld [vmem:[%s3369_s5 + $0x8] sm:$0xf0] }
  0x29   :  { %v2029_v63 = vld [vmem:[%s3369_s5 + $0x88] sm:$0xf0]  ;;  %v2149_v0 = vld [vmem:[%s3369_s5 + $0x140] sm:$0xf]  ;;  %v2323_v2 = vld [vmem:[%s3369_s5 + $0x144] sm:$0xf0]  ;;  %v1968_v8 = vor.u32 %v2285_v58, %v1965_v61 }
  0x2a   :  { %345 = vmatpush.bf16.msra.mxu0 %v1980_v34  ;;  %v2150_v12 = vor.u32 %v2323_v2, %v2149_v0  ;;  %v2145_v16 = vld [vmem:[%s3369_s5 + $0x130] sm:$0xf]  ;;  %v2322_v17 = vld [vmem:[%s3369_s5 + $0x134] sm:$0xf0]  ;;  %v2141_v21 = vld [vmem:[%s3369_s5 + $0x120] sm:$0xf] }
  0x2b   :  { %371 = vmatpush.bf16.msra.mxu2 %v1984_v40  ;;  %v2146_v20 = vor.u32 %v2322_v17, %v2145_v16  ;;  %v2321_v22 = vld [vmem:[%s3369_s5 + $0x124] sm:$0xf0]  ;;  %v2137_v24 = vld [vmem:[%s3369_s5 + $0x110] sm:$0xf]  ;;  %v2320_v25 = vld [vmem:[%s3369_s5 + $0x114] sm:$0xf0] }
  0x2c   :  { %359 = vmatpush.bf16.msra.mxu1 %v2036_v62  ;;  %384 = vmatpush.bf16.msra.mxu3 %v2048_v41  ;;  %v2301_v62 = vld [vmem:[%s3369_s5 + $0x84] sm:$0xf]  ;;  %v2142_v23 = vor.u32 %v2321_v22, %v2141_v21  ;;  %v2133_v32 = vld [vmem:[%s3369_s5 + $0x100] sm:$0xf]  ;;  %s3393_s26 = sld [smem:[#allocation6_spill]]  ;;  %vm477_vm10 = vcmask 261120  }
  0x2d   :  { %v2032_v9 = vor.u32 %v2301_v62, %v2029_v63  ;;  %s2483_s28 = smov 96   ;;  %s2485_s27 = smov 80  }
  0x2e   :  { %346 = vmatpush.bf16.msra.mxu0 %v1972_v55  ;;  %s2486_s20 = smov 48   ;;  %s2487_s21 = smov 32  }
  0x2f   :  { %372 = vmatpush.bf16.msra.mxu2 %v1976_v56  ;;  %s3394_s25 = sld [smem:[#allocation8_spill]]  ;;  %s2492_s1 = smov 4  }
  0x30   :  { %360 = vmatpush.bf16.msra.mxu1 %v2028_v13  ;;  %385 = vmatpush.bf16.msra.mxu3 %v2040_v59  ;;  %s3395_s29 = sld [smem:[#allocation9_spill]] }
  0x33   :  { %373 = vmatpush.bf16.msra.mxu2 %v1968_v8 }
  0x34   :  { %631 = vmatpush.bf16.msrb.mxu1 %v2162_v28  ;;  %386 = vmatpush.bf16.msra.mxu3 %v2032_v9  ;;  %v2138_v28 = vor.u32 %v2320_v25, %v2137_v24  ;;  %v2318_v25 = vld [vmem:[%s3371_s7 + $0x8] sm:$0xff] }
  0x37   :  { %487 = vmatpush.bf16.msrb.mxu2 %v2318_v25 }
  0x38   :  { %632 = vmatpush.bf16.msrb.mxu1 %v2158_v46 }
  0x3c   :  { %633 = vmatpush.bf16.msrb.mxu1 %v2154_v60  ;;  %v174_v60 = vld [vmem:[%s3370_s6] sm:$0x3] }
  0x3d   :  { %v176_v61 = vperm.slane %v174_v60, 0 }
  0x40   :  { %634 = vmatpush.bf16.msrb.mxu1 %v2150_v12 }
  0x44   :  { %635 = vmatpush.bf16.msrb.mxu1 %v2146_v20  ;;  %v2902_v20 = vld [vmem:[%s3393_s26 + $0x8] sm:$0xff] }
  0x45   :  { %v663_v22 = vsel %vm477_vm10, %v2902_v20, 0.0 }
  0x48   :  { %636 = vmatpush.bf16.msrb.mxu1 %v2142_v23 }
  0x4c   :  { %637 = vmatpush.bf16.msrb.mxu1 %v2138_v28  ;;  %v2317_v28 = vld [vmem:[%s3371_s7] sm:$0xff] }
  0x4d   :  { %488 = vmatpush.bf16.msrb.mxu2 %v2317_v28 }
  0x7f   :  { %v72_v33 = vpop.permute.xlu0 %71 }
  0x80   :  { %v81_v3 = vmul.f32 %v79_v37, %v72_v33  ;;  %v82_v6 = vmul.f32 %v80_v38, %v72_v33  ;;  %v2319_v33 = vld [vmem:[%s3369_s5 + $0x104] sm:$0xf0] }
  0x81   :  { %v2134_v15 = vor.u32 %v2319_v33, %v2133_v32 }
  0x82   :  { %v401_v39 = vpop.xlane.xlu1 %400 }
  0x83   :  { %v409_v45 = vmul.f32 %v2771_v27, %v401_v39  ;;  %638 = vmatpush.bf16.msrb.mxu1 %v2134_v15  ;;  %v2333_v15 = vld [vmem:[%s3369_s5 + $0x1e4] sm:$0xf0] }
  0x85   :  { %v2819_v52 = vsub.f32 %v2599_v1, %v409_v45  ;;  %v2286_v1 = vld [vmem:[%s3369_s5 + $0x4] sm:$0xf0] }
  0x86   :  { %v1964_v5 = vor.u32 %v2286_v1, %v1963_v57 }
  0x87   :  { %v411_v29 = vmul.f32 %v2819_v52, %v2819_v52 }
  0x88   :  { %v85_v7 = vpop.permute.xlu0 %84  ;;  %347 = vmatpush.bf16.msra.mxu0 %v1964_v5 }
  0x89   :  { %v412_v4 = vsel %vm398_vm0, %v411_v29, 0.0  ;;  %v93_v10 = vmul.f32 %v91_v53, %v85_v7  ;;  %v94_v11 = vmul.f32 %v92_v54, %v85_v7  ;;  %v64_v29 = vld [vmem:[%s3393_s26] sm:$0xff]  ;;  %s2484_s26 = smov 112  }
  0x8a   :  { %413 = vadd.xlane.f32.xlu1 %v412_v4  ;;  %v660_v59 = vsel %vm477_vm10, %v64_v29, 0.0 }
  0x8b   :  { %v95_v13 = vadd.f32 %v93_v10, %v81_v3  ;;  %v96_v14 = vadd.f32 %v94_v11, %v82_v6  ;;  %v177_v3 = vperm.slane %v174_v60, 1 }
  0x8d   :  { %v1959_v18 = vmul.f32 -1.442695, %v95_v13  ;;  %v1960_v19 = vmul.f32 -1.442695, %v96_v14 }
  0x8f   :  { %2377 = vpow2.f32 %v1959_v18 }
  0x90   :  { %2379 = vpow2.f32 %v1960_v19 }
  0x92   :  { %661 = vadd.xlane.f32.xlu1 %v660_v59 }
  0x95   :  { %v2378_v26 = vpop.eup %2377 }
  0x96   :  { %v2380_v30 = vpop.eup %2379  ;;  %v103_v31 = vadd.f32 1.0, %v2378_v26 }
  0x97   :  { %v104_v34 = vadd.f32 1.0, %v2380_v30  ;;  %v2193_v30 = vld [vmem:[%s3369_s5 + $0x1f0] sm:$0xf] }
  0x98   :  { %2381 = vrcp.f32 %v103_v31  ;;  %v116_v40 = vand.u32 2147483648, %v103_v31  ;;  %v114_v44 = vand.u32 2147483647, %v103_v31  ;;  %vm110_vm4 = vweird.f32 %v103_v31 }
  0x99   :  { %2383 = vrcp.f32 %v104_v34  ;;  %v131_v45 = vand.u32 2147483648, %v104_v34  ;;  %v129_v43 = vand.u32 2147483647, %v104_v34  ;;  %vm125_vm6 = vweird.f32 %v104_v34 }
  0x9a   :  { %v117_v48 = vor.u32 1.1754944e-38, %v116_v40  ;;  %vm115_vm7 = vcmp.eq.f32.partialorder %v114_v44, 8.507059e+37  ;;  %v2332_v40 = vld [vmem:[%s3369_s5 + $0x1d4] sm:$0xf0] }
  0x9b   :  { %v132_v51 = vor.u32 1.1754944e-38, %v131_v45  ;;  %vm130_vm9 = vcmp.eq.f32.partialorder %v129_v43, 8.507059e+37  ;;  %v2331_v43 = vld [vmem:[%s3369_s5 + $0x1c4] sm:$0xf0] }
  0x9e   :  { %v2382_v35 = vpop.eup %2381 }
  0x9f   :  { %v2384_v36 = vpop.eup %2383  ;;  %v106_v37 = vmul.f32 %v2382_v35, %v103_v31  ;;  %vm111_vm2 = vweird.f32 %v2382_v35  ;;  %v2334_v31 = vld [vmem:[%s3369_s5 + $0x1f4] sm:$0xf0] }
  0xa0   :  { %v121_v38 = vmul.f32 %v2384_v36, %v104_v34  ;;  %vm126_vm3 = vweird.f32 %v2384_v36  ;;  %vm112_vm5 = vmor %vm110_vm4, %vm111_vm2  ;;  %v2194_v32 = vor.u32 %v2334_v31, %v2193_v30  ;;  %v2189_v34 = vld [vmem:[%s3369_s5 + $0x1e0] sm:$0xf] }
  0xa1   :  { %v107_v39 = vsub.f32 1.0, %v106_v37  ;;  %vm127_vm8 = vmor %vm125_vm6, %vm126_vm3  ;;  %vm835_vm6 = vcmask 130048  }
  0xa2   :  { %v122_v41 = vsub.f32 1.0, %v121_v38 }
  0xa3   :  { %v108_v42 = vmul.f32 %v2382_v35, %v107_v39  ;;  %v2185_v39 = vld [vmem:[%s3369_s5 + $0x1d0] sm:$0xf] }
  0xa4   :  { %v123_v46 = vmul.f32 %v2384_v36, %v122_v41 }
  0xa5   :  { %v109_v47 = vadd.f32 %v2382_v35, %v108_v42  ;;  %v2186_v42 = vor.u32 %v2332_v40, %v2185_v39  ;;  %v2336_v39 = vld [vmem:[%s3371_s7 + $0x18] sm:$0xff] }
  0xa6   :  { %v124_v49 = vadd.f32 %v2384_v36, %v123_v46  ;;  %v2181_v46 = vld [vmem:[%s3369_s5 + $0x1c0] sm:$0xf]  ;;  %758 = vmatpush.bf16.msrb.mxu3 %v2336_v39 }
  0xa7   :  { %v113_v50 = vsel %vm112_vm5, %v2382_v35, %v109_v47  ;;  %v2190_v35 = vor.u32 %v2333_v15, %v2189_v34  ;;  %vm771_vm5 = vcmask 125952  }
  0xa8   :  { %v118_v53 = vsel %vm115_vm7, %v117_v48, %v113_v50  ;;  %v128_v54 = vsel %vm127_vm8, %v2384_v36, %v124_v49  ;;  %v2182_v48 = vor.u32 %v2331_v43, %v2181_v46  ;;  %v2177_v50 = vld [vmem:[%s3369_s5 + $0x1b0] sm:$0xf] }
  0xa9   :  { %v135_v55 = vmul.f32 %v118_v53, %v95_v13  ;;  %v133_v56 = vsel %vm130_vm9, %v132_v51, %v128_v54  ;;  %v2330_v51 = vld [vmem:[%s3369_s5 + $0x1b4] sm:$0xf0]  ;;  %v2173_v54 = vld [vmem:[%s3369_s5 + $0x1a0] sm:$0xf] }
  0xaa   :  { %v136_v57 = vmul.f32 %v133_v56, %v96_v14  ;;  %v2178_v53 = vor.u32 %v2330_v51, %v2177_v50  ;;  %v2335_v50 = vld [vmem:[%s3371_s7 + $0x10] sm:$0xff] }
  0xab   :  { %v137_v1 = vpack.c.bf16 %v135_v55, %v135_v55  ;;  %v2329_v55 = vld [vmem:[%s3369_s5 + $0x1a4] sm:$0xf0]  ;;  %759 = vmatpush.bf16.msrb.mxu3 %v2335_v50 }
  0xac   :  { %v2876_v58 = vpack.c.bf16 %v136_v57, %v136_v57  ;;  %v2174_v57 = vor.u32 %v2329_v55, %v2173_v54 }
  0xad   :  { %348 = vmatmul.bf16.vlgmr.msra.gmra.mxu0 %v137_v1  ;;  %374 = vmatmul.bf16.vlgmr.msra.gmra.mxu2 %v137_v1 }
  0xae   :  { %361 = vmatmul.bf16.vlgmr.msra.gmra.mxu1 %v2876_v58  ;;  %387 = vmatmul.bf16.vlgmr.msra.gmra.mxu3 %v2876_v58 }
  0xaf   :  { %644 = vmatpush.bf16.msra.mxu2 %v2194_v32 }
  0xb3   :  { %645 = vmatpush.bf16.msra.mxu2 %v2190_v35 }
  0xb7   :  { %646 = vmatpush.bf16.msra.mxu2 %v2186_v42 }
  0xbb   :  { %647 = vmatpush.bf16.msra.mxu2 %v2182_v48 }
  0xbe   :  { %639 = vmatmul.bf16.vlgmr.msrb.gmra.mxu1 %v137_v1  ;;  %v2169_v1 = vld [vmem:[%s3369_s5 + $0x190] sm:$0xf] }
  0xbf   :  { %648 = vmatpush.bf16.msra.mxu2 %v2178_v53 }
  0xc3   :  { %649 = vmatpush.bf16.msra.mxu2 %v2174_v57 }
  0xfd   :  { %v414_v21 = vpop.xlane.xlu1 %413 }
  0xfe   :  { %v415_v23 = vmul.f32 %v414_v21, %v2771_v27 }
 0x100   :  { %v416_v24 = vadd.f32 1e-05, %v415_v23 }
 0x102   :  { %2385 = vrsqrt.f32 %v416_v24  ;;  %vm423_vm11 = vweird.f32 %v416_v24 }
 0x105   :  { %v662_v37 = vpop.xlane.xlu1 %661 }
 0x106   :  { %v666_v38 = vmul.f32 %v662_v37, %v2771_v27 }
 0x108   :  { %v2386_v26 = vpop.eup %2385  ;;  %v2932_v41 = vsub.f32 %v64_v29, %v666_v38  ;;  %v2328_v29 = vld [vmem:[%s3369_s5 + $0x194] sm:$0xf0] }
 0x109   :  { %v418_v33 = vmul.f32 %v2386_v26, %v416_v24  ;;  %vm424_vm12 = vweird.f32 %v2386_v26  ;;  %v2170_v60 = vor.u32 %v2328_v29, %v2169_v1 }
 0x10a   :  { %v670_v45 = vmul.f32 %v2932_v41, %v2932_v41  ;;  %vm425_vm13 = vmor %vm423_vm11, %vm424_vm12 }
 0x10b   :  { %v419_v36 = vmul.f32 %v2386_v26, %v418_v33  ;;  %650 = vmatpush.bf16.msra.mxu2 %v2170_v60 }
 0x10c   :  { %v672_v47 = vsel %vm477_vm10, %v670_v45, 0.0 }
 0x10d   :  { %v420_v44 = vmul.f32 0.5, %v419_v36  ;;  %673 = vadd.xlane.f32.xlu0 %v672_v47 }
 0x10f   :  { %v421_v49 = vsub.f32 1.5, %v420_v44 }
 0x111   :  { %v422_v56 = vmul.f32 %v2386_v26, %v421_v49 }
 0x113   :  { %v426_v59 = vsel %vm425_vm13, %v2386_v26, %v422_v56 }
 0x12a   :  { %v349_v62 = vpop.f32.mrf.mxu0 }
 0x12b   :  { %v350_v63 = vadd.f32 %v349_v62, %v176_v61  ;;  %v362_v0 = vpop.f32.mrf.mxu1  ;;  %v2165_v61 = vld [vmem:[%s3369_s5 + $0x180] sm:$0xf]  ;;  %v2327_v62 = vld [vmem:[%s3369_s5 + $0x184] sm:$0xf0]  ;;  %s2489_s5 = smov 16  }
 0x12d   :  { %v2887_v2 = vadd.f32 %v362_v0, %v350_v63  ;;  %v427_v63 = vmul.f32 %v426_v59, %v2819_v52 }
 0x12f   :  { %v429_v4 = vadd.f32 1.0, %v2887_v2  ;;  %v393_v6 = vrot.slane %v2887_v2, 1 }
 0x130   :  { %v375_v5 = vpop.f32.mrf.mxu2 }
 0x131   :  { %v376_v7 = vadd.f32 %v375_v5, %v177_v3  ;;  %v388_v8 = vpop.f32.mrf.mxu3  ;;  %v433_v9 = vperm.slane %v429_v4, 0  ;;  %v430_v13 = vadd.f32 1.0, %v393_v6  ;;  %v2969_v3 = vperm.slane %v2887_v2, 0 }
 0x132   :  { %v351_v10 = vpop.f32.mrf.mxu0  ;;  %v2166_v5 = vor.u32 %v2327_v62, %v2165_v61 }
 0x133   :  { %v2891_v11 = vadd.f32 %v388_v8, %v376_v7  ;;  %v364_v12 = vpop.f32.mrf.mxu1  ;;  %435 = vrot.lane.b32.xlu2 %v433_v9, %s2483_s28  ;;  %v434_v17 = vperm.slane %v430_v13, 0  ;;  %v2974_v9 = vperm.slane %v393_v6, 0 }
 0x134   :  { %651 = vmatpush.bf16.msra.mxu2 %v2166_v5 }
 0x138   :  { %v377_v14 = vpop.f32.mrf.mxu2 }
 0x139   :  { %v390_v16 = vpop.f32.mrf.mxu3 }
 0x13b   :  { %v2896_v18 = vpop.f32.mrf.mxu1  ;;  %437 = vrot.lane.b32.xlu2 %v434_v17, %s2483_s28 }
 0x143   :  { %v642_v19 = vpop.f32.mrf.mxu1 }
 0x144   :  { %v2366_v19 = vld [vmem:[%s3372_s8] ss:$0 sm:$0xff] }
 0x164   :  { %664 = vadd.xlane.f32.xlu2 %v663_v22 }
 0x180   :  { %v674_v45 = vpop.xlane.xlu0 %673 }
 0x181   :  { %v678_v43 = vmul.f32 %v674_v45, %v2771_v27 }
 0x183   :  { %v680_v48 = vadd.f32 1e-05, %v678_v43 }
 0x185   :  { %2387 = vrsqrt.f32 %v680_v48  ;;  %vm688_vm14 = vweird.f32 %v680_v48 }
 0x18b   :  { %v2388_v51 = vpop.eup %2387 }
 0x18c   :  { %v683_v54 = vmul.f32 %v2388_v51, %v680_v48  ;;  %vm689_vm15 = vweird.f32 %v2388_v51 }
 0x18d   :  { %v436_v0 = vpop.permute.xlu2 %435  ;;  %vm690_vm3 = vmor %vm688_vm14, %vm689_vm15 }
 0x18e   :  { %v441_v4 = vmul.f32 %v436_v0, %v427_v63  ;;  %v684_v56 = vmul.f32 %v2388_v51, %v683_v54 }
 0x190   :  { %v447_v7 = vadd.f32 %v2969_v3, %v441_v4  ;;  %v685_v1 = vmul.f32 0.5, %v684_v56 }
 0x192   :  { %456 = vst [vmem:[#allocation1] ss:$2 sm:$0xff] %v447_v7  ;;  %v686_v59 = vsub.f32 1.5, %v685_v1 }
 0x194   :  { %v687_v61 = vmul.f32 %v2388_v51, %v686_v59 }
 0x195   :  { %v438_v8 = vpop.permute.xlu2 %437 }
 0x196   :  { %v442_v10 = vmul.f32 %v438_v8, %v427_v63  ;;  %v691_v0 = vsel %vm690_vm3, %v2388_v51, %v687_v61 }
 0x197   :  { %v702_v5 = vmul.f32 %v691_v0, %v2932_v41 }
 0x198   :  { %v448_v12 = vadd.f32 %v2974_v9, %v442_v10 }
 0x19a   :  { %458 = vst [vmem:[#allocation1 + $0x1] ss:$2 sm:$0xff] %v448_v12 }
 0x1a1   :  { %v459_v52 = vld.sshfl [vmem:[#allocation1] sm:$0xff pattern:$0x75316420] }
 0x1a2   :  { %v461_v13 = vpack.c.bf16 %v459_v52, %v459_v52 }
 0x1a4   :  { %2097 = vmatmul.msk.bf16.vlgmr.msrb.gmra.mxu2 %vm477_vm10, %v461_v13 }
 0x1b4   :  { %652 = vmatmul.bf16.vlgmr.msra.gmra.mxu2 %v2876_v58 }
 0x1d7   :  { %v665_v14 = vpop.xlane.xlu2 %664 }
 0x1d8   :  { %v667_v16 = vmul.f32 %v665_v14, %v2771_v27 }
 0x1da   :  { %v2981_v17 = vsub.f32 %v2902_v20, %v667_v16  ;;  %v2130_v20 = vld [vmem:[%s3370_s6 + $0x2] sm:$0x3] }
 0x1db   :  { %v533_v24 = vperm.slane %v2130_v20, 0 }
 0x1dc   :  { %v671_v2 = vmul.f32 %v2981_v17, %v2981_v17 }
 0x1dd   :  { %v641_v26 = vadd.f32 %v2896_v18, %v533_v24 }
 0x1de   :  { %v675_v6 = vsel %vm477_vm10, %v671_v2, 0.0 }
 0x1df   :  { %676 = vadd.xlane.f32.xlu1 %v675_v6 }
 0x227   :  { %v490_v21 = vpop.f32.mrf.mxu2 }
 0x228   :  { %v2989_v22 = vadd.f32 %v2366_v19, %v490_v21 }
 0x22a   :  { %v2993_v58 = vmul.f32 %v2989_v22, %v2989_v22  ;;  %v3007_v15 = vrot.slane %v2989_v22, 4 }
 0x22c   :  { %801 = vst [vmem:[#allocation1] ss:$2 sm:$0xff] %v2993_v58  ;;  %v3012_v18 = vmul.f32 %v3007_v15, %v3007_v15  ;;  %v772_v45 = vsel %vm771_vm5, %v2993_v58, 0.0 }
 0x22f   :  { %v492_v23 = vpop.f32.mrf.mxu2 }
 0x233   :  { %v802_v25 = vld.sshfl [vmem:[#allocation1] sm:$0xff pattern:$0x75316420] }
 0x234   :  { %979 = vst [vmem:[#allocation1] ss:$2 sm:$0xff] %v2993_v58 }
 0x237   :  { %v653_v28 = vpop.f32.mrf.mxu2 }
 0x238   :  { %v3001_v30 = vadd.f32 %v653_v28, %v641_v26 }
 0x23a   :  { %v706_v31 = vadd.f32 1.0, %v3001_v30  ;;  %v658_v33 = vrot.slane %v3001_v30, 1  ;;  %v720_v12 = vperm.slane %v3001_v30, 0 }
 0x23b   :  { %v980_v32 = vld.sshfl [vmem:[#allocation1] sm:$0xff pattern:$0x75316420] }
 0x23c   :  { %1005 = vst [vmem:[#allocation1] ss:$2 sm:$0xff] %v2993_v58  ;;  %v710_v34 = vperm.slane %v706_v31, 0  ;;  %v707_v36 = vadd.f32 1.0, %v658_v33  ;;  %v721_v52 = vperm.slane %v658_v33, 0 }
 0x23e   :  { %712 = vrot.lane.b32.xlu1 %v710_v34, %s2483_s28  ;;  %v711_v38 = vperm.slane %v707_v36, 0  ;;  %v2368_v34 = vld [vmem:[%s3374_s10] ss:$0 sm:$0xff] }
 0x23f   :  { %v655_v35 = vpop.f32.mrf.mxu2 }
 0x240   :  { %v2369_v35 = vld [vmem:[%s3374_s10 + $0x1] ss:$0 sm:$0xff] }
 0x243   :  { %v1006_v37 = vld.sshfl [vmem:[#allocation1] sm:$0xff pattern:$0x75316420] }
 0x244   :  { %1193 = vst [vmem:[#allocation1] ss:$2 sm:$0xff] %v3012_v18 }
 0x246   :  { %714 = vrot.lane.b32.xlu1 %v711_v38, %s2483_s28 }
 0x24b   :  { %v1194_v40 = vld.sshfl [vmem:[#allocation1] sm:$0xff pattern:$0x75316420] }
 0x24c   :  { %1195 = vrot.lane.b32.xlu0 %v1194_v40, %s2483_s28  ;;  %1354 = vst [vmem:[#allocation1] ss:$2 sm:$0xff] %v3012_v18 }
 0x24e   :  { %803 = vrot.lane.b32.xlu1 %v802_v25, %s2483_s28 }
 0x252   :  { %v677_v46 = vpop.xlane.xlu1 %676 }
 0x253   :  { %v3022_v42 = vld.sshfl [vmem:[#allocation1] sm:$0xff pattern:$0x75316420]  ;;  %v679_v47 = vmul.f32 %v677_v46, %v2771_v27 }
 0x254   :  { %1377 = vst [vmem:[#allocation1] ss:$2 sm:$0xff] %v3012_v18 }
 0x255   :  { %v681_v49 = vadd.f32 1e-05, %v679_v47 }
 0x256   :  { %981 = vrot.lane.b32.xlu1 %v980_v32, %s2484_s26 }
 0x257   :  { %2389 = vrsqrt.f32 %v681_v49  ;;  %vm698_vm1 = vweird.f32 %v681_v49 }
 0x25b   :  { %v1378_v44 = vld.sshfl [vmem:[#allocation1] sm:$0xff pattern:$0x75316420] }
 0x25c   :  { %1379 = vrot.lane.b32.xlu0 %v1378_v44, %s2485_s27 }
 0x25d   :  { %v2390_v53 = vpop.eup %2389 }
 0x25e   :  { %1007 = vrot.lane.b32.xlu1 %v1006_v37, %s2485_s27  ;;  %v693_v55 = vmul.f32 %v2390_v53, %v681_v49  ;;  %vm699_vm2 = vweird.f32 %v2390_v53 }
 0x25f   :  { %vm700_vm4 = vmor %vm698_vm1, %vm699_vm2 }
 0x260   :  { %v694_v57 = vmul.f32 %v2390_v53, %v693_v55 }
 0x262   :  { %v695_v29 = vmul.f32 0.5, %v694_v57 }
 0x264   :  { %v696_v60 = vsub.f32 1.5, %v695_v29 }
 0x266   :  { %v697_v63 = vmul.f32 %v2390_v53, %v696_v60 }
 0x268   :  { %v701_v4 = vsel %vm700_vm4, %v2390_v53, %v697_v63 }
 0x269   :  { %v703_v8 = vmul.f32 %v701_v4, %v2981_v17  ;;  %v2367_v17 = vld [vmem:[%s3372_s8 + $0x1] ss:$0 sm:$0xff] }
 0x2b0   :  { %v713_v62 = vpop.permute.xlu1 %712 }
 0x2b1   :  { %v718_v7 = vmul.f32 %v713_v62, %v702_v5 }
 0x2b3   :  { %v724_v14 = vadd.f32 %v720_v12, %v718_v7 }
 0x2b8   :  { %v715_v10 = vpop.permute.xlu1 %714 }
 0x2b9   :  { %v719_v13 = vmul.f32 %v715_v10, %v703_v8 }
 0x2bb   :  { %v725_v16 = vadd.f32 %v721_v52, %v719_v13 }
 0x2bd   :  { %v733_v2 = vpack.c.bf16 %v725_v16, %v724_v14 }
 0x2be   :  { %v1196_v32 = vpop.permute.xlu0 %1195 }
 0x2bf   :  { %2208 = vmatmul.msk.bf16.vlgmr.msrb.gmra.mxu3 %vm477_vm10, %v733_v2  ;;  %v1198_v33 = vsel %vm771_vm5, %v1196_v32, 0.0 }
 0x2c0   :  { %v804_v6 = vpop.permute.xlu1 %803 }
 0x2c1   :  { %v806_v31 = vsel %vm771_vm5, %v804_v6, 0.0 }
 0x2c8   :  { %v982_v19 = vpop.permute.xlu1 %981 }
 0x2c9   :  { %v984_v41 = vsel %vm771_vm5, %v982_v19, 0.0 }
 0x2ce   :  { %v3068_v38 = vpop.permute.xlu0 %1379 }
 0x2d0   :  { %v1008_v21 = vpop.permute.xlu1 %1007 }
 0x2d1   :  { %v1010_v20 = vsel %vm771_vm5, %v1008_v21, 0.0 }
 0x2d2   :  { %1011 = vadd.xlane.f32.xlu1 %v1010_v20 }
 0x2da   :  { %985 = vadd.xlane.f32.xlu1 %v984_v41 }
 0x342   :  { %v761_v23 = vpop.f32.mrf.mxu3 }
 0x343   :  { %v3042_v24 = vadd.f32 %v2367_v17, %v761_v23 }
 0x345   :  { %v830_v25 = vmul.f32 %v3042_v24, %v3042_v24  ;;  %v1012_v50 = vpop.xlane.xlu1 %1011 }
 0x347   :  { %1031 = vrot.lane.b32.xlu0 %v830_v25, %s2485_s27  ;;  %832 = vrot.lane.b32.xlu2 %v830_v25, %s2483_s28 }
 0x34a   :  { %v763_v26 = vpop.f32.mrf.mxu3 }
 0x34b   :  { %v3048_v28 = vadd.f32 %v2367_v17, %v763_v26 }
 0x34d   :  { %v1217_v30 = vmul.f32 %v3048_v28, %v3048_v28 }
 0x34f   :  { %1400 = vrot.lane.b32.xlu0 %v1217_v30, %s2485_s27 }
 0x370   :  { %807 = vadd.xlane.f32.xlu2 %v806_v31 }
 0x379   :  { %1199 = vadd.xlane.f32.xlu0 %v1198_v33 }
 0x388   :  { %1356 = vrot.lane.b32.xlu2 %v3022_v42, %s2484_s26  ;;  %v2488_v42 = vmov 16.0  }
 0x389   :  { %2391 = vrcp.f32 %v2488_v42  ;;  %v986_v42 = vpop.xlane.xlu1 %985 }
 0x38d   :  { %1026 = vrot.lane.b32.xlu0 %v2368_v34, %s2486_s20 }
 0x38f   :  { %v2392_v44 = vpop.eup %2391 }
 0x390   :  { %1219 = vrot.lane.b32.xlu2 %v1217_v30, %s2483_s28  ;;  %v776_v46 = vmul.f32 16.0, %v2392_v44  ;;  %vm780_vm7 = vweird.f32 %v2392_v44 }
 0x392   :  { %v777_v43 = vsub.f32 1.0, %v776_v46 }
 0x394   :  { %v778_v47 = vmul.f32 %v2392_v44, %v777_v43 }
 0x396   :  { %v779_v48 = vadd.f32 %v2392_v44, %v778_v47 }
 0x398   :  { %824 = vrot.lane.b32.xlu2 %v2368_v34, %s2487_s21  ;;  %v3074_v49 = vsel %vm780_vm7, %v2392_v44, %v779_v48 }
 0x399   :  { %v1013_v51 = vmul.f32 %v1012_v50, %v3074_v49 }
 0x39b   :  { %v1014_v53 = vadd.f32 1e-06, %v1013_v51 }
 0x39d   :  { %2393 = vrsqrt.f32 %v1014_v53  ;;  %vm1021_vm13 = vweird.f32 %v1014_v53 }
 0x3a0   :  { %1050 = vrot.lane.b32.xlu2 %v2369_v35, %s2486_s20 }
 0x3a1   :  { %v833_v36 = vpop.permute.xlu2 %832 }
 0x3a2   :  { %v836_v37 = vsel %vm835_vm6, %v833_v36, 0.0 }
 0x3a3   :  { %837 = vadd.xlane.f32.xlu1 %v836_v37  ;;  %v2394_v1 = vpop.eup %2393 }
 0x3a4   :  { %v1016_v63 = vmul.f32 %v2394_v1, %v1014_v53  ;;  %vm1022_vm12 = vweird.f32 %v2394_v1 }
 0x3a5   :  { %vm1023_vm14 = vmor %vm1021_vm13, %vm1022_vm12 }
 0x3a6   :  { %v1017_v7 = vmul.f32 %v2394_v1, %v1016_v63 }
 0x3a8   :  { %v1018_v13 = vmul.f32 0.5, %v1017_v7 }
 0x3aa   :  { %v1019_v19 = vsub.f32 1.5, %v1018_v13 }
 0x3ac   :  { %v1020_v23 = vmul.f32 %v2394_v1, %v1019_v19 }
 0x3ae   :  { %v1024_v30 = vsel %vm1023_vm14, %v2394_v1, %v1020_v23 }
 0x3af   :  { %v1025_v34 = vmul.f32 %v1024_v30, %v2989_v22 }
 0x3b9   :  { %v1032_v39 = vpop.permute.xlu0 %1031 }
 0x3ba   :  { %v1034_v40 = vsel %vm835_vm6, %v1032_v39, 0.0 }
 0x3bb   :  { %1035 = vadd.xlane.f32.xlu0 %v1034_v40 }
 0x3bc   :  { %854 = vrot.lane.b32.xlu1 %v2369_v35, %s2487_s21  ;;  %v3090_v35 = vld [vmem:[%s3373_s9] ss:$0 sm:$0xff]  ;;  %s2490_s9 = smov 64  }
 0x3c1   :  { %v1401_v54 = vpop.permute.xlu0 %1400 }
 0x3c2   :  { %v1403_v57 = vsel %vm835_vm6, %v1401_v54, 0.0 }
 0x3c9   :  { %773 = vadd.xlane.f32.xlu2 %v772_v45 }
 0x3e3   :  { %v808_v55 = vpop.xlane.xlu2 %807 }
 0x3e4   :  { %v809_v56 = vmul.f32 %v808_v55, %v3074_v49 }
 0x3e6   :  { %v810_v58 = vadd.f32 1e-06, %v809_v56  ;;  %1404 = vadd.xlane.f32.xlu1 %v1403_v57 }
 0x3e8   :  { %2395 = vrsqrt.f32 %v810_v58  ;;  %vm817_vm9 = vweird.f32 %v810_v58 }
 0x3eb   :  { %v1357_v29 = vpop.permute.xlu2 %1356 }
 0x3ec   :  { %v1200_v59 = vpop.xlane.xlu0 %1199  ;;  %v1359_v60 = vsel %vm771_vm5, %v1357_v29, 0.0 }
 0x3ed   :  { %v1201_v61 = vmul.f32 %v1200_v59, %v3074_v49  ;;  %1360 = vadd.xlane.f32.xlu2 %v1359_v60 }
 0x3ee   :  { %v2396_v62 = vpop.eup %2395 }
 0x3ef   :  { %v812_v0 = vmul.f32 %v2396_v62, %v810_v58  ;;  %v1202_v4 = vadd.f32 1e-06, %v1201_v61  ;;  %vm818_vm8 = vweird.f32 %v2396_v62 }
 0x3f0   :  { %vm819_vm11 = vmor %vm817_vm9, %vm818_vm8 }
 0x3f1   :  { %v813_v5 = vmul.f32 %v2396_v62, %v812_v0  ;;  %2397 = vrsqrt.f32 %v1202_v4  ;;  %vm1209_vm1 = vweird.f32 %v1202_v4 }
 0x3f3   :  { %v814_v8 = vmul.f32 0.5, %v813_v5  ;;  %v1220_v10 = vpop.permute.xlu2 %1219  ;;  %v1174_v5 = vsel %vm771_vm5, %v3012_v18, 0.0 }
 0x3f4   :  { %v1222_v12 = vsel %vm835_vm6, %v1220_v10, 0.0 }
 0x3f5   :  { %v815_v52 = vsub.f32 1.5, %v814_v8  ;;  %1223 = vadd.xlane.f32.xlu0 %v1222_v12 }
 0x3f7   :  { %v2398_v14 = vpop.eup %2397  ;;  %v816_v16 = vmul.f32 %v2396_v62, %v815_v52 }
 0x3f8   :  { %v1204_v2 = vmul.f32 %v2398_v14, %v1202_v4  ;;  %vm1210_vm15 = vweird.f32 %v2398_v14 }
 0x3f9   :  { %v820_v6 = vsel %vm819_vm11, %v2396_v62, %v816_v16  ;;  %vm1211_vm2 = vmor %vm1209_vm1, %vm1210_vm15  ;;  %v1382_v62 = vsel %vm771_vm5, %v3068_v38, 0.0 }
 0x3fa   :  { %v1205_v21 = vmul.f32 %v2398_v14, %v1204_v2  ;;  %v821_v20 = vmul.f32 %v820_v6, %v2989_v22 }
 0x3fb   :  { %v825_v17 = vpop.permute.xlu2 %824 }
 0x3fc   :  { %v1206_v41 = vmul.f32 0.5, %v1205_v21  ;;  %v827_v25 = vmul.f32 %v825_v17, %v821_v20  ;;  %v987_v21 = vmul.f32 %v986_v42, %v3074_v49 }
 0x3fe   :  { %v1207_v26 = vsub.f32 1.5, %v1206_v41  ;;  %v828_v31 = vpack.c.bf16 %v827_v25, %v827_v25  ;;  %v988_v41 = vadd.f32 1e-06, %v987_v21 }
 0x3ff   :  { %v3083_v33 = vpop.permute.xlu0 %1026 }
 0x400   :  { %v1208_v32 = vmul.f32 %v2398_v14, %v1207_v26  ;;  %v1029_v36 = vmul.f32 %v3083_v33, %v1025_v34  ;;  %vm995_vm15 = vweird.f32 %v988_v41 }
 0x402   :  { %v1212_v37 = vsel %vm1211_vm2, %v2398_v14, %v1208_v32  ;;  %v1030_v40 = vpack.c.bf16 %v1029_v36, %v1029_v36 }
 0x403   :  { %v1213_v39 = vmul.f32 %v1212_v37, %v3007_v15  ;;  %v3106_v63 = vpop.permute.xlu2 %1050 }
 0x405   :  { %861 = vrot.lane.b32.xlu2 %v828_v31, %s2483_s28  ;;  %v1214_v44 = vmul.f32 %v1213_v39, %v825_v17 }
 0x407   :  { %v1215_v45 = vpack.c.bf16 %v1214_v44, %v1214_v44 }
 0x409   :  { %1000 = vrot.lane.b32.xlu0 %v3090_v35, %s2489_s5 }
 0x40d   :  { %1059 = vrot.lane.b32.xlu2 %v1030_v40, %s2485_s27 }
 0x415   :  { %1242 = vrot.lane.b32.xlu2 %v1215_v45, %s2483_s28 }
 0x416   :  { %v838_v46 = vpop.xlane.xlu1 %837 }
 0x417   :  { %v839_v43 = vmul.f32 %v838_v46, %v3074_v49 }
 0x419   :  { %v840_v47 = vadd.f32 1e-06, %v839_v43 }
 0x41b   :  { %2399 = vrsqrt.f32 %v840_v47  ;;  %vm847_vm4 = vweird.f32 %v840_v47 }
 0x421   :  { %v2400_v48 = vpop.eup %2399 }
 0x422   :  { %v842_v50 = vmul.f32 %v2400_v48, %v840_v47  ;;  %vm848_vm3 = vweird.f32 %v2400_v48 }
 0x423   :  { %vm849_vm7 = vmor %vm847_vm4, %vm848_vm3 }
 0x424   :  { %v843_v51 = vmul.f32 %v2400_v48, %v842_v50 }
 0x426   :  { %v844_v53 = vmul.f32 0.5, %v843_v51 }
 0x428   :  { %v845_v54 = vsub.f32 1.5, %v844_v53 }
 0x42a   :  { %v846_v55 = vmul.f32 %v2400_v48, %v845_v54 }
 0x42c   :  { %v850_v56 = vsel %vm849_vm7, %v2400_v48, %v846_v55 }
 0x42d   :  { %v851_v57 = vmul.f32 %v850_v56, %v3042_v24 }
 0x42e   :  { %v1036_v58 = vpop.xlane.xlu0 %1035  ;;  %v3100_v1 = vpop.permute.xlu1 %854 }
 0x42f   :  { %v1037_v29 = vmul.f32 %v1036_v58, %v3074_v49  ;;  %v857_v59 = vmul.f32 %v3100_v1, %v851_v57 }
 0x431   :  { %v1038_v60 = vadd.f32 1e-06, %v1037_v29  ;;  %v858_v61 = vpack.c.bf16 %v857_v59, %v857_v59 }
 0x433   :  { %2401 = vrsqrt.f32 %v1038_v60  ;;  %1383 = vadd.xlane.f32.xlu0 %v1382_v62  ;;  %884 = vrot.lane.b32.xlu1 %v858_v61, %s2483_s28  ;;  %vm1045_vm9 = vweird.f32 %v1038_v60 }
 0x439   :  { %v2402_v0 = vpop.eup %2401 }
 0x43a   :  { %v1040_v4 = vmul.f32 %v2402_v0, %v1038_v60  ;;  %vm1046_vm8 = vweird.f32 %v2402_v0 }
 0x43b   :  { %1175 = vadd.xlane.f32.xlu0 %v1174_v5  ;;  %vm1047_vm11 = vmor %vm1045_vm9, %vm1046_vm8 }
 0x43c   :  { %v1041_v7 = vmul.f32 %v2402_v0, %v1040_v4  ;;  %v774_v8 = vpop.xlane.xlu2 %773 }
 0x43d   :  { %v782_v12 = vmul.f32 %v3074_v49, %v774_v8 }
 0x43e   :  { %v1042_v10 = vmul.f32 0.5, %v1041_v7 }
 0x43f   :  { %v783_v13 = vadd.f32 1e-06, %v782_v12 }
 0x440   :  { %v1043_v52 = vsub.f32 1.5, %v1042_v10 }
 0x441   :  { %2403 = vrsqrt.f32 %v783_v13  ;;  %vm790_vm12 = vweird.f32 %v783_v13 }
 0x442   :  { %v1044_v38 = vmul.f32 %v2402_v0, %v1043_v52  ;;  %2405 = vrsqrt.f32 %v988_v41 }
 0x444   :  { %v1048_v14 = vsel %vm1047_vm11, %v2402_v0, %v1044_v38 }
 0x445   :  { %v1049_v16 = vmul.f32 %v1048_v14, %v3042_v24 }
 0x447   :  { %v1053_v2 = vmul.f32 %v3106_v63, %v1049_v16  ;;  %v2404_v18 = vpop.eup %2403 }
 0x448   :  { %v785_v19 = vmul.f32 %v2404_v18, %v783_v13  ;;  %v2406_v31 = vpop.eup %2405  ;;  %vm791_vm5 = vweird.f32 %v2404_v18 }
 0x449   :  { %v1054_v6 = vpack.c.bf16 %v1053_v2, %v1053_v2  ;;  %v990_v36 = vmul.f32 %v2406_v31, %v988_v41  ;;  %vm792_vm13 = vmor %vm790_vm12, %vm791_vm5  ;;  %vm996_vm14 = vweird.f32 %v2406_v31 }
 0x44a   :  { %v786_v20 = vmul.f32 %v2404_v18, %v785_v19  ;;  %vm997_vm1 = vmor %vm995_vm15, %vm996_vm14 }
 0x44b   :  { %1082 = vrot.lane.b32.xlu1 %v1054_v6, %s2485_s27  ;;  %v991_v40 = vmul.f32 %v2406_v31, %v990_v36 }
 0x44c   :  { %v787_v17 = vmul.f32 0.5, %v786_v20 }
 0x44d   :  { %v992_v50 = vmul.f32 0.5, %v991_v40  ;;  %v3150_v40 = vpack.c.bf16 %v3042_v24, %v3042_v24 }
 0x44e   :  { %v788_v26 = vsub.f32 1.5, %v787_v17 }
 0x44f   :  { %v993_v55 = vsub.f32 1.5, %v992_v50 }
 0x450   :  { %v789_v32 = vmul.f32 %v2404_v18, %v788_v26 }
 0x451   :  { %v994_v61 = vmul.f32 %v2406_v31, %v993_v55 }
 0x452   :  { %v793_v37 = vsel %vm792_vm13, %v2404_v18, %v789_v32 }
 0x453   :  { %v794_v42 = vmul.f32 %v793_v37, %v2989_v22  ;;  %v998_v7 = vsel %vm997_vm1, %v2406_v31, %v994_v61  ;;  %vm905_vm1 = vcmask 27648  }
 0x454   :  { %v999_v14 = vmul.f32 %v998_v7, %v2989_v22 }
 0x455   :  { %v798_v53 = vmul.f32 %v3090_v35, %v794_v42 }
 0x457   :  { %v3129_v56 = vpack.c.bf16 %v798_v53, %v798_v53 }
 0x459   :  { %v1405_v23 = vpop.xlane.xlu1 %1404 }
 0x45a   :  { %v1406_v25 = vmul.f32 %v1405_v23, %v3074_v49 }
 0x45c   :  { %v3117_v30 = vadd.f32 1e-06, %v1406_v25 }
 0x45e   :  { %2407 = vrsqrt.f32 %v3117_v30  ;;  %vm1414_vm8 = vweird.f32 %v3117_v30 }
 0x460   :  { %v1361_v34 = vpop.xlane.xlu2 %1360 }
 0x461   :  { %v1362_v39 = vmul.f32 %v1361_v34, %v3074_v49 }
 0x463   :  { %v3122_v44 = vadd.f32 1e-06, %v1362_v39 }
 0x464   :  { %v2408_v43 = vpop.eup %2407 }
 0x465   :  { %v1409_v54 = vmul.f32 %v2408_v43, %v3117_v30  ;;  %2409 = vrsqrt.f32 %v3122_v44  ;;  %vm1415_vm3 = vweird.f32 %v2408_v43  ;;  %vm1370_vm5 = vweird.f32 %v3122_v44 }
 0x466   :  { %vm1416_vm9 = vmor %vm1414_vm8, %vm1415_vm3  ;;  %vm961_vm8 = vcmask 1041408  }
 0x467   :  { %v1410_v57 = vmul.f32 %v2408_v43, %v1409_v54 }
 0x468   :  { %v1224_v45 = vpop.xlane.xlu0 %1223  ;;  %v862_v46 = vpop.permute.xlu2 %861 }
 0x469   :  { %v1225_v47 = vmul.f32 %v1224_v45, %v3074_v49  ;;  %v867_v48 = vsel %vm835_vm6, %v862_v46, 0  ;;  %v1411_v62 = vmul.f32 0.5, %v1410_v57 }
 0x46a   :  { %876 = vmatpush.bf16.xpose.msrb.mxu0 %v867_v48 }
 0x46b   :  { %v1226_v51 = vadd.f32 1e-06, %v1225_v47  ;;  %v2410_v59 = vpop.eup %2409  ;;  %v1412_v8 = vsub.f32 1.5, %v1411_v62 }
 0x46c   :  { %v1365_v4 = vmul.f32 %v2410_v59, %v3122_v44  ;;  %vm1371_vm11 = vweird.f32 %v2410_v59 }
 0x46d   :  { %2411 = vrsqrt.f32 %v1226_v51  ;;  %v1413_v2 = vmul.f32 %v2408_v43, %v1412_v8  ;;  %vm1233_vm4 = vweird.f32 %v1226_v51  ;;  %vm1372_vm12 = vmor %vm1370_vm5, %vm1371_vm11  ;;  %vm957_vm11 = vcmask 31744  }
 0x46e   :  { %v1366_v38 = vmul.f32 %v2410_v59, %v1365_v4  ;;  %vm933_vm5 = vcmask 64512  }
 0x46f   :  { %v1417_v17 = vsel %vm1416_vm9, %v2408_v43, %v1413_v2  ;;  %vm909_vm9 = vcmask 60416  }
 0x470   :  { %v1060_v58 = vpop.permute.xlu2 %1059  ;;  %v1367_v19 = vmul.f32 0.5, %v1366_v38  ;;  %v1418_v31 = vmul.f32 %v1417_v17, %v3048_v28 }
 0x471   :  { %v1065_v29 = vsel %vm835_vm6, %v1060_v58, 0  ;;  %2210 = vmatmul.msk.bf16.vlgmr.msrb.gmra.mxu0 %vm835_vm6, %v3129_v56 }
 0x472   :  { %1074 = vmatpush.bf16.xpose.msrb.mxu2 %v1065_v29  ;;  %v1368_v25 = vsub.f32 1.5, %v1367_v19  ;;  %v1419_v30 = vmul.f32 %v1418_v31, %v3106_v63  ;;  %v829_v63 = vpack.c.bf16 %v2989_v22, %v2989_v22 }
 0x473   :  { %v2412_v60 = vpop.eup %2411 }
 0x474   :  { %v1228_v0 = vmul.f32 %v2412_v60, %v1226_v51  ;;  %vm1234_vm2 = vweird.f32 %v2412_v60  ;;  %v1369_v32 = vmul.f32 %v2410_v59, %v1368_v25  ;;  %v1420_v36 = vpack.c.bf16 %v1419_v30, %v1419_v30 }
 0x475   :  { %vm1235_vm7 = vmor %vm1233_vm4, %vm1234_vm2 }
 0x476   :  { %v1229_v5 = vmul.f32 %v2412_v60, %v1228_v0  ;;  %v1373_v34 = vsel %vm1372_vm12, %v2410_v59, %v1369_v32 }
 0x477   :  { %v1374_v37 = vmul.f32 %v1373_v34, %v3007_v15 }
 0x478   :  { %v1230_v10 = vmul.f32 0.5, %v1229_v5  ;;  %v1243_v12 = vpop.permute.xlu2 %1242 }
 0x479   :  { %v1248_v52 = vsel %vm835_vm6, %v1243_v12, 0 }
 0x47a   :  { %v1231_v13 = vsub.f32 1.5, %v1230_v10  ;;  %1257 = vmatpush.bf16.xpose.msra.mxu2 %v1248_v52 }
 0x47b   :  { %v1001_v16 = vpop.permute.xlu0 %1000 }
 0x47c   :  { %v1232_v6 = vmul.f32 %v2412_v60, %v1231_v13  ;;  %v1003_v18 = vmul.f32 %v1001_v16, %v999_v14 }
 0x47e   :  { %v1004_v21 = vpack.c.bf16 %v1003_v18, %v1003_v18  ;;  %v1236_v20 = vsel %vm1235_vm7, %v2412_v60, %v1232_v6  ;;  %vm937_vm7 = vcmask 1043456  }
 0x47f   :  { %v1237_v41 = vmul.f32 %v1236_v20, %v3048_v28 }
 0x480   :  { %1056 = vrot.lane.b32.xlu0 %v1004_v21, %s2484_s26  ;;  %v1240_v21 = vpack.c.bf16 %v3048_v28, %v3048_v28  ;;  %v139_v28 = vld [vmem:[%s3394_s25] sm:$0x3] }
 0x481   :  { %v1238_v23 = vmul.f32 %v1237_v41, %v3100_v1  ;;  %v1375_v1 = vmul.f32 %v1374_v37, %v1001_v16 }
 0x483   :  { %v1239_v26 = vpack.c.bf16 %v1238_v23, %v1238_v23  ;;  %v1376_v39 = vpack.c.bf16 %v1375_v1, %v1375_v1 }
 0x485   :  { %1265 = vrot.lane.b32.xlu1 %v1239_v26, %s2483_s28  ;;  %v140_v26 = vsub.f32 1.0, %v139_v28 }
 0x487   :  { %v3190_v31 = vmul.f32 -1e+30, %v140_v26 }
 0x489   :  { %v903_v32 = vperm.slane %v3190_v31, 0 }
 0x48d   :  { %1448 = vrot.lane.b32.xlu1 %v1420_v36, %s2485_s27 }
 0x495   :  { %1422 = vrot.lane.b32.xlu1 %v1376_v39, %s2484_s26 }
 0x49d   :  { %931 = vrot.lane.b32.xlu1 %v3150_v40, %s2490_s9 }
 0x4a5   :  { %955 = vrot.lane.b32.xlu1 %v829_v63, %s2490_s9  ;;  %v885_v42 = vpop.permute.xlu1 %884 }
 0x4a6   :  { %v887_v44 = vsel %vm835_vm6, %v885_v42, 0  ;;  %v1384_v45 = vpop.xlane.xlu0 %1383 }
 0x4a7   :  { %v1385_v46 = vmul.f32 %v1384_v45, %v3074_v49  ;;  %896 = vmatpush.bf16.xpose.msra.mxu3 %v887_v44 }
 0x4a9   :  { %v1386_v43 = vadd.f32 1e-06, %v1385_v46 }
 0x4ab   :  { %2413 = vrsqrt.f32 %v1386_v43  ;;  %vm1393_vm14 = vweird.f32 %v1386_v43 }
 0x4ae   :  { %2211 = vmatmul.msk.bf16.vlgmr.msra.gmra.mxu3 %vm835_vm6, %v3129_v56  ;;  %v1176_v56 = vpop.xlane.xlu0 %1175 }
 0x4af   :  { %v1177_v59 = vmul.f32 %v1176_v56, %v3074_v49 }
 0x4b1   :  { %v2414_v24 = vpop.eup %2413  ;;  %v1178_v60 = vadd.f32 1e-06, %v1177_v59 }
 0x4b2   :  { %v1388_v47 = vmul.f32 %v2414_v24, %v1386_v43  ;;  %vm1394_vm13 = vweird.f32 %v2414_v24 }
 0x4b3   :  { %vm1395_vm15 = vmor %vm1393_vm14, %vm1394_vm13  ;;  %2415 = vrsqrt.f32 %v1178_v60  ;;  %vm1185_vm3 = vweird.f32 %v1178_v60 }
 0x4b4   :  { %v1389_v48 = vmul.f32 %v2414_v24, %v1388_v47 }
 0x4b6   :  { %v1390_v50 = vmul.f32 0.5, %v1389_v48 }
 0x4b8   :  { %v1391_v51 = vsub.f32 1.5, %v1390_v50 }
 0x4b9   :  { %v2416_v61 = vpop.eup %2415 }
 0x4ba   :  { %v1392_v22 = vmul.f32 %v2414_v24, %v1391_v51  ;;  %v1180_v62 = vmul.f32 %v2416_v61, %v1178_v60  ;;  %vm1186_vm2 = vweird.f32 %v2416_v61  ;;  %v1284_v51 = vperm.slane %v3190_v31, 1 }
 0x4bb   :  { %vm1187_vm4 = vmor %vm1185_vm3, %vm1186_vm2 }
 0x4bc   :  { %v1396_v53 = vsel %vm1395_vm15, %v2414_v24, %v1392_v22  ;;  %v1181_v0 = vmul.f32 %v2416_v61, %v1180_v62  ;;  %v1216_v62 = vpack.c.bf16 %v3007_v15, %v3007_v15 }
 0x4bd   :  { %v1083_v54 = vpop.permute.xlu1 %1082  ;;  %v1397_v55 = vmul.f32 %v1396_v53, %v3007_v15 }
 0x4be   :  { %v1085_v57 = vsel %vm835_vm6, %v1083_v54, 0  ;;  %v1182_v4 = vmul.f32 0.5, %v1181_v0 }
 0x4bf   :  { %1094 = vmatpush.bf16.xpose.msrb.mxu3 %v1085_v57  ;;  %v1398_v58 = vmul.f32 %v1397_v55, %v3083_v33 }
 0x4c0   :  { %v1183_v5 = vsub.f32 1.5, %v1182_v4 }
 0x4c1   :  { %v1399_v29 = vpack.c.bf16 %v1398_v58, %v1398_v58 }
 0x4c2   :  { %v1184_v10 = vmul.f32 %v2416_v61, %v1183_v5 }
 0x4c3   :  { %1425 = vrot.lane.b32.xlu2 %v1399_v29, %s2485_s27 }
 0x4c4   :  { %v1188_v49 = vsel %vm1187_vm4, %v2416_v61, %v1184_v10 }
 0x4c5   :  { %v1189_v14 = vmul.f32 %v1188_v49, %v3007_v15 }
 0x4c7   :  { %v1190_v16 = vmul.f32 %v3090_v35, %v1189_v14 }
 0x4c9   :  { %v1191_v18 = vpack.c.bf16 %v1190_v16, %v1190_v16 }
 0x4ee   :  { %v878_v7 = vpop.f32.mrf.mxu0 }
 0x4ef   :  { %v3166_v8 = vmul.f32 0.25, %v878_v7 }
 0x4f1   :  { %v906_v33 = vsel %vm905_vm1, %v3166_v8, -inf }
 0x4f2   :  { %907 = vmax.xlane.f32.xlu0 %v906_v33  ;;  %v1057_v12 = vpop.permute.xlu0 %1056 }
 0x4f3   :  { %2214 = vmatmul.msk.bf16.vlgmr.msrb.gmra.mxu2 %vm835_vm6, %v1057_v12  ;;  %2215 = vmatmul.msk.bf16.vlgmr.msrb.gmra.mxu3 %vm835_vm6, %v1057_v12 }
 0x4f6   :  { %v880_v52 = vpop.f32.mrf.mxu0 }
 0x4f7   :  { %v1266_v38 = vpop.permute.xlu1 %1265 }
 0x4f8   :  { %v1268_v13 = vsel %vm835_vm6, %v1266_v38, 0 }
 0x4f9   :  { %1277 = vmatpush.bf16.xpose.msra.mxu3 %v1268_v13 }
 0x4ff   :  { %v1449_v2 = vpop.permute.xlu1 %1448 }
 0x500   :  { %v1451_v6 = vsel %vm835_vm6, %v1449_v2, 0 }
 0x501   :  { %1460 = vmatpush.bf16.xpose.msrb.mxu3 %v1451_v6 }
 0x503   :  { %2218 = vmatmul.msk.bf16.vlgmr.msra.gmra.mxu2 %vm835_vm6, %v1191_v18  ;;  %2219 = vmatmul.msk.bf16.vlgmr.msra.gmra.mxu3 %vm835_vm6, %v1191_v18 }
 0x506   :  { %1146 = vrot.lane.b32.xlu0 %v829_v63, %s2486_s20 }
 0x507   :  { %v1423_v19 = vpop.permute.xlu1 %1422 }
 0x50e   :  { %1310 = vrot.lane.b32.xlu0 %v1240_v21, %s2490_s9 }
 0x50f   :  { %v932_v20 = vpop.permute.xlu1 %931 }
 0x510   :  { %v939_v35 = vsel %vm937_vm7, %v932_v20, 0 }
 0x511   :  { %948 = vmatpush.bf16.msra.mxu0 %v939_v35 }
 0x513   :  { %2223 = vmatmul.msk.bf16.vlgmr.msrb.gmra.mxu3 %vm835_vm6, %v1423_v19 }
 0x517   :  { %v956_v41 = vpop.permute.xlu1 %955 }
 0x518   :  { %v963_v17 = vsel %vm961_vm8, %v956_v41, 0 }
 0x519   :  { %972 = vmatpush.bf16.msra.mxu1 %v963_v17 }
 0x51d   :  { %v1426_v23 = vpop.permute.xlu2 %1425 }
 0x51e   :  { %v1431_v25 = vsel %vm835_vm6, %v1426_v23, 0 }
 0x51f   :  { %1440 = vmatpush.bf16.xpose.msrb.mxu2 %v1431_v25 }
 0x526   :  { %2222 = vmatmul.msk.bf16.vlgmr.msrb.gmra.mxu2 %vm835_vm6, %v1423_v19 }
 0x531   :  { %v898_v30 = vpop.f32.mrf.mxu3 }
 0x532   :  { %v902_v34 = vmul.f32 0.25, %v898_v30 }
 0x534   :  { %v904_v36 = vadd.f32 %v903_v32, %v902_v34 }
 0x536   :  { %v910_v37 = vsel %vm909_vm9, %v904_v36, -inf }
 0x537   :  { %911 = vmax.xlane.f32.xlu2 %v910_v37 }
 0x539   :  { %v900_v1 = vpop.f32.mrf.mxu3 }
 0x54f   :  { %1125 = vrot.lane.b32.xlu2 %v3150_v40, %s2486_s20 }
 0x565   :  { %v908_v39 = vpop.xlane.xlu0 %907 }
 0x576   :  { %v1076_v63 = vpop.f32.mrf.mxu2  ;;  %v1096_v42 = vpop.f32.mrf.mxu3 }
 0x577   :  { %v3196_v44 = vmul.f32 0.25, %v1076_v63  ;;  %v1100_v45 = vmul.f32 0.25, %v1096_v42 }
 0x578   :  { %v1147_v46 = vpop.permute.xlu0 %1146 }
 0x579   :  { %v1152_v43 = vsel %vm961_vm8, %v1147_v46, 0  ;;  %v1102_v24 = vsel %vm905_vm1, %v3196_v44, -inf  ;;  %v1101_v47 = vadd.f32 %v1100_v45, %v903_v32 }
 0x57a   :  { %1103 = vmax.xlane.f32.xlu1 %v1102_v24  ;;  %1161 = vmatpush.bf16.msrb.mxu1 %v1152_v43 }
 0x57b   :  { %v1105_v48 = vsel %vm909_vm9, %v1101_v47, -inf }
 0x57c   :  { %1106 = vmax.xlane.f32.xlu0 %v1105_v48 }
 0x57e   :  { %v1078_v50 = vpop.f32.mrf.mxu2  ;;  %v1098_v40 = vpop.f32.mrf.mxu3 }
 0x580   :  { %v1311_v2 = vpop.permute.xlu0 %1310 }
 0x581   :  { %v1316_v18 = vsel %vm937_vm7, %v1311_v2, 0 }
 0x586   :  { %v1259_v22 = vpop.f32.mrf.mxu2  ;;  %v1279_v53 = vpop.f32.mrf.mxu3 }
 0x587   :  { %v3203_v54 = vmul.f32 0.25, %v1259_v22  ;;  %v1283_v55 = vmul.f32 0.25, %v1279_v53 }
 0x589   :  { %v1286_v57 = vsel %vm905_vm1, %v3203_v54, -inf  ;;  %v3207_v58 = vadd.f32 %v1284_v51, %v1283_v55 }
 0x58a   :  { %1287 = vmax.xlane.f32.xlu1 %v1286_v57 }
 0x58b   :  { %v1289_v29 = vsel %vm909_vm9, %v3207_v58, -inf }
 0x58c   :  { %1290 = vmax.xlane.f32.xlu2 %v1289_v29 }
 0x58e   :  { %v1261_v56 = vpop.f32.mrf.mxu2  ;;  %v1281_v59 = vpop.f32.mrf.mxu3 }
 0x596   :  { %v1462_v60 = vpop.f32.mrf.mxu3 }
 0x597   :  { %v1466_v19 = vmul.f32 0.25, %v1462_v60 }
 0x59e   :  { %v1464_v61 = vpop.f32.mrf.mxu3 }
 0x5a3   :  { %1332 = vrot.lane.b32.xlu1 %v1216_v62, %s2490_s9 }
 0x5a4   :  { %1491 = vrot.lane.b32.xlu2 %v1240_v21, %s2486_s20  ;;  %v1467_v21 = vadd.f32 %v1466_v19, %v1284_v51 }
 0x5a6   :  { %v1471_v20 = vsel %vm909_vm9, %v1467_v21, -inf }
 0x5a9   :  { %v1442_v0 = vpop.f32.mrf.mxu2 }
 0x5aa   :  { %v3215_v4 = vmul.f32 0.25, %v1442_v0  ;;  %v912_v5 = vpop.xlane.xlu2 %911 }
 0x5ab   :  { %v913_v7 = vmax.f32 %v908_v39, %v912_v5 }
 0x5ac   :  { %v1468_v33 = vsel %vm905_vm1, %v3215_v4, -inf }
 0x5ad   :  { %v914_v10 = vsub.f32 %v3166_v8, %v913_v7  ;;  %v917_v12 = vsub.f32 %v904_v36, %v913_v7  ;;  %1469 = vmax.xlane.f32.xlu0 %v1468_v33 }
 0x5af   :  { %v915_v49 = vmul.f32 1.442695, %v914_v10  ;;  %v918_v52 = vmul.f32 1.442695, %v917_v12 }
 0x5b1   :  { %2417 = vpow2.f32 %v915_v49  ;;  %v1444_v15 = vpop.f32.mrf.mxu2 }
 0x5b2   :  { %2419 = vpow2.f32 %v918_v52  ;;  %v1126_v38 = vpop.permute.xlu2 %1125 }
 0x5b3   :  { %v1131_v13 = vsel %vm937_vm7, %v1126_v38, 0 }
 0x5b4   :  { %1140 = vmatpush.bf16.msrb.mxu0 %v1131_v13 }
 0x5b7   :  { %v2418_v14 = vpop.eup %2417 }
 0x5b8   :  { %v3221_v16 = vpop.eup %2419  ;;  %v928_v6 = vpack.c.bf16 %v2418_v14, %v2418_v14  ;;  %v920_v45 = vsel %vm905_vm1, %v2418_v14, 0.0 }
 0x5b9   :  { %v929_v8 = vpack.c.bf16 %v3221_v16, %v3221_v16 }
 0x5ba   :  { %2213 = vmatmul.msk.bf16.vlgmr.msra.gmra.mxu1 %vm957_vm11, %v928_v6 }
 0x5bb   :  { %2212 = vmatmul.msk.bf16.vlgmr.msra.gmra.mxu0 %vm933_vm5, %v929_v8 }
 0x5bc   :  { %1325 = vmatpush.bf16.msra.mxu0 %v1316_v18 }
 0x5c1   :  { %1512 = vrot.lane.b32.xlu0 %v1216_v62, %s2486_s20  ;;  %s1947_s20 = sshll.u32 %s3383_s19, 4  ;;  %s1948_s20 = int_to_ptr.hbm [resolvable:$true] %s1947_s20 }
 0x5cd   :  { %1472 = vmax.xlane.f32.xlu1 %v1471_v20 }
 0x5ed   :  { %v1104_v35 = vpop.xlane.xlu1 %1103 }
 0x5ef   :  { %v1107_v41 = vpop.xlane.xlu0 %1106 }
 0x5f0   :  { %v1108_v17 = vmax.f32 %v1104_v35, %v1107_v41 }
 0x5f2   :  { %v1109_v23 = vsub.f32 %v3196_v44, %v1108_v17  ;;  %v1112_v25 = vsub.f32 %v1101_v47, %v1108_v17 }
 0x5f4   :  { %v1110_v28 = vmul.f32 1.442695, %v1109_v23  ;;  %v1113_v26 = vmul.f32 1.442695, %v1112_v25 }
 0x5f6   :  { %2421 = vpow2.f32 %v1110_v28 }
 0x5f7   :  { %2423 = vpow2.f32 %v1113_v26 }
 0x5fc   :  { %v2422_v31 = vpop.eup %2421 }
 0x5fd   :  { %v2424_v32 = vpop.eup %2423  ;;  %v1123_v30 = vpack.c.bf16 %v2422_v31, %v2422_v31  ;;  %v1115_v34 = vsel %vm905_vm1, %v2422_v31, 0.0  ;;  %v1288_v1 = vpop.xlane.xlu1 %1287 }
 0x5fe   :  { %v1124_v36 = vpack.c.bf16 %v2424_v32, %v2424_v32  ;;  %v1118_v37 = vsel %vm909_vm9, %v2424_v32, 0.0  ;;  %1116 = vadd.xlane.f32.xlu2 %v1115_v34 }
 0x5ff   :  { %1119 = vadd.xlane.f32.xlu1 %v1118_v37  ;;  %v1291_v39 = vpop.xlane.xlu2 %1290  ;;  %2217 = vmatmul.msk.bf16.vlgmr.msrb.gmra.mxu1 %vm957_vm11, %v1123_v30 }
 0x600   :  { %v1292_v63 = vmax.f32 %v1288_v1, %v1291_v39  ;;  %2216 = vmatmul.msk.bf16.vlgmr.msrb.gmra.mxu0 %vm933_vm5, %v1124_v36 }
 0x602   :  { %v1296_v42 = vsub.f32 %v3207_v58, %v1292_v63  ;;  %v1293_v46 = vsub.f32 %v3203_v54, %v1292_v63 }
 0x604   :  { %v1297_v44 = vmul.f32 1.442695, %v1296_v42  ;;  %v1294_v47 = vmul.f32 1.442695, %v1293_v46 }
 0x606   :  { %2425 = vpow2.f32 %v1297_v44 }
 0x607   :  { %921 = vadd.xlane.f32.xlu1 %v920_v45  ;;  %v1492_v43 = vpop.permute.xlu2 %1491  ;;  %2427 = vpow2.f32 %v1294_v47  ;;  %v2338_v45 = vld [vmem:[%s3375_s11 + $0x8] sm:$0xff] }
 0x608   :  { %v1497_v24 = vsel %vm937_vm7, %v1492_v43, 0  ;;  %1572 = vmatpush.bf16.msra.mxu2 %v2338_v45 }
 0x609   :  { %1506 = vmatpush.bf16.msrb.mxu0 %v1497_v24 }
 0x60c   :  { %v2426_v48 = vpop.eup %2425 }
 0x60d   :  { %v1308_v50 = vpack.c.bf16 %v2426_v48, %v2426_v48  ;;  %v1302_v40 = vsel %vm909_vm9, %v2426_v48, 0.0  ;;  %v2428_v51 = vpop.eup %2427 }
 0x60e   :  { %1303 = vadd.xlane.f32.xlu2 %v1302_v40  ;;  %v1307_v54 = vpack.c.bf16 %v2428_v51, %v2428_v51  ;;  %v1299_v14 = vsel %vm905_vm1, %v2428_v51, 0.0  ;;  %v2337_v51 = vld [vmem:[%s3375_s11] sm:$0xff] }
 0x60f   :  { %1573 = vmatpush.bf16.msra.mxu2 %v2337_v51 }
 0x610   :  { %2220 = vmatmul.msk.bf16.vlgmr.msra.gmra.mxu0 %vm933_vm5, %v1308_v50 }
 0x615   :  { %v1333_v22 = vpop.permute.xlu1 %1332 }
 0x616   :  { %v1338_v53 = vsel %vm961_vm8, %v1333_v22, 0 }
 0x617   :  { %1347 = vmatpush.bf16.msra.mxu1 %v1338_v53 }
 0x61a   :  { %2221 = vmatmul.msk.bf16.vlgmr.msra.gmra.mxu1 %vm957_vm11, %v1307_v54 }
 0x620   :  { %v1470_v55 = vpop.xlane.xlu0 %1469 }
 0x633   :  { %v1513_v57 = vpop.permute.xlu0 %1512 }
 0x634   :  { %v1518_v58 = vsel %vm961_vm8, %v1513_v57, 0 }
 0x635   :  { %1527 = vmatpush.bf16.msrb.mxu1 %v1518_v58 }
 0x637   :  { %v974_v29 = vpop.f32.mrf.mxu1 }
 0x638   :  { %v950_v56 = vpop.f32.mrf.mxu0 }
 0x639   :  { %v975_v59 = vadd.f32 %v974_v29, %v950_v56 }
 0x63f   :  { %v976_v60 = vpop.f32.mrf.mxu1 }
 0x640   :  { %v952_v61 = vpop.f32.mrf.mxu0  ;;  %v1473_v62 = vpop.xlane.xlu1 %1472 }
 0x641   :  { %v1474_v0 = vmax.f32 %v1470_v55, %v1473_v62 }
 0x643   :  { %v1475_v5 = vsub.f32 %v3215_v4, %v1474_v0  ;;  %v1478_v7 = vsub.f32 %v1467_v21, %v1474_v0  ;;  %v923_v4 = vsel %vm909_vm9, %v3221_v16, 0.0 }
 0x645   :  { %v1476_v33 = vmul.f32 1.442695, %v1475_v5  ;;  %v1479_v10 = vmul.f32 1.442695, %v1478_v7 }
 0x647   :  { %2429 = vpow2.f32 %v1476_v33 }
 0x648   :  { %2431 = vpow2.f32 %v1479_v10 }
 0x64d   :  { %v2430_v12 = vpop.eup %2429 }
 0x64e   :  { %v2432_v49 = vpop.eup %2431  ;;  %v1489_v52 = vpack.c.bf16 %v2430_v12, %v2430_v12  ;;  %v1481_v15 = vsel %vm905_vm1, %v2430_v12, 0.0 }
 0x64f   :  { %v1490_v38 = vpack.c.bf16 %v2432_v49, %v2432_v49  ;;  %v1484_v13 = vsel %vm909_vm9, %v2432_v49, 0.0  ;;  %1482 = vadd.xlane.f32.xlu0 %v1481_v15 }
 0x650   :  { %1485 = vadd.xlane.f32.xlu1 %v1484_v13  ;;  %2225 = vmatmul.msk.bf16.vlgmr.msrb.gmra.mxu1 %vm957_vm11, %v1489_v52 }
 0x651   :  { %2224 = vmatmul.msk.bf16.vlgmr.msrb.gmra.mxu0 %vm933_vm5, %v1490_v38  ;;  %v2453_v38 = vld [vmem:[%s3392_s14] sm:$0xf] }
 0x658   :  { %924 = vadd.xlane.f32.xlu1 %v923_v4 }
 0x660   :  { %1300 = vadd.xlane.f32.xlu1 %v1299_v14 }
 0x671   :  { %v1117_v2 = vpop.xlane.xlu2 %1116 }
 0x672   :  { %v1120_v6 = vpop.xlane.xlu1 %1119 }
 0x673   :  { %v1121_v8 = vadd.f32 %v1120_v6, %v1117_v2 }
 0x675   :  { %2433 = vrcp.f32 %v1121_v8 }
 0x67a   :  { %v922_v31 = vpop.xlane.xlu1 %921 }
 0x67b   :  { %v2434_v20 = vpop.eup %2433 }
 0x67c   :  { %v1163_v18 = vpop.f32.mrf.mxu1 }
 0x67d   :  { %v1142_v19 = vpop.f32.mrf.mxu0 }
 0x67e   :  { %v1164_v21 = vadd.f32 %v1163_v18, %v1142_v19 }
 0x680   :  { %v1167_v35 = vmul.f32 %v2434_v20, %v1164_v21 }
 0x681   :  { %v1304_v22 = vpop.xlane.xlu2 %1303 }
 0x682   :  { %1169 = vrot.lane.b32.xlu1 %v1167_v35, %s2489_s5 }
 0x684   :  { %v1165_v41 = vpop.f32.mrf.mxu1 }
 0x685   :  { %v1144_v17 = vpop.f32.mrf.mxu0 }
 0x68d   :  { %v1327_v23 = vpop.f32.mrf.mxu0 }
 0x695   :  { %v1329_v25 = vpop.f32.mrf.mxu0 }
 0x697   :  { %v1349_v16 = vpop.f32.mrf.mxu1 }
 0x698   :  { %v1350_v28 = vadd.f32 %v1349_v16, %v1327_v23 }
 0x69f   :  { %v1351_v26 = vpop.f32.mrf.mxu1 }
 0x6c2   :  { %v1483_v32 = vpop.xlane.xlu0 %1482 }
 0x6c3   :  { %v1486_v30 = vpop.xlane.xlu1 %1485 }
 0x6c4   :  { %v1487_v34 = vadd.f32 %v1486_v30, %v1483_v32  ;;  %v2340_v32 = vld [vmem:[%s3377_s13 + $0x8] sm:$0xff] }
 0x6c5   :  { %1714 = vmatpush.bf16.msra.mxu3 %v2340_v32 }
 0x6c6   :  { %2435 = vrcp.f32 %v1487_v34  ;;  %v396_v34 = vrot.slane %v2891_v11, 1 }
 0x6cb   :  { %v925_v46 = vpop.xlane.xlu1 %924 }
 0x6cc   :  { %v2436_v39 = vpop.eup %2435  ;;  %v926_v43 = vadd.f32 %v925_v46, %v922_v31 }
 0x6cd   :  { %v1529_v36 = vpop.f32.mrf.mxu1 }
 0x6ce   :  { %v1508_v37 = vpop.f32.mrf.mxu0  ;;  %2437 = vrcp.f32 %v926_v43 }
 0x6cf   :  { %v1530_v1 = vadd.f32 %v1529_v36, %v1508_v37  ;;  %v2339_v36 = vld [vmem:[%s3377_s13] sm:$0xff] }
 0x6d0   :  { %1715 = vmatpush.bf16.msra.mxu3 %v2339_v36 }
 0x6d1   :  { %v1533_v63 = vmul.f32 %v2436_v39, %v1530_v1 }
 0x6d3   :  { %1535 = vrot.lane.b32.xlu2 %v1533_v63, %s2489_s5  ;;  %v1301_v24 = vpop.xlane.xlu1 %1300 }
 0x6d4   :  { %v2438_v47 = vpop.eup %2437  ;;  %v1305_v53 = vadd.f32 %v1304_v22, %v1301_v24 }
 0x6d5   :  { %v1531_v42 = vpop.f32.mrf.mxu1  ;;  %v978_v48 = vmul.f32 %v2438_v47, %v975_v59  ;;  %v2371_v59 = vld [vmem:[%s3376_s12] ss:$0 sm:$0xff] }
 0x6d6   :  { %v1510_v44 = vpop.f32.mrf.mxu0  ;;  %2439 = vrcp.f32 %v1305_v53  ;;  %v1660_v42 = vadd.f32 1.0, %v396_v34  ;;  %v1659_v53 = vadd.f32 1.0, %v2891_v11 }
 0x6d8   :  { %v1664_v46 = vperm.slane %v1660_v42, 0 }
 0x6dc   :  { %v2440_v54 = vpop.eup %2439 }
 0x6dd   :  { %v1353_v55 = vmul.f32 %v2440_v54, %v1350_v28 }
 0x6f4   :  { %v1170_v50 = vpop.permute.xlu1 %1169 }
 0x6f5   :  { %v1172_v40 = vsel %vm835_vm6, %v978_v48, %v1170_v50 }
 0x6f6   :  { %1545 = vst [vmem:[#allocation1] ss:$2 sm:$0xff] %v1172_v40 }
 0x72d   :  { %v1536_v57 = vpop.permute.xlu2 %1535 }
 0x72e   :  { %v1538_v58 = vsel %vm835_vm6, %v1353_v55, %v1536_v57  ;;  %v1663_v57 = vperm.slane %v1659_v53, 0 }
 0x72f   :  { %1547 = vst [vmem:[#allocation1 + $0x1] ss:$2 sm:$0xff] %v1538_v58 }
 0x736   :  { %v1548_v29 = vld.sshfl [vmem:[#allocation1] sm:$0xff pattern:$0x75316420] }
 0x737   :  { %v1550_v56 = vpack.c.bf16 %v1548_v29, %v1548_v29 }
 0x739   :  { %2234 = vmatmul.msk.bf16.vlgmr.msra.gmra.mxu2 %vm477_vm10, %v1550_v56 }
 0x7bc   :  { %v1575_v60 = vpop.f32.mrf.mxu2 }
 0x7bd   :  { %v1580_v61 = vrot.slane %v1575_v60, 4  ;;  %v1586_v62 = vadd.f32 %v2371_v59, %v1575_v60 }
 0x7bf   :  { %v1587_v0 = vadd.f32 %v2371_v59, %v1580_v61  ;;  %1590 = vst [vmem:[#allocation1] ss:$2 sm:$0xff] %v1586_v62  ;;  %v2348_v62 = vld [vmem:[%s3379_s15 + $0x38] sm:$0xff] }
 0x7c0   :  { %1818 = vmatpush.bf16.msra.mxu0 %v2348_v62 }
 0x7c1   :  { %1593 = vst [vmem:[#allocation1 + $0x10] ss:$2 sm:$0xff] %v1587_v0  ;;  %v2347_v0 = vld [vmem:[%s3379_s15 + $0x30] sm:$0xff] }
 0x7c4   :  { %v1577_v5 = vpop.f32.mrf.mxu2  ;;  %1819 = vmatpush.bf16.msra.mxu0 %v2347_v0 }
 0x7c5   :  { %v2346_v5 = vld [vmem:[%s3379_s15 + $0x28] sm:$0xff] }
 0x7c6   :  { %v1591_v7 = vld.sshfl [vmem:[#allocation1] sm:$0xff pattern:$0x75316420] }
 0x7c7   :  { %1595 = vrot.lane.b32.xlu0 %v1591_v7, %s2490_s9  ;;  %v2345_v7 = vld [vmem:[%s3379_s15 + $0x20] sm:$0xff] }
 0x7c8   :  { %v1594_v33 = vld.sshfl [vmem:[#allocation1 + $0x10] sm:$0xff pattern:$0x75316420]  ;;  %1820 = vmatpush.bf16.msra.mxu0 %v2346_v5 }
 0x7cc   :  { %1821 = vmatpush.bf16.msra.mxu0 %v2345_v7 }
 0x7cf   :  { %1597 = vrot.lane.b32.xlu0 %v1594_v33, %s2490_s9  ;;  %v2344_v33 = vld [vmem:[%s3379_s15 + $0x18] sm:$0xff] }
 0x7d0   :  { %1822 = vmatpush.bf16.msra.mxu0 %v2344_v33 }
 0x839   :  { %v1596_v10 = vpop.permute.xlu0 %1595 }
 0x83a   :  { %v1601_v12 = vmul.f32 %v1596_v10, %v2969_v3  ;;  %v2343_v10 = vld [vmem:[%s3379_s15 + $0x10] sm:$0xff] }
 0x83b   :  { %1823 = vmatpush.bf16.msra.mxu0 %v2343_v10 }
 0x83c   :  { %1605 = vrot.lane.b32.xlu1 %v1601_v12, %s2490_s9  ;;  %v2342_v12 = vld [vmem:[%s3379_s15 + $0x8] sm:$0xff] }
 0x83f   :  { %1824 = vmatpush.bf16.msra.mxu0 %v2342_v12 }
 0x841   :  { %v1598_v49 = vpop.permute.xlu0 %1597 }
 0x842   :  { %v1602_v52 = vmul.f32 %v1598_v49, %v2974_v9  ;;  %v2372_v49 = vld [vmem:[%s3395_s29] ss:$0 sm:$0xff] }
 0x844   :  { %1607 = vrot.lane.b32.xlu2 %v1602_v52, %s2490_s9 }
 0x89e   :  { %v1608_v15 = vpop.permute.xlu2 %1607 }
 0x89f   :  { %v3275_v13 = vadd.f32 %v2453_v38, %v1608_v15  ;;  %v2341_v15 = vld [vmem:[%s3379_s15] sm:$0xff] }
 0x8a0   :  { %1825 = vmatpush.bf16.msra.mxu0 %v2341_v15 }
 0x8a1   :  { %v1616_v4 = vsel %vm398_vm0, %v3275_v13, 0.0 }
 0x8a2   :  { %1617 = vadd.xlane.f32.xlu1 %v1616_v4 }
 0x8ae   :  { %v1606_v14 = vpop.permute.xlu1 %1605 }
 0x8af   :  { %v3279_v2 = vadd.f32 %v2453_v38, %v1606_v14 }
 0x8b1   :  { %v1613_v6 = vsel %vm398_vm0, %v3279_v2, 0.0 }
 0x8b2   :  { %1614 = vadd.xlane.f32.xlu0 %v1613_v6 }
 0x8bb   :  { %1669 = vrot.lane.b32.xlu1 %v2969_v3, %s2487_s21 }
 0x915   :  { %v1618_v8 = vpop.xlane.xlu1 %1617 }
 0x916   :  { %v1620_v18 = vmul.f32 %v1618_v8, %v2771_v27 }
 0x918   :  { %v1622_v19 = vsub.f32 %v3275_v13, %v1620_v18 }
 0x91a   :  { %v1624_v21 = vmul.f32 %v1622_v19, %v1622_v19 }
 0x91c   :  { %v1628_v20 = vsel %vm398_vm0, %v1624_v21, 0.0 }
 0x91d   :  { %1629 = vadd.xlane.f32.xlu0 %v1628_v20 }
 0x925   :  { %v1615_v35 = vpop.xlane.xlu0 %1614 }
 0x926   :  { %v1619_v41 = vmul.f32 %v1615_v35, %v2771_v27 }
 0x928   :  { %v1621_v17 = vsub.f32 %v3279_v2, %v1619_v41 }
 0x92a   :  { %v1623_v23 = vmul.f32 %v1621_v17, %v1621_v17 }
 0x92c   :  { %v1625_v25 = vsel %vm398_vm0, %v1623_v23, 0.0 }
 0x92d   :  { %1626 = vadd.xlane.f32.xlu2 %v1625_v25  ;;  %v1670_v56 = vpop.permute.xlu1 %1669 }
 0x945   :  { %1671 = vrot.lane.b32.xlu2 %v2974_v9, %s2487_s21 }
 0x990   :  { %v1630_v3 = vpop.xlane.xlu0 %1629 }
 0x991   :  { %v1632_v16 = vmul.f32 %v1630_v3, %v2771_v27 }
 0x993   :  { %v1634_v28 = vadd.f32 1e-05, %v1632_v16 }
 0x995   :  { %2441 = vrsqrt.f32 %v1634_v28  ;;  %vm1651_vm12 = vweird.f32 %v1634_v28 }
 0x99b   :  { %v2442_v26 = vpop.eup %2441 }
 0x99c   :  { %v1646_v31 = vmul.f32 %v2442_v26, %v1634_v28  ;;  %vm1652_vm6 = vweird.f32 %v2442_v26 }
 0x99d   :  { %vm1653_vm13 = vmor %vm1651_vm12, %vm1652_vm6 }
 0x99e   :  { %v1647_v30 = vmul.f32 %v2442_v26, %v1646_v31 }
 0x9a0   :  { %v1648_v9 = vmul.f32 0.5, %v1647_v30  ;;  %v1627_v37 = vpop.xlane.xlu2 %1626 }
 0x9a1   :  { %v1631_v1 = vmul.f32 %v1627_v37, %v2771_v27  ;;  %v2373_v37 = vld [vmem:[%s3380_s16] ss:$0 sm:$0xff] }
 0x9a2   :  { %v1649_v39 = vsub.f32 1.5, %v1648_v9 }
 0x9a3   :  { %v1633_v63 = vadd.f32 1e-05, %v1631_v1 }
 0x9a4   :  { %v1650_v44 = vmul.f32 %v2442_v26, %v1649_v39 }
 0x9a5   :  { %2443 = vrsqrt.f32 %v1633_v63  ;;  %vm1641_vm15 = vweird.f32 %v1633_v63 }
 0x9a6   :  { %v1654_v45 = vsel %vm1653_vm13, %v2442_v26, %v1650_v44 }
 0x9a7   :  { %v1656_v43 = vmul.f32 %v1654_v45, %v1622_v19 }
 0x9a8   :  { %v1672_v47 = vpop.permute.xlu2 %1671 }
 0x9a9   :  { %v1668_v24 = vmul.f32 %v1664_v46, %v1656_v43  ;;  %v1834_v46 = vperm.slane %v396_v34, 0 }
 0x9ab   :  { %v2444_v48 = vpop.eup %2443  ;;  %v1676_v50 = vadd.f32 %v1672_v47, %v1668_v24  ;;  %v1833_v47 = vperm.slane %v2891_v11, 0 }
 0x9ac   :  { %v1636_v40 = vmul.f32 %v2444_v48, %v1633_v63  ;;  %vm1642_vm14 = vweird.f32 %v2444_v48 }
 0x9ad   :  { %1686 = vst [vmem:[#allocation1 + $0x1] ss:$2 sm:$0xff] %v1676_v50  ;;  %vm1643_vm1 = vmor %vm1641_vm15, %vm1642_vm14 }
 0x9ae   :  { %v1637_v27 = vmul.f32 %v2444_v48, %v1636_v40  ;;  %v2350_v40 = vld [vmem:[%s3381_s17 + $0x8] sm:$0xff] }
 0x9af   :  { %1897 = vmatpush.bf16.msra.mxu1 %v2350_v40 }
 0x9b0   :  { %v1638_v51 = vmul.f32 0.5, %v1637_v27  ;;  %v2349_v27 = vld [vmem:[%s3381_s17] sm:$0xff]  ;;  %s2491_s17 = smov [#allocation2]  }
 0x9b2   :  { %v1639_v22 = vsub.f32 1.5, %v1638_v51 }
 0x9b3   :  { %1898 = vmatpush.bf16.msra.mxu1 %v2349_v27 }
 0x9b4   :  { %v1640_v54 = vmul.f32 %v2444_v48, %v1639_v22 }
 0x9b6   :  { %v1644_v55 = vsel %vm1643_vm1, %v2444_v48, %v1640_v54 }
 0x9b7   :  { %v1655_v58 = vmul.f32 %v1644_v55, %v1621_v17  ;;  %v2374_v55 = vld [vmem:[%s3382_s18] ss:$0 sm:$0xff]  ;;  %s1945_s18 = sshll.u32 %s2491_s17, 4  ;;  %s1946_s18 = int_to_ptr.vmem [resolvable:$true] %s1945_s18 }
 0x9b9   :  { %v1667_v29 = vmul.f32 %v1663_v57, %v1655_v58 }
 0x9bb   :  { %v1675_v59 = vadd.f32 %v1670_v56, %v1667_v29 }
 0x9bd   :  { %1684 = vst [vmem:[#allocation1] ss:$2 sm:$0xff] %v1675_v59 }
 0x9c4   :  { %v1687_v60 = vld.sshfl [vmem:[#allocation1] sm:$0xff pattern:$0x75316420] }
 0x9c5   :  { %v1689_v61 = vpack.c.bf16 %v1687_v60, %v1687_v60 }
 0x9c7   :  { %2243 = vmatmul.msk.bf16.vlgmr.msra.gmra.mxu3 %vm477_vm10, %v1689_v61 }
 0xa4a   :  { %v1717_v52 = vpop.f32.mrf.mxu3 }
 0xa4b   :  { %v1718_v38 = vadd.f32 %v2372_v49, %v1717_v52 }
 0xa4d   :  { %v1722_v4 = vrot.slane %v1718_v38, 4  ;;  %v1724_v14 = vmul.f32 %v1718_v38, %v1718_v38 }
 0xa4f   :  { %v1725_v6 = vmul.f32 %v1722_v4, %v1722_v4  ;;  %v1726_v8 = vmul.f32 %v1724_v14, %v1718_v38 }
 0xa51   :  { %v1727_v18 = vmul.f32 %v1725_v6, %v1722_v4  ;;  %v1728_v19 = vmul.f32 0.044715, %v1726_v8 }
 0xa52   :  { %v1719_v21 = vpop.f32.mrf.mxu3 }
 0xa53   :  { %v1729_v20 = vmul.f32 0.044715, %v1727_v18  ;;  %v1730_v35 = vadd.f32 %v1728_v19, %v1718_v38 }
 0xa55   :  { %v1731_v41 = vadd.f32 %v1729_v20, %v1722_v4  ;;  %v1732_v17 = vmul.f32 0.7978846, %v1730_v35 }
 0xa57   :  { %v1733_v23 = vmul.f32 0.7978846, %v1731_v41  ;;  %2445 = vtanh.f32 %v1732_v17 }
 0xa59   :  { %2447 = vtanh.f32 %v1733_v23 }
 0xa5d   :  { %v2446_v25 = vpop.eup %2445 }
 0xa5e   :  { %v1736_v3 = vadd.f32 1.0, %v2446_v25 }
 0xa5f   :  { %v2448_v16 = vpop.eup %2447 }
 0xa60   :  { %v1737_v28 = vadd.f32 1.0, %v2448_v16  ;;  %v1738_v26 = vmul.f32 0.5, %v1736_v3 }
 0xa62   :  { %v1739_v31 = vmul.f32 0.5, %v1737_v28  ;;  %v1740_v32 = vmul.f32 %v1738_v26, %v1718_v38 }
 0xa64   :  { %v1741_v30 = vmul.f32 %v1739_v31, %v1722_v4  ;;  %1761 = vst [vmem:[#allocation1] ss:$2 sm:$0xff] %v1740_v32 }
 0xa66   :  { %1763 = vst [vmem:[#allocation1 + $0x1] ss:$2 sm:$0xff] %v1741_v30 }
 0xa6d   :  { %v1764_v36 = vld.sshfl [vmem:[#allocation1] sm:$0xff pattern:$0x75316420] }
 0xa6e   :  { %v1766_v9 = vpack.c.bf16 %v1764_v36, %v1764_v36 }
 0xa70   :  { %1826 = vmatmul.bf16.vlgmr.msra.gmra.mxu0 %v1766_v9 }
 0xaed   :  { %v1827_v1 = vpop.f32.mrf.mxu0 }
 0xaee   :  { %v1828_v39 = vadd.f32 %v2373_v37, %v1827_v1 }
 0xaf0   :  { %v1832_v63 = vrot.slane %v1828_v39, 4  ;;  %1837 = vst [vmem:[#allocation1] ss:$2 sm:$0xff] %v1828_v39 }
 0xaf2   :  { %1840 = vst [vmem:[#allocation1 + $0x10] ss:$2 sm:$0xff] %v1832_v63 }
 0xaf5   :  { %v1829_v42 = vpop.f32.mrf.mxu0 }
 0xaf7   :  { %v1838_v44 = vld.sshfl [vmem:[#allocation1] sm:$0xff pattern:$0x75316420] }
 0xaf8   :  { %1842 = vrot.lane.b32.xlu0 %v1838_v44, %s2487_s21 }
 0xaf9   :  { %v1841_v45 = vld.sshfl [vmem:[#allocation1 + $0x10] sm:$0xff pattern:$0x75316420] }
 0xafa   :  { %1844 = vrot.lane.b32.xlu2 %v1841_v45, %s2487_s21 }
 0xb54   :  { %v1845_v43 = vpop.permute.xlu2 %1844 }
 0xb55   :  { %v1849_v24 = vmul.f32 %v1845_v43, %v1834_v46 }
 0xb57   :  { %1854 = vrot.lane.b32.xlu0 %v1849_v24, %s2483_s28 }
 0xb6a   :  { %v1843_v48 = vpop.permute.xlu0 %1842 }
 0xb6b   :  { %v1848_v50 = vmul.f32 %v1843_v48, %v1833_v47 }
 0xb6d   :  { %1852 = vrot.lane.b32.xlu1 %v1848_v50, %s2483_s28 }
 0xbc9   :  { %v1855_v34 = vpop.permute.xlu0 %1854 }
 0xbca   :  { %v1859_v51 = vadd.f32 %v1855_v34, %v3275_v13 }
 0xbcc   :  { %1869 = vst [vmem:[#allocation1 + $0x1] ss:$2 sm:$0xff] %v1859_v51 }
 0xbdf   :  { %v1853_v22 = vpop.permute.xlu1 %1852 }
 0xbe0   :  { %v1858_v11 = vadd.f32 %v1853_v22, %v3279_v2 }
 0xbe2   :  { %1867 = vst [vmem:[#allocation1] ss:$2 sm:$0xff] %v1858_v11 }
 0xbe9   :  { %v1870_v53 = vld.sshfl [vmem:[#allocation1] sm:$0xff pattern:$0x75316420] }
 0xbea   :  { %v1872_v54 = vpack.c.bf16 %v1870_v53, %v1870_v53 }
 0xbec   :  { %2284 = vmatmul.msk.bf16.vlgmr.msra.gmra.mxu1 %vm477_vm10, %v1872_v54 }
 0xc69   :  { %v1900_v57 = vpop.f32.mrf.mxu1 }
 0xc6a   :  { %v1901_v58 = vadd.f32 %v2374_v55, %v1900_v57 }
 0xc6c   :  { %v1907_v29 = vmul.f32 %v1901_v58, %v1901_v58  ;;  %v1905_v56 = vrot.slane %v1901_v58, 4 }
 0xc6e   :  { %v1909_v59 = vsel %vm398_vm0, %v1907_v29, 0.0  ;;  %v1908_v13 = vmul.f32 %v1905_v56, %v1905_v56 }
 0xc6f   :  { %1910 = vadd.xlane.f32.xlu2 %v1909_v59 }
 0xc70   :  { %v1912_v60 = vsel %vm398_vm0, %v1908_v13, 0.0 }
 0xc71   :  { %v1902_v2 = vpop.f32.mrf.mxu1  ;;  %1913 = vadd.xlane.f32.xlu1 %v1912_v60 }
 0xce2   :  { %v1911_v61 = vpop.xlane.xlu2 %1910 }
 0xce3   :  { %v1915_v62 = vmax.f32 %v1911_v61, 1e-24 }
 0xce4   :  { %v1914_v0 = vpop.xlane.xlu1 %1913 }
 0xce5   :  { %2449 = vrsqrt.f32 %v1915_v62  ;;  %v1916_v5 = vmax.f32 %v1914_v0, 1e-24  ;;  %vm1923_vm2 = vweird.f32 %v1915_v62 }
 0xce7   :  { %2451 = vrsqrt.f32 %v1916_v5  ;;  %vm1933_vm7 = vweird.f32 %v1916_v5 }
 0xceb   :  { %v2450_v7 = vpop.eup %2449 }
 0xcec   :  { %v1918_v33 = vmul.f32 %v2450_v7, %v1915_v62  ;;  %vm1924_vm10 = vweird.f32 %v2450_v7 }
 0xced   :  { %v2452_v10 = vpop.eup %2451  ;;  %vm1925_vm4 = vmor %vm1923_vm2, %vm1924_vm10 }
 0xcee   :  { %v1919_v12 = vmul.f32 %v2450_v7, %v1918_v33  ;;  %v1928_v49 = vmul.f32 %v2452_v10, %v1916_v5  ;;  %vm1934_vm3 = vweird.f32 %v2452_v10 }
 0xcef   :  { %vm1935_vm8 = vmor %vm1933_vm7, %vm1934_vm3 }
 0xcf0   :  { %v1920_v52 = vmul.f32 0.5, %v1919_v12  ;;  %v1929_v15 = vmul.f32 %v2452_v10, %v1928_v49 }
 0xcf2   :  { %v1921_v38 = vsub.f32 1.5, %v1920_v52  ;;  %v1930_v4 = vmul.f32 0.5, %v1929_v15 }
 0xcf4   :  { %v1922_v14 = vmul.f32 %v2450_v7, %v1921_v38  ;;  %v1931_v6 = vsub.f32 1.5, %v1930_v4 }
 0xcf6   :  { %v1926_v8 = vsel %vm1925_vm4, %v2450_v7, %v1922_v14  ;;  %v1932_v18 = vmul.f32 %v2452_v10, %v1931_v6 }
 0xcf7   :  { %v1937_v19 = vmul.f32 %v1926_v8, %v1901_v58 }
 0xcf8   :  { %v1936_v21 = vsel %vm1935_vm8, %v2452_v10, %v1932_v18 }
 0xcf9   :  { %1939 = vst.msk [vmem:[#allocation2] sm:$0xf] %vm398_vm0, %v1937_v19  ;;  %v1938_v20 = vmul.f32 %v1936_v21, %v1905_v56 }
 0xcfb   :  { %1940 = vst.msk [vmem:[#allocation2 + $0x4] sm:$0xf] %vm398_vm0, %v1938_v20 }
 0xcfc   :  { %1953 = dma.vmem_to_hbm [thread:$0]  %s1946_s18, 128, %s1948_s20, [#allocation3], %s2490_s9, %s2490_s9, %s2492_s1  }
 0xcfd   :  { %2478 = dma.done.wait [#allocation3], 128  }
 0xcfe   :  { %2479 = vsyncadd [#allocation3], 4294967168 }
 0xcff   :  { %1958 = vsyncpa [#allocation3], 1 }

</bundles_post_ra>
